<compile_context>
chip_gen: v6e
topology: v6e:2x2x1
jax: 0.10.0
libtpu: 0.0.40
codegen_flags: <defaults>
</compile_context>

<pallas_src>
import functools

import jax
import jax.numpy as jnp
from jax import lax
from jax.experimental import pallas as pl
from jax.experimental.pallas import tpu as pltpu


# taps[parity][window_offset] -> ConvTranspose2d kernel tap index along that axis
_TAPS = {0: (3, 1), 1: (2, 0)}


def _round_up(x, m):
    return ((x + m - 1) // m) * m


def _vmem_capacity_bytes():
    try:
        return int(pltpu.get_tpu_info().vmem_capacity_bytes)
    except Exception:
        return 64 * 1024 * 1024  # v7x-safe fallback


def _pick_cout_tile(cout_pad, cin, M, L, vmem_cap):
    """Largest Cout tile from {512,256,128} whose working set fits a VMEM budget."""
    budget = int(0.55 * vmem_cap)
    cands = [t for t in (512, 256, 128) if cout_pad % t == 0]
    if not cands:
        cands = [cout_pad]
    for t in cands:
        need = (2 * 16 * cin * t * 2      # bf16 weight block, double-buffered
                + 2 * L * cin * 2         # bf16 flat-activation block, double-buffered
                + 2 * 4 * M * t * 2       # bf16 output block, double-buffered
                + 2 * M * t * 4           # f32 tap accumulator scratch + one hidden temp
                + 2 * M * 128 * 4)        # (M,1) f32 mask, lane-padded, double-buffered
        if need <= budget:
            return t
    return cands[-1]


def _make_kernel(H, W, tc, n_valid):
    Wp = W + 2
    M = H * Wp
    inv_n = 1.0 / float(n_valid)

    def kernel(flat_ref, w_ref, mask_ref, out_ref, acc_ref):
        # flat_ref: (L, Cin)      bf16  -- flattened zero-padded NHWC input, one instance
        # w_ref   : (16, Cin, tc) bf16  -- weight matrix per (py, px, dy, dx)
        # mask_ref: (M, 1)        f32   -- 1.0 on valid output columns, 0.0 on pad columns
        # out_ref : (4, M, tc)    bf16  -- per-parity output (raw stash, normalized in place)
        # acc_ref : (M, tc)       f32   -- tap accumulator scratch
        mask = mask_ref[...]
        s1 = jnp.zeros((1, tc), jnp.float32)
        s2 = jnp.zeros((1, tc), jnp.float32)

        for py in range(2):
            for px in range(2):
                p = py * 2 + px
                for dy in range(2):
                    for dx in range(2):
                        off = (py + dy) * Wp + (px + dx)      # static row offset
                        t = (p * 2 + dy) * 2 + dx
                        contrib = jnp.dot(flat_ref[off:off + M, :], w_ref[t],
                                          preferred_element_type=jnp.float32)
                        if dy == 0 and dx == 0:
                            acc_ref[...] = contrib
                        else:
                            acc_ref[...] += contrib
                acc = acc_ref[...]
                am = acc * mask                                # drop junk columns from stats
                s1 = s1 + jnp.sum(am, axis=0, keepdims=True)
                s2 = s2 + jnp.sum(am * acc, axis=0, keepdims=True)
                out_ref[p] = acc.astype(out_ref.dtype)         # stash raw values (bf16)

        mean = s1 * inv_n                                      # (1, tc) f32
        var = s2 * inv_n - mean * mean
        inv_std = lax.rsqrt(var + 1e-5)
        for p in range(4):                                     # InstanceNorm + ReLU, in place
            y = out_ref[p].astype(jnp.float32)
            out_ref[p] = jnp.maximum((y - mean) * inv_std, 0.0).astype(out_ref.dtype)

    return kernel


def unet_up_prepare_weights(weight):
    """ConvTranspose2d weight (Cin, Cout, 4, 4) -> (16, Cin, Cout_pad) bf16 tap matrices.

    Hoist this out of the per-call jit: weights are static across calls.
    """
    cin, cout = weight.shape[:2]
    cout_pad = _round_up(cout, 128)                            # lane-dense output stores
    if cout_pad != cout:
        weight = jnp.pad(weight, ((0, 0), (0, cout_pad - cout), (0, 0), (0, 0)))
    w_list = []
    for py in range(2):
        for px in range(2):
            for dy in range(2):
                for dx in range(2):
                    w_list.append(weight[:, :, _TAPS[py][dy], _TAPS[px][dx]])
    return jnp.stack(w_list, axis=0).astype(jnp.bfloat16)      # (16, Cin, Cout_pad)


def unet_up_apply(x, skip_input, w_all, out_channels):
    """UNetUp.forward with pre-built tap weights.

    x          : (B, Cin, H, W)          float32 (NCHW, like PyTorch)
    skip_input : (B, Cs, 2H, 2W)         float32
    w_all      : (16, Cin, Cout_pad)     bf16 (from unet_up_prepare_weights)
    returns    : (B, out_channels + Cs, 2H, 2W) float32
    """
    B, Cin, H, W = x.shape
    assert w_all.shape[0] == 16 and w_all.shape[1] == Cin
    Cout_pad = w_all.shape[2]
    Wp = W + 2
    M = H * Wp
    L = (H + 3) * Wp

    vmem_cap = _vmem_capacity_bytes()
    tc = _pick_cout_tile(Cout_pad, Cin, M, L, vmem_cap)
    nt = Cout_pad // tc

    # glue: NCHW -> zero-padded NHWC, spatially flattened, bf16 (lane-dense Cin)
    x_nhwc = jnp.transpose(x, (0, 2, 3, 1))
    x_pad = jnp.pad(x_nhwc, ((0, 0), (1, 2), (1, 1), (0, 0)))   # (B, H+3, W+2, Cin)
    flat = x_pad.reshape(B, L, Cin).astype(jnp.bfloat16)

    # valid-column mask over the padded-width row layout
    col = jnp.arange(M, dtype=jnp.int32) % Wp
    mask = (col < W).astype(jnp.float32).reshape(M, 1)

    kernel = _make_kernel(H, W, tc, 4 * H * W)
    flops = 2 * B * 16 * M * Cin * Cout_pad

    # Grid order by operand size: keep the cheaper operand on the inner (re-fetched) axis.
    weights_inner = (B > 1) and (L >= 16 * tc)
    if weights_inner:
        grid = (B, nt)
        flat_map = lambda b, j: (b, 0, 0)
        w_map = lambda b, j: (0, 0, j)
        mask_map = lambda b, j: (0, 0)
        out_map = lambda b, j: (b, 0, 0, j)
        bytes_accessed = (B * L * Cin * 2 + B * 16 * Cin * Cout_pad * 2
                          + B * 4 * M * Cout_pad * 2 + M * 4)
    else:
        grid = (nt, B)      # nt leads: also keeps both v7x cores busy when B == 1
        flat_map = lambda j, b: (b, 0, 0)
        w_map = lambda j, b: (0, 0, j)
        mask_map = lambda j, b: (0, 0)
        out_map = lambda j, b: (b, 0, 0, j)
        bytes_accessed = (nt * B * L * Cin * 2 + 16 * Cin * Cout_pad * 2
                          + B * 4 * M * Cout_pad * 2 + M * 4)

    y4 = pl.pallas_call(
        kernel,
        out_shape=jax.ShapeDtypeStruct((B, 4, M, Cout_pad), jnp.bfloat16),
        grid=grid,
        in_specs=[
            pl.BlockSpec((None, L, Cin), flat_map),
            pl.BlockSpec((16, Cin, tc), w_map),
            pl.BlockSpec((M, 1), mask_map),
        ],
        out_specs=pl.BlockSpec((None, 4, M, tc), out_map),
        scratch_shapes=[pltpu.VMEM((M, tc), jnp.float32)],
        compiler_params=pltpu.CompilerParams(
            dimension_semantics=("parallel", "parallel"),
            vmem_limit_bytes=min(int(0.9 * vmem_cap), 100 * 1024 * 1024),
        ),
        cost_estimate=pl.CostEstimate(
            flops=flops, transcendentals=B * Cout_pad, bytes_accessed=bytes_accessed),
    )(flat, w_all, mask)

    # epilogue: drop pad columns + padded channels, de-interleave parities, back to NCHW,
    # concat skip (one transpose pass bf16->f32 + one concat of output-sized data)
    y = y4.reshape(B, 2, 2, H, Wp, Cout_pad)[:, :, :, :, :W, :out_channels]  # (b,py,px,m,w,c)
    y = jnp.transpose(y, (0, 5, 3, 1, 4, 2)).astype(jnp.float32)
    y = y.reshape(B, out_channels, 2 * H, 2 * W)
    return jnp.concatenate([y, skip_input], axis=1)


def unet_up_forward(x, skip_input, weight):
    """Convenience path taking the raw PyTorch-layout weight (Cin, Cout, 4, 4)."""
    w_all = unet_up_prepare_weights(weight)
    return unet_up_apply(x, skip_input, w_all, weight.shape[1])

# TODO(synk): nn.Dropout is only added when dropout > 0; the default module (dropout=0.0) has none.


# -----------------------------------------------------------------------------
# Pure-JAX f32 reference (for correctness check)
# -----------------------------------------------------------------------------
def unet_up_reference(x, skip_input, weight):
    # ConvTranspose2d(k=4, s=2, p=1) as a dilated conv with flipped kernel
    w_flip = jnp.flip(weight, axis=(2, 3))
    w_oihw = jnp.transpose(w_flip, (1, 0, 2, 3))                # (Cout, Cin, 4, 4)
    y = jax.lax.conv_general_dilated(
        x, w_oihw,
        window_strides=(1, 1),
        padding=((2, 2), (2, 2)),
        lhs_dilation=(2, 2),
        dimension_numbers=("NCHW", "OIHW", "NCHW"),
    )
    mean = jnp.mean(y, axis=(2, 3), keepdims=True)
    var = jnp.mean((y - mean) ** 2, axis=(2, 3), keepdims=True)
    y = jnp.maximum((y - mean) / jnp.sqrt(var + 1e-5), 0.0)
    return jnp.concatenate([y, skip_input], axis=1)


if __name__ == "__main__":
    B, Cin, Cout, H, W = 2, 4, 8, 16, 16
    key = jax.random.PRNGKey(0)
    kx, ks, kw = jax.random.split(key, 3)

    x = jax.random.normal(kx, (B, Cin, H, W), dtype=jnp.float32)
    skip = jax.random.normal(ks, (B, Cout, 2 * H, 2 * W), dtype=jnp.float32)
    # deterministic ConvTranspose2d weight, PyTorch layout (Cin, Cout, kH, kW)
    weight = jax.random.normal(kw, (Cin, Cout, 4, 4), dtype=jnp.float32) * 0.1

    # weight prep hoisted out of the per-call jit (weights are static across calls)
    w_all = jax.block_until_ready(unet_up_prepare_weights(weight))
    fwd = jax.jit(unet_up_apply, static_argnames=("out_channels",))
    out = jax.block_until_ready(fwd(x, skip, w_all, out_channels=Cout))

    ref = jax.block_until_ready(unet_up_reference(x, skip, weight))

    assert out.shape == (B, 2 * Cout, 2 * H, 2 * W), out.shape
    # bf16 matmul inputs + bf16 pre-norm stash (f32 accumulation / stats) -> loose tolerance
    max_err = float(jnp.max(jnp.abs(out - ref)))
    assert max_err < 6e-2, max_err
    print("KERNEL_OK")
</pallas_src>

<mosaic_0001>
module attributes {stable_mosaic.version = 11 : i64} {
  func.func @kernel(%arg0: i32, %arg1: i32, %arg2: memref<1x342x4xbf16, #tpu.memory_space<vmem>>, %arg3: memref<16x4x128xbf16, #tpu.memory_space<vmem>>, %arg4: memref<288x1xf32, #tpu.memory_space<vmem>>, %arg5: memref<1x4x288x128xbf16, #tpu.memory_space<vmem>>, %arg6: memref<288x128xf32, #tpu.memory_space<vmem>>) attributes {dimension_semantics = [#tpu.dimension_semantics<parallel>, #tpu.dimension_semantics<parallel>], iteration_bounds = array<i64: 1, 2>, scalar_prefetch = 0 : i64, scratch_operands = 1 : i64, tpu.core_type = #tpu.core_type<tc>, window_params = [{transform_indices = @transform_0, window_bounds = array<i64: 1, 342, 4>}, {transform_indices = @transform_1, window_bounds = array<i64: 16, 4, 128>}, {pipeline_mode = #tpu.pipeline_mode<synchronous>, transform_indices = @transform_2, window_bounds = array<i64: 288, 1>}, {transform_indices = @transform_3, window_bounds = array<i64: 1, 4, 288, 128>}]} {
    %c0 = arith.constant 0 : index
    %c0_0 = arith.constant 0 : index
    %0 = vector.load %arg4[%c0, %c0_0] : memref<288x1xf32, #tpu.memory_space<vmem>>, vector<288x1xf32>
    %cst = arith.constant 0.000000e+00 : f32
    %1 = vector.broadcast %cst : f32 to vector<1x128xf32>
    %cst_1 = arith.constant 0.000000e+00 : f32
    %2 = vector.broadcast %cst_1 : f32 to vector<1x128xf32>
    %c0_2 = arith.constant 0 : index
    %c0_3 = arith.constant 0 : index
    %c0_4 = arith.constant 0 : index
    %3 = vector.load %arg2[%c0_2, %c0_3, %c0_4] : memref<1x342x4xbf16, #tpu.memory_space<vmem>>, vector<1x288x4xbf16>
    %4 = vector.shape_cast %3 : vector<1x288x4xbf16> to vector<288x4xbf16>
    %c0_5 = arith.constant 0 : index
    %c0_6 = arith.constant 0 : index
    %c0_7 = arith.constant 0 : index
    %5 = vector.load %arg3[%c0_5, %c0_6, %c0_7] : memref<16x4x128xbf16, #tpu.memory_space<vmem>>, vector<1x4x128xbf16>
    %6 = vector.shape_cast %5 : vector<1x4x128xbf16> to vector<4x128xbf16>
    %cst_8 = arith.constant dense<0.000000e+00> : vector<288x128xf32>
    %7 = tpu.matmul %4, %6, %cst_8 {dimension_numbers = #tpu.dot_dimension_numbers<[1], [0], [0], [1], [0, 0, 1, 1], [], []>} : vector<288x4xbf16>, vector<4x128xbf16>, vector<288x128xf32> -> vector<288x128xf32>
    %c0_9 = arith.constant 0 : index
    %c0_10 = arith.constant 0 : index
    %8 = vector.load %arg6[%c0_9, %c0_10] : memref<288x128xf32, #tpu.memory_space<vmem>>, vector<288x128xf32>
    tpu.vector_store %arg6[%c0_9, %c0_10], %7 {strides = array<i32>} : memref<288x128xf32, #tpu.memory_space<vmem>>, vector<288x128xf32>,
    %c0_11 = arith.constant 0 : index
    %c1 = arith.constant 1 : index
    %c0_12 = arith.constant 0 : index
    %9 = vector.load %arg2[%c0_11, %c1, %c0_12] : memref<1x342x4xbf16, #tpu.memory_space<vmem>>, vector<1x288x4xbf16>
    %10 = vector.shape_cast %9 : vector<1x288x4xbf16> to vector<288x4xbf16>
    %c1_13 = arith.constant 1 : index
    %c0_14 = arith.constant 0 : index
    %c0_15 = arith.constant 0 : index
    %11 = vector.load %arg3[%c1_13, %c0_14, %c0_15] : memref<16x4x128xbf16, #tpu.memory_space<vmem>>, vector<1x4x128xbf16>
    %12 = vector.shape_cast %11 : vector<1x4x128xbf16> to vector<4x128xbf16>
    %cst_16 = arith.constant dense<0.000000e+00> : vector<288x128xf32>
    %13 = tpu.matmul %10, %12, %cst_16 {dimension_numbers = #tpu.dot_dimension_numbers<[1], [0], [0], [1], [0, 0, 1, 1], [], []>} : vector<288x4xbf16>, vector<4x128xbf16>, vector<288x128xf32> -> vector<288x128xf32>
    %c0_17 = arith.constant 0 : index
    %c0_18 = arith.constant 0 : index
    %14 = vector.load %arg6[%c0_17, %c0_18] : memref<288x128xf32, #tpu.memory_space<vmem>>, vector<288x128xf32>
    %15 = arith.addf %14, %13 : vector<288x128xf32>
    %c0_19 = arith.constant 0 : index
    %c0_20 = arith.constant 0 : index
    %16 = vector.load %arg6[%c0_19, %c0_20] : memref<288x128xf32, #tpu.memory_space<vmem>>, vector<288x128xf32>
    tpu.vector_store %arg6[%c0_19, %c0_20], %15 {strides = array<i32>} : memref<288x128xf32, #tpu.memory_space<vmem>>, vector<288x128xf32>,
    %c0_21 = arith.constant 0 : index
    %c18 = arith.constant 18 : index
    %c0_22 = arith.constant 0 : index
    %17 = vector.load %arg2[%c0_21, %c18, %c0_22] : memref<1x342x4xbf16, #tpu.memory_space<vmem>>, vector<1x288x4xbf16>
    %18 = vector.shape_cast %17 : vector<1x288x4xbf16> to vector<288x4xbf16>
    %c2 = arith.constant 2 : index
    %c0_23 = arith.constant 0 : index
    %c0_24 = arith.constant 0 : index
    %19 = vector.load %arg3[%c2, %c0_23, %c0_24] : memref<16x4x128xbf16, #tpu.memory_space<vmem>>, vector<1x4x128xbf16>
    %20 = vector.shape_cast %19 : vector<1x4x128xbf16> to vector<4x128xbf16>
    %cst_25 = arith.constant dense<0.000000e+00> : vector<288x128xf32>
    %21 = tpu.matmul %18, %20, %cst_25 {dimension_numbers = #tpu.dot_dimension_numbers<[1], [0], [0], [1], [0, 0, 1, 1], [], []>} : vector<288x4xbf16>, vector<4x128xbf16>, vector<288x128xf32> -> vector<288x128xf32>
    %c0_26 = arith.constant 0 : index
    %c0_27 = arith.constant 0 : index
    %22 = vector.load %arg6[%c0_26, %c0_27] : memref<288x128xf32, #tpu.memory_space<vmem>>, vector<288x128xf32>
    %23 = arith.addf %22, %21 : vector<288x128xf32>
    %c0_28 = arith.constant 0 : index
    %c0_29 = arith.constant 0 : index
    %24 = vector.load %arg6[%c0_28, %c0_29] : memref<288x128xf32, #tpu.memory_space<vmem>>, vector<288x128xf32>
    tpu.vector_store %arg6[%c0_28, %c0_29], %23 {strides = array<i32>} : memref<288x128xf32, #tpu.memory_space<vmem>>, vector<288x128xf32>,
    %c0_30 = arith.constant 0 : index
    %c19 = arith.constant 19 : index
    %c0_31 = arith.constant 0 : index
    %25 = vector.load %arg2[%c0_30, %c19, %c0_31] : memref<1x342x4xbf16, #tpu.memory_space<vmem>>, vector<1x288x4xbf16>
    %26 = vector.shape_cast %25 : vector<1x288x4xbf16> to vector<288x4xbf16>
    %c3 = arith.constant 3 : index
    %c0_32 = arith.constant 0 : index
    %c0_33 = arith.constant 0 : index
    %27 = vector.load %arg3[%c3, %c0_32, %c0_33] : memref<16x4x128xbf16, #tpu.memory_space<vmem>>, vector<1x4x128xbf16>
    %28 = vector.shape_cast %27 : vector<1x4x128xbf16> to vector<4x128xbf16>
    %cst_34 = arith.constant dense<0.000000e+00> : vector<288x128xf32>
    %29 = tpu.matmul %26, %28, %cst_34 {dimension_numbers = #tpu.dot_dimension_numbers<[1], [0], [0], [1], [0, 0, 1, 1], [], []>} : vector<288x4xbf16>, vector<4x128xbf16>, vector<288x128xf32> -> vector<288x128xf32>
    %c0_35 = arith.constant 0 : index
    %c0_36 = arith.constant 0 : index
    %30 = vector.load %arg6[%c0_35, %c0_36] : memref<288x128xf32, #tpu.memory_space<vmem>>, vector<288x128xf32>
    %31 = arith.addf %30, %29 : vector<288x128xf32>
    %c0_37 = arith.constant 0 : index
    %c0_38 = arith.constant 0 : index
    %32 = vector.load %arg6[%c0_37, %c0_38] : memref<288x128xf32, #tpu.memory_space<vmem>>, vector<288x128xf32>
    tpu.vector_store %arg6[%c0_37, %c0_38], %31 {strides = array<i32>} : memref<288x128xf32, #tpu.memory_space<vmem>>, vector<288x128xf32>,
    %c0_39 = arith.constant 0 : index
    %c0_40 = arith.constant 0 : index
    %33 = vector.load %arg6[%c0_39, %c0_40] : memref<288x128xf32, #tpu.memory_space<vmem>>, vector<288x128xf32>
    %34 = vector.broadcast %0 : vector<288x1xf32> to vector<288x128xf32>
    %35 = arith.mulf %33, %34 : vector<288x128xf32>
    %cst_41 = arith.constant dense<0.000000e+00> : vector<128xf32>
    %36 = vector.multi_reduction <add>, %35, %cst_41 [0] : vector<288x128xf32> to vector<128xf32>
    %37 = vector.shape_cast %36 : vector<128xf32> to vector<1x128xf32>
    %38 = arith.addf %1, %37 : vector<1x128xf32>
    %39 = arith.mulf %35, %33 : vector<288x128xf32>
    %cst_42 = arith.constant dense<0.000000e+00> : vector<128xf32>
    %40 = vector.multi_reduction <add>, %39, %cst_42 [0] : vector<288x128xf32> to vector<128xf32>
    %41 = vector.shape_cast %40 : vector<128xf32> to vector<1x128xf32>
    %42 = arith.addf %2, %41 : vector<1x128xf32>
    %43 = arith.truncf %33 : vector<288x128xf32> to vector<288x128xbf16>
    %c0_43 = arith.constant 0 : index
    %c0_44 = arith.constant 0 : index
    %c0_45 = arith.constant 0 : index
    %c0_46 = arith.constant 0 : index
    %44 = vector.load %arg5[%c0_43, %c0_44, %c0_45, %c0_46] : memref<1x4x288x128xbf16, #tpu.memory_space<vmem>>, vector<1x1x288x128xbf16>
    %45 = vector.shape_cast %44 : vector<1x1x288x128xbf16> to vector<288x128xbf16>
    %46 = vector.shape_cast %43 : vector<288x128xbf16> to vector<1x1x288x128xbf16>
    tpu.vector_store %arg5[%c0_43, %c0_44, %c0_45, %c0_46], %46 {strides = array<i32>} : memref<1x4x288x128xbf16, #tpu.memory_space<vmem>>, vector<1x1x288x128xbf16>,
    %c0_47 = arith.constant 0 : index
    %c1_48 = arith.constant 1 : index
    %c0_49 = arith.constant 0 : index
    %47 = vector.load %arg2[%c0_47, %c1_48, %c0_49] : memref<1x342x4xbf16, #tpu.memory_space<vmem>>, vector<1x288x4xbf16>
    %48 = vector.shape_cast %47 : vector<1x288x4xbf16> to vector<288x4xbf16>
    %c4 = arith.constant 4 : index
    %c0_50 = arith.constant 0 : index
    %c0_51 = arith.constant 0 : index
    %49 = vector.load %arg3[%c4, %c0_50, %c0_51] : memref<16x4x128xbf16, #tpu.memory_space<vmem>>, vector<1x4x128xbf16>
    %50 = vector.shape_cast %49 : vector<1x4x128xbf16> to vector<4x128xbf16>
    %cst_52 = arith.constant dense<0.000000e+00> : vector<288x128xf32>
    %51 = tpu.matmul %48, %50, %cst_52 {dimension_numbers = #tpu.dot_dimension_numbers<[1], [0], [0], [1], [0, 0, 1, 1], [], []>} : vector<288x4xbf16>, vector<4x128xbf16>, vector<288x128xf32> -> vector<288x128xf32>
    %c0_53 = arith.constant 0 : index
    %c0_54 = arith.constant 0 : index
    %52 = vector.load %arg6[%c0_53, %c0_54] : memref<288x128xf32, #tpu.memory_space<vmem>>, vector<288x128xf32>
    tpu.vector_store %arg6[%c0_53, %c0_54], %51 {strides = array<i32>} : memref<288x128xf32, #tpu.memory_space<vmem>>, vector<288x128xf32>,
    %c0_55 = arith.constant 0 : index
    %c2_56 = arith.constant 2 : index
    %c0_57 = arith.constant 0 : index
    %53 = vector.load %arg2[%c0_55, %c2_56, %c0_57] : memref<1x342x4xbf16, #tpu.memory_space<vmem>>, vector<1x288x4xbf16>
    %54 = vector.shape_cast %53 : vector<1x288x4xbf16> to vector<288x4xbf16>
    %c5 = arith.constant 5 : index
    %c0_58 = arith.constant 0 : index
    %c0_59 = arith.constant 0 : index
    %55 = vector.load %arg3[%c5, %c0_58, %c0_59] : memref<16x4x128xbf16, #tpu.memory_space<vmem>>, vector<1x4x128xbf16>
    %56 = vector.shape_cast %55 : vector<1x4x128xbf16> to vector<4x128xbf16>
    %cst_60 = arith.constant dense<0.000000e+00> : vector<288x128xf32>
    %57 = tpu.matmul %54, %56, %cst_60 {dimension_numbers = #tpu.dot_dimension_numbers<[1], [0], [0], [1], [0, 0, 1, 1], [], []>} : vector<288x4xbf16>, vector<4x128xbf16>, vector<288x128xf32> -> vector<288x128xf32>
    %c0_61 = arith.constant 0 : index
    %c0_62 = arith.constant 0 : index
    %58 = vector.load %arg6[%c0_61, %c0_62] : memref<288x128xf32, #tpu.memory_space<vmem>>, vector<288x128xf32>
    %59 = arith.addf %58, %57 : vector<288x128xf32>
    %c0_63 = arith.constant 0 : index
    %c0_64 = arith.constant 0 : index
    %60 = vector.load %arg6[%c0_63, %c0_64] : memref<288x128xf32, #tpu.memory_space<vmem>>, vector<288x128xf32>
    tpu.vector_store %arg6[%c0_63, %c0_64], %59 {strides = array<i32>} : memref<288x128xf32, #tpu.memory_space<vmem>>, vector<288x128xf32>,
    %c0_65 = arith.constant 0 : index
    %c19_66 = arith.constant 19 : index
    %c0_67 = arith.constant 0 : index
    %61 = vector.load %arg2[%c0_65, %c19_66, %c0_67] : memref<1x342x4xbf16, #tpu.memory_space<vmem>>, vector<1x288x4xbf16>
    %62 = vector.shape_cast %61 : vector<1x288x4xbf16> to vector<288x4xbf16>
    %c6 = arith.constant 6 : index
    %c0_68 = arith.constant 0 : index
    %c0_69 = arith.constant 0 : index
    %63 = vector.load %arg3[%c6, %c0_68, %c0_69] : memref<16x4x128xbf16, #tpu.memory_space<vmem>>, vector<1x4x128xbf16>
    %64 = vector.shape_cast %63 : vector<1x4x128xbf16> to vector<4x128xbf16>
    %cst_70 = arith.constant dense<0.000000e+00> : vector<288x128xf32>
    %65 = tpu.matmul %62, %64, %cst_70 {dimension_numbers = #tpu.dot_dimension_numbers<[1], [0], [0], [1], [0, 0, 1, 1], [], []>} : vector<288x4xbf16>, vector<4x128xbf16>, vector<288x128xf32> -> vector<288x128xf32>
    %c0_71 = arith.constant 0 : index
    %c0_72 = arith.constant 0 : index
    %66 = vector.load %arg6[%c0_71, %c0_72] : memref<288x128xf32, #tpu.memory_space<vmem>>, vector<288x128xf32>
    %67 = arith.addf %66, %65 : vector<288x128xf32>
    %c0_73 = arith.constant 0 : index
    %c0_74 = arith.constant 0 : index
    %68 = vector.load %arg6[%c0_73, %c0_74] : memref<288x128xf32, #tpu.memory_space<vmem>>, vector<288x128xf32>
    tpu.vector_store %arg6[%c0_73, %c0_74], %67 {strides = array<i32>} : memref<288x128xf32, #tpu.memory_space<vmem>>, vector<288x128xf32>,
    %c0_75 = arith.constant 0 : index
    %c20 = arith.constant 20 : index
    %c0_76 = arith.constant 0 : index
    %69 = vector.load %arg2[%c0_75, %c20, %c0_76] : memref<1x342x4xbf16, #tpu.memory_space<vmem>>, vector<1x288x4xbf16>
    %70 = vector.shape_cast %69 : vector<1x288x4xbf16> to vector<288x4xbf16>
    %c7 = arith.constant 7 : index
    %c0_77 = arith.constant 0 : index
    %c0_78 = arith.constant 0 : index
    %71 = vector.load %arg3[%c7, %c0_77, %c0_78] : memref<16x4x128xbf16, #tpu.memory_space<vmem>>, vector<1x4x128xbf16>
    %72 = vector.shape_cast %71 : vector<1x4x128xbf16> to vector<4x128xbf16>
    %cst_79 = arith.constant dense<0.000000e+00> : vector<288x128xf32>
    %73 = tpu.matmul %70, %72, %cst_79 {dimension_numbers = #tpu.dot_dimension_numbers<[1], [0], [0], [1], [0, 0, 1, 1], [], []>} : vector<288x4xbf16>, vector<4x128xbf16>, vector<288x128xf32> -> vector<288x128xf32>
    %c0_80 = arith.constant 0 : index
    %c0_81 = arith.constant 0 : index
    %74 = vector.load %arg6[%c0_80, %c0_81] : memref<288x128xf32, #tpu.memory_space<vmem>>, vector<288x128xf32>
    %75 = arith.addf %74, %73 : vector<288x128xf32>
    %c0_82 = arith.constant 0 : index
    %c0_83 = arith.constant 0 : index
    %76 = vector.load %arg6[%c0_82, %c0_83] : memref<288x128xf32, #tpu.memory_space<vmem>>, vector<288x128xf32>
    tpu.vector_store %arg6[%c0_82, %c0_83], %75 {strides = array<i32>} : memref<288x128xf32, #tpu.memory_space<vmem>>, vector<288x128xf32>,
    %c0_84 = arith.constant 0 : index
    %c0_85 = arith.constant 0 : index
    %77 = vector.load %arg6[%c0_84, %c0_85] : memref<288x128xf32, #tpu.memory_space<vmem>>, vector<288x128xf32>
    %78 = vector.broadcast %0 : vector<288x1xf32> to vector<288x128xf32>
    %79 = arith.mulf %77, %78 : vector<288x128xf32>
    %cst_86 = arith.constant dense<0.000000e+00> : vector<128xf32>
    %80 = vector.multi_reduction <add>, %79, %cst_86 [0] : vector<288x128xf32> to vector<128xf32>
    %81 = vector.shape_cast %80 : vector<128xf32> to vector<1x128xf32>
    %82 = arith.addf %38, %81 : vector<1x128xf32>
    %83 = arith.mulf %79, %77 : vector<288x128xf32>
    %cst_87 = arith.constant dense<0.000000e+00> : vector<128xf32>
    %84 = vector.multi_reduction <add>, %83, %cst_87 [0] : vector<288x128xf32> to vector<128xf32>
    %85 = vector.shape_cast %84 : vector<128xf32> to vector<1x128xf32>
    %86 = arith.addf %42, %85 : vector<1x128xf32>
    %87 = arith.truncf %77 : vector<288x128xf32> to vector<288x128xbf16>
    %c0_88 = arith.constant 0 : index
    %c1_89 = arith.constant 1 : index
    %c0_90 = arith.constant 0 : index
    %c0_91 = arith.constant 0 : index
    %88 = vector.load %arg5[%c0_88, %c1_89, %c0_90, %c0_91] : memref<1x4x288x128xbf16, #tpu.memory_space<vmem>>, vector<1x1x288x128xbf16>
    %89 = vector.shape_cast %88 : vector<1x1x288x128xbf16> to vector<288x128xbf16>
    %90 = vector.shape_cast %87 : vector<288x128xbf16> to vector<1x1x288x128xbf16>
    tpu.vector_store %arg5[%c0_88, %c1_89, %c0_90, %c0_91], %90 {strides = array<i32>} : memref<1x4x288x128xbf16, #tpu.memory_space<vmem>>, vector<1x1x288x128xbf16>,
    %c0_92 = arith.constant 0 : index
    %c18_93 = arith.constant 18 : index
    %c0_94 = arith.constant 0 : index
    %91 = vector.load %arg2[%c0_92, %c18_93, %c0_94] : memref<1x342x4xbf16, #tpu.memory_space<vmem>>, vector<1x288x4xbf16>
    %92 = vector.shape_cast %91 : vector<1x288x4xbf16> to vector<288x4xbf16>
    %c8 = arith.constant 8 : index
    %c0_95 = arith.constant 0 : index
    %c0_96 = arith.constant 0 : index
    %93 = vector.load %arg3[%c8, %c0_95, %c0_96] : memref<16x4x128xbf16, #tpu.memory_space<vmem>>, vector<1x4x128xbf16>
    %94 = vector.shape_cast %93 : vector<1x4x128xbf16> to vector<4x128xbf16>
    %cst_97 = arith.constant dense<0.000000e+00> : vector<288x128xf32>
    %95 = tpu.matmul %92, %94, %cst_97 {dimension_numbers = #tpu.dot_dimension_numbers<[1], [0], [0], [1], [0, 0, 1, 1], [], []>} : vector<288x4xbf16>, vector<4x128xbf16>, vector<288x128xf32> -> vector<288x128xf32>
    %c0_98 = arith.constant 0 : index
    %c0_99 = arith.constant 0 : index
    %96 = vector.load %arg6[%c0_98, %c0_99] : memref<288x128xf32, #tpu.memory_space<vmem>>, vector<288x128xf32>
    tpu.vector_store %arg6[%c0_98, %c0_99], %95 {strides = array<i32>} : memref<288x128xf32, #tpu.memory_space<vmem>>, vector<288x128xf32>,
    %c0_100 = arith.constant 0 : index
    %c19_101 = arith.constant 19 : index
    %c0_102 = arith.constant 0 : index
    %97 = vector.load %arg2[%c0_100, %c19_101, %c0_102] : memref<1x342x4xbf16, #tpu.memory_space<vmem>>, vector<1x288x4xbf16>
    %98 = vector.shape_cast %97 : vector<1x288x4xbf16> to vector<288x4xbf16>
    %c9 = arith.constant 9 : index
    %c0_103 = arith.constant 0 : index
    %c0_104 = arith.constant 0 : index
    %99 = vector.load %arg3[%c9, %c0_103, %c0_104] : memref<16x4x128xbf16, #tpu.memory_space<vmem>>, vector<1x4x128xbf16>
    %100 = vector.shape_cast %99 : vector<1x4x128xbf16> to vector<4x128xbf16>
    %cst_105 = arith.constant dense<0.000000e+00> : vector<288x128xf32>
    %101 = tpu.matmul %98, %100, %cst_105 {dimension_numbers = #tpu.dot_dimension_numbers<[1], [0], [0], [1], [0, 0, 1, 1], [], []>} : vector<288x4xbf16>, vector<4x128xbf16>, vector<288x128xf32> -> vector<288x128xf32>
    %c0_106 = arith.constant 0 : index
    %c0_107 = arith.constant 0 : index
    %102 = vector.load %arg6[%c0_106, %c0_107] : memref<288x128xf32, #tpu.memory_space<vmem>>, vector<288x128xf32>
    %103 = arith.addf %102, %101 : vector<288x128xf32>
    %c0_108 = arith.constant 0 : index
    %c0_109 = arith.constant 0 : index
    %104 = vector.load %arg6[%c0_108, %c0_109] : memref<288x128xf32, #tpu.memory_space<vmem>>, vector<288x128xf32>
    tpu.vector_store %arg6[%c0_108, %c0_109], %103 {strides = array<i32>} : memref<288x128xf32, #tpu.memory_space<vmem>>, vector<288x128xf32>,
    %c0_110 = arith.constant 0 : index
    %c36 = arith.constant 36 : index
    %c0_111 = arith.constant 0 : index
    %105 = vector.load %arg2[%c0_110, %c36, %c0_111] : memref<1x342x4xbf16, #tpu.memory_space<vmem>>, vector<1x288x4xbf16>
    %106 = vector.shape_cast %105 : vector<1x288x4xbf16> to vector<288x4xbf16>
    %c10 = arith.constant 10 : index
    %c0_112 = arith.constant 0 : index
    %c0_113 = arith.constant 0 : index
    %107 = vector.load %arg3[%c10, %c0_112, %c0_113] : memref<16x4x128xbf16, #tpu.memory_space<vmem>>, vector<1x4x128xbf16>
    %108 = vector.shape_cast %107 : vector<1x4x128xbf16> to vector<4x128xbf16>
    %cst_114 = arith.constant dense<0.000000e+00> : vector<288x128xf32>
    %109 = tpu.matmul %106, %108, %cst_114 {dimension_numbers = #tpu.dot_dimension_numbers<[1], [0], [0], [1], [0, 0, 1, 1], [], []>} : vector<288x4xbf16>, vector<4x128xbf16>, vector<288x128xf32> -> vector<288x128xf32>
    %c0_115 = arith.constant 0 : index
    %c0_116 = arith.constant 0 : index
    %110 = vector.load %arg6[%c0_115, %c0_116] : memref<288x128xf32, #tpu.memory_space<vmem>>, vector<288x128xf32>
    %111 = arith.addf %110, %109 : vector<288x128xf32>
    %c0_117 = arith.constant 0 : index
    %c0_118 = arith.constant 0 : index
    %112 = vector.load %arg6[%c0_117, %c0_118] : memref<288x128xf32, #tpu.memory_space<vmem>>, vector<288x128xf32>
    tpu.vector_store %arg6[%c0_117, %c0_118], %111 {strides = array<i32>} : memref<288x128xf32, #tpu.memory_space<vmem>>, vector<288x128xf32>,
    %c0_119 = arith.constant 0 : index
    %c37 = arith.constant 37 : index
    %c0_120 = arith.constant 0 : index
    %113 = vector.load %arg2[%c0_119, %c37, %c0_120] : memref<1x342x4xbf16, #tpu.memory_space<vmem>>, vector<1x288x4xbf16>
    %114 = vector.shape_cast %113 : vector<1x288x4xbf16> to vector<288x4xbf16>
    %c11 = arith.constant 11 : index
    %c0_121 = arith.constant 0 : index
    %c0_122 = arith.constant 0 : index
    %115 = vector.load %arg3[%c11, %c0_121, %c0_122] : memref<16x4x128xbf16, #tpu.memory_space<vmem>>, vector<1x4x128xbf16>
    %116 = vector.shape_cast %115 : vector<1x4x128xbf16> to vector<4x128xbf16>
    %cst_123 = arith.constant dense<0.000000e+00> : vector<288x128xf32>
    %117 = tpu.matmul %114, %116, %cst_123 {dimension_numbers = #tpu.dot_dimension_numbers<[1], [0], [0], [1], [0, 0, 1, 1], [], []>} : vector<288x4xbf16>, vector<4x128xbf16>, vector<288x128xf32> -> vector<288x128xf32>
    %c0_124 = arith.constant 0 : index
    %c0_125 = arith.constant 0 : index
    %118 = vector.load %arg6[%c0_124, %c0_125] : memref<288x128xf32, #tpu.memory_space<vmem>>, vector<288x128xf32>
    %119 = arith.addf %118, %117 : vector<288x128xf32>
    %c0_126 = arith.constant 0 : index
    %c0_127 = arith.constant 0 : index
    %120 = vector.load %arg6[%c0_126, %c0_127] : memref<288x128xf32, #tpu.memory_space<vmem>>, vector<288x128xf32>
    tpu.vector_store %arg6[%c0_126, %c0_127], %119 {strides = array<i32>} : memref<288x128xf32, #tpu.memory_space<vmem>>, vector<288x128xf32>,
    %c0_128 = arith.constant 0 : index
    %c0_129 = arith.constant 0 : index
    %121 = vector.load %arg6[%c0_128, %c0_129] : memref<288x128xf32, #tpu.memory_space<vmem>>, vector<288x128xf32>
    %122 = vector.broadcast %0 : vector<288x1xf32> to vector<288x128xf32>
    %123 = arith.mulf %121, %122 : vector<288x128xf32>
    %cst_130 = arith.constant dense<0.000000e+00> : vector<128xf32>
    %124 = vector.multi_reduction <add>, %123, %cst_130 [0] : vector<288x128xf32> to vector<128xf32>
    %125 = vector.shape_cast %124 : vector<128xf32> to vector<1x128xf32>
    %126 = arith.addf %82, %125 : vector<1x128xf32>
    %127 = arith.mulf %123, %121 : vector<288x128xf32>
    %cst_131 = arith.constant dense<0.000000e+00> : vector<128xf32>
    %128 = vector.multi_reduction <add>, %127, %cst_131 [0] : vector<288x128xf32> to vector<128xf32>
    %129 = vector.shape_cast %128 : vector<128xf32> to vector<1x128xf32>
    %130 = arith.addf %86, %129 : vector<1x128xf32>
    %131 = arith.truncf %121 : vector<288x128xf32> to vector<288x128xbf16>
    %c0_132 = arith.constant 0 : index
    %c2_133 = arith.constant 2 : index
    %c0_134 = arith.constant 0 : index
    %c0_135 = arith.constant 0 : index
    %132 = vector.load %arg5[%c0_132, %c2_133, %c0_134, %c0_135] : memref<1x4x288x128xbf16, #tpu.memory_space<vmem>>, vector<1x1x288x128xbf16>
    %133 = vector.shape_cast %132 : vector<1x1x288x128xbf16> to vector<288x128xbf16>
    %134 = vector.shape_cast %131 : vector<288x128xbf16> to vector<1x1x288x128xbf16>
    tpu.vector_store %arg5[%c0_132, %c2_133, %c0_134, %c0_135], %134 {strides = array<i32>} : memref<1x4x288x128xbf16, #tpu.memory_space<vmem>>, vector<1x1x288x128xbf16>,
    %c0_136 = arith.constant 0 : index
    %c19_137 = arith.constant 19 : index
    %c0_138 = arith.constant 0 : index
    %135 = vector.load %arg2[%c0_136, %c19_137, %c0_138] : memref<1x342x4xbf16, #tpu.memory_space<vmem>>, vector<1x288x4xbf16>
    %136 = vector.shape_cast %135 : vector<1x288x4xbf16> to vector<288x4xbf16>
    %c12 = arith.constant 12 : index
    %c0_139 = arith.constant 0 : index
    %c0_140 = arith.constant 0 : index
    %137 = vector.load %arg3[%c12, %c0_139, %c0_140] : memref<16x4x128xbf16, #tpu.memory_space<vmem>>, vector<1x4x128xbf16>
    %138 = vector.shape_cast %137 : vector<1x4x128xbf16> to vector<4x128xbf16>
    %cst_141 = arith.constant dense<0.000000e+00> : vector<288x128xf32>
    %139 = tpu.matmul %136, %138, %cst_141 {dimension_numbers = #tpu.dot_dimension_numbers<[1], [0], [0], [1], [0, 0, 1, 1], [], []>} : vector<288x4xbf16>, vector<4x128xbf16>, vector<288x128xf32> -> vector<288x128xf32>
    %c0_142 = arith.constant 0 : index
    %c0_143 = arith.constant 0 : index
    %140 = vector.load %arg6[%c0_142, %c0_143] : memref<288x128xf32, #tpu.memory_space<vmem>>, vector<288x128xf32>
    tpu.vector_store %arg6[%c0_142, %c0_143], %139 {strides = array<i32>} : memref<288x128xf32, #tpu.memory_space<vmem>>, vector<288x128xf32>,
    %c0_144 = arith.constant 0 : index
    %c20_145 = arith.constant 20 : index
    %c0_146 = arith.constant 0 : index
    %141 = vector.load %arg2[%c0_144, %c20_145, %c0_146] : memref<1x342x4xbf16, #tpu.memory_space<vmem>>, vector<1x288x4xbf16>
    %142 = vector.shape_cast %141 : vector<1x288x4xbf16> to vector<288x4xbf16>
    %c13 = arith.constant 13 : index
    %c0_147 = arith.constant 0 : index
    %c0_148 = arith.constant 0 : index
    %143 = vector.load %arg3[%c13, %c0_147, %c0_148] : memref<16x4x128xbf16, #tpu.memory_space<vmem>>, vector<1x4x128xbf16>
    %144 = vector.shape_cast %143 : vector<1x4x128xbf16> to vector<4x128xbf16>
    %cst_149 = arith.constant dense<0.000000e+00> : vector<288x128xf32>
    %145 = tpu.matmul %142, %144, %cst_149 {dimension_numbers = #tpu.dot_dimension_numbers<[1], [0], [0], [1], [0, 0, 1, 1], [], []>} : vector<288x4xbf16>, vector<4x128xbf16>, vector<288x128xf32> -> vector<288x128xf32>
    %c0_150 = arith.constant 0 : index
    %c0_151 = arith.constant 0 : index
    %146 = vector.load %arg6[%c0_150, %c0_151] : memref<288x128xf32, #tpu.memory_space<vmem>>, vector<288x128xf32>
    %147 = arith.addf %146, %145 : vector<288x128xf32>
    %c0_152 = arith.constant 0 : index
    %c0_153 = arith.constant 0 : index
    %148 = vector.load %arg6[%c0_152, %c0_153] : memref<288x128xf32, #tpu.memory_space<vmem>>, vector<288x128xf32>
    tpu.vector_store %arg6[%c0_152, %c0_153], %147 {strides = array<i32>} : memref<288x128xf32, #tpu.memory_space<vmem>>, vector<288x128xf32>,
    %c0_154 = arith.constant 0 : index
    %c37_155 = arith.constant 37 : index
    %c0_156 = arith.constant 0 : index
    %149 = vector.load %arg2[%c0_154, %c37_155, %c0_156] : memref<1x342x4xbf16, #tpu.memory_space<vmem>>, vector<1x288x4xbf16>
    %150 = vector.shape_cast %149 : vector<1x288x4xbf16> to vector<288x4xbf16>
    %c14 = arith.constant 14 : index
    %c0_157 = arith.constant 0 : index
    %c0_158 = arith.constant 0 : index
    %151 = vector.load %arg3[%c14, %c0_157, %c0_158] : memref<16x4x128xbf16, #tpu.memory_space<vmem>>, vector<1x4x128xbf16>
    %152 = vector.shape_cast %151 : vector<1x4x128xbf16> to vector<4x128xbf16>
    %cst_159 = arith.constant dense<0.000000e+00> : vector<288x128xf32>
    %153 = tpu.matmul %150, %152, %cst_159 {dimension_numbers = #tpu.dot_dimension_numbers<[1], [0], [0], [1], [0, 0, 1, 1], [], []>} : vector<288x4xbf16>, vector<4x128xbf16>, vector<288x128xf32> -> vector<288x128xf32>
    %c0_160 = arith.constant 0 : index
    %c0_161 = arith.constant 0 : index
    %154 = vector.load %arg6[%c0_160, %c0_161] : memref<288x128xf32, #tpu.memory_space<vmem>>, vector<288x128xf32>
    %155 = arith.addf %154, %153 : vector<288x128xf32>
    %c0_162 = arith.constant 0 : index
    %c0_163 = arith.constant 0 : index
    %156 = vector.load %arg6[%c0_162, %c0_163] : memref<288x128xf32, #tpu.memory_space<vmem>>, vector<288x128xf32>
    tpu.vector_store %arg6[%c0_162, %c0_163], %155 {strides = array<i32>} : memref<288x128xf32, #tpu.memory_space<vmem>>, vector<288x128xf32>,
    %c0_164 = arith.constant 0 : index
    %c38 = arith.constant 38 : index
    %c0_165 = arith.constant 0 : index
    %157 = vector.load %arg2[%c0_164, %c38, %c0_165] : memref<1x342x4xbf16, #tpu.memory_space<vmem>>, vector<1x288x4xbf16>
    %158 = vector.shape_cast %157 : vector<1x288x4xbf16> to vector<288x4xbf16>
    %c15 = arith.constant 15 : index
    %c0_166 = arith.constant 0 : index
    %c0_167 = arith.constant 0 : index
    %159 = vector.load %arg3[%c15, %c0_166, %c0_167] : memref<16x4x128xbf16, #tpu.memory_space<vmem>>, vector<1x4x128xbf16>
    %160 = vector.shape_cast %159 : vector<1x4x128xbf16> to vector<4x128xbf16>
    %cst_168 = arith.constant dense<0.000000e+00> : vector<288x128xf32>
    %161 = tpu.matmul %158, %160, %cst_168 {dimension_numbers = #tpu.dot_dimension_numbers<[1], [0], [0], [1], [0, 0, 1, 1], [], []>} : vector<288x4xbf16>, vector<4x128xbf16>, vector<288x128xf32> -> vector<288x128xf32>
    %c0_169 = arith.constant 0 : index
    %c0_170 = arith.constant 0 : index
    %162 = vector.load %arg6[%c0_169, %c0_170] : memref<288x128xf32, #tpu.memory_space<vmem>>, vector<288x128xf32>
    %163 = arith.addf %162, %161 : vector<288x128xf32>
    %c0_171 = arith.constant 0 : index
    %c0_172 = arith.constant 0 : index
    %164 = vector.load %arg6[%c0_171, %c0_172] : memref<288x128xf32, #tpu.memory_space<vmem>>, vector<288x128xf32>
    tpu.vector_store %arg6[%c0_171, %c0_172], %163 {strides = array<i32>} : memref<288x128xf32, #tpu.memory_space<vmem>>, vector<288x128xf32>,
    %c0_173 = arith.constant 0 : index
    %c0_174 = arith.constant 0 : index
    %165 = vector.load %arg6[%c0_173, %c0_174] : memref<288x128xf32, #tpu.memory_space<vmem>>, vector<288x128xf32>
    %166 = vector.broadcast %0 : vector<288x1xf32> to vector<288x128xf32>
    %167 = arith.mulf %165, %166 : vector<288x128xf32>
    %cst_175 = arith.constant dense<0.000000e+00> : vector<128xf32>
    %168 = vector.multi_reduction <add>, %167, %cst_175 [0] : vector<288x128xf32> to vector<128xf32>
    %169 = vector.shape_cast %168 : vector<128xf32> to vector<1x128xf32>
    %170 = arith.addf %126, %169 : vector<1x128xf32>
    %171 = arith.mulf %167, %165 : vector<288x128xf32>
    %cst_176 = arith.constant dense<0.000000e+00> : vector<128xf32>
    %172 = vector.multi_reduction <add>, %171, %cst_176 [0] : vector<288x128xf32> to vector<128xf32>
    %173 = vector.shape_cast %172 : vector<128xf32> to vector<1x128xf32>
    %174 = arith.addf %130, %173 : vector<1x128xf32>
    %175 = arith.truncf %165 : vector<288x128xf32> to vector<288x128xbf16>
    %c0_177 = arith.constant 0 : index
    %c3_178 = arith.constant 3 : index
    %c0_179 = arith.constant 0 : index
    %c0_180 = arith.constant 0 : index
    %176 = vector.load %arg5[%c0_177, %c3_178, %c0_179, %c0_180] : memref<1x4x288x128xbf16, #tpu.memory_space<vmem>>, vector<1x1x288x128xbf16>
    %177 = vector.shape_cast %176 : vector<1x1x288x128xbf16> to vector<288x128xbf16>
    %178 = vector.shape_cast %175 : vector<288x128xbf16> to vector<1x1x288x128xbf16>
    tpu.vector_store %arg5[%c0_177, %c3_178, %c0_179, %c0_180], %178 {strides = array<i32>} : memref<1x4x288x128xbf16, #tpu.memory_space<vmem>>, vector<1x1x288x128xbf16>,
    %cst_181 = arith.constant 9.765625E-4 : f32
    %179 = vector.broadcast %cst_181 : f32 to vector<1x128xf32>
    %180 = arith.mulf %170, %179 : vector<1x128xf32>
    %cst_182 = arith.constant 9.765625E-4 : f32
    %181 = vector.broadcast %cst_182 : f32 to vector<1x128xf32>
    %182 = arith.mulf %174, %181 : vector<1x128xf32>
    %183 = arith.mulf %180, %180 : vector<1x128xf32>
    %184 = arith.subf %182, %183 : vector<1x128xf32>
    %cst_183 = arith.constant 9.99999974E-6 : f32
    %185 = vector.broadcast %cst_183 : f32 to vector<1x128xf32>
    %186 = arith.addf %184, %185 : vector<1x128xf32>
    %187 = math.rsqrt %186 : vector<1x128xf32>
    %c0_184 = arith.constant 0 : index
    %c0_185 = arith.constant 0 : index
    %c0_186 = arith.constant 0 : index
    %c0_187 = arith.constant 0 : index
    %188 = vector.load %arg5[%c0_184, %c0_185, %c0_186, %c0_187] : memref<1x4x288x128xbf16, #tpu.memory_space<vmem>>, vector<1x1x288x128xbf16>
    %189 = vector.shape_cast %188 : vector<1x1x288x128xbf16> to vector<288x128xbf16>
    %190 = arith.extf %189 : vector<288x128xbf16> to vector<288x128xf32>
    %191 = vector.broadcast %180 : vector<1x128xf32> to vector<288x128xf32>
    %192 = arith.subf %190, %191 : vector<288x128xf32>
    %193 = vector.broadcast %187 : vector<1x128xf32> to vector<288x128xf32>
    %194 = arith.mulf %192, %193 : vector<288x128xf32>
    %cst_188 = arith.constant 0.000000e+00 : f32
    %195 = vector.broadcast %cst_188 : f32 to vector<288x128xf32>
    %196 = arith.maximumf %194, %195 : vector<288x128xf32>
    %197 = arith.truncf %196 : vector<288x128xf32> to vector<288x128xbf16>
    %c0_189 = arith.constant 0 : index
    %c0_190 = arith.constant 0 : index
    %c0_191 = arith.constant 0 : index
    %c0_192 = arith.constant 0 : index
    %198 = vector.load %arg5[%c0_189, %c0_190, %c0_191, %c0_192] : memref<1x4x288x128xbf16, #tpu.memory_space<vmem>>, vector<1x1x288x128xbf16>
    %199 = vector.shape_cast %198 : vector<1x1x288x128xbf16> to vector<288x128xbf16>
    %200 = vector.shape_cast %197 : vector<288x128xbf16> to vector<1x1x288x128xbf16>
    tpu.vector_store %arg5[%c0_189, %c0_190, %c0_191, %c0_192], %200 {strides = array<i32>} : memref<1x4x288x128xbf16, #tpu.memory_space<vmem>>, vector<1x1x288x128xbf16>,
    %c0_193 = arith.constant 0 : index
    %c1_194 = arith.constant 1 : index
    %c0_195 = arith.constant 0 : index
    %c0_196 = arith.constant 0 : index
    %201 = vector.load %arg5[%c0_193, %c1_194, %c0_195, %c0_196] : memref<1x4x288x128xbf16, #tpu.memory_space<vmem>>, vector<1x1x288x128xbf16>
    %202 = vector.shape_cast %201 : vector<1x1x288x128xbf16> to vector<288x128xbf16>
    %203 = arith.extf %202 : vector<288x128xbf16> to vector<288x128xf32>
    %204 = vector.broadcast %180 : vector<1x128xf32> to vector<288x128xf32>
    %205 = arith.subf %203, %204 : vector<288x128xf32>
    %206 = vector.broadcast %187 : vector<1x128xf32> to vector<288x128xf32>
    %207 = arith.mulf %205, %206 : vector<288x128xf32>
    %cst_197 = arith.constant 0.000000e+00 : f32
    %208 = vector.broadcast %cst_197 : f32 to vector<288x128xf32>
    %209 = arith.maximumf %207, %208 : vector<288x128xf32>
    %210 = arith.truncf %209 : vector<288x128xf32> to vector<288x128xbf16>
    %c0_198 = arith.constant 0 : index
    %c1_199 = arith.constant 1 : index
    %c0_200 = arith.constant 0 : index
    %c0_201 = arith.constant 0 : index
    %211 = vector.load %arg5[%c0_198, %c1_199, %c0_200, %c0_201] : memref<1x4x288x128xbf16, #tpu.memory_space<vmem>>, vector<1x1x288x128xbf16>
    %212 = vector.shape_cast %211 : vector<1x1x288x128xbf16> to vector<288x128xbf16>
    %213 = vector.shape_cast %210 : vector<288x128xbf16> to vector<1x1x288x128xbf16>
    tpu.vector_store %arg5[%c0_198, %c1_199, %c0_200, %c0_201], %213 {strides = array<i32>} : memref<1x4x288x128xbf16, #tpu.memory_space<vmem>>, vector<1x1x288x128xbf16>,
    %c0_202 = arith.constant 0 : index
    %c2_203 = arith.constant 2 : index
    %c0_204 = arith.constant 0 : index
    %c0_205 = arith.constant 0 : index
    %214 = vector.load %arg5[%c0_202, %c2_203, %c0_204, %c0_205] : memref<1x4x288x128xbf16, #tpu.memory_space<vmem>>, vector<1x1x288x128xbf16>
    %215 = vector.shape_cast %214 : vector<1x1x288x128xbf16> to vector<288x128xbf16>
    %216 = arith.extf %215 : vector<288x128xbf16> to vector<288x128xf32>
    %217 = vector.broadcast %180 : vector<1x128xf32> to vector<288x128xf32>
    %218 = arith.subf %216, %217 : vector<288x128xf32>
    %219 = vector.broadcast %187 : vector<1x128xf32> to vector<288x128xf32>
    %220 = arith.mulf %218, %219 : vector<288x128xf32>
    %cst_206 = arith.constant 0.000000e+00 : f32
    %221 = vector.broadcast %cst_206 : f32 to vector<288x128xf32>
    %222 = arith.maximumf %220, %221 : vector<288x128xf32>
    %223 = arith.truncf %222 : vector<288x128xf32> to vector<288x128xbf16>
    %c0_207 = arith.constant 0 : index
    %c2_208 = arith.constant 2 : index
    %c0_209 = arith.constant 0 : index
    %c0_210 = arith.constant 0 : index
    %224 = vector.load %arg5[%c0_207, %c2_208, %c0_209, %c0_210] : memref<1x4x288x128xbf16, #tpu.memory_space<vmem>>, vector<1x1x288x128xbf16>
    %225 = vector.shape_cast %224 : vector<1x1x288x128xbf16> to vector<288x128xbf16>
    %226 = vector.shape_cast %223 : vector<288x128xbf16> to vector<1x1x288x128xbf16>
    tpu.vector_store %arg5[%c0_207, %c2_208, %c0_209, %c0_210], %226 {strides = array<i32>} : memref<1x4x288x128xbf16, #tpu.memory_space<vmem>>, vector<1x1x288x128xbf16>,
    %c0_211 = arith.constant 0 : index
    %c3_212 = arith.constant 3 : index
    %c0_213 = arith.constant 0 : index
    %c0_214 = arith.constant 0 : index
    %227 = vector.load %arg5[%c0_211, %c3_212, %c0_213, %c0_214] : memref<1x4x288x128xbf16, #tpu.memory_space<vmem>>, vector<1x1x288x128xbf16>
    %228 = vector.shape_cast %227 : vector<1x1x288x128xbf16> to vector<288x128xbf16>
    %229 = arith.extf %228 : vector<288x128xbf16> to vector<288x128xf32>
    %230 = vector.broadcast %180 : vector<1x128xf32> to vector<288x128xf32>
    %231 = arith.subf %229, %230 : vector<288x128xf32>
    %232 = vector.broadcast %187 : vector<1x128xf32> to vector<288x128xf32>
    %233 = arith.mulf %231, %232 : vector<288x128xf32>
    %cst_215 = arith.constant 0.000000e+00 : f32
    %234 = vector.broadcast %cst_215 : f32 to vector<288x128xf32>
    %235 = arith.maximumf %233, %234 : vector<288x128xf32>
    %236 = arith.truncf %235 : vector<288x128xf32> to vector<288x128xbf16>
    %c0_216 = arith.constant 0 : index
    %c3_217 = arith.constant 3 : index
    %c0_218 = arith.constant 0 : index
    %c0_219 = arith.constant 0 : index
    %237 = vector.load %arg5[%c0_216, %c3_217, %c0_218, %c0_219] : memref<1x4x288x128xbf16, #tpu.memory_space<vmem>>, vector<1x1x288x128xbf16>
    %238 = vector.shape_cast %237 : vector<1x1x288x128xbf16> to vector<288x128xbf16>
    %239 = vector.shape_cast %236 : vector<288x128xbf16> to vector<1x1x288x128xbf16>
    tpu.vector_store %arg5[%c0_216, %c3_217, %c0_218, %c0_219], %239 {strides = array<i32>} : memref<1x4x288x128xbf16, #tpu.memory_space<vmem>>, vector<1x1x288x128xbf16>,
    return
  }
  func.func @transform_0(%arg0: i32, %arg1: i32) -> (i32, i32, i32) {
    %c0_i32 = arith.constant 0 : i32
    %c0_i32_0 = arith.constant 0 : i32
    %c0_i32_1 = arith.constant 0 : i32
    return %arg1, %c0_i32, %c0_i32_0 : i32, i32, i32
  }
  func.func @transform_1(%arg0: i32, %arg1: i32) -> (i32, i32, i32) {
    %c0_i32 = arith.constant 0 : i32
    %c0_i32_0 = arith.constant 0 : i32
    %c0_i32_1 = arith.constant 0 : i32
    return %c0_i32, %c0_i32_0, %arg0 : i32, i32, i32
  }
  func.func @transform_2(%arg0: i32, %arg1: i32) -> (i32, i32) {
    %c0_i32 = arith.constant 0 : i32
    %c0_i32_0 = arith.constant 0 : i32
    %c0_i32_1 = arith.constant 0 : i32
    return %c0_i32, %c0_i32_0 : i32, i32
  }
  func.func @transform_3(%arg0: i32, %arg1: i32) -> (i32, i32, i32, i32) {
    %c0_i32 = arith.constant 0 : i32
    %c0_i32_0 = arith.constant 0 : i32
    %c0_i32_1 = arith.constant 0 : i32
    return %arg1, %c0_i32, %c0_i32_0, %arg0 : i32, i32, i32, i32
  }
}

</mosaic_0001>

<bundles_post_ra>
// kernel: unet_up_apply.1
= control target key start
LH: loop header
LB: loop body
LE: loop exit
PB: predicated region body
PF: predicated region fallthrough
CT: control target
= control target key end

     0   :  { %s16373_s12 = smov 0   ;;  %s16375_s13 = smov 0   ;;  %s21357_s0 = inlined_call_operand.vmem [shape: bf16[2,342,4], index: 0, kind: input, shape index: {}]   ;;  %s21358_s1 = inlined_call_operand.vmem [shape: bf16[16,4,128], index: 1, kind: input, shape index: {}]   ;;  %s21359_s2 = inlined_call_operand.vmem [shape: f32[288,1], index: 2, kind: input, shape index: {}]   ;;  %s21360_s3 = inlined_call_operand.vmem [shape: bf16[2,4,288,128], index: 3, kind: output, shape index: {}]  }
   0x1   :  { %s16377_s14 = smov 0  }
   0x2 LB: > { %s22_s15 = sadd.s32 1, %s16346_s13  ;;  %p12334_p0 = scmp.ge.s32.totalorder %s16350_s14, 1  ;;  %s16350_s14 = sphi %s16377_s14, %s13_s14   ;;  %s16346_s13 = sphi %s16375_s13, %s22361_s13   ;;  %s16342_s12 = sphi %s16373_s12, %s22360_s12  }
   0x3   : > { %p23_p1 = scmp.ge.s32.totalorder %s22_s15, 2  ;;  %p160_p2 = scmp.lt.s32.totalorder %s16350_s14, 3 }
   0x5   : > { %s22363_s15 = smov (%p23_p1, %s22_s15), 0  ;;  %p161_p3 = pnand %p12334_p0, %p160_p2 }
   0x7   : > { %164 = sbr.rel (%p161_p3) target bundleno = 1004 (0x3ec), region = 32 }
   0xc   : > { %v281_v0 = vld [vmem:[%s21358_s1] sm:$0x3]  ;;  %vm427_vm0 = vcmask 1041408   ;;  %p191_p4 = scmp.lt.s32.totalorder %s16342_s12, 1  ;;  %v12373_v2 = vld [vmem:[%s21358_s1 + $0x2] sm:$0x3] }
   0xd   : > { %15978 = vmatprep.subr.msk.bf16.mxu0 %vm427_vm0, %v281_v0  ;;  %v429_v1 = vsel %vm427_vm0, %v281_v0, 0  ;;  %v12411_v3 = vld [vmem:[%s21358_s1 + $0x4] sm:$0x3]  ;;  %15979 = vmatprep.subr.msk.bf16.mxu1 %vm427_vm0, %v12373_v2  ;;  %v980_v4 = vsel %vm427_vm0, %v12373_v2, 0  ;;  %v12449_v5 = vld [vmem:[%s21358_s1 + $0x6] sm:$0x3] }
   0xe   : > { %15371 = vmatpush3.bf16.msra.mxu0 %v429_v1  ;;  %s22365_s12 = smov (!%p191_p4, %s16342_s12), 1  ;;  %15409 = vmatpush3.bf16.msra.mxu1 %v980_v4  ;;  %vm372_vm1 = vcmask 31744   ;;  %v16421_v7 = vld [vmem:[%s21358_s1 + $0x8] sm:$0x3]  ;;  %v1492_v9 = vsel %vm427_vm0, %v12411_v3, 0  ;;  %v2137_v18 = vsel %vm427_vm0, %v12449_v5, 0 }
   0xf   : > { %15980 = vmatprep.subr.msk.bf16.mxu0 %vm427_vm0, %v12411_v3  ;;  %s15994_s24 = smul.u32 172, %s22365_s12  ;;  %15981 = vmatprep.subr.msk.bf16.mxu1 %vm427_vm0, %v12449_v5  ;;  %vm776_vm2 = vsmask.f32 7424  ;;  %v16442_v31 = vld [vmem:[%s21358_s1 + $0xa] sm:$0x3]  ;;  %vm1399_vm3 = vcmask 1046528  }
  0x10   : > { %vm1911_vm4 = vsmask.f32 6400  ;;  %vm4813_vm5 = vcmask 1045504   ;;  %vm7292_vm6 = vsmask.f32 5376  ;;  %vm10037_vm7 = vcmask 1044480  }
  0x11   : > { %s16415_s27 = scalar_lea.vmem %s21357_s0, %s15994_s24 }
  0x12   : > { %v16023_v6 = vld [vmem:[%s16415_s27] sm:$0xff]   ;;  %v16024_v8 = vld [vmem:[%s16415_s27 + $0x8] sm:$0xff]   ;;  %v16027_v12 = vld [vmem:[%s16415_s27 + $0x10] sm:$0xff]  }
  0x13   : > { %15372 = vmatprep.mubr.msk.bf16.mxu0 %vm372_vm1, %v16023_v6  ;;  %v16025_v10 = vld [vmem:[%s16415_s27] sm:$0xff]   ;;  %v16026_v11 = vld [vmem:[%s16415_s27 + $0x8] sm:$0xff]   ;;  %v16028_v17 = vld [vmem:[%s16415_s27 + $0x10] sm:$0xff]  }
  0x14   : > { %15373 = vmatmul.mubr.msk.bf16.vlgmr.msra.gmra.mxu0 %vm372_vm1, %v16024_v8  ;;  %v778_v13 = vshrl.u32 %v16025_v10, 16  ;;  %v780_v14 = vshll.u32 %v16025_v10, 16  ;;  %v785_v15 = vshll.u32 %v16026_v11, 16  ;;  %v789_v16 = vshrl.u32 %v16026_v11, 16  ;;  %v16029_v21 = vld [vmem:[%s16415_s27 + $0x18] sm:$0xff]   ;;  %v16031_v28 = vld [vmem:[%s16415_s27 + $0x20] sm:$0xff]  }
  0x15   : > { %15447 = vmatpush3.bf16.msra.mxu0 %v1492_v9  ;;  %15376 = vmatprep.mubr.msk.bf16.mxu0 %vm372_vm1, %v16027_v12  ;;  %v16030_v22 = vld [vmem:[%s16415_s27 + $0x18] sm:$0xff]   ;;  %v793_v23 = vshll.u32 %v16028_v17, 16  ;;  %v797_v24 = vshrl.u32 %v16028_v17, 16  ;;  %v16032_v30 = vld [vmem:[%s16415_s27 + $0x20] sm:$0xff]   ;;  %v16034_v38 = vld [vmem:[%s16415_s27 + $0x28] sm:$0xff]   ;;  %v16352_v11 = vmov 0  }
  0x16   : > { %15982 = vmatprep.subr.msk.bf16.mxu0 %vm427_vm0, %v16421_v7  ;;  %v782_v19 = vrot.slane %v780_v14, 1  ;;  %v787_v20 = vrot.slane %v785_v15, 1  ;;  %v801_v27 = vshll.u32 %v16030_v22, 16  ;;  %v805_v34 = vshrl.u32 %v16030_v22, 16  ;;  %v16033_v43 = vld [vmem:[%s16415_s27 + $0x28] sm:$0xff]   ;;  %v16035_v45 = vld [vmem:[%s16415_s27 + $0x30] sm:$0xff]   ;;  %16021 = vset.pattern.permute.xlu0 %v16352_v11 }
  0x17   : > { %v795_v29 = vrot.slane %v793_v23, 1  ;;  %v809_v37 = vshll.u32 %v16032_v30, 16  ;;  %v813_v39 = vshrl.u32 %v16032_v30, 16  ;;  %v817_v44 = vshll.u32 %v16034_v38, 16  ;;  %v16036_v46 = vld [vmem:[%s16415_s27 + $0x30] sm:$0xff]   ;;  %v16038_v50 = vld [vmem:[%s16415_s27 + $0x38] sm:$0xff]   ;;  %16022 = vset.pattern.permute.xlu1 %v16352_v11 }
  0x18   : > { %v783_v25 = vor.u32 %v782_v19, %v778_v13  ;;  %v791_v26 = vor.u32 %v789_v16, %v787_v20  ;;  %v803_v33 = vrot.slane %v801_v27, 1  ;;  %v825_v49 = vshll.u32 %v16036_v46, 16  ;;  %v16040_v56 = vld [vmem:[%s16415_s27 + $0x40] sm:$0xff]   ;;  %v16042_v59 = vld [vmem:[%s16415_s27 + $0x48] sm:$0xff]   ;;  %v16037_v60 = vld [vmem:[%s16415_s27 + $0x38] sm:$0xff]  }
  0x19   : > { %v799_v36 = vor.u32 %v797_v24, %v795_v29  ;;  %v811_v42 = vrot.slane %v809_v37, 1  ;;  %v819_v48 = vrot.slane %v817_v44, 1  ;;  %v821_v52 = vshrl.u32 %v16034_v38, 16  ;;  %v16039_v63 = vld [vmem:[%s16415_s27 + $0x40] sm:$0xff]   ;;  %v16044_v8 = vld [vmem:[%s16415_s27 + $0x50] sm:$0xff]   ;;  %v16041_v10 = vld [vmem:[%s16415_s27 + $0x48] sm:$0xff]  }
  0x1a   : > { %v788_v32 = vsel %vm776_vm2, %v783_v25, %v787_v20  ;;  %v796_v35 = vsel %vm776_vm2, %v791_v26, %v795_v29  ;;  %v807_v41 = vor.u32 %v805_v34, %v803_v33  ;;  %v829_v54 = vshrl.u32 %v16036_v46, 16  ;;  %v16046_v14 = vld [vmem:[%s16415_s27 + $0x58] sm:$0xff]   ;;  %v16043_v15 = vld [vmem:[%s16415_s27 + $0x50] sm:$0xff]   ;;  %v16048_v22 = vld [vmem:[%s16415_s27 + $0x60] sm:$0xff]  }
  0x1b   : > { %15410 = vmatprep.mubr.msk.bf16.mxu1 %vm372_vm1, %v788_v32  ;;  %v804_v40 = vsel %vm776_vm2, %v799_v36, %v803_v33  ;;  %v815_v47 = vor.u32 %v813_v39, %v811_v42  ;;  %v833_v55 = vshll.u32 %v16038_v50, 16  ;;  %v827_v57 = vrot.slane %v825_v49, 1  ;;  %v16050_v24 = vld [vmem:[%s16415_s27 + $0x68] sm:$0xff]   ;;  %v16045_v26 = vld [vmem:[%s16415_s27 + $0x58] sm:$0xff]   ;;  %v16047_v29 = vld [vmem:[%s16415_s27 + $0x60] sm:$0xff]  }
  0x1c   : > { %15377 = vmatmul.mubr.msk.bf16.gmra.mxu0 %vm372_vm1, %v16029_v21  ;;  %15411 = vmatmul.mubr.msk.bf16.vlgmr.msra.gmra.mxu1 %vm372_vm1, %v796_v35  ;;  %v812_v51 = vsel %vm776_vm2, %v807_v41, %v811_v42  ;;  %v823_v58 = vor.u32 %v821_v52, %v819_v48  ;;  %v841_v0 = vshll.u32 %v16040_v56, 16  ;;  %v837_v2 = vshrl.u32 %v16038_v50, 16  ;;  %v16052_v38 = vld [vmem:[%s16415_s27 + $0x70] sm:$0xff]   ;;  %v16054_v42 = vld [vmem:[%s16415_s27 + $0x78] sm:$0xff]  }
  0x1d   : > { %15380 = vmatprep.mubr.msk.bf16.mxu0 %vm372_vm1, %v16031_v28  ;;  %15485 = vmatpush3.bf16.msra.mxu1 %v2137_v18  ;;  %v820_v53 = vsel %vm776_vm2, %v815_v47, %v819_v48  ;;  %v831_v61 = vor.u32 %v829_v54, %v827_v57  ;;  %v835_v62 = vrot.slane %v833_v55, 1  ;;  %v845_v3 = vshrl.u32 %v16040_v56, 16  ;;  %v16051_v44 = vld [vmem:[%s16415_s27 + $0x70] sm:$0xff]   ;;  %v16053_v54 = vld [vmem:[%s16415_s27 + $0x78] sm:$0xff]  }
  0x1e   : > { %15414 = vmatprep.mubr.msk.bf16.mxu1 %vm372_vm1, %v804_v40  ;;  %15983 = vmatprep.subr.msk.bf16.mxu1 %vm427_vm0, %v16442_v31  ;;  %v828_v1 = vsel %vm776_vm2, %v823_v58, %v827_v57  ;;  %v849_v4 = vshll.u32 %v16042_v59, 16  ;;  %v843_v6 = vrot.slane %v841_v0, 1  ;;  %v857_v16 = vshll.u32 %v16044_v8, 16  ;;  %v16049_v40 = vld [vmem:[%s16415_s27 + $0x68] sm:$0xff]   ;;  %v16055_v57 = vld [vmem:[%s16415_s27 + $0x80] sm:$0xff]   ;;  %v16064_v0 = vld [vmem:[%s16415_s27 + $0x10] sm:$0xff]  }
  0x1f   : > { %v836_v5 = vsel %vm776_vm2, %v831_v61, %v835_v62  ;;  %v839_v9 = vor.u32 %v837_v2, %v835_v62  ;;  %v853_v18 = vshrl.u32 %v16042_v59, 16  ;;  %v861_v20 = vshrl.u32 %v16044_v8, 16  ;;  %v16058_v59 = vld [vmem:[%s16415_s27 + $0x88] sm:$0xff]   ;;  %v16061_v61 = vld [vmem:[%s16415_s27 + $0x10] sm:$0xff]  }
  0x20   : > { %v847_v12 = vor.u32 %v845_v3, %v843_v6  ;;  %v851_v13 = vrot.slane %v849_v4, 1  ;;  %v865_v21 = vshll.u32 %v16046_v14, 16  ;;  %v859_v23 = vrot.slane %v857_v16, 1  ;;  %v16063_v2 = vld [vmem:[%s16415_s27 + $0x8] sm:$0xfe]  }
  0x21   : > { %v844_v17 = vsel %vm776_vm2, %v839_v9, %v843_v6  ;;  %v873_v30 = vshll.u32 %v16048_v22, 16  ;;  %v869_v33 = vshrl.u32 %v16046_v14, 16  ;;  %v881_v34 = vshll.u32 %v16050_v24, 16  ;;  %v16057_v8 = vld [vmem:[%s16415_s27 + $0x88] sm:$0xff]  }
  0x22   : > { %v852_v19 = vsel %vm776_vm2, %v847_v12, %v851_v13  ;;  %v855_v25 = vor.u32 %v853_v18, %v851_v13  ;;  %v863_v27 = vor.u32 %v861_v20, %v859_v23  ;;  %v867_v28 = vrot.slane %v865_v21, 1  ;;  %v16065_v20 = vld [vmem:[%s16415_s27 + $0x20] sm:$0xff]  }
  0x23   : > { %v877_v36 = vshrl.u32 %v16048_v22, 16  ;;  %v875_v37 = vrot.slane %v873_v30, 1  ;;  %v883_v41 = vrot.slane %v881_v34, 1  ;;  %v885_v47 = vshrl.u32 %v16050_v24, 16  ;;  %v16068_v30 = vld [vmem:[%s16415_s27 + $0x20] sm:$0xff]  }
  0x24   : > { %15381 = vmatmul.mubr.msk.bf16.gmra.mxu0 %vm372_vm1, %v16033_v43  ;;  %15415 = vmatmul.mubr.msk.bf16.gmra.mxu1 %vm372_vm1, %v812_v51  ;;  %v860_v32 = vsel %vm776_vm2, %v855_v25, %v859_v23  ;;  %v868_v35 = vsel %vm776_vm2, %v863_v27, %v867_v28  ;;  %v871_v39 = vor.u32 %v869_v33, %v867_v28  ;;  %v893_v48 = vshrl.u32 %v16052_v38, 16  ;;  %v16056_v51 = vld [vmem:[%s16415_s27 + $0x80] sm:$0xff]   ;;  %v16066_v23 = vld [vmem:[%s16415_s27 + $0x18] sm:$0xff]  }
  0x25   : > { %15384 = vmatprep.mubr.msk.bf16.mxu0 %vm372_vm1, %v16035_v45  ;;  %15418 = vmatprep.mubr.msk.bf16.mxu1 %vm372_vm1, %v820_v53  ;;  %v879_v43 = vor.u32 %v877_v36, %v875_v37  ;;  %v889_v45 = vshll.u32 %v16052_v38, 16  ;;  %v897_v49 = vshll.u32 %v16054_v42, 16  ;;  %v887_v53 = vor.u32 %v885_v47, %v883_v41 }
  0x26   : > { %v876_v46 = vsel %vm776_vm2, %v871_v39, %v875_v37  ;;  %v901_v58 = vshrl.u32 %v16054_v42, 16  ;;  %v909_v62 = vshrl.u32 %v16056_v51, 16  ;;  %v913_v4 = vshll.u32 %v16058_v59, 16 }
  0x27   : > { %v884_v50 = vsel %vm776_vm2, %v879_v43, %v883_v41  ;;  %v891_v52 = vrot.slane %v889_v45, 1  ;;  %v899_v56 = vrot.slane %v897_v49, 1  ;;  %v1921_v11 = vshrl.u32 %v16064_v0, 16  ;;  %v16069_v45 = vld [vmem:[%s16415_s27 + $0x30] sm:$0xff]  }
  0x28   : > { %v1913_v13 = vshrl.u32 %v16063_v2, 16  ;;  %v1924_v14 = vshll.u32 %v16064_v0, 16  ;;  %v915_v16 = vrot.slane %v913_v4, 1  ;;  %v917_v18 = vshrl.u32 %v16058_v59, 16  ;;  %v16073_v0 = vld [vmem:[%s16415_s27 + $0x40] sm:$0xff]  }
  0x29   : > { %v895_v55 = vor.u32 %v893_v48, %v891_v52  ;;  %v903_v12 = vor.u32 %v901_v58, %v899_v56  ;;  %v1405_v33 = vrot.slane %v16065_v20, 1  ;;  %v1930_v34 = vshrl.u32 %v16066_v23, 16  ;;  %v16070_v48 = vld [vmem:[%s16415_s27 + $0x28] sm:$0xff]  }
  0x2a   : > { %v1915_v25 = vrot.slane %v1913_v13, 1  ;;  %v1926_v27 = vrot.slane %v1924_v14, 2  ;;  %v1933_v37 = vshll.u32 %v16066_v23, 16  ;;  %v1942_v41 = vshll.u32 %v16068_v30, 16  ;;  %v16075_v20 = vld [vmem:[%s16415_s27 + $0x48] sm:$0xff]  }
  0x2b   : > { %v900_v3 = vsel %vm776_vm2, %v895_v55, %v899_v56  ;;  %v3311_v43 = vsel %vm427_vm0, %v16421_v7, 0  ;;  %v1932_v47 = vrot.slane %v1930_v34, 1  ;;  %v1409_v55 = vrot.slane %v16069_v45, 1  ;;  %v16078_v23 = vld [vmem:[%s16415_s27 + $0x48] sm:$0xff]   ;;  %v16079_v45 = vld [vmem:[%s16415_s27 + $0x58] sm:$0xff]  }
  0x2c   : > { %15385 = vmatmul.mubr.msk.bf16.gmra.mxu0 %vm372_vm1, %v16037_v60  ;;  %15419 = vmatmul.mubr.msk.bf16.gmra.mxu1 %vm372_vm1, %v828_v1  ;;  %v905_v60 = vshll.u32 %v16056_v51, 16  ;;  %v892_v1 = vsel %vm776_vm2, %v887_v53, %v891_v52  ;;  %v16072_v51 = vld [vmem:[%s16415_s27 + $0x30] sm:$0xff]   ;;  %v1948_v56 = vshrl.u32 %v16070_v48, 16  ;;  %v1951_v58 = vshll.u32 %v16070_v48, 16  ;;  %v16578_v34 = vld [vmem:[%s21358_s1 + $0xc] sm:$0x3] }
  0x2d   : > { %15388 = vmatprep.mubr.msk.bf16.mxu0 %vm372_vm1, %v16039_v63  ;;  %15422 = vmatprep.mubr.msk.bf16.mxu1 %vm372_vm1, %v836_v5  ;;  %v16060_v63 = vld [vmem:[%s16415_s27 + $0x8] sm:$0xfe]   ;;  %v16059_v5 = vld [vmem:[%s16415_s27 + $0x90] ss:$0 sps:$4 sm:$0x11]   ;;  %v1957_v59 = vshrl.u32 %v16072_v51, 16 }
  0x2e   : > { %v907_v6 = vrot.slane %v905_v60, 1  ;;  %v1400_v9 = vrot.slane %v16060_v63, 1  ;;  %v921_v21 = vshll.u32 %v16059_v5, 16  ;;  %v1960_v60 = vshll.u32 %v16072_v51, 16  ;;  %v16071_v63 = vld [vmem:[%s16415_s27 + $0x38] sm:$0xff]  }
  0x2f   : > { %v1953_v5 = vrot.slane %v1951_v58, 2  ;;  %v1413_v13 = vrot.slane %v16073_v0, 1  ;;  %v213_v58 = vld [vmem:[%s21359_s2 + $0x20] sm:$0xff] }
  0x30   : > { %v908_v24 = vsel %vm776_vm2, %v903_v12, %v907_v6  ;;  %v923_v36 = vrot.slane %v921_v21, 1  ;;  %v1411_v12 = vrot.slane %v16071_v63, 1  ;;  %v16563_v21 = vld [vmem:[%s16415_s27 + $0x50] sm:$0xff]  }
  0x34   : > { %15389 = vmatmul.mubr.msk.bf16.gmra.mxu0 %vm372_vm1, %v16041_v10  ;;  %15423 = vmatmul.mubr.msk.bf16.gmra.mxu1 %vm372_vm1, %v844_v17  ;;  %v1401_v10 = vrot.slane %v16061_v61, 1  ;;  %v1916_v17 = vshll.u32 %v16063_v2, 16  ;;  %v1950_v2 = vrot.slane %v1948_v56, 1  ;;  %v1419_v56 = vrot.slane %v16079_v45, 1 }
  0x35   : > { %15392 = vmatprep.mubr.msk.bf16.mxu0 %vm372_vm1, %v16043_v15  ;;  %15426 = vmatprep.mubr.msk.bf16.mxu1 %vm372_vm1, %v852_v19  ;;  %v911_v15 = vor.u32 %v909_v62, %v907_v6  ;;  %v16062_v19 = vld [vmem:[%s16415_s27 + $0x18] sm:$0xff]   ;;  %v16076_v6 = vld [vmem:[%s16415_s27 + $0x40] sm:$0xff]  }
  0x36   : > { %v1402_v22 = vsel %vm1399_vm3, %v1400_v9, %v1401_v10 }
  0x37   : > { %v916_v28 = vsel %vm776_vm2, %v911_v15, %v915_v16 }
  0x3c   : > { %15393 = vmatmul.mubr.msk.bf16.gmra.mxu0 %vm372_vm1, %v16045_v26  ;;  %15427 = vmatmul.mubr.msk.bf16.gmra.mxu1 %vm372_vm1, %v860_v32  ;;  %v1923_v26 = vrot.slane %v1921_v11, 1  ;;  %v1403_v32 = vrot.slane %v16062_v19, 1  ;;  %v1962_v11 = vrot.slane %v1960_v60, 2  ;;  %v1412_v19 = vsel %vm1399_vm3, %v1409_v55, %v1411_v12 }
  0x3d   : > { %15396 = vmatprep.mubr.msk.bf16.mxu0 %vm372_vm1, %v16047_v29  ;;  %15430 = vmatprep.mubr.msk.bf16.mxu1 %vm372_vm1, %v868_v35  ;;  %v1918_v29 = vrot.slane %v1916_v17, 2  ;;  %v919_v35 = vor.u32 %v917_v18, %v915_v16  ;;  %v1975_v16 = vshrl.u32 %v16076_v6, 16  ;;  %v1978_v18 = vshll.u32 %v16076_v6, 16  ;;  %v16628_v6 = vld [vmem:[%s16415_s27 + $0x70] sm:$0xff]  }
  0x3e   : > { %v1927_v39 = vor.u32 %v1926_v27, %v1923_v26  ;;  %v1404_v42 = vsel %vm1399_vm3, %v1401_v10, %v1403_v32  ;;  %v1959_v10 = vrot.slane %v1957_v59, 1 }
  0x3f   : > { %v1919_v38 = vor.u32 %v1918_v29, %v1915_v25  ;;  %v924_v49 = vsel %vm776_vm2, %v919_v35, %v923_v36  ;;  %v1977_v27 = vrot.slane %v1975_v16, 1  ;;  %v1980_v29 = vrot.slane %v1978_v18, 2  ;;  %v217_v18 = vld [vmem:[%s21359_s2 + $0x40] sm:$0xff] }
  0x40   : > { %v1963_v17 = vor.u32 %v1962_v11, %v1959_v10  ;;  %v1417_v35 = vrot.slane %v16563_v21, 1  ;;  %v1984_v36 = vshrl.u32 %v16078_v23, 16 }
  0x41   : > { %v1928_v52 = vsel %vm1911_vm4, %v1919_v38, %v1927_v39 }
  0x44   : > { %15397 = vmatmul.mubr.msk.bf16.gmra.mxu0 %vm372_vm1, %v16049_v40  ;;  %15431 = vmatmul.mubr.msk.bf16.gmra.mxu1 %vm372_vm1, %v876_v46  ;;  %v1939_v40 = vshrl.u32 %v16068_v30, 16  ;;  %v1406_v46 = vsel %vm1399_vm3, %v1403_v32, %v1405_v33  ;;  %v16080_v30 = vld [vmem:[%s16415_s27 + $0x50] sm:$0xff]   ;;  %v1415_v32 = vrot.slane %v16075_v20, 1 }
  0x45   : > { %15400 = vmatprep.mubr.msk.bf16.mxu0 %vm372_vm1, %v16051_v44  ;;  %15434 = vmatprep.mubr.msk.bf16.mxu1 %vm372_vm1, %v884_v50  ;;  %v16067_v44 = vld [vmem:[%s16415_s27 + $0x28] sm:$0xff]   ;;  %v1935_v50 = vrot.slane %v1933_v37, 2  ;;  %v211_v37 = vld [vmem:[%s21359_s2 + $0x10] sm:$0xff] }
  0x46   : > { %v1941_v53 = vrot.slane %v1939_v40, 1  ;;  %v1407_v7 = vrot.slane %v16067_v44, 1  ;;  %v210_v40 = vld [vmem:[%s21359_s2 + $0x8] sm:$0xff]  ;;  %2472 = vperm.xlu1 %16022, %v211_v37   ;;  %v1416_v44 = vsel %vm1399_vm3, %v1413_v13, %v1415_v32  ;;  %v1418_v48 = vsel %vm1399_vm3, %v1415_v32, %v1417_v35 }
  0x48   : > { %v1408_v62 = vsel %vm1399_vm3, %v1405_v33, %v1407_v7  ;;  %v209_v33 = vld [vmem:[%s21359_s2] sm:$0xff] }
  0x49   : > { %2462 = vperm.xlu0 %16021, %v209_v33  }
  0x4c   : > { %15401 = vmatmul.mubr.msk.bf16.gmra.mxu0 %vm372_vm1, %v16053_v54  ;;  %15435 = vmatmul.mubr.msk.bf16.gmra.mxu1 %vm372_vm1, %v892_v1  ;;  %v1944_v54 = vrot.slane %v1942_v41, 2  ;;  %v1410_v1 = vsel %vm1399_vm3, %v1407_v7, %v1409_v55  ;;  %v1981_v41 = vor.u32 %v1980_v29, %v1977_v27  ;;  %v219_v27 = vld [vmem:[%s21359_s2 + $0x50] sm:$0xff]  ;;  %v16087_v29 = vld [vmem:[%s16415_s27 + $0x78] sm:$0xff]  }
  0x4d   : > { %15404 = vmatprep.mubr.msk.bf16.mxu0 %vm372_vm1, %v16055_v57  ;;  %15438 = vmatprep.mubr.msk.bf16.mxu1 %vm372_vm1, %v900_v3  ;;  %v1936_v57 = vor.u32 %v1935_v50, %v1932_v47  ;;  %v16074_v3 = vld [vmem:[%s16415_s27 + $0x38] sm:$0xff]   ;;  %v16599_v47 = vld [vmem:[%s21358_s1 + $0xe] sm:$0x3] }
  0x4e   : > { %v1945_v61 = vor.u32 %v1944_v54, %v1941_v53  ;;  %v1966_v14 = vshrl.u32 %v16074_v3, 16  ;;  %v1969_v15 = vshll.u32 %v16074_v3, 16  ;;  %v16082_v50 = vld [vmem:[%s16415_s27 + $0x58] sm:$0xff]   ;;  %2467 = vperm.xlu0 %16021, %v210_v40   ;;  %v16084_v53 = vld [vmem:[%s16415_s27 + $0x60] sm:$0xff]  }
  0x4f   : > { %v1937_v4 = vsel %vm1911_vm4, %v1927_v39, %v1936_v57  ;;  %v1987_v39 = vshll.u32 %v16078_v23, 16  ;;  %v2002_v60 = vshrl.u32 %v16082_v50, 16  ;;  %v2011_v0 = vshrl.u32 %v16084_v53, 16  ;;  %v220_v40 = vld [vmem:[%s21359_s2 + $0x58] sm:$0xff] }
  0x50   : > { %v1946_v9 = vsel %vm1911_vm4, %v1936_v57, %v1945_v61  ;;  %v1968_v25 = vrot.slane %v1966_v14, 1  ;;  %v1971_v26 = vrot.slane %v1969_v15, 2  ;;  %v212_v57 = vld [vmem:[%s21359_s2 + $0x18] sm:$0xff]  ;;  %v2014_v3 = vshll.u32 %v16084_v53, 16  ;;  %v16094_v53 = vld [vmem:[%s16415_s27 + $0x88] sm:$0xff]  }
  0x51   : > { %2477 = vperm.xlu1 %16022, %v212_v57   ;;  %v2004_v11 = vrot.slane %v2002_v60, 1  ;;  %v216_v14 = vld [vmem:[%s21359_s2 + $0x38] sm:$0xff]  ;;  %v2013_v16 = vrot.slane %v2011_v0, 1  ;;  %v16098_v60 = vld [vmem:[%s16415_s27] sm:$0xff]  }
  0x52   : > { %v1972_v38 = vor.u32 %v1971_v26, %v1968_v25  ;;  %2482 = vperm.xlu0 %16021, %v213_v58   ;;  %v16096_v58 = vld [vmem:[%s16415_s27 + $0x90] sm:$0xff]   ;;  %v224_v0 = vld [vmem:[%s21359_s2 + $0x78] sm:$0xff] }
  0x54   : > { %15405 = vmatmul.mubr.msk.bf16.gmra.mxu0 %vm372_vm1, %v16057_v8  ;;  %15439 = vmatmul.mubr.msk.bf16.gmra.mxu1 %vm372_vm1, %v908_v24  ;;  %v3750_v8 = vsel %vm427_vm0, %v16442_v31, 0  ;;  %v1954_v31 = vor.u32 %v1953_v5, %v1950_v2  ;;  %v1973_v51 = vsel %vm1911_vm4, %v1963_v17, %v1972_v38  ;;  %v1982_v54 = vsel %vm1911_vm4, %v1972_v38, %v1981_v41 }
  0x55   : > { %15448 = vmatprep.mubr.msk.bf16.mxu0 %vm372_vm1, %v1402_v22  ;;  %15442 = vmatprep.mubr.msk.bf16.mxu1 %vm372_vm1, %v916_v28  ;;  %v1414_v22 = vsel %vm1399_vm3, %v1411_v12, %v1413_v13  ;;  %v1420_v5 = vsel %vm1399_vm3, %v1417_v35, %v1419_v56  ;;  %v16088_v13 = vld [vmem:[%s16415_s27 + $0x70] sm:$0xff]   ;;  %v16090_v35 = vld [vmem:[%s16415_s27 + $0x78] sm:$0xff]  }
  0x56   : > { %v1955_v24 = vsel %vm1911_vm4, %v1945_v61, %v1954_v31  ;;  %v1964_v28 = vsel %vm1911_vm4, %v1954_v31, %v1963_v17  ;;  %v2005_v61 = vshll.u32 %v16082_v50, 16  ;;  %v2016_v17 = vrot.slane %v2014_v3, 2 }
  0x57   : > { %v2029_v23 = vshrl.u32 %v16088_v13, 16  ;;  %v2032_v26 = vshll.u32 %v16088_v13, 16  ;;  %v3111_v13 = vshll.u32 %v16098_v60, 16 }
  0x58   : > { %v2007_v12 = vrot.slane %v2005_v61, 2  ;;  %v2017_v25 = vor.u32 %v2016_v17, %v2013_v16  ;;  %v227_v17 = vld [vmem:[%s21359_s2 + $0x90] sm:$0xff] }
  0x59   : > { %v2031_v38 = vrot.slane %v2029_v23, 1 }
  0x5c   : > { %15449 = vmatmul.mubr.msk.bf16.vlgmr.msra.gmra.mxu0 %vm372_vm1, %v1404_v42  ;;  %15443 = vmatmul.mubr.msk.bf16.gmra.mxu1 %vm372_vm1, %v924_v49  ;;  %v1993_v42 = vshrl.u32 %v16080_v30, 16  ;;  %v1986_v49 = vrot.slane %v1984_v36, 1 }
  0x5d   : > { %15523 = vmatpush3.bf16.msra.mxu0 %v3311_v43  ;;  %15452 = vmatprep.mubr.msk.bf16.mxu0 %vm372_vm1, %v1406_v46  ;;  %v1996_v43 = vshll.u32 %v16080_v30, 16  ;;  %v16594_v46 = vld [vmem:[%s16415_s27 + $0x60] sm:$0xff]  }
  0x5e   : > { %15486 = vmatprep.mubr.msk.bf16.mxu1 %vm372_vm1, %v1928_v52  ;;  %15984 = vmatprep.subr.msk.bf16.mxu0 %vm427_vm0, %v16578_v34  ;;  %v1989_v52 = vrot.slane %v1987_v39, 2  ;;  %v1995_v7 = vrot.slane %v1993_v42, 1  ;;  %v1421_v59 = vrot.slane %v16594_v46, 1  ;;  %v16655_v30 = vld [vmem:[%s16415_s27 + $0x80] sm:$0xff]   ;;  %v2034_v42 = vrot.slane %v2032_v26, 2 }
  0x5f   : > { %v1998_v55 = vrot.slane %v1996_v43, 2  ;;  %v16092_v39 = vld [vmem:[%s16415_s27 + $0x80] sm:$0xff]   ;;  %v1429_v45 = vrot.slane %v16655_v30, 1  ;;  %v2038_v46 = vshrl.u32 %v16090_v35, 16  ;;  %v228_v30 = vld [vmem:[%s21359_s2 + $0x98] sm:$0xff] }
  0x60   : > { %v1990_v63 = vor.u32 %v1989_v52, %v1986_v49  ;;  %v221_v43 = vld [vmem:[%s21359_s2 + $0x60] sm:$0xff]  ;;  %v16091_v49 = vld [vmem:[%s16415_s27 + $0x88] sm:$0xff]   ;;  %v16675_v52 = vld [vmem:[%s16415_s27 + $0x90] sm:$0xff]  }
  0x61   : > { %v1999_v2 = vor.u32 %v1998_v55, %v1995_v7  ;;  %v2035_v7 = vor.u32 %v2034_v42, %v2031_v38  ;;  %v2050_v55 = vshll.u32 %v16092_v39, 16  ;;  %v230_v42 = vld [vmem:[%s21359_s2 + $0xa8] sm:$0xff] }
  0x62   : > { %v1991_v10 = vsel %vm1911_vm4, %v1981_v41, %v1990_v63 }
  0x63   : > { %v2000_v31 = vsel %vm1911_vm4, %v1990_v63, %v1999_v2 }
  0x64   : > { %15453 = vmatmul.mubr.msk.bf16.gmra.mxu0 %vm372_vm1, %v1408_v62  ;;  %15487 = vmatmul.mubr.msk.bf16.vlgmr.msra.gmra.mxu1 %vm372_vm1, %v1937_v4  ;;  %v16083_v62 = vld [vmem:[%s16415_s27 + $0x68] sm:$0xff]   ;;  %v215_v4 = vld [vmem:[%s21359_s2 + $0x30] sm:$0xff] }
  0x65   : > { %15456 = vmatprep.mubr.msk.bf16.mxu0 %vm372_vm1, %v1410_v1  ;;  %15561 = vmatpush3.bf16.msra.mxu1 %v3750_v8  ;;  %v214_v1 = vld [vmem:[%s21359_s2 + $0x28] sm:$0xff]  ;;  %v1422_v8 = vsel %vm1399_vm3, %v1419_v56, %v1421_v59  ;;  %v1423_v15 = vrot.slane %v16083_v62, 1  ;;  %v223_v56 = vld [vmem:[%s21359_s2 + $0x70] sm:$0xff]  ;;  %v2040_v62 = vrot.slane %v2038_v46, 1 }
  0x66   : > { %15490 = vmatprep.mubr.msk.bf16.mxu1 %vm372_vm1, %v1946_v9  ;;  %15985 = vmatprep.subr.msk.bf16.mxu1 %vm427_vm0, %v16599_v47  ;;  %v16086_v9 = vld [vmem:[%s16415_s27 + $0x68] sm:$0xff]  }
  0x67   : > { %2487 = vperm.xlu1 %16022, %v214_v1   ;;  %2492 = vperm.xlu0 %16021, %v215_v4   ;;  %v2020_v20 = vshrl.u32 %v16086_v9, 16  ;;  %v2023_v21 = vshll.u32 %v16086_v9, 16  ;;  %v2052_v4 = vrot.slane %v2050_v55, 2  ;;  %v2059_v9 = vshll.u32 %v16094_v53, 16 }
  0x69   : > { %v2022_v33 = vrot.slane %v2020_v20, 1  ;;  %v2025_v37 = vrot.slane %v2023_v21, 2  ;;  %v2061_v20 = vrot.slane %v2059_v9, 2  ;;  %v16095_v21 = vld [vmem:[%s16415_s27 + $0x98] ss:$0 sps:$4 sm:$0x11]  }
  0x6a   : > { %v4394_v9 = vsel %vm427_vm0, %v16578_v34, 0  ;;  %v236_v34 = vld [vmem:[%s21359_s2 + $0xd8] sm:$0xff] }
  0x6b   : > { %2497 = vperm.xlu1 %16022, %v216_v14   ;;  %2502 = vperm.xlu0 %16021, %v217_v18   ;;  %v2026_v50 = vor.u32 %v2025_v37, %v2022_v33 }
  0x6c   : > { %15457 = vmatmul.mubr.msk.bf16.gmra.mxu0 %vm372_vm1, %v1412_v19  ;;  %15491 = vmatmul.mubr.msk.bf16.gmra.mxu1 %vm372_vm1, %v1955_v24  ;;  %v1425_v19 = vrot.slane %v16628_v6, 1  ;;  %v218_v24 = vld [vmem:[%s21359_s2 + $0x48] sm:$0xff]  ;;  %v1433_v6 = vrot.slane %v16675_v52, 1  ;;  %v16101_v52 = vld [vmem:[%s16415_s27] sm:$0xfe]  }
  0x6d   : > { %15460 = vmatprep.mubr.msk.bf16.mxu0 %vm372_vm1, %v1414_v22  ;;  %15494 = vmatprep.mubr.msk.bf16.mxu1 %vm372_vm1, %v1964_v28  ;;  %v2008_v22 = vor.u32 %v2007_v12, %v2004_v11  ;;  %v1424_v28 = vsel %vm1399_vm3, %v1421_v59, %v1423_v15  ;;  %v2027_v61 = vsel %vm1911_vm4, %v2017_v25, %v2026_v50  ;;  %v16097_v11 = vld [vmem:[%s16415_s27 + $0x98] ss:$0 sps:$4 sm:$0x33]   ;;  %v16702_v12 = vld [vmem:[%s16415_s27 + $0x8] sm:$0xff]  }
  0x6e   : > { %v1426_v32 = vsel %vm1399_vm3, %v1423_v15, %v1425_v19  ;;  %v2036_v1 = vsel %vm1911_vm4, %v2026_v50, %v2035_v7  ;;  %v226_v15 = vld [vmem:[%s21359_s2 + $0x88] sm:$0xff]  ;;  %v3116_v26 = vshll.u32 %v16702_v12, 16  ;;  %v2074_v33 = vshrl.u32 %v16097_v11, 16 }
  0x6f   : > { %2507 = vperm.xlu1 %16022, %v218_v24   ;;  %v2009_v36 = vsel %vm1911_vm4, %v1999_v2, %v2008_v22  ;;  %2512 = vperm.xlu0 %16021, %v219_v27   ;;  %v2018_v41 = vsel %vm1911_vm4, %v2008_v22, %v2017_v25  ;;  %v1431_v2 = vrot.slane %v16091_v49, 1  ;;  %v3109_v24 = vshrl.u32 %v16098_v60, 16  ;;  %v16100_v27 = vld [vmem:[%s16415_s27 + $0x10] sm:$0xff]   ;;  %v16740_v50 = vld [vmem:[%s16415_s27 + $0x8] sm:$0xff]   ;;  %v233_v60 = vld [vmem:[%s21359_s2 + $0xc0] sm:$0xff] }
  0x70   : > { %v3113_v25 = vrot.slane %v3111_v13, 1  ;;  %v3118_v38 = vrot.slane %v3116_v26, 1  ;;  %v3124_v46 = vshll.u32 %v16100_v27, 16  ;;  %v16775_v13 = vld [vmem:[%s16415_s27 + $0x18] sm:$0xff]  }
  0x71   : > { %v1432_v18 = vsel %vm1399_vm3, %v1429_v45, %v1431_v2  ;;  %v1434_v23 = vsel %vm1399_vm3, %v1431_v2, %v1433_v6  ;;  %v3658_v2 = vrot.slane %v16101_v52, 1  ;;  %v3663_v26 = vrot.slane %v16775_v13, 1  ;;  %v242_v52 = vld [vmem:[%s21359_s2 + $0x108] sm:$0xff] }
  0x72   : > { %v3114_v37 = vor.u32 %v3113_v25, %v3109_v24  ;;  %v16111_v24 = vld [vmem:[%s16415_s27 + $0x38] sm:$0xff]  }
  0x73   : > { %2517 = vperm.xlu1 %16022, %v220_v40   ;;  %2522 = vperm.xlu0 %16021, %v221_v43  }
  0x74   : > { %15461 = vmatmul.mubr.msk.bf16.gmra.mxu0 %vm372_vm1, %v1416_v44  ;;  %15495 = vmatmul.mubr.msk.bf16.gmra.mxu1 %vm372_vm1, %v1973_v51  ;;  %v1427_v44 = vrot.slane %v16087_v29, 1  ;;  %v2047_v51 = vshrl.u32 %v16092_v39, 16  ;;  %v16728_v39 = vld [vmem:[%s16415_s27 + $0x18] sm:$0xff]  }
  0x75   : > { %15464 = vmatprep.mubr.msk.bf16.mxu0 %vm372_vm1, %v1418_v48  ;;  %15498 = vmatprep.mubr.msk.bf16.mxu1 %vm372_vm1, %v1982_v54  ;;  %v2041_v48 = vshll.u32 %v16090_v35, 16  ;;  %v222_v54 = vld [vmem:[%s21359_s2 + $0x68] sm:$0xff]  ;;  %v229_v35 = vld [vmem:[%s21359_s2 + $0xa0] sm:$0xff] }
  0x76   : > { %v1428_v57 = vsel %vm1399_vm3, %v1425_v19, %v1427_v44  ;;  %v1430_v59 = vsel %vm1399_vm3, %v1427_v44, %v1429_v45  ;;  %v2049_v3 = vrot.slane %v2047_v51, 1  ;;  %v2076_v44 = vrot.slane %v2074_v33, 1 }
  0x77   : > { %2527 = vperm.xlu1 %16022, %v222_v54   ;;  %v2043_v63 = vrot.slane %v2041_v48, 2  ;;  %2532 = vperm.xlu0 %16021, %v223_v56   ;;  %v3120_v45 = vshrl.u32 %v16702_v12, 16  ;;  %v231_v48 = vld [vmem:[%s21359_s2 + $0xb0] sm:$0xff]  ;;  %v3119_v51 = vsel %vm776_vm2, %v3114_v37, %v3118_v38  ;;  %v3132_v54 = vshll.u32 %v16728_v39, 16  ;;  %v232_v56 = vld [vmem:[%s21359_s2 + $0xb8] sm:$0xff] }
  0x78   : > { %v2053_v16 = vor.u32 %v2052_v4, %v2049_v3  ;;  %v3659_v3 = vrot.slane %v16740_v50, 1  ;;  %v234_v4 = vld [vmem:[%s21359_s2 + $0xc8] sm:$0xff]  ;;  %v16104_v12 = vld [vmem:[%s16415_s27 + $0x10] sm:$0xff]  }
  0x79   : > { %v2044_v14 = vor.u32 %v2043_v63, %v2040_v62  ;;  %v3134_v63 = vrot.slane %v3132_v54, 1  ;;  %v3661_v25 = vrot.slane %v16104_v12, 1  ;;  %v16115_v50 = vld [vmem:[%s16415_s27 + $0x48] sm:$0xff]  }
  0x7a   : > { %v3184_v12 = vshrl.u32 %v16115_v50, 16 }
  0x7b   : > { %2537 = vperm.xlu1 %16022, %v224_v0   ;;  %v16758_v0 = vld [vmem:[%s16415_s27 + $0x28] sm:$0xff]  }
  0x7c   : > { %15465 = vmatmul.mubr.msk.bf16.gmra.mxu0 %vm372_vm1, %v1420_v5  ;;  %15499 = vmatmul.mubr.msk.bf16.gmra.mxu1 %vm372_vm1, %v1991_v10  ;;  %v225_v5 = vld [vmem:[%s21359_s2 + $0x80] sm:$0xff]  ;;  %v2065_v10 = vshrl.u32 %v16096_v58, 16  ;;  %v3152_v33 = vshrl.u32 %v16758_v0, 16 }
  0x7d   : > { %15468 = vmatprep.mubr.msk.bf16.mxu0 %vm372_vm1, %v1422_v8  ;;  %15502 = vmatprep.mubr.msk.bf16.mxu1 %vm372_vm1, %v2000_v31  ;;  %v2056_v8 = vshrl.u32 %v16094_v53, 16  ;;  %v2068_v31 = vshll.u32 %v16096_v58, 16  ;;  %v3128_v53 = vshrl.u32 %v16100_v27, 16  ;;  %v3126_v58 = vrot.slane %v3124_v46, 1 }
  0x7e   : > { %2542 = vperm.xlu0 %16021, %v225_v5   ;;  %v2067_v22 = vrot.slane %v2065_v10, 1  ;;  %v3136_v10 = vshrl.u32 %v16728_v39, 16  ;;  %v3662_v39 = vsel %vm1399_vm3, %v3659_v3, %v3661_v25 }
  0x7f   : > { %v2058_v19 = vrot.slane %v2056_v8, 1  ;;  %2547 = vperm.xlu1 %16022, %v226_v15   ;;  %v2070_v29 = vrot.slane %v2068_v31, 2  ;;  %v3130_v62 = vor.u32 %v3128_v53, %v3126_v58  ;;  %v3148_v31 = vshll.u32 %v16758_v0, 16 }
  0x81   : > { %v2062_v40 = vor.u32 %v2061_v20, %v2058_v19  ;;  %v2071_v43 = vor.u32 %v2070_v29, %v2067_v22  ;;  %v237_v19 = vld [vmem:[%s21359_s2 + $0xe0] sm:$0xff]  ;;  %v3138_v20 = vor.u32 %v3136_v10, %v3134_v63  ;;  %v239_v29 = vld [vmem:[%s21359_s2 + $0xf0] sm:$0xff] }
  0x82   : > { %2552 = vperm.xlu0 %16021, %v227_v17   ;;  %v3660_v17 = vsel %vm1399_vm3, %v3658_v2, %v3659_v3  ;;  %v16117_v2 = vld [vmem:[%s16415_s27 + $0x50] sm:$0xff]  }
  0x83   : > { %2557 = vperm.xlu1 %16022, %v228_v30   ;;  %v3188_v10 = vshll.u32 %v16117_v2, 16 }
  0x84   : > { %15469 = vmatmul.mubr.msk.bf16.gmra.mxu0 %vm372_vm1, %v1424_v28  ;;  %15503 = vmatmul.mubr.msk.bf16.gmra.mxu1 %vm372_vm1, %v2009_v36  ;;  %v2045_v28 = vsel %vm1911_vm4, %v2035_v7, %v2044_v14  ;;  %v1435_v36 = vrot.slane %v16095_v21, 1  ;;  %v2063_v7 = vsel %vm1911_vm4, %v2053_v16, %v2062_v40  ;;  %v16792_v21 = vld [vmem:[%s21358_s1 + $0x10] sm:$0x3] }
  0x85   : > { %15472 = vmatprep.mubr.msk.bf16.mxu0 %vm372_vm1, %v1426_v32  ;;  %15506 = vmatprep.mubr.msk.bf16.mxu1 %vm372_vm1, %v2018_v41  ;;  %v2054_v32 = vsel %vm1911_vm4, %v2044_v14, %v2053_v16  ;;  %v2077_v41 = vshll.u32 %v16097_v11, 16  ;;  %v3135_v11 = vsel %vm776_vm2, %v3130_v62, %v3134_v63  ;;  %v16109_v16 = vld [vmem:[%s16415_s27 + $0x30] sm:$0xff]   ;;  %v244_v62 = vld [vmem:[%s21359_s2 + $0x118] sm:$0xff] }
  0x86   : > { %2562 = vperm.xlu0 %16021, %v229_v35   ;;  %v1436_v49 = vsel %vm1399_vm3, %v1433_v6, %v1435_v36  ;;  %v235_v6 = vld [vmem:[%s21359_s2 + $0xd0] sm:$0xff]  ;;  %v3156_v27 = vshll.u32 %v16109_v16, 16  ;;  %v16811_v36 = vld [vmem:[%s16415_s27 + $0x28] sm:$0xff]   ;;  %v3160_v37 = vshrl.u32 %v16109_v16, 16  ;;  %v16116_v16 = vld [vmem:[%s16415_s27 + $0x40] sm:$0xff]  }
  0x87   : > { %2567 = vperm.xlu1 %16022, %v230_v42   ;;  %v2079_v55 = vrot.slane %v2077_v41, 2  ;;  %v16113_v41 = vld [vmem:[%s16415_s27 + $0x40] sm:$0xff]   ;;  %v240_v42 = vld [vmem:[%s21359_s2 + $0xf8] sm:$0xff]  ;;  %v3667_v53 = vrot.slane %v16811_v36, 1 }
  0x88   : > { %v3172_v54 = vshll.u32 %v16113_v41, 16 }
  0x8a   : > { %2572 = vperm.xlu0 %16021, %v231_v48   ;;  %v3174_v0 = vrot.slane %v3172_v54, 1  ;;  %v16899_v54 = vld [vmem:[%s16415_s27 + $0x70] sm:$0xff]  }
  0x8b   : > { %2577 = vperm.xlu1 %16022, %v232_v56   ;;  %v243_v56 = vld [vmem:[%s21359_s2 + $0x110] sm:$0xff] }
  0x8c   : > { %15473 = vmatmul.mubr.msk.bf16.gmra.mxu0 %vm372_vm1, %v1428_v57  ;;  %15507 = vmatmul.mubr.msk.bf16.gmra.mxu1 %vm372_vm1, %v2027_v61  ;;  %v2072_v57 = vsel %vm1911_vm4, %v2062_v40, %v2071_v43  ;;  %v3122_v61 = vor.u32 %v3120_v45, %v3118_v38  ;;  %v3164_v38 = vshll.u32 %v16111_v24, 16  ;;  %v4906_v40 = vsel %vm427_vm0, %v16599_v47, 0  ;;  %v241_v45 = vld [vmem:[%s21359_s2 + $0x100] sm:$0xff]  ;;  %v16829_v47 = vld [vmem:[%s21358_s1 + $0x12] sm:$0x3] }
  0x8d   : > { %15476 = vmatprep.mubr.msk.bf16.mxu0 %vm372_vm1, %v1430_v59  ;;  %15510 = vmatprep.mubr.msk.bf16.mxu1 %vm372_vm1, %v2036_v1  ;;  %v16105_v59 = vld [vmem:[%s16415_s27 + $0x20] sm:$0xff]   ;;  %v2080_v1 = vor.u32 %v2079_v55, %v2076_v44  ;;  %v3158_v44 = vrot.slane %v3156_v27, 1  ;;  %v3168_v55 = vshrl.u32 %v16111_v24, 16  ;;  %v16123_v24 = vld [vmem:[%s16415_s27 + $0x68] sm:$0xff]   ;;  %v16120_v27 = vld [vmem:[%s16415_s27 + $0x50] sm:$0xff]  }
  0x8e   : > { %2582 = vperm.xlu0 %16021, %v233_v60   ;;  %v3140_v5 = vshll.u32 %v16105_v59, 16  ;;  %v3127_v8 = vsel %vm776_vm2, %v3122_v61, %v3126_v58  ;;  %v3144_v14 = vshrl.u32 %v16105_v59, 16  ;;  %v16112_v58 = vld [vmem:[%s16415_s27 + $0x30] sm:$0xff]   ;;  %v3176_v59 = vshrl.u32 %v16113_v41, 16 }
  0x8f   : > { %2587 = vperm.xlu1 %16022, %v234_v4   ;;  %v2081_v15 = vsel %vm1911_vm4, %v2071_v43, %v2080_v1  ;;  %v3664_v43 = vsel %vm1399_vm3, %v3661_v25, %v3663_v26  ;;  %v3162_v48 = vor.u32 %v3160_v37, %v3158_v44  ;;  %v3180_v60 = vshll.u32 %v16115_v50, 16  ;;  %v16114_v1 = vld [vmem:[%s16415_s27 + $0x38] sm:$0xff]  }
  0x90   : > { %v3178_v4 = vor.u32 %v3176_v59, %v3174_v0  ;;  %v3673_v25 = vrot.slane %v16116_v16, 1  ;;  %v3212_v37 = vshll.u32 %v16123_v24, 16  ;;  %v16907_v59 = vld [vmem:[%s16415_s27 + $0x88] sm:$0xff]  }
  0x91   : > { %v16930_v16 = vld [vmem:[%s16415_s27 + $0x88] sm:$0xff]  }
  0x92   : > { %2592 = vperm.xlu0 %16021, %v235_v6   ;;  %v16119_v6 = vld [vmem:[%s16415_s27 + $0x58] sm:$0xff]  }
  0x93   : > { %2597 = vperm.xlu1 %16022, %v236_v34   ;;  %v16118_v34 = vld [vmem:[%s16415_s27 + $0x48] sm:$0xff]  }
  0x94   : > { %15477 = vmatmul.mubr.msk.bf16.gmra.mxu0 %vm372_vm1, %v1432_v18  ;;  %15511 = vmatmul.mubr.msk.bf16.gmra.mxu1 %vm372_vm1, %v2045_v28  ;;  %v3142_v18 = vrot.slane %v3140_v5, 1  ;;  %v238_v28 = vld [vmem:[%s21359_s2 + $0xe8] sm:$0xff]  ;;  %v3182_v5 = vrot.slane %v3180_v60, 1  ;;  %v16133_v60 = vld [vmem:[%s16415_s27 + $0x90] ss:$0 sps:$4 sm:$0x11]  }
  0x95   : > { %15480 = vmatprep.mubr.msk.bf16.mxu0 %vm372_vm1, %v1434_v23  ;;  %15514 = vmatprep.mubr.msk.bf16.mxu1 %vm372_vm1, %v2054_v32  ;;  %v3150_v23 = vrot.slane %v3148_v31, 1  ;;  %v16108_v32 = vld [vmem:[%s16415_s27 + $0x20] sm:$0xff]   ;;  %v3196_v31 = vshll.u32 %v16119_v6, 16 }
  0x96   : > { %v3146_v22 = vor.u32 %v3144_v14, %v3142_v18  ;;  %2602 = vperm.xlu0 %16021, %v237_v19   ;;  %v3143_v30 = vsel %vm776_vm2, %v3138_v20, %v3142_v18  ;;  %v3183_v13 = vsel %vm776_vm2, %v3178_v4, %v3182_v5  ;;  %v3192_v14 = vshrl.u32 %v16117_v2, 16  ;;  %v16121_v19 = vld [vmem:[%s16415_s27 + $0x60] sm:$0xff]  }
  0x97   : > { %2607 = vperm.xlu1 %16022, %v238_v28   ;;  %v3154_v46 = vor.u32 %v3152_v33, %v3150_v23  ;;  %v3190_v18 = vrot.slane %v3188_v10, 1  ;;  %v3186_v20 = vor.u32 %v3184_v12, %v3182_v5  ;;  %v3204_v28 = vshll.u32 %v16121_v19, 16  ;;  %v16137_v10 = vld [vmem:[%s16415_s27 + $0x10] sm:$0xff]  }
  0x98   : > { %v3151_v35 = vsel %vm776_vm2, %v3146_v22, %v3150_v23  ;;  %v3198_v23 = vrot.slane %v3196_v31, 1  ;;  %v3208_v33 = vshrl.u32 %v16121_v19, 16  ;;  %v3244_v12 = vshll.u32 %v16907_v59, 16 }
  0x99   : > { %v3194_v22 = vor.u32 %v3192_v14, %v3190_v18  ;;  %v4178_v19 = vshrl.u32 %v16137_v10, 16 }
  0x9a   : > { %2612 = vperm.xlu0 %16021, %v239_v29   ;;  %v3191_v29 = vsel %vm776_vm2, %v3186_v20, %v3190_v18  ;;  %v16136_v18 = vld [vmem:[%s16415_s27 + $0x8] sm:$0xfe]  }
  0x9b   : > { %2617 = vperm.xlu1 %16022, %v240_v42   ;;  %v3199_v36 = vsel %vm776_vm2, %v3194_v22, %v3198_v23  ;;  %v3206_v42 = vrot.slane %v3204_v28, 1  ;;  %v4181_v22 = vshll.u32 %v16137_v10, 16  ;;  %v3691_v28 = vrot.slane %v16930_v16, 1 }
  0x9c   : > { %15481 = vmatmul.mubr.msk.bf16.gmra.mxu0 %vm372_vm1, %v1436_v49  ;;  %15515 = vmatmul.mubr.msk.bf16.gmra.mxu1 %vm372_vm1, %v2063_v7  ;;  %v3166_v49 = vrot.slane %v3164_v38, 1  ;;  %v3159_v7 = vsel %vm776_vm2, %v3154_v46, %v3158_v44  ;;  %v16125_v38 = vld [vmem:[%s16415_s27 + $0x70] sm:$0xff]   ;;  %v3677_v44 = vrot.slane %v16120_v27, 1 }
  0x9d   : > { %15524 = vmatprep.mubr.msk.bf16.mxu0 %vm372_vm1, %v3119_v51  ;;  %15518 = vmatprep.mubr.msk.bf16.mxu1 %vm372_vm1, %v2072_v57  ;;  %v3665_v51 = vrot.slane %v16108_v32, 1  ;;  %v16873_v32 = vld [vmem:[%s16415_s27 + $0x58] sm:$0xff]  }
  0x9e   : > { %2622 = vperm.xlu0 %16021, %v241_v45   ;;  %v3167_v57 = vsel %vm776_vm2, %v3162_v48, %v3166_v49  ;;  %v3170_v3 = vor.u32 %v3168_v55, %v3166_v49  ;;  %v3679_v46 = vrot.slane %v16873_v32, 1  ;;  %v3210_v48 = vor.u32 %v3208_v33, %v3206_v42  ;;  %v16141_v32 = vld [vmem:[%s16415_s27 + $0x20] sm:$0xff]  }
  0x9f   : > { %2627 = vperm.xlu1 %16022, %v242_v52   ;;  %v3666_v61 = vsel %vm1399_vm3, %v3663_v26, %v3665_v51  ;;  %v3668_v63 = vsel %vm1399_vm3, %v3665_v51, %v3667_v53  ;;  %v3675_v26 = vrot.slane %v16118_v34, 1  ;;  %v3214_v49 = vrot.slane %v3212_v37, 1  ;;  %v16894_v52 = vld [vmem:[%s16415_s27 + $0x68] sm:$0xff]   ;;  %v16933_v34 = vld [vmem:[%s16415_s27 + $0x90] ss:$0 sps:$4 sm:$0x11]  }
  0xa0   : > { %v3220_v51 = vshll.u32 %v16125_v38, 16  ;;  %v3224_v55 = vshrl.u32 %v16125_v38, 16  ;;  %v3680_v5 = vsel %vm1399_vm3, %v3677_v44, %v3679_v46  ;;  %v4173_v37 = vshll.u32 %v16136_v18, 16 }
  0xa1   : > { %v3676_v41 = vsel %vm1399_vm3, %v3673_v25, %v3675_v26  ;;  %v4180_v38 = vrot.slane %v4178_v19, 1 }
  0xa2   : > { %2632 = vperm.xlu0 %16021, %v243_v56  }
  0xa3   : > { %2637 = vperm.xlu1 %16022, %v244_v62   ;;  %v3215_v62 = vsel %vm776_vm2, %v3210_v48, %v3214_v49  ;;  %v4196_v48 = vshrl.u32 %v16141_v32, 16 }
  0xa4   : > { %15525 = vmatmul.mubr.msk.bf16.vlgmr.msra.gmra.mxu0 %vm372_vm1, %v3127_v8  ;;  %15519 = vmatmul.mubr.msk.bf16.gmra.mxu1 %vm372_vm1, %v2081_v15  ;;  %v3669_v8 = vrot.slane %v16112_v58, 1 }
  0xa5   : > { %15599 = vmatpush3.bf16.msra.mxu0 %v4394_v9  ;;  %15528 = vmatprep.mubr.msk.bf16.mxu0 %vm372_vm1, %v3135_v11  ;;  %v3671_v9 = vrot.slane %v16114_v1, 1  ;;  %v3175_v11 = vsel %vm776_vm2, %v3170_v3, %v3174_v0  ;;  %v16913_v0 = vld [vmem:[%s16415_s27 + $0x80] sm:$0xff]   ;;  %v3683_v1 = vrot.slane %v16894_v52, 1  ;;  %v3685_v3 = vrot.slane %v16899_v54, 1 }
  0xa6   : > { %15562 = vmatprep.mubr.msk.bf16.mxu1 %vm372_vm1, %v3660_v17  ;;  %15986 = vmatprep.subr.msk.bf16.mxu0 %vm427_vm0, %v16792_v21  ;;  %v3670_v15 = vsel %vm1399_vm3, %v3667_v53, %v3669_v8  ;;  %v3689_v31 = vrot.slane %v16913_v0, 1  ;;  %v17064_v0 = vld [vmem:[%s16415_s27 + $0x48] sm:$0xff]  }
  0xa7   : > { %v3672_v17 = vsel %vm1399_vm3, %v3669_v8, %v3671_v9 }
  0xac   : > { %15529 = vmatmul.mubr.msk.bf16.gmra.mxu0 %vm372_vm1, %v3143_v30  ;;  %15563 = vmatmul.mubr.msk.bf16.vlgmr.msra.gmra.mxu1 %vm372_vm1, %v3662_v39  ;;  %v3200_v30 = vshrl.u32 %v16119_v6, 16  ;;  %v3674_v39 = vsel %vm1399_vm3, %v3671_v9, %v3673_v25  ;;  %v3246_v25 = vrot.slane %v3244_v12, 1 }
  0xad   : > { %15532 = vmatprep.mubr.msk.bf16.mxu0 %vm372_vm1, %v3151_v35  ;;  %15637 = vmatpush3.bf16.msra.mxu1 %v4906_v40  ;;  %v16876_v35 = vld [vmem:[%s16415_s27 + $0x60] sm:$0xff]   ;;  %v16882_v40 = vld [vmem:[%s16415_s27 + $0x78] sm:$0xff]  }
  0xae   : > { %15566 = vmatprep.mubr.msk.bf16.mxu1 %vm372_vm1, %v3664_v43  ;;  %15987 = vmatprep.subr.msk.bf16.mxu1 %vm427_vm0, %v16829_v47  ;;  %v16887_v43 = vld [vmem:[%s16415_s27 + $0x80] sm:$0xff]   ;;  %v3202_v45 = vor.u32 %v3200_v30, %v3198_v23  ;;  %v3681_v50 = vrot.slane %v16876_v35, 1  ;;  %v3228_v53 = vshll.u32 %v16882_v40, 16  ;;  %v3232_v4 = vshrl.u32 %v16882_v40, 16 }
  0xaf   : > { %v3236_v56 = vshll.u32 %v16887_v43, 16  ;;  %v3240_v9 = vshrl.u32 %v16887_v43, 16 }
  0xb0   : > { %v3207_v58 = vsel %vm776_vm2, %v3202_v45, %v3206_v42  ;;  %v3230_v2 = vrot.slane %v3228_v53, 1  ;;  %v3682_v27 = vsel %vm1399_vm3, %v3679_v46, %v3681_v50  ;;  %v3684_v35 = vsel %vm1399_vm3, %v3681_v50, %v3683_v1  ;;  %v16955_v45 = vld [vmem:[%s16415_s27 + $0x8] sm:$0xfc]  }
  0xb1   : > { %v3238_v6 = vrot.slane %v3236_v56, 1  ;;  %v16143_v50 = vld [vmem:[%s16415_s27 + $0x28] sm:$0xff]   ;;  %v16963_v53 = vsel %vm427_vm0, %v16792_v21, 0  ;;  %v3686_v56 = vsel %vm1399_vm3, %v3683_v1, %v3685_v3 }
  0xb2   : > { %v3234_v40 = vor.u32 %v3232_v4, %v3230_v2  ;;  %v16147_v4 = vld [vmem:[%s16415_s27 + $0x38] sm:$0xff]  }
  0xb4   : > { %15533 = vmatmul.mubr.msk.bf16.gmra.mxu0 %vm372_vm1, %v3159_v7  ;;  %15567 = vmatmul.mubr.msk.bf16.gmra.mxu1 %vm372_vm1, %v3666_v61  ;;  %v3216_v7 = vshrl.u32 %v16123_v24, 16  ;;  %v3678_v61 = vsel %vm1399_vm3, %v3675_v26, %v3677_v44  ;;  %v3242_v44 = vor.u32 %v3240_v9, %v3238_v6  ;;  %v4208_v9 = vshll.u32 %v16143_v50, 16 }
  0xb5   : > { %15536 = vmatprep.mubr.msk.bf16.mxu0 %vm372_vm1, %v3167_v57  ;;  %15570 = vmatprep.mubr.msk.bf16.mxu1 %vm372_vm1, %v3668_v63  ;;  %v16903_v57 = vld [vmem:[%s16415_s27 + $0x78] sm:$0xff]   ;;  %v3222_v63 = vrot.slane %v3220_v51, 1 }
  0xb6   : > { %v3687_v8 = vrot.slane %v16903_v57, 1  ;;  %v16153_v57 = vld [vmem:[%s16415_s27 + $0x50] sm:$0xff]  }
  0xb7   : > { %v3226_v14 = vor.u32 %v3224_v55, %v3222_v63  ;;  %v16145_v55 = vld [vmem:[%s16415_s27 + $0x30] sm:$0xff]  }
  0xb9   : > { %v3231_v24 = vsel %vm776_vm2, %v3226_v14, %v3230_v2  ;;  %v16981_v2 = vsel %vm427_vm0, %v16829_v47, 0  ;;  %v16999_v14 = vld [vmem:[%s16415_s27 + $0x28] sm:$0xff]  }
  0xbc   : > { %15537 = vmatmul.mubr.msk.bf16.gmra.mxu0 %vm372_vm1, %v3175_v11  ;;  %15571 = vmatmul.mubr.msk.bf16.gmra.mxu1 %vm372_vm1, %v3670_v15  ;;  %v3218_v11 = vor.u32 %v3216_v7, %v3214_v49  ;;  %v3252_v15 = vshll.u32 %v16133_v60, 16  ;;  %v4199_v49 = vshll.u32 %v16141_v32, 16  ;;  %v16966_v7 = vld [vmem:[%s16415_s27 + $0x18] sm:$0xff]   ;;  %v16974_v60 = vld [vmem:[%s16415_s27 + $0x20] sm:$0xff]  }
  0xbd   : > { %15540 = vmatprep.mubr.msk.bf16.mxu0 %vm372_vm1, %v3183_v13  ;;  %15574 = vmatprep.mubr.msk.bf16.mxu1 %vm372_vm1, %v3672_v17  ;;  %v16138_v13 = vld [vmem:[%s16415_s27 + $0x18] sm:$0xff]   ;;  %v3248_v17 = vshrl.u32 %v16907_v59, 16  ;;  %v4175_v59 = vrot.slane %v4173_v37, 2  ;;  %v21361_v19 = vrot.slane %v16974_v60, 2 }
  0xbe   : > { %v3223_v20 = vsel %vm776_vm2, %v3218_v11, %v3222_v63  ;;  %v4187_v23 = vshrl.u32 %v16138_v13, 16  ;;  %v16939_v26 = vrot.slane %v3252_v15, 1  ;;  %v4190_v30 = vshll.u32 %v16138_v13, 16 }
  0xbf   : > { %v4814_v63 = vrot.slane %v16955_v45, 2  ;;  %v16986_v1 = vrot.slane %v4199_v49, 2  ;;  %v3688_v11 = vsel %vm1399_vm3, %v3685_v3, %v3687_v8  ;;  %v3250_v47 = vor.u32 %v3248_v17, %v3246_v25 }
  0xc0   : > { %v16951_v42 = vrot.slane %v4187_v23, 1  ;;  %v16958_v46 = vrot.slane %v4190_v30, 2  ;;  %v4214_v13 = vshrl.u32 %v16145_v55, 16  ;;  %v4223_v17 = vshrl.u32 %v16147_v4, 16 }
  0xc1   : > { %v4226_v23 = vshll.u32 %v16147_v4, 16 }
  0xc4   : > { %15541 = vmatmul.mubr.msk.bf16.gmra.mxu0 %vm372_vm1, %v3191_v29  ;;  %15575 = vmatmul.mubr.msk.bf16.gmra.mxu1 %vm372_vm1, %v3674_v39  ;;  %v3693_v29 = vrot.slane %v16933_v34, 1  ;;  %v16948_v39 = vld [vmem:[%s16415_s27 + $0x10] sm:$0xff]  }
  0xc5   : > { %15544 = vmatprep.mubr.msk.bf16.mxu0 %vm372_vm1, %v3199_v36  ;;  %15578 = vmatprep.mubr.msk.bf16.mxu1 %vm372_vm1, %v3676_v41  ;;  %v4170_v36 = vshrl.u32 %v16136_v18, 16  ;;  %v4183_v41 = vrot.slane %v4181_v22, 2  ;;  %v4815_v21 = vrot.slane %v16948_v39, 2  ;;  %v4817_v18 = vrot.slane %v16966_v7, 2  ;;  %v16149_v22 = vld [vmem:[%s16415_s27 + $0x40] sm:$0xff]  }
  0xc6   : > { %v16165_v39 = vld [vmem:[%s16415_s27 + $0x80] sm:$0xff]  }
  0xc7   : > { %v4172_v52 = vrot.slane %v4170_v36, 1  ;;  %v16996_v12 = vor.u32 %v4183_v41, %v4180_v38  ;;  %v17014_v36 = vrot.slane %v4214_v13, 1  ;;  %v17018_v38 = vld [vmem:[%s16415_s27 + $0x30] sm:$0xff]   ;;  %v17159_v13 = vld [vmem:[%s16415_s27 + $0x68] sm:$0xff]  }
  0xc9   : > { %v4176_v15 = vor.u32 %v4175_v59, %v4172_v52 }
  0xcb   : > { %v4185_v41 = vsel %vm1911_vm4, %v4176_v15, %v16996_v12  ;;  %v17061_v15 = vld [vmem:[%s16415_s27 + $0x40] sm:$0xff]  }
  0xcc   : > { %15545 = vmatmul.mubr.msk.bf16.gmra.mxu0 %vm372_vm1, %v3207_v58  ;;  %15579 = vmatmul.mubr.msk.bf16.gmra.mxu1 %vm372_vm1, %v3678_v61  ;;  %v3239_v58 = vsel %vm776_vm2, %v3234_v40, %v3238_v6  ;;  %v4205_v6 = vshrl.u32 %v16143_v50, 16 }
  0xcd   : > { %15548 = vmatprep.mubr.msk.bf16.mxu0 %vm372_vm1, %v3215_v62  ;;  %15582 = vmatprep.mubr.msk.bf16.mxu1 %vm372_vm1, %v3680_v5  ;;  %v3247_v62 = vsel %vm776_vm2, %v3242_v44, %v3246_v25  ;;  %v16984_v5 = vrot.slane %v4196_v48, 1  ;;  %v4232_v44 = vshrl.u32 %v16149_v22, 16  ;;  %v17027_v48 = vld [vmem:[%s16415_s27 + $0x38] sm:$0xff]  }
  0xce   : > { %v17009_v25 = vrot.slane %v4205_v6, 1 }
  0xd4   : > { %v15374_v33 = vpop.f32.mrf.mxu0  ;;  %15549 = vmatmul.mubr.msk.bf16.gmra.mxu0 %vm372_vm1, %v3223_v20  ;;  %15583 = vmatmul.mubr.msk.bf16.gmra.mxu1 %vm372_vm1, %v3682_v27  ;;  %v4217_v20 = vshll.u32 %v16145_v55, 16  ;;  %v16151_v27 = vld [vmem:[%s16415_s27 + $0x48] sm:$0xff]   ;;  %v17031_v55 = vrot.slane %v4223_v17, 1 }
  0xd5   : > { %15552 = vmatprep.mubr.msk.bf16.mxu0 %vm372_vm1, %v3231_v24  ;;  %15586 = vmatprep.mubr.msk.bf16.mxu1 %vm372_vm1, %v3684_v35  ;;  %v17012_v35 = vrot.slane %v4208_v9, 2  ;;  %v4241_v59 = vshrl.u32 %v16151_v27, 16 }
  0xd6   : > { %v465_v43 = vpop.f32.mrf.mxu0  ;;  %v17029_v52 = vrot.slane %v4217_v20, 2  ;;  %v4202_v20 = vor.u32 %v16986_v1, %v16984_v5  ;;  %v16157_v5 = vld [vmem:[%s16415_s27 + $0x60] sm:$0xff]  }
  0xd8   : > { %v15375_v51 = vpop.f32.mrf.mxu0 }
  0xda   : > { %v468_v61 = vpop.f32.mrf.mxu0 }
  0xdc   : > { %v16988_v10 = vpop.f32.mrf.mxu0  ;;  %15553 = vmatmul.mubr.msk.bf16.gmra.mxu0 %vm372_vm1, %v3239_v58  ;;  %v15412_v54 = vpop.f32.mrf.mxu1  ;;  %15587 = vmatmul.mubr.msk.bf16.gmra.mxu1 %vm372_vm1, %v3686_v56  ;;  %v17033_v56 = vrot.slane %v4226_v23, 2 }
  0xdd   : > { %15556 = vmatprep.mubr.msk.bf16.mxu0 %vm372_vm1, %v3247_v62  ;;  %v17006_v24 = vadd.f32 %v15412_v54, %v15374_v33  ;;  %15590 = vmatprep.mubr.msk.bf16.mxu1 %vm372_vm1, %v3688_v11  ;;  %v3255_v33 = vsel %vm776_vm2, %v3250_v47, %v16939_v26  ;;  %v3690_v26 = vsel %vm1399_vm3, %v3687_v8, %v3689_v31  ;;  %v4244_v62 = vshll.u32 %v16151_v27, 16 }
  0xde   : > { %v481_v3 = vpop.f32.mrf.mxu0  ;;  %v1016_v30 = vpop.f32.mrf.mxu1  ;;  %v4193_v8 = vor.u32 %v16958_v46, %v16951_v42  ;;  %v17057_v47 = vrot.slane %v4232_v44, 1  ;;  %v16155_v42 = vld [vmem:[%s16415_s27 + $0x58] sm:$0xff]   ;;  %v17076_v54 = vrot.slane %v4241_v59, 1 }
  0xdf   : > { %v17020_v40 = vadd.f32 %v1016_v30, %v465_v43  ;;  %v4235_v43 = vshll.u32 %v16149_v22, 16  ;;  %v17078_v17 = vrot.slane %v4244_v62, 2  ;;  %v4250_v30 = vshrl.u32 %v16153_v57, 16 }
  0xe0   : > { %v15379_v32 = vpop.f32.mrf.mxu0  ;;  %v15413_v49 = vpop.f32.mrf.mxu1  ;;  %v4259_v62 = vshrl.u32 %v16155_v42, 16  ;;  %v4262_v34 = vshll.u32 %v16155_v42, 16 }
  0xe1   : > { %v17035_v58 = vadd.f32 %v15413_v49, %v15375_v51  ;;  %v3692_v51 = vsel %vm1399_vm3, %v3689_v31, %v3691_v28  ;;  %v17069_v22 = vrot.slane %v4235_v43, 2  ;;  %v4203_v43 = vsel %vm1911_vm4, %v4193_v8, %v4202_v20 }
  0xe2   : > { %v484_v50 = vpop.f32.mrf.mxu0  ;;  %v1019_v4 = vpop.f32.mrf.mxu1  ;;  %v17114_v16 = vrot.slane %v4250_v30, 1  ;;  %v17129_v30 = vld [vmem:[%s16415_s27 + $0x60] sm:$0xff]  }
  0xe3   : > { %v17052_v11 = vadd.f32 %v1019_v4, %v468_v61  ;;  %v16159_v4 = vld [vmem:[%s16415_s27 + $0x68] sm:$0xff]  }
  0xe4   : > { %v17042_v6 = vpop.f32.mrf.mxu0  ;;  %15557 = vmatmul.mubr.msk.bf16.gmra.mxu0 %vm372_vm1, %v3255_v33  ;;  %v15416_v31 = vpop.f32.mrf.mxu1  ;;  %15591 = vmatmul.mubr.msk.bf16.gmra.mxu1 %vm372_vm1, %v3690_v26  ;;  %v4253_v33 = vshll.u32 %v16153_v57, 16  ;;  %v17109_v57 = vld [vmem:[%s21358_s1 + $0x14] sm:$0x3] }
  0xe5   : > { %15600 = vmatprep.mubr.msk.bf16.mxu0 %vm372_vm1, %v4185_v41  ;;  %v17073_v46 = vadd.f32 %v15416_v31, %v16988_v10  ;;  %15594 = vmatprep.mubr.msk.bf16.mxu1 %vm372_vm1, %v3692_v51  ;;  %v17081_v41 = vld [vmem:[%s16415_s27 + $0x50] sm:$0xff]   ;;  %v4194_v10 = vsel %vm1911_vm4, %v16996_v12, %v4193_v8  ;;  %v4816_v12 = vsel %vm4813_vm5, %v4814_v63, %v4815_v21 }
  0xe6   : > { %v497_v61 = vpop.f32.mrf.mxu0  ;;  %v1032_v23 = vpop.f32.mrf.mxu1  ;;  %v4211_v63 = vor.u32 %v17012_v35, %v17009_v25  ;;  %v17122_v31 = vrot.slane %v4253_v33, 2  ;;  %v17141_v35 = vrot.slane %v4259_v62, 1  ;;  %v4280_v33 = vshll.u32 %v16159_v4, 16  ;;  %v17171_v62 = vld [vmem:[%s16415_s27 + $0x70] sm:$0xff]  }
  0xe7   : > { %v17084_v1 = vadd.f32 %v1032_v23, %v481_v3  ;;  %v3694_v3 = vsel %vm1399_vm3, %v3691_v28, %v3693_v29  ;;  %v4268_v28 = vshrl.u32 %v16157_v5, 16  ;;  %v4271_v29 = vshll.u32 %v16157_v5, 16 }
  0xe8   : > { %v15383_v27 = vpop.f32.mrf.mxu0  ;;  %v15417_v44 = vpop.f32.mrf.mxu1  ;;  %v4277_v5 = vshrl.u32 %v16159_v4, 16 }
  0xe9   : > { %21565 = vst [vmem:[#allocation3_spill] sm:$0xff] %v17084_v1  ;;  %v17094_v51 = vadd.f32 %v15417_v44, %v15379_v32  ;;  %v16161_v44 = vld [vmem:[%s16415_s27 + $0x70] sm:$0xff]   ;;  %v17145_v23 = vrot.slane %v4268_v28, 1 }
  0xea   : > { %v17088_v49 = vpop.f32.mrf.mxu0  ;;  %v1035_v32 = vpop.f32.mrf.mxu1  ;;  %v17156_v28 = vrot.slane %v4277_v5, 1  ;;  %v4289_v26 = vshll.u32 %v16161_v44, 16 }
  0xeb   : > { %21566 = vst [vmem:[#allocation4_spill] sm:$0xff] %v17094_v51  ;;  %v17116_v45 = vadd.f32 %v1035_v32, %v484_v50  ;;  %v17143_v32 = vrot.slane %v4262_v34, 2 }
  0xec   : > { %v17111_v8 = vpop.f32.mrf.mxu0  ;;  %15601 = vmatmul.mubr.msk.bf16.vlgmr.msra.gmra.mxu0 %vm372_vm1, %v4194_v10  ;;  %v17126_v10 = vld [vmem:[%s16415_s27 + $0x58] sm:$0xff]   ;;  %v15420_v42 = vpop.f32.mrf.mxu1  ;;  %15595 = vmatmul.mubr.msk.bf16.gmra.mxu1 %vm372_vm1, %v3694_v3 }
  0xed   : > { %21567 = vst [vmem:[#allocation5_spill] sm:$0xff] %v17116_v45  ;;  %15675 = vmatpush3.bf16.msra.mxu0 %v16963_v53  ;;  %15604 = vmatprep.mubr.msk.bf16.mxu0 %vm372_vm1, %v4203_v43  ;;  %v4220_v53 = vor.u32 %v17029_v52, %v17014_v36  ;;  %v17138_v25 = vadd.f32 %v15420_v42, %v17042_v6  ;;  %v17147_v36 = vrot.slane %v4271_v29, 2  ;;  %v16163_v52 = vld [vmem:[%s16415_s27 + $0x78] sm:$0xff]   ;;  %v4286_v29 = vshrl.u32 %v16161_v44, 16 }
  0xee   : > { %v513_v50 = vpop.f32.mrf.mxu0  ;;  %15988 = vmatprep.subr.msk.bf16.mxu0 %vm427_vm0, %v17109_v57  ;;  %15638 = vmatprep.mubr.msk.bf16.mxu1 %vm372_vm1, %v4816_v12  ;;  %v1048_v43 = vpop.f32.mrf.mxu1  ;;  %v4212_v6 = vsel %vm1911_vm4, %v4202_v20, %v4211_v63  ;;  %v4818_v20 = vsel %vm4813_vm5, %v4815_v21, %v4817_v18  ;;  %v4295_v5 = vshrl.u32 %v16163_v52, 16  ;;  %v4298_v44 = vshll.u32 %v16163_v52, 16 }
  0xef   : > { %21568 = vst [vmem:[#allocation6_spill] sm:$0xff] %v17138_v25  ;;  %v17150_v59 = vadd.f32 %v1048_v43, %v497_v61  ;;  %v4221_v34 = vsel %vm1911_vm4, %v4211_v63, %v4220_v53  ;;  %v17168_v43 = vrot.slane %v4280_v33, 2  ;;  %v4229_v33 = vor.u32 %v17033_v56, %v17031_v55 }
  0xf0   : > { %v15387_v3 = vpop.f32.mrf.mxu0  ;;  %v15421_v4 = vpop.f32.mrf.mxu1  ;;  %v4238_v52 = vor.u32 %v17069_v22, %v17057_v47  ;;  %v17205_v55 = vrot.slane %v4289_v26, 2  ;;  %v17209_v47 = vrot.slane %v4295_v5, 1  ;;  %v16169_v22 = vld [vmem:[%s16415_s27 + $0x90] sm:$0xff]   ;;  %v17217_v26 = vrot.slane %v4298_v44, 2 }
  0xf1   : > { %21569 = vst [vmem:[#allocation7_spill] sm:$0xff] %v17150_v59  ;;  %v17161_v61 = vadd.f32 %v15421_v4, %v15383_v27  ;;  %v4820_v27 = vsel %vm4813_vm5, %v4817_v18, %v21361_v19  ;;  %v17181_v4 = vld [vmem:[%s16415_s27 + $0x78] sm:$0xff]   ;;  %v4307_v5 = vshll.u32 %v16165_v39, 16 }
  0xf2   : > { %v516_v42 = vpop.f32.mrf.mxu0  ;;  %v1051_v63 = vpop.f32.mrf.mxu1 }
  0xf3   : > { %21570 = vst [vmem:[#allocation8_spill] sm:$0xff] %v17161_v61  ;;  %v17184_v21 = vadd.f32 %v1051_v63, %v17088_v49  ;;  %v17197_v49 = vrot.slane %v4286_v29, 1  ;;  %v16167_v63 = vld [vmem:[%s16415_s27 + $0x88] sm:$0xff]   ;;  %v4304_v29 = vshrl.u32 %v16165_v39, 16  ;;  %v21577_v39 = vrot.slane %v17018_v38, 2 }
  0xf4   : > { %v15390_v12 = vpop.f32.mrf.mxu0  ;;  %15605 = vmatmul.mubr.msk.bf16.gmra.mxu0 %vm372_vm1, %v4212_v6  ;;  %v17192_v6 = vld [vmem:[%s21358_s1 + $0x16] sm:$0x3]  ;;  %v15424_v7 = vpop.f32.mrf.mxu1  ;;  %15639 = vmatmul.mubr.msk.bf16.vlgmr.msra.gmra.mxu1 %vm372_vm1, %v4818_v20  ;;  %v4239_v20 = vsel %vm1911_vm4, %v4229_v33, %v4238_v52  ;;  %v4313_v37 = vshrl.u32 %v16167_v63, 16  ;;  %v4316_v44 = vshll.u32 %v16167_v63, 16 }
  0xf5   : > { %21571 = vst [vmem:[#allocation9_spill] sm:$0xff] %v17184_v21  ;;  %15608 = vmatprep.mubr.msk.bf16.mxu0 %vm372_vm1, %v4221_v34  ;;  %v17201_v34 = vadd.f32 %v15424_v7, %v17111_v8  ;;  %15713 = vmatpush3.bf16.msra.mxu1 %v16981_v2  ;;  %v4230_v2 = vsel %vm1911_vm4, %v4220_v53, %v4229_v33  ;;  %v16171_v63 = vld [vmem:[%s16415_s27 + $0x98] ss:$0 sps:$4 sm:$0x33]  }
  0xf6   : > { %v529_v18 = vpop.f32.mrf.mxu0  ;;  %15642 = vmatprep.mubr.msk.bf16.mxu1 %vm372_vm1, %v4820_v27  ;;  %v1064_v9 = vpop.f32.mrf.mxu1  ;;  %15989 = vmatprep.subr.msk.bf16.mxu1 %vm427_vm0, %v17192_v6 }
  0xf7   : > { %21572 = vst [vmem:[#allocation10_spill] sm:$0xff] %v17201_v34  ;;  %v17214_v8 = vadd.f32 %v1064_v9, %v513_v50  ;;  %v17224_v34 = vld [vmem:[%s16415_s27 + $0x80] sm:$0xff]   ;;  %v21575_v9 = vrot.slane %v16999_v14, 2  ;;  %v21576_v50 = vrot.slane %v16974_v60, 2  ;;  %v4247_v60 = vor.u32 %v17078_v17, %v17076_v54 }
  0xf8   : > { %v15391_v19 = vpop.f32.mrf.mxu0  ;;  %v15425_v27 = vpop.f32.mrf.mxu1  ;;  %v17257_v54 = vrot.slane %v4307_v5, 2  ;;  %v17259_v17 = vrot.slane %v4313_v37, 1 }
  0xf9   : > { %21573 = vst [vmem:[#allocation11_spill] sm:$0xff] %v17214_v8  ;;  %v17226_v21 = vadd.f32 %v15425_v27, %v15387_v3  ;;  %v4822_v53 = vsel %vm4813_vm5, %v21576_v50, %v21575_v9  ;;  %v17234_v8 = vld [vmem:[%s16415_s27 + $0x88] sm:$0xff]   ;;  %v21578_v3 = vmov %v21575_v9  ;;  %v4322_v27 = vshrl.u32 %v16169_v22, 16 }
  0xfa   : > { %v17219_v7 = vpop.f32.mrf.mxu0  ;;  %v1067_v61 = vpop.f32.mrf.mxu1  ;;  %v4824_v33 = vsel %vm4813_vm5, %v21578_v3, %v21577_v39  ;;  %v17250_v50 = vrot.slane %v4304_v29, 1  ;;  %v4256_v39 = vor.u32 %v17122_v31, %v17114_v16  ;;  %v17272_v29 = vld [vmem:[%s16415_s27 + $0x10] sm:$0xff]   ;;  %v4248_v37 = vsel %vm1911_vm4, %v4238_v52, %v4247_v60 }
  0xfb   : > { %21574 = vst [vmem:[#allocation12_spill] sm:$0xff] %v17226_v21  ;;  %v17247_v9 = vadd.f32 %v1067_v61, %v516_v42  ;;  %v17262_v42 = vld [vmem:[%s16415_s27 + $0x90] sm:$0xff]   ;;  %v17265_v61 = vld [vmem:[%s16415_s27 + $0x98] ss:$0 sps:$4 sm:$0x33]   ;;  %v17277_v31 = vrot.slane %v4316_v44, 2  ;;  %v4265_v3 = vor.u32 %v17143_v32, %v17141_v35  ;;  %v4274_v32 = vor.u32 %v17147_v36, %v17145_v23 }
  0xfc   : > { %v17236_v59 = vpop.f32.mrf.mxu0  ;;  %15609 = vmatmul.mubr.msk.bf16.gmra.mxu0 %vm372_vm1, %v4230_v2  ;;  %v4325_v2 = vshll.u32 %v16169_v22, 16  ;;  %v15428_v56 = vpop.f32.mrf.mxu1  ;;  %15643 = vmatmul.mubr.msk.bf16.gmra.mxu1 %vm372_vm1, %v4822_v53  ;;  %v17279_v5 = vrot.slane %v4322_v27, 1  ;;  %v4334_v22 = vshll.u32 %v16171_v63, 16  ;;  %v16177_v21 = vld [vmem:[%s16415_s27 + $0x8] sm:$0xfe]   ;;  %v21582_v52 = vrot.slane %v17027_v48, 2 }
  0xfd   : > { %21579 = vst [vmem:[#allocation13_spill] sm:$0xff] %v17247_v9  ;;  %15612 = vmatprep.mubr.msk.bf16.mxu0 %vm372_vm1, %v4239_v20  ;;  %v17267_v20 = vadd.f32 %v15428_v56, %v15390_v12  ;;  %15646 = vmatprep.mubr.msk.bf16.mxu1 %vm372_vm1, %v4824_v33  ;;  %v16178_v12 = vld [vmem:[%s16415_s27 + $0x10] sm:$0xff]   ;;  %v4331_v33 = vshrl.u32 %v16171_v63, 16  ;;  %v17288_v9 = vld [vmem:[%s16415_s27 + $0x18] sm:$0xff]   ;;  %v21583_v44 = vrot.slane %v17018_v38, 2  ;;  %v21587_v48 = vrot.slane %v17064_v0, 2 }
  0xfe   : > { %v17253_v14 = vpop.f32.mrf.mxu0  ;;  %v1080_v53 = vpop.f32.mrf.mxu1  ;;  %v4266_v36 = vsel %vm1911_vm4, %v4256_v39, %v4265_v3  ;;  %v17348_v38 = vrot.slane %v4334_v22, 2 }
  0xff   : > { %21580 = vst [vmem:[#allocation14_spill] sm:$0xff] %v17267_v20  ;;  %v17283_v56 = vadd.f32 %v1080_v53, %v529_v18  ;;  %v17285_v20 = vrot.slane %v4325_v2, 2  ;;  %v4826_v27 = vsel %vm4813_vm5, %v21583_v44, %v21582_v52  ;;  %v21584_v18 = vrot.slane %v17061_v15, 2 }
 0x100   : > { %v17274_v16 = vpop.f32.mrf.mxu0  ;;  %v15429_v25 = vpop.f32.mrf.mxu1  ;;  %v21585_v2 = vmov %v21582_v52  ;;  %v4257_v53 = vsel %vm1911_vm4, %v4247_v60, %v4256_v39  ;;  %v17334_v52 = vld [vmem:[%s16415_s27 + $0x18] sm:$0xff]   ;;  %v17342_v0 = vrot.slane %v4331_v33, 1  ;;  %v4283_v39 = vor.u32 %v17168_v43, %v17156_v28 }
 0x101   : > { %21581 = vst [vmem:[#allocation15_spill] sm:$0xff] %v17283_v56  ;;  %v4828_v63 = vsel %vm4813_vm5, %v21585_v2, %v21584_v18  ;;  %v17306_v56 = vadd.f32 %v15429_v25, %v15391_v19  ;;  %v21588_v60 = vmov %v21584_v18  ;;  %v21589_v19 = vrot.slane %v17081_v41, 2  ;;  %v17331_v2 = vld [vmem:[%s16415_s27 + $0x8] sm:$0xfe]  }
 0x102   : > { %v17291_v45 = vpop.f32.mrf.mxu0  ;;  %v1083_v44 = vpop.f32.mrf.mxu1  ;;  %v17319_v18 = vsel %vm4813_vm5, %v21588_v60, %v21587_v48  ;;  %v21590_v25 = vmov %v21587_v48  ;;  %v6138_v60 = vshrl.u32 %v16177_v21, 16  ;;  %v4275_v43 = vsel %vm1911_vm4, %v4265_v3, %v4274_v32 }
 0x103   : > { %21586 = vst [vmem:[#allocation16_spill] sm:$0xff] %v17306_v56  ;;  %v17326_v35 = vsel %vm4813_vm5, %v21590_v25, %v21589_v19  ;;  %v17337_v15 = vadd.f32 %v1083_v44, %v17219_v7  ;;  %v17340_v48 = vpop.permute.xlu0 %2462  ;;  %v6149_v19 = vshll.u32 %v16178_v12, 16  ;;  %v6141_v44 = vshll.u32 %v16177_v21, 16  ;;  %v16184_v56 = vld [vmem:[%s16415_s27 + $0x28] sm:$0xff]  }
 0x104   : > { %v17311_v1 = vpop.f32.mrf.mxu0  ;;  %15613 = vmatmul.mubr.msk.bf16.gmra.mxu0 %vm372_vm1, %v4248_v37  ;;  %v6146_v37 = vshrl.u32 %v16178_v12, 16  ;;  %21592 = vst [vmem:[#allocation18_spill] sm:$0xff] %v17340_v48  ;;  %v15432_v25 = vpop.f32.mrf.mxu1  ;;  %15647 = vmatmul.mubr.msk.bf16.gmra.mxu1 %vm372_vm1, %v4826_v27  ;;  %v21594_v12 = vrot.slane %v17126_v10, 2  ;;  %v21595_v27 = vrot.slane %v17081_v41, 2  ;;  %v4292_v21 = vor.u32 %v17205_v55, %v17197_v49 }
 0x105   : > { %21591 = vst [vmem:[#allocation17_spill] sm:$0xff] %v17337_v15  ;;  %15616 = vmatprep.mubr.msk.bf16.mxu0 %vm372_vm1, %v4257_v53  ;;  %v17352_v53 = vld [vmem:[%s16415_s27 + $0x20] sm:$0xff]   ;;  %v17355_v33 = vadd.f32 %v15432_v25, %v17236_v59  ;;  %15650 = vmatprep.mubr.msk.bf16.mxu1 %vm372_vm1, %v4828_v63  ;;  %v17374_v63 = vsel %vm427_vm0, %v17109_v57, 0  ;;  %v6155_v25 = vshrl.u32 %v17334_v52, 16  ;;  %v17384_v49 = vpop.permute.xlu1 %2472  ;;  %v17386_v55 = vrot.slane %v6138_v60, 1 }
 0x106   : > { %v17345_v23 = vpop.f32.mrf.mxu0  ;;  %v17363_v51 = vsel %vm4813_vm5, %v21595_v27, %v21594_v12  ;;  %v1096_v22 = vpop.f32.mrf.mxu1  ;;  %21596 = vst [vmem:[#allocation20_spill] sm:$0xff] %v17374_v63  ;;  %v17376_v41 = vrot.slane %v6146_v37, 1  ;;  %v16182_v12 = vld [vmem:[%s16415_s27 + $0x20] sm:$0xff]   ;;  %21598 = vst [vmem:[#allocation22_spill] sm:$0xff] %v17384_v49  ;;  %v17388_v27 = vrot.slane %v6149_v19, 2  ;;  %v21599_v37 = vrot.slane %v17129_v30, 2 }
 0x107   : > { %21593 = vst [vmem:[#allocation19_spill] sm:$0xff] %v17355_v33  ;;  %v17381_v28 = vadd.f32 %v1096_v22, %v17253_v14  ;;  %v21600_v33 = vrot.slane %v17126_v10, 2  ;;  %v21601_v14 = vrot.slane %v17159_v13, 2  ;;  %v17406_v60 = vrot.slane %v6141_v44, 2  ;;  %v17420_v30 = vpop.permute.xlu0 %2467 }
 0x108   : > { %v17369_v7 = vpop.f32.mrf.mxu0  ;;  %v15433_v57 = vpop.f32.mrf.mxu1  ;;  %v21602_v3 = vmov %v21599_v37  ;;  %21604 = vst [vmem:[#allocation24_spill] sm:$0xff] %v17420_v30  ;;  %v6158_v44 = vshll.u32 %v17334_v52, 16  ;;  %v21607_v63 = vrot.slane %v17171_v62, 2  ;;  %v6173_v62 = vshrl.u32 %v16184_v56, 16 }
 0x109   : > { %21597 = vst [vmem:[#allocation21_spill] sm:$0xff] %v17381_v28  ;;  %v17397_v15 = vsel %vm4813_vm5, %v21600_v33, %v21599_v37  ;;  %v17404_v22 = vsel %vm4813_vm5, %v21602_v3, %v21601_v14  ;;  %v17410_v28 = vld [vmem:[%s16415_s27 + $0x28] sm:$0xff]   ;;  %v17414_v10 = vadd.f32 %v15433_v57, %v17274_v16  ;;  %v4284_v33 = vsel %vm1911_vm4, %v4274_v32, %v4283_v39  ;;  %v17424_v14 = vld [vmem:[%s16415_s27 + $0x30] sm:$0xff]  }
 0x10a   : > { %v17390_v59 = vpop.f32.mrf.mxu0  ;;  %v17418_v37 = vsel %vm1911_vm4, %v4283_v39, %v4292_v21  ;;  %v1099_v3 = vpop.f32.mrf.mxu1  ;;  %v4301_v16 = vor.u32 %v17217_v26, %v17209_v47  ;;  %v17431_v57 = vrot.slane %v6155_v25, 1  ;;  %v17435_v32 = vsel %vm427_vm0, %v17192_v6, 0 }
 0x10b   : > { %21603 = vst [vmem:[#allocation23_spill] sm:$0xff] %v17414_v10  ;;  %21605 = vst [vmem:[#allocation25_spill] sm:$0xff] %v17435_v32  ;;  %v6164_v39 = vshrl.u32 %v16182_v12, 16  ;;  %v16186_v10 = vld [vmem:[%s16415_s27 + $0x30] sm:$0xff]   ;;  %v17439_v52 = vadd.f32 %v1099_v3, %v17291_v45  ;;  %v21609_v47 = vrot.slane %v17181_v4, 2  ;;  %v21610_v26 = vmov %v21607_v63  ;;  %v17457_v45 = vld [vmem:[%s16415_s27 + $0x38] sm:$0xff]  }
 0x10c   : > { %v17426_v19 = vpop.f32.mrf.mxu0  ;;  %15617 = vmatmul.mubr.msk.bf16.gmra.mxu0 %vm372_vm1, %v4266_v36  ;;  %v21608_v36 = vrot.slane %v17159_v13, 2  ;;  %v6167_v25 = vshll.u32 %v16182_v12, 16  ;;  %v15436_v3 = vpop.f32.mrf.mxu1  ;;  %15651 = vmatmul.mubr.msk.bf16.gmra.mxu1 %vm372_vm1, %v17319_v18  ;;  %v4310_v13 = vor.u32 %v17257_v54, %v17250_v50  ;;  %v17474_v18 = vrot.slane %v6158_v44, 2  ;;  %v17479_v54 = vld [vmem:[%s16415_s27 + $0x40] sm:$0xff]  }
 0x10d   : > { %21606 = vst [vmem:[#allocation26_spill] sm:$0xff] %v17439_v52  ;;  %15620 = vmatprep.mubr.msk.bf16.mxu0 %vm372_vm1, %v4275_v43  ;;  %v17454_v6 = vsel %vm4813_vm5, %v21610_v26, %v21609_v47  ;;  %v17468_v47 = vadd.f32 %v15436_v3, %v17311_v1  ;;  %15654 = vmatprep.mubr.msk.bf16.mxu1 %vm372_vm1, %v17326_v35  ;;  %v17472_v12 = vpop.permute.xlu1 %2477  ;;  %v21613_v1 = vrot.slane %v17224_v34, 2  ;;  %v21614_v35 = vrot.slane %v17181_v4, 2  ;;  %v16188_v26 = vld [vmem:[%s16415_s27 + $0x38] sm:$0xff]   ;;  %v17499_v52 = vpop.permute.xlu0 %2482 }
 0x10e   : > { %v17447_v30 = vsel %vm4813_vm5, %v21608_v36, %v21607_v63  ;;  %v17461_v43 = vpop.f32.mrf.mxu0  ;;  %v4319_v63 = vor.u32 %v17277_v31, %v17259_v17  ;;  %v6176_v36 = vshll.u32 %v16184_v56, 16  ;;  %21612 = vst [vmem:[#allocation28_spill] sm:$0xff] %v17472_v12  ;;  %v1112_v17 = vpop.f32.mrf.mxu1  ;;  %v17484_v56 = vsel %vm1911_vm4, %v4292_v21, %v4301_v16  ;;  %21616 = vst [vmem:[#allocation30_spill] sm:$0xff] %v17499_v52 }
 0x10f   : > { %21611 = vst [vmem:[#allocation27_spill] sm:$0xff] %v17468_v47  ;;  %v17491_v44 = vsel %vm4813_vm5, %v21614_v35, %v21613_v1  ;;  %v4328_v3 = vor.u32 %v17285_v20, %v17279_v5  ;;  %v6182_v50 = vshrl.u32 %v16186_v10, 16  ;;  %v17497_v47 = vadd.f32 %v1112_v17, %v17345_v23  ;;  %v16190_v17 = vld [vmem:[%s16415_s27 + $0x40] sm:$0xff]  }
 0x110   : > { %v17481_v31 = vpop.f32.mrf.mxu0  ;;  %v17501_v21 = vrot.slane %v6164_v39, 1  ;;  %v17503_v32 = vrot.slane %v6167_v25, 2  ;;  %v6185_v4 = vshll.u32 %v16186_v10, 16  ;;  %v15437_v12 = vpop.f32.mrf.mxu1  ;;  %v17508_v1 = vsel %vm1911_vm4, %v4301_v16, %v4310_v13 }
 0x111   : > { %21615 = vst [vmem:[#allocation29_spill] sm:$0xff] %v17497_v47  ;;  %v17510_v20 = vrot.slane %v6173_v62, 1  ;;  %v17512_v5 = vrot.slane %v6176_v36, 2  ;;  %v17517_v39 = vadd.f32 %v15437_v12, %v17369_v7  ;;  %v17520_v25 = vsel %vm1911_vm4, %v4310_v13, %v4319_v63  ;;  %v17531_v36 = vld [vmem:[%s16415_s27 + $0x48] sm:$0xff]  }
 0x112   : > { %v17505_v49 = vpop.f32.mrf.mxu0  ;;  %v21618_v10 = vrot.slane %v17234_v8, 2  ;;  %v21619_v35 = vrot.slane %v17224_v34, 2  ;;  %v1115_v23 = vpop.f32.mrf.mxu1  ;;  %v4337_v7 = vor.u32 %v17348_v38, %v17342_v0  ;;  %v17538_v13 = vrot.slane %v6182_v50, 1 }
 0x113   : > { %21617 = vst [vmem:[#allocation31_spill] sm:$0xff] %v17517_v39  ;;  %v6191_v12 = vshrl.u32 %v16188_v26, 16  ;;  %v6194_v34 = vshll.u32 %v16188_v26, 16  ;;  %v17549_v62 = vsel %vm1911_vm4, %v4319_v63, %v4328_v3  ;;  %v21622_v38 = vrot.slane %v17262_v42, 2  ;;  %v17563_v39 = vld [vmem:[%s16415_s27 + $0x50] sm:$0xff]   ;;  %v17588_v42 = vpop.permute.xlu0 %2492 }
 0x114   : > { %v17527_v16 = vsel %vm4813_vm5, %v21619_v35, %v21618_v10  ;;  %v17533_v47 = vpop.f32.mrf.mxu0  ;;  %15621 = vmatmul.mubr.msk.bf16.gmra.mxu0 %vm372_vm1, %v4284_v33  ;;  %v17541_v10 = vld [vmem:[%s16415_s27 + $0x48] sm:$0xff]   ;;  %v17544_v35 = vadd.f32 %v1115_v23, %v17390_v59  ;;  %v17551_v33 = vpop.permute.xlu1 %2487  ;;  %v21623_v0 = vrot.slane %v17234_v8, 2  ;;  %v17560_v50 = vrot.slane %v6185_v4, 2  ;;  %15655 = vmatmul.mubr.msk.bf16.gmra.mxu1 %vm372_vm1, %v17363_v51  ;;  %v16194_v51 = vld [vmem:[%s16415_s27 + $0x50] sm:$0xff]   ;;  %21628 = vst [vmem:[#allocation36_spill] sm:$0xff] %v17588_v42  ;;  %v16198_v42 = vld [vmem:[%s16415_s27 + $0x60] sm:$0xff]  }
 0x115   : > { %15624 = vmatprep.mubr.msk.bf16.mxu0 %vm372_vm1, %v17418_v37  ;;  %21621 = vst [vmem:[#allocation33_spill] sm:$0xff] %v17551_v33  ;;  %v15440_v59 = vpop.f32.mrf.mxu1  ;;  %v21624_v63 = vrot.slane %v17265_v61, 2  ;;  %v21625_v23 = vmov %v21622_v38  ;;  %v6144_v8 = vor.u32 %v17406_v60, %v17386_v55  ;;  %v17580_v4 = vor.u32 %v17388_v27, %v17376_v41  ;;  %15658 = vmatprep.mubr.msk.bf16.mxu1 %vm372_vm1, %v17397_v15 }
 0x116   : > { %21620 = vst [vmem:[#allocation32_spill] sm:$0xff] %v17544_v35  ;;  %v17558_v26 = vsel %vm4813_vm5, %v21623_v0, %v21622_v38  ;;  %v17567_v37 = vpop.f32.mrf.mxu0  ;;  %v6200_v38 = vshrl.u32 %v16190_v17, 16  ;;  %v17584_v0 = vadd.f32 %v15440_v59, %v17426_v19  ;;  %v21629_v61 = vrot.slane %v17288_v9, 1 }
 0x117   : > { %v17574_v35 = vsel %vm4813_vm5, %v21625_v23, %v21624_v63  ;;  %v21630_v55 = vrot.slane %v17272_v29, 1  ;;  %v6203_v41 = vshll.u32 %v16190_v17, 16  ;;  %v6209_v27 = vshrl.u32 %v17531_v36, 16  ;;  %v1128_v63 = vpop.f32.mrf.mxu1  ;;  %v17615_v17 = vld [vmem:[%s16415_s27 + $0x58] sm:$0xff]  }
 0x118   : > { %21626 = vst [vmem:[#allocation34_spill] sm:$0xff] %v17574_v35  ;;  %21627 = vst [vmem:[#allocation35_spill] sm:$0xff] %v17584_v0  ;;  %v17598_v23 = vpop.f32.mrf.mxu0  ;;  %v17601_v19 = vsel %vm1911_vm4, %v4328_v3, %v4337_v7  ;;  %v21633_v59 = vrot.slane %v17331_v2, 1  ;;  %v17610_v33 = vrot.slane %v6191_v12, 1  ;;  %v17619_v35 = vadd.f32 %v1128_v63, %v17461_v43 }
 0x119   : > { %v17595_v60 = vsel %vm1399_vm3, %v21630_v55, %v21629_v61  ;;  %v21632_v15 = vmov %v21630_v55  ;;  %v17612_v61 = vrot.slane %v6194_v34, 2  ;;  %v16196_v55 = vld [vmem:[%s16415_s27 + $0x58] sm:$0xff]   ;;  %v21635_v3 = vrot.slane %v17352_v53, 1  ;;  %v15441_v34 = vpop.f32.mrf.mxu1 }
 0x11a   : > { %21631 = vst [vmem:[#allocation37_spill] sm:$0xff] %v17595_v60  ;;  %v17608_v0 = vsel %vm1399_vm3, %v21633_v59, %v21632_v15  ;;  %21634 = vst [vmem:[#allocation38_spill] sm:$0xff] %v17619_v35  ;;  %v21636_v29 = vrot.slane %v17288_v9, 1  ;;  %v6212_v12 = vshll.u32 %v17531_v36, 16  ;;  %v17630_v15 = vpop.f32.mrf.mxu0  ;;  %v17634_v59 = vsel %vm1911_vm4, %v6144_v8, %v17580_v4  ;;  %v17638_v9 = vld [vmem:[%s16415_s27 + $0x60] sm:$0xff]  }
 0x11b   : > { %v6218_v63 = vshrl.u32 %v16194_v51, 16  ;;  %v6221_v35 = vshll.u32 %v16194_v51, 16  ;;  %v6202_v7 = vrot.slane %v6200_v38, 1  ;;  %v6205_v36 = vrot.slane %v6203_v41, 2  ;;  %v1131_v60 = vpop.f32.mrf.mxu1 }
 0x11c   : > { %v17626_v2 = vsel %vm1399_vm3, %v21636_v29, %v21635_v3  ;;  %v17641_v3 = vadd.f32 %v15441_v34, %v17481_v31  ;;  %v17643_v29 = vpop.permute.xlu1 %2497  ;;  %v15450_v8 = vpop.f32.mrf.mxu0  ;;  %15625 = vmatmul.mubr.msk.bf16.gmra.mxu0 %vm372_vm1, %v17484_v56  ;;  %v6161_v51 = vor.u32 %v17474_v18, %v17431_v57  ;;  %v21640_v43 = vrot.slane %v17410_v28, 1  ;;  %v17675_v56 = vld [vmem:[%s16415_s27 + $0x68] sm:$0xff]   ;;  %15659 = vmatmul.mubr.msk.bf16.gmra.mxu1 %vm372_vm1, %v17404_v22 }
 0x11d   : > { %21637 = vst [vmem:[#allocation39_spill] sm:$0xff] %v17626_v2  ;;  %21639 = vst [vmem:[#allocation41_spill] sm:$0xff] %v17643_v29  ;;  %v17645_v2 = vrot.slane %v6209_v27, 1  ;;  %v21641_v31 = vrot.slane %v17352_v53, 1  ;;  %v6227_v41 = vshrl.u32 %v16196_v55, 16  ;;  %v17661_v27 = vadd.f32 %v1131_v60, %v17505_v49  ;;  %15628 = vmatprep.mubr.msk.bf16.mxu0 %vm372_vm1, %v17508_v1  ;;  %v17668_v57 = vpop.permute.xlu0 %2502  ;;  %15662 = vmatprep.mubr.msk.bf16.mxu1 %vm372_vm1, %v17447_v30 }
 0x11e   : > { %21638 = vst [vmem:[#allocation40_spill] sm:$0xff] %v17641_v3  ;;  %v17664_v3 = vadd.f32 %v15450_v8, %v17006_v24  ;;  %21643 = vst [vmem:[#allocation43_spill] sm:$0xff] %v17668_v57  ;;  %v6170_v53 = vor.u32 %v17503_v32, %v17501_v21  ;;  %v17672_v18 = vrot.slane %v6212_v12, 2  ;;  %v1528_v49 = vpop.f32.mrf.mxu0  ;;  %v17679_v24 = vrot.slane %v6218_v63, 1  ;;  %v17700_v63 = vld [vmem:[%s16415_s27 + $0x70] sm:$0xff]  }
 0x11f   : > { %v17657_v34 = vsel %vm1399_vm3, %v21641_v31, %v21640_v43  ;;  %21642 = vst [vmem:[#allocation42_spill] sm:$0xff] %v17661_v27  ;;  %v15444_v43 = vpop.f32.mrf.mxu1  ;;  %v17681_v60 = vrot.slane %v6221_v35, 2  ;;  %v6230_v8 = vshll.u32 %v16196_v55, 16  ;;  %v17688_v32 = vadd.f32 %v1528_v49, %v17020_v40 }
 0x120   : > { %v17685_v31 = vadd.f32 %v15444_v43, %v17533_v47  ;;  %v21645_v22 = vrot.slane %v17424_v14, 1  ;;  %v21646_v21 = vrot.slane %v17410_v28, 1  ;;  %v6236_v12 = vshrl.u32 %v16198_v42, 16  ;;  %v15451_v47 = vpop.f32.mrf.mxu0 }
 0x121   : > { %v1144_v55 = vpop.f32.mrf.mxu1  ;;  %v17704_v40 = vsel %vm1911_vm4, %v17580_v4, %v6161_v51  ;;  %v6179_v30 = vor.u32 %v17512_v5, %v17510_v20  ;;  %v17708_v43 = vrot.slane %v6227_v41, 1  ;;  %v6239_v49 = vshll.u32 %v16198_v42, 16  ;;  %v16200_v5 = vld [vmem:[%s16415_s27 + $0x68] sm:$0xff]   ;;  %v17743_v20 = vpop.permute.xlu0 %2512 }
 0x122   : > { %21644 = vst [vmem:[#allocation44_spill] sm:$0xff] %v17685_v31  ;;  %v17697_v35 = vsel %vm1399_vm3, %v21646_v21, %v21645_v22  ;;  %v17711_v28 = vadd.f32 %v1144_v55, %v17567_v37  ;;  %v17714_v22 = vadd.f32 %v15451_v47, %v17035_v58  ;;  %v17716_v21 = vpop.permute.xlu1 %2507  ;;  %v21649_v1 = vrot.slane %v17457_v45, 1  ;;  %v1531_v41 = vpop.f32.mrf.mxu0  ;;  %v16202_v47 = vld [vmem:[%s16415_s27 + $0x70] sm:$0xff]   ;;  %21652 = vst [vmem:[#allocation48_spill] sm:$0xff] %v17743_v20 }
 0x123   : > { %21648 = vst [vmem:[#allocation46_spill] sm:$0xff] %v17716_v21  ;;  %v21650_v4 = vrot.slane %v17424_v14, 1  ;;  %v15445_v42 = vpop.f32.mrf.mxu1  ;;  %v17728_v37 = vsel %vm1911_vm4, %v6161_v51, %v6170_v53  ;;  %v6188_v58 = vor.u32 %v17560_v50, %v17538_v13  ;;  %v6197_v55 = vor.u32 %v17612_v61, %v17610_v33  ;;  %v17749_v13 = vld [vmem:[%s16415_s27 + $0x78] sm:$0xff]  }
 0x124   : > { %21647 = vst [vmem:[#allocation45_spill] sm:$0xff] %v17711_v28  ;;  %v17734_v14 = vrot.slane %v6230_v8, 2  ;;  %v17745_v51 = vrot.slane %v6236_v12, 1  ;;  %v15454_v33 = vpop.f32.mrf.mxu0  ;;  %15629 = vmatmul.mubr.msk.bf16.gmra.mxu0 %vm372_vm1, %v17520_v25  ;;  %v17754_v61 = vsel %vm1911_vm4, %v6170_v53, %v6179_v30  ;;  %v6206_v12 = vor.u32 %v6205_v36, %v6202_v7  ;;  %15663 = vmatmul.mubr.msk.bf16.gmra.mxu1 %vm372_vm1, %v17454_v6  ;;  %v17794_v6 = vld [vmem:[%s16415_s27 + $0x80] sm:$0xff]  }
 0x125   : > { %v17723_v38 = vsel %vm1399_vm3, %v21650_v4, %v21649_v1  ;;  %v17738_v1 = vadd.f32 %v15445_v42, %v17598_v23  ;;  %v17741_v4 = vadd.f32 %v1531_v41, %v17052_v11  ;;  %v1147_v50 = vpop.f32.mrf.mxu1  ;;  %21653 = vst [vmem:[#allocation49_spill] sm:$0xff] %v17754_v61  ;;  %v21654_v23 = vrot.slane %v17479_v54, 1  ;;  %v16204_v41 = vld [vmem:[%s16415_s27 + $0x78] sm:$0xff]   ;;  %15632 = vmatprep.mubr.msk.bf16.mxu0 %vm372_vm1, %v17549_v62 }
 0x126   : > { %v21655_v11 = vrot.slane %v17457_v45, 1  ;;  %v17763_v42 = vrot.slane %v6239_v49, 2  ;;  %v17767_v28 = vadd.f32 %v1147_v50, %v17630_v15  ;;  %v17770_v25 = vadd.f32 %v15454_v33, %v17073_v46  ;;  %v1544_v7 = vpop.f32.mrf.mxu0  ;;  %15666 = vmatprep.mubr.msk.bf16.mxu1 %vm372_vm1, %v17491_v44  ;;  %v17804_v54 = vpop.permute.xlu1 %2517 }
 0x127   : > { %21651 = vst [vmem:[#allocation47_spill] sm:$0xff] %v17738_v1  ;;  %v6245_v53 = vshrl.u32 %v16200_v5, 16  ;;  %v6248_v45 = vshll.u32 %v16200_v5, 16  ;;  %v15488_v1 = vpop.f32.mrf.mxu1  ;;  %v17777_v36 = vsel %vm1911_vm4, %v6179_v30, %v6188_v58  ;;  %v21658_v15 = vrot.slane %v17541_v10, 1 }
 0x128   : > { %v17761_v8 = vsel %vm1399_vm3, %v21655_v11, %v21654_v23  ;;  %21656 = vst [vmem:[#allocation50_spill] sm:$0xff] %v17767_v28  ;;  %21657 = vst [vmem:[#allocation51_spill] sm:$0xff] %v17777_v36  ;;  %v21659_v49 = vmov %v21654_v23  ;;  %v21661_v62 = vrot.slane %v17563_v39, 1  ;;  %v6254_v33 = vshrl.u32 %v16202_v47, 16  ;;  %v21664_v23 = vld [vmem:[#allocation3_spill] sm:$0xff]  ;;  %v21669_v28 = vld [vmem:[#allocation4_spill] sm:$0xff] }
 0x129   : > { %v17784_v46 = vsel %vm1399_vm3, %v21659_v49, %v21658_v15  ;;  %v21662_v50 = vmov %v21658_v15  ;;  %v17797_v30 = vadd.f32 %v15488_v1, %v17664_v3  ;;  %v17800_v11 = vadd.f32 %v1544_v7, %v21664_v23  ;;  %21665 = vst [vmem:[#allocation3_spill] sm:$0xff] %v17804_v54  ;;  %v17810_v49 = vld [vmem:[%s16415_s27 + $0x88] sm:$0xff]  }
 0x12a   : > { %21660 = vst [vmem:[#allocation52_spill] sm:$0xff] %v17784_v46  ;;  %v17791_v5 = vsel %vm1399_vm3, %v21662_v50, %v21661_v62  ;;  %v17807_v15 = vsel %vm1911_vm4, %v6188_v58, %v6197_v55  ;;  %v6257_v10 = vshll.u32 %v16202_v47, 16  ;;  %21667 = vst [vmem:[#allocation55_spill] sm:$0xff] %v17810_v49  ;;  %v2173_v62 = vpop.f32.mrf.mxu1  ;;  %v15455_v50 = vpop.f32.mrf.mxu0  ;;  %v17813_v3 = vsel %vm1911_vm4, %v6197_v55, %v6206_v12 }
 0x12b   : > { %21663 = vst [vmem:[#allocation53_spill] sm:$0xff] %v17791_v5  ;;  %21666 = vst [vmem:[#allocation54_spill] sm:$0xff] %v17807_v15  ;;  %v6215_v1 = vor.u32 %v17672_v18, %v17645_v2  ;;  %v6263_v7 = vshrl.u32 %v16204_v41, 16  ;;  %v6266_v44 = vshll.u32 %v16204_v41, 16  ;;  %v2352_v23 = vadd.f32 %v2173_v62, %v17688_v32  ;;  %v17819_v47 = vpop.permute.xlu0 %2522  ;;  %v17843_v62 = vld [vmem:[%s16415_s27 + $0x80] sm:$0xff]  }
 0x12c   : > { %21668 = vst [vmem:[#allocation56_spill] sm:$0xff] %v17813_v3  ;;  %v1714_v58 = vadd.f32 %v15455_v50, %v21669_v28  ;;  %21670 = vst [vmem:[#allocation4_spill] sm:$0xff] %v17819_v47  ;;  %v17821_v31 = vrot.slane %v6245_v53, 1  ;;  %v15489_v15 = vpop.f32.mrf.mxu1  ;;  %v1547_v55 = vpop.f32.mrf.mxu0  ;;  %v21671_v3 = vrot.slane %v17615_v17, 1  ;;  %v21672_v5 = vrot.slane %v17563_v39, 1  ;;  %v17846_v50 = vld [vmem:[%s16415_s27 + $0x90] sm:$0xff]   ;;  %15633 = vmatmul.mubr.msk.bf16.gmra.mxu0 %vm372_vm1, %v17601_v19  ;;  %15667 = vmatmul.mubr.msk.bf16.gmra.mxu1 %vm372_vm1, %v17527_v16 }
 0x12d   : > { %v21674_v18 = vrot.slane %v17638_v9, 1  ;;  %v17838_v41 = vrot.slane %v6248_v45, 2  ;;  %v17840_v53 = vrot.slane %v6254_v33, 1  ;;  %21677 = vst [vmem:[#allocation59_spill] sm:$0xff] %v17846_v50  ;;  %v2640_v39 = vmul.f32 %v17340_v48, %v2352_v23  ;;  %v17856_v17 = vld [vmem:[%s16415_s27 + $0x88] sm:$0xff]   ;;  %15676 = vmatprep.mubr.msk.bf16.mxu0 %vm372_vm1, %v17608_v0  ;;  %15670 = vmatprep.mubr.msk.bf16.mxu1 %vm372_vm1, %v17558_v26 }
 0x12e   : > { %v17829_v2 = vsel %vm1399_vm3, %v21672_v5, %v21671_v3  ;;  %v21675_v32 = vmov %v21671_v3  ;;  %v2355_v5 = vadd.f32 %v15489_v15, %v17714_v22  ;;  %v21678_v3 = vld [vmem:[#allocation5_spill] sm:$0xff]  ;;  %v15458_v45 = vpop.f32.mrf.mxu0  ;;  %v17875_v19 = vsel %vm1911_vm4, %v6206_v12, %v6215_v1  ;;  %v21686_v48 = vld [vmem:[#allocation24_spill] sm:$0xff] }
 0x12f   : > { %21673 = vst [vmem:[#allocation57_spill] sm:$0xff] %v17829_v2  ;;  %v17836_v28 = vsel %vm1399_vm3, %v21675_v32, %v21674_v18  ;;  %v17851_v27 = vadd.f32 %v1547_v55, %v21678_v3  ;;  %v17853_v2 = vrot.slane %v6257_v10, 2  ;;  %v2176_v18 = vpop.f32.mrf.mxu1  ;;  %v17861_v32 = vrot.slane %v6263_v7, 1  ;;  %v17872_v55 = vpop.permute.xlu1 %2527  ;;  %21683 = vst [vmem:[#allocation63_spill] sm:$0xff] %v17875_v19 }
 0x130   : > { %21676 = vst [vmem:[#allocation58_spill] sm:$0xff] %v17836_v28  ;;  %v17863_v28 = vrot.slane %v6266_v44, 2  ;;  %v17867_v15 = vpack.c.bf16 %v2355_v5, %v17797_v30  ;;  %v2353_v10 = vadd.f32 %v2176_v18, %v17741_v4  ;;  %21682 = vst [vmem:[#allocation62_spill] sm:$0xff] %v17872_v55  ;;  %v17879_v7 = vor.u32 %v17681_v60, %v17679_v24  ;;  %v21684_v44 = vld [vmem:[#allocation22_spill] sm:$0xff]  ;;  %v1560_v0 = vpop.f32.mrf.mxu0  ;;  %v17893_v24 = vpop.permute.xlu0 %2532 }
 0x131   : > { %21679 = vst [vmem:[#allocation5_spill] sm:$0xff] %v17861_v32  ;;  %v2642_v3 = vmul.f32 %v21684_v44, %v17797_v30  ;;  %v15492_v22 = vpop.f32.mrf.mxu1  ;;  %v21685_v4 = vld [vmem:[#allocation6_spill] sm:$0xff]  ;;  %v6272_v33 = vshrl.u32 %v17843_v62, 16  ;;  %v6275_v12 = vshll.u32 %v17843_v62, 16  ;;  %v6281_v16 = vshrl.u32 %v17856_v17, 16  ;;  %v21688_v44 = vld [vmem:[#allocation28_spill] sm:$0xff] }
 0x132   : > { %21680 = vst [vmem:[#allocation60_spill] sm:$0xff] %v17863_v28  ;;  %21681 = vst [vmem:[#allocation61_spill] sm:$0xff] %v17867_v15  ;;  %v17886_v18 = vadd.f32 %v15458_v45, %v21685_v4  ;;  %v2718_v15 = vmul.f32 %v2640_v39, %v2352_v23  ;;  %v2641_v19 = vmul.f32 %v21686_v48, %v2353_v10  ;;  %v21690_v32 = vld [vmem:[#allocation7_spill] sm:$0xff]  ;;  %v15459_v48 = vpop.f32.mrf.mxu0 }
 0x133   : > { %21687 = vst [vmem:[#allocation6_spill] sm:$0xff] %v17893_v24  ;;  %v2643_v45 = vmul.f32 %v21688_v44, %v2355_v5  ;;  %v17898_v4 = vpack.c.bf16 %v2353_v10, %v2352_v23  ;;  %v17901_v28 = vadd.f32 %v15492_v22, %v17770_v25  ;;  %v2189_v62 = vpop.f32.mrf.mxu1  ;;  %v1715_v46 = vadd.f32 %v1560_v0, %v21690_v32  ;;  %v21691_v24 = vld [vmem:[#allocation8_spill] sm:$0xff]  ;;  %v21695_v0 = vld [vmem:[#allocation9_spill] sm:$0xff] }
 0x134   : > { %v2676_v36 = vadd.f32 %v2641_v19, %v2640_v39  ;;  %v2719_v55 = vmul.f32 %v2641_v19, %v2353_v10  ;;  %v2356_v26 = vadd.f32 %v2189_v62, %v17800_v11  ;;  %v1718_v61 = vadd.f32 %v15459_v48, %v21691_v24  ;;  %v1563_v49 = vpop.f32.mrf.mxu0  ;;  %v17923_v19 = vpop.permute.xlu1 %2537 }
 0x135   : > { %21689 = vst [vmem:[#allocation64_spill] sm:$0xff] %v17898_v4  ;;  %v2720_v60 = vmul.f32 %v2642_v3, %v17797_v30  ;;  %v15493_v50 = vpop.f32.mrf.mxu1  ;;  %v17909_v23 = vsel %vm1911_vm4, %v6215_v1, %v17879_v7  ;;  %v17913_v25 = vor.u32 %v17734_v14, %v17708_v43  ;;  %v21692_v32 = vrot.slane %v17675_v56, 1  ;;  %21694 = vst [vmem:[#allocation7_spill] sm:$0xff] %v17923_v19  ;;  %v21696_v14 = vld [vmem:[#allocation37_spill] sm:$0xff]  ;;  %v17949_v56 = vpop.permute.xlu0 %2542 }
 0x136   : > { %v21693_v39 = vrot.slane %v17638_v9, 1  ;;  %v2677_v48 = vadd.f32 %v2676_v36, %v2642_v3  ;;  %v2754_v22 = vadd.f32 %v2719_v55, %v2718_v15  ;;  %v2644_v30 = vmul.f32 %v17499_v52, %v2356_v26  ;;  %v15462_v43 = vpop.f32.mrf.mxu0  ;;  %15677 = vmatmul.mubr.msk.bf16.vlgmr.msra.gmra.mxu0 %vm372_vm1, %v21696_v14  ;;  %21702 = vst [vmem:[#allocation37_spill] sm:$0xff] %v17949_v56 }
 0x137   : > { %v2359_v10 = vadd.f32 %v15493_v50, %v1714_v58  ;;  %v2192_v1 = vpop.f32.mrf.mxu1  ;;  %v17926_v24 = vadd.f32 %v1563_v49, %v21695_v0  ;;  %v21697_v9 = vrot.slane %v17700_v63, 1  ;;  %v21698_v62 = vmov %v21692_v32  ;;  %v17943_v49 = vld [vmem:[%s21358_s1 + $0x18] sm:$0x3] }
 0x138   : > { %v17920_v11 = vsel %vm1399_vm3, %v21693_v39, %v21692_v32  ;;  %v17937_v15 = vrot.slane %v6272_v33, 1  ;;  %v6284_v58 = vshll.u32 %v17856_v17, 16  ;;  %v2721_v50 = vmul.f32 %v2643_v45, %v2355_v5  ;;  %v21701_v39 = vld [vmem:[#allocation20_spill] sm:$0xff]  ;;  %v21705_v5 = vld [vmem:[#allocation10_spill] sm:$0xff]  ;;  %v17979_v52 = vpop.permute.xlu1 %2547 }
 0x139   : > { %v17935_v36 = vsel %vm1399_vm3, %v21698_v62, %v21697_v9  ;;  %v2755_v55 = vadd.f32 %v2754_v22, %v2720_v60  ;;  %v2678_v3 = vadd.f32 %v2677_v48, %v2643_v45  ;;  %v17946_v32 = vpack.c.bf16 %v2359_v10, %v17901_v28  ;;  %15751 = vmatpush3.bf16.msra.mxu0 %v21701_v39  ;;  %v21703_v33 = vld [vmem:[#allocation36_spill] sm:$0xff]  ;;  %v15496_v14 = vpop.f32.mrf.mxu1  ;;  %v21704_v9 = vld [vmem:[#allocation34_spill] sm:$0xff]  ;;  %v1576_v45 = vpop.f32.mrf.mxu0  ;;  %v21706_v48 = vld [vmem:[#allocation39_spill] sm:$0xff] }
 0x13a   : > { %21699 = vst [vmem:[#allocation8_spill] sm:$0xff] %v17935_v36  ;;  %v2646_v0 = vmul.f32 %v21703_v33, %v17901_v28  ;;  %v2357_v17 = vadd.f32 %v2192_v1, %v17851_v27  ;;  %15671 = vmatmul.mubr.msk.bf16.gmra.mxu1 %vm372_vm1, %v21704_v9  ;;  %v1721_v60 = vadd.f32 %v15462_v43, %v21705_v5  ;;  %v17959_v22 = vrot.slane %v6275_v12, 2  ;;  %v17966_v27 = vld [vmem:[%s16415_s27 + $0x90] sm:$0xff]  }
 0x13b   : > { %21700 = vst [vmem:[#allocation9_spill] sm:$0xff] %v17946_v32  ;;  %15680 = vmatprep.mubr.msk.bf16.mxu0 %vm372_vm1, %v21706_v48  ;;  %v2679_v62 = vadd.f32 %v2678_v3, %v2644_v30  ;;  %v2722_v39 = vmul.f32 %v2644_v30, %v2356_v26  ;;  %v2756_v32 = vadd.f32 %v2755_v55, %v2721_v50  ;;  %v17963_v4 = vrot.slane %v6281_v16, 1  ;;  %v21708_v43 = vld [vmem:[#allocation33_spill] sm:$0xff]  ;;  %v2205_v30 = vpop.f32.mrf.mxu1  ;;  %v15463_v50 = vpop.f32.mrf.mxu0  ;;  %v21710_v16 = vld [vmem:[#allocation11_spill] sm:$0xff]  ;;  %v21711_v48 = vld [vmem:[#allocation12_spill] sm:$0xff] }
 0x13c   : > { %15714 = vmatprep.mubr.msk.bf16.mxu1 %vm372_vm1, %v17634_v59  ;;  %15990 = vmatprep.subr.msk.bf16.mxu0 %vm427_vm0, %v17943_v49  ;;  %v2647_v1 = vmul.f32 %v17643_v29, %v2359_v10  ;;  %v2645_v9 = vmul.f32 %v21708_v43, %v2357_v17  ;;  %v17972_v5 = vpack.c.bf16 %v2357_v17, %v2356_v26 }
 0x13d   : > { %21707 = vst [vmem:[#allocation20_spill] sm:$0xff] %v17963_v4  ;;  %v17975_v12 = vadd.f32 %v15496_v14, %v17886_v18  ;;  %v2757_v55 = vadd.f32 %v2756_v32, %v2722_v39  ;;  %v2360_v59 = vadd.f32 %v2205_v30, %v1715_v46  ;;  %v1719_v3 = vadd.f32 %v1576_v45, %v21710_v16  ;;  %v15497_v29 = vpop.f32.mrf.mxu1  ;;  %v1579_v36 = vpop.f32.mrf.mxu0  ;;  %v21713_v14 = vld [vmem:[#allocation13_spill] sm:$0xff] }
 0x13e   : > { %21709 = vst [vmem:[#allocation34_spill] sm:$0xff] %v17972_v5  ;;  %v1722_v33 = vadd.f32 %v15463_v50, %v21711_v48  ;;  %21712 = vst [vmem:[#allocation10_spill] sm:$0xff] %v17979_v52  ;;  %v2680_v44 = vadd.f32 %v2679_v62, %v2645_v9  ;;  %v2723_v4 = vmul.f32 %v2645_v9, %v2357_v17  ;;  %v17992_v39 = vpop.permute.xlu0 %2552  ;;  %v17994_v62 = vrot.slane %v6284_v58, 2  ;;  %v21740_v5 = vld [vmem:[#allocation21_spill] sm:$0xff] }
 0x13f   : > { %v17984_v26 = vsel %vm1911_vm4, %v17879_v7, %v17913_v25  ;;  %v6242_v18 = vor.u32 %v17763_v42, %v17745_v51  ;;  %v2648_v46 = vmul.f32 %v17668_v57, %v2360_v59  ;;  %v17989_v32 = vadd.f32 %v15497_v29, %v1718_v61  ;;  %21714 = vst [vmem:[#allocation39_spill] sm:$0xff] %v17992_v39  ;;  %v2208_v50 = vpop.f32.mrf.mxu1  ;;  %v15466_v7 = vpop.f32.mrf.mxu0  ;;  %v18003_v29 = vld [vmem:[%s21358_s1 + $0x1a] sm:$0x3] }
 0x140   : > { %v1720_v45 = vadd.f32 %v1579_v36, %v21713_v14  ;;  %v2724_v17 = vmul.f32 %v2646_v0, %v17901_v28  ;;  %v2681_v9 = vadd.f32 %v2680_v44, %v2646_v0  ;;  %v2758_v30 = vadd.f32 %v2757_v55, %v2723_v4  ;;  %15681 = vmatmul.mubr.msk.bf16.gmra.mxu0 %vm372_vm1, %v17657_v34 }
 0x141   : > { %v2725_v61 = vmul.f32 %v2647_v1, %v2359_v10  ;;  %v18007_v42 = vpack.c.bf16 %v17989_v32, %v17975_v12  ;;  %15684 = vmatprep.mubr.msk.bf16.mxu0 %vm372_vm1, %v17697_v35  ;;  %v18013_v28 = vor.u32 %v17838_v41, %v17821_v31  ;;  %v21716_v34 = vrot.slane %v17749_v13, 1  ;;  %v15500_v0 = vpop.f32.mrf.mxu1  ;;  %v21718_v35 = vld [vmem:[#allocation14_spill] sm:$0xff]  ;;  %v1592_v16 = vpop.f32.mrf.mxu0 }
 0x142   : > { %v21717_v44 = vrot.slane %v17700_v63, 1  ;;  %v2759_v36 = vadd.f32 %v2758_v30, %v2724_v17  ;;  %v2682_v10 = vadd.f32 %v2681_v9, %v2647_v1  ;;  %v2361_v58 = vadd.f32 %v2208_v50, %v17926_v24  ;;  %15715 = vmatmul.mubr.msk.bf16.vlgmr.msra.gmra.mxu1 %vm372_vm1, %v17704_v40  ;;  %v21719_v63 = vld [vmem:[#allocation25_spill] sm:$0xff]  ;;  %v18033_v1 = vpop.permute.xlu1 %2557 }
 0x143   : > { %21715 = vst [vmem:[#allocation11_spill] sm:$0xff] %v18007_v42  ;;  %v1725_v55 = vadd.f32 %v15466_v7, %v21718_v35  ;;  %v2650_v31 = vmul.f32 %v17743_v20, %v17975_v12  ;;  %v2726_v41 = vmul.f32 %v2648_v46, %v2360_v59  ;;  %v18028_v48 = vadd.f32 %v15500_v0, %v1721_v60  ;;  %v2221_v30 = vpop.f32.mrf.mxu1  ;;  %v15467_v50 = vpop.f32.mrf.mxu0  ;;  %v21722_v7 = vld [vmem:[#allocation15_spill] sm:$0xff] }
 0x144   : > { %v18020_v4 = vsel %vm1399_vm3, %v21717_v44, %v21716_v34  ;;  %15789 = vmatpush3.bf16.msra.mxu1 %v21719_v63  ;;  %15718 = vmatprep.mubr.msk.bf16.mxu1 %vm372_vm1, %v17728_v37  ;;  %21720 = vst [vmem:[#allocation12_spill] sm:$0xff] %v18033_v1  ;;  %v2683_v14 = vadd.f32 %v2682_v10, %v2648_v46  ;;  %v21723_v44 = vld [vmem:[#allocation16_spill] sm:$0xff]  ;;  %v18043_v0 = vpop.permute.xlu0 %2562 }
 0x145   : > { %v2760_v40 = vadd.f32 %v2759_v36, %v2725_v61  ;;  %v2649_v17 = vmul.f32 %v17716_v21, %v2361_v58  ;;  %v18037_v9 = vpack.c.bf16 %v2361_v58, %v2360_v59  ;;  %15991 = vmatprep.subr.msk.bf16.mxu1 %vm427_vm0, %v18003_v29  ;;  %v2364_v60 = vadd.f32 %v2221_v30, %v1719_v3  ;;  %v15501_v35 = vpop.f32.mrf.mxu1  ;;  %v1595_v63 = vpop.f32.mrf.mxu0 }
 0x146   : > { %v1723_v34 = vadd.f32 %v1592_v16, %v21722_v7  ;;  %v1726_v37 = vadd.f32 %v15467_v50, %v21723_v44  ;;  %21724 = vst [vmem:[#allocation14_spill] sm:$0xff] %v18043_v0  ;;  %v18047_v46 = vsel %vm1911_vm4, %v17913_v25, %v6242_v18  ;;  %v2651_v59 = vmul.f32 %v17804_v54, %v17989_v32 }
 0x147   : > { %21721 = vst [vmem:[#allocation13_spill] sm:$0xff] %v18037_v9  ;;  %v2761_v61 = vadd.f32 %v2760_v40, %v2726_v41  ;;  %v2684_v36 = vadd.f32 %v2683_v14, %v2649_v17  ;;  %v2727_v10 = vmul.f32 %v2649_v17, %v2361_v58  ;;  %v2652_v3 = vmul.f32 %v17819_v47, %v2364_v60  ;;  %v2224_v7 = vpop.f32.mrf.mxu1  ;;  %v21725_v14 = vld [vmem:[#allocation17_spill] sm:$0xff]  ;;  %v15470_v17 = vpop.f32.mrf.mxu0 }
 0x148   : > { %v2367_v16 = vadd.f32 %v15501_v35, %v1722_v33  ;;  %v18054_v30 = vsel %vm1911_vm4, %v6242_v18, %v18013_v28  ;;  %v18058_v25 = vor.u32 %v17853_v2, %v17840_v53  ;;  %v2728_v41 = vmul.f32 %v2650_v31, %v17975_v12  ;;  %15685 = vmatmul.mubr.msk.bf16.gmra.mxu0 %vm372_vm1, %v17723_v38  ;;  %v18065_v33 = vld [vmem:[%s16415_s27 + $0x98] ss:$0 sps:$4 sm:$0x11]   ;;  %v18072_v2 = vpop.permute.xlu1 %2567 }
 0x149   : > { %v2685_v40 = vadd.f32 %v2684_v36, %v2650_v31  ;;  %v2762_v50 = vadd.f32 %v2761_v61, %v2727_v10  ;;  %v1724_v58 = vadd.f32 %v1595_v63, %v21725_v14  ;;  %v2365_v44 = vadd.f32 %v2224_v7, %v1720_v45  ;;  %15688 = vmatprep.mubr.msk.bf16.mxu0 %vm372_vm1, %v17761_v8  ;;  %v21730_v61 = vld [vmem:[#allocation55_spill] sm:$0xff]  ;;  %v15504_v63 = vpop.f32.mrf.mxu1  ;;  %v21733_v7 = vld [vmem:[#allocation49_spill] sm:$0xff]  ;;  %v1608_v24 = vpop.f32.mrf.mxu0 }
 0x14a   : > { %v18068_v18 = vpack.c.bf16 %v2367_v16, %v18028_v48  ;;  %21727 = vst [vmem:[#allocation15_spill] sm:$0xff] %v18072_v2  ;;  %v21728_v53 = vrot.slane %v17794_v6, 1  ;;  %v21729_v12 = vrot.slane %v17749_v13, 1  ;;  %v21731_v38 = vrot.slane %v21730_v61, 1  ;;  %15719 = vmatmul.mubr.msk.bf16.gmra.mxu1 %vm372_vm1, %v21733_v7  ;;  %v21734_v14 = vld [vmem:[#allocation19_spill] sm:$0xff] }
 0x14b   : > { %v2729_v45 = vmul.f32 %v2651_v59, %v17989_v32  ;;  %v2763_v35 = vadd.f32 %v2762_v50, %v2728_v41  ;;  %v2686_v8 = vadd.f32 %v2685_v40, %v2651_v59  ;;  %v1729_v13 = vadd.f32 %v15470_v17, %v21734_v14  ;;  %v21737_v32 = vld [vmem:[#allocation51_spill] sm:$0xff]  ;;  %v18101_v59 = vpop.permute.xlu0 %2572  ;;  %v2237_v7 = vpop.f32.mrf.mxu1 }
 0x14c   : > { %21726 = vst [vmem:[#allocation25_spill] sm:$0xff] %v18068_v18  ;;  %v18079_v31 = vsel %vm1399_vm3, %v21729_v12, %v21728_v53  ;;  %v21732_v36 = vmov %v21728_v53  ;;  %v18093_v53 = vld [vmem:[%s16415_s27 + $0x98] ss:$0 sps:$4 sm:$0x33]   ;;  %v2730_v6 = vmul.f32 %v2652_v3, %v2364_v60  ;;  %15722 = vmatprep.mubr.msk.bf16.mxu1 %vm372_vm1, %v21737_v32  ;;  %21738 = vst [vmem:[#allocation16_spill] sm:$0xff] %v18101_v59  ;;  %v15471_v14 = vpop.f32.mrf.mxu0 }
 0x14d   : > { %v18086_v10 = vsel %vm1399_vm3, %v21732_v36, %v21731_v38  ;;  %v21735_v12 = vld [vmem:[#allocation6_spill] sm:$0xff]  ;;  %v2655_v38 = vmul.f32 %v17923_v19, %v2367_v16  ;;  %v2687_v41 = vadd.f32 %v2686_v8, %v2652_v3  ;;  %v2764_v40 = vadd.f32 %v2763_v35, %v2729_v45  ;;  %v21741_v19 = vld [vmem:[#allocation23_spill] sm:$0xff]  ;;  %v15505_v54 = vpop.f32.mrf.mxu1 }
 0x14e   : > { %v2654_v51 = vmul.f32 %v21735_v12, %v18028_v48  ;;  %v21736_v36 = vld [vmem:[#allocation62_spill] sm:$0xff]  ;;  %v18103_v50 = vpack.c.bf16 %v2365_v44, %v2364_v60  ;;  %v18105_v17 = vadd.f32 %v15504_v63, %v1725_v55  ;;  %v2368_v42 = vadd.f32 %v2237_v7, %v1723_v34  ;;  %v1611_v32 = vpop.f32.mrf.mxu0 }
 0x14f   : > { %v2653_v18 = vmul.f32 %v21736_v36, %v2365_v44  ;;  %v1727_v12 = vadd.f32 %v1608_v24, %v21740_v5  ;;  %v1730_v47 = vadd.f32 %v15471_v14, %v21741_v19  ;;  %v2765_v36 = vadd.f32 %v2764_v40, %v2730_v6  ;;  %v18118_v5 = vpop.permute.xlu1 %2577  ;;  %v2240_v63 = vpop.f32.mrf.mxu1 }
 0x150   : > { %21739 = vst [vmem:[#allocation17_spill] sm:$0xff] %v18103_v50  ;;  %v21742_v3 = vshrl.u32 %v17966_v27, 16  ;;  %v2656_v55 = vmul.f32 %v17949_v56, %v2368_v42  ;;  %v18115_v45 = vadd.f32 %v15505_v54, %v1726_v37  ;;  %21744 = vst [vmem:[#allocation55_spill] sm:$0xff] %v18118_v5  ;;  %v21745_v19 = vshll.u32 %v17966_v27, 16  ;;  %v15474_v6 = vpop.f32.mrf.mxu0  ;;  %v18132_v7 = vpop.permute.xlu0 %2582  ;;  %v21749_v27 = vld [vmem:[#allocation53_spill] sm:$0xff] }
 0x151   : > { %v2731_v9 = vmul.f32 %v2653_v18, %v2365_v44  ;;  %v2688_v21 = vadd.f32 %v2687_v41, %v2653_v18  ;;  %v21743_v44 = vld [vmem:[#allocation26_spill] sm:$0xff]  ;;  %v2732_v18 = vmul.f32 %v2654_v51, %v18028_v48  ;;  %v21746_v41 = vld [vmem:[#allocation52_spill] sm:$0xff]  ;;  %v2733_v37 = vmul.f32 %v2655_v38, %v2367_v16  ;;  %21748 = vst [vmem:[#allocation19_spill] sm:$0xff] %v18132_v7  ;;  %v18146_v16 = vld [vmem:[%s16415_s27 + $0x10] sm:$0xfc]  }
 0x152   : > { %v18112_v60 = vrot.slane %v21742_v3, 1  ;;  %v1728_v34 = vadd.f32 %v1611_v32, %v21743_v44  ;;  %v18122_v24 = vrot.slane %v21745_v19, 2  ;;  %15689 = vmatmul.mubr.msk.bf16.gmra.mxu0 %vm372_vm1, %v21746_v41  ;;  %v18130_v40 = vpack.c.bf16 %v18115_v45, %v18105_v17  ;;  %v21751_v48 = vld [vmem:[#allocation60_spill] sm:$0xff]  ;;  %v15508_v3 = vpop.f32.mrf.mxu1  ;;  %v21752_v44 = vld [vmem:[#allocation54_spill] sm:$0xff]  ;;  %v21753_v19 = vld [vmem:[#allocation27_spill] sm:$0xff] }
 0x153   : > { %v2689_v35 = vadd.f32 %v2688_v21, %v2654_v51  ;;  %v2766_v8 = vadd.f32 %v2765_v36, %v2731_v9  ;;  %15692 = vmatprep.mubr.msk.bf16.mxu0 %vm372_vm1, %v21749_v27  ;;  %v18139_v21 = vsel %vm1911_vm4, %v18013_v28, %v18058_v25  ;;  %v21750_v51 = vld [vmem:[#allocation5_spill] sm:$0xff]  ;;  %v2369_v32 = vadd.f32 %v2240_v63, %v1724_v58  ;;  %v1624_v27 = vpop.f32.mrf.mxu0  ;;  %v18166_v50 = vpop.permute.xlu1 %2587 }
 0x154   : > { %21747 = vst [vmem:[#allocation49_spill] sm:$0xff] %v18130_v40  ;;  %v18143_v9 = vor.u32 %v21751_v48, %v21750_v51  ;;  %15723 = vmatmul.mubr.msk.bf16.gmra.mxu1 %vm372_vm1, %v21752_v44  ;;  %v1733_v41 = vadd.f32 %v15474_v6, %v21753_v19  ;;  %v2658_v28 = vmul.f32 %v17992_v39, %v18105_v17  ;;  %v21754_v51 = vld [vmem:[#allocation56_spill] sm:$0xff]  ;;  %v2253_v6 = vpop.f32.mrf.mxu1  ;;  %v21756_v19 = vld [vmem:[#allocation29_spill] sm:$0xff]  ;;  %21758 = vst [vmem:[#allocation21_spill] sm:$0xff] %v18166_v50 }
 0x155   : > { %v2767_v36 = vadd.f32 %v2766_v8, %v2732_v18  ;;  %v2690_v14 = vadd.f32 %v2689_v35, %v2655_v38  ;;  %v2734_v20 = vmul.f32 %v2656_v55, %v2368_v42  ;;  %v18153_v54 = vadd.f32 %v15508_v3, %v1729_v13  ;;  %15726 = vmatprep.mubr.msk.bf16.mxu1 %vm372_vm1, %v21754_v51  ;;  %v18159_v38 = vld [vmem:[%s16415_s27 + $0x18] sm:$0xff]   ;;  %v15475_v48 = vpop.f32.mrf.mxu0  ;;  %v21757_v13 = vld [vmem:[#allocation31_spill] sm:$0xff] }
 0x156   : > { %v2657_v8 = vmul.f32 %v17979_v52, %v2369_v32  ;;  %v18162_v63 = vpack.c.bf16 %v2369_v32, %v2368_v42  ;;  %v2372_v44 = vadd.f32 %v2253_v6, %v1727_v12  ;;  %v1731_v40 = vadd.f32 %v1624_v27, %v21756_v19  ;;  %v21759_v51 = vld [vmem:[#allocation59_spill] sm:$0xff]  ;;  %v15509_v12 = vpop.f32.mrf.mxu1  ;;  %v18178_v19 = vpop.permute.xlu0 %2592 }
 0x157   : > { %v2691_v58 = vadd.f32 %v2690_v14, %v2656_v55  ;;  %v2768_v35 = vadd.f32 %v2767_v36, %v2733_v37  ;;  %v1734_v3 = vadd.f32 %v15475_v48, %v21757_v13  ;;  %v21760_v39 = vrot.slane %v21759_v51, 1  ;;  %v1627_v6 = vpop.f32.mrf.mxu0  ;;  %21762 = vst [vmem:[#allocation23_spill] sm:$0xff] %v18178_v19 }
 0x158   : > { %21755 = vst [vmem:[#allocation51_spill] sm:$0xff] %v18162_v63  ;;  %v21761_v18 = vrot.slane %v21730_v61, 1  ;;  %v2659_v42 = vmul.f32 %v18033_v1, %v18115_v45  ;;  %v2735_v14 = vmul.f32 %v2657_v8, %v2369_v32  ;;  %v2660_v27 = vmul.f32 %v18043_v0, %v2372_v44  ;;  %v21763_v63 = vld [vmem:[#allocation32_spill] sm:$0xff]  ;;  %v21766_v0 = vld [vmem:[#allocation58_spill] sm:$0xff] }
 0x159   : > { %v2769_v37 = vadd.f32 %v2768_v35, %v2734_v20  ;;  %v2692_v36 = vadd.f32 %v2691_v58, %v2657_v8  ;;  %v2375_v48 = vadd.f32 %v15509_v12, %v1730_v47  ;;  %v2256_v35 = vpop.f32.mrf.mxu1  ;;  %v1732_v58 = vadd.f32 %v1627_v6, %v21763_v63  ;;  %v15478_v32 = vpop.f32.mrf.mxu0  ;;  %v21764_v8 = vld [vmem:[#allocation57_spill] sm:$0xff]  ;;  %v21767_v6 = vld [vmem:[#allocation63_spill] sm:$0xff] }
 0x15a   : > { %v18173_v55 = vsel %vm1399_vm3, %v21761_v18, %v21760_v39  ;;  %v2736_v39 = vmul.f32 %v2658_v28, %v18105_v17  ;;  %15693 = vmatmul.mubr.msk.bf16.gmra.mxu0 %vm372_vm1, %v21764_v8  ;;  %v2373_v12 = vadd.f32 %v2256_v35, %v1728_v34  ;;  %v18194_v17 = vsel %vm1911_vm4, %v18058_v25, %v18143_v9  ;;  %v21768_v34 = vld [vmem:[#allocation35_spill] sm:$0xff]  ;;  %v18221_v52 = vpop.permute.xlu0 %2602 }
 0x15b   : > { %v2693_v18 = vadd.f32 %v2692_v36, %v2658_v28  ;;  %v2770_v20 = vadd.f32 %v2769_v37, %v2735_v14  ;;  %v18187_v47 = vpack.c.bf16 %v2375_v48, %v18153_v54  ;;  %15696 = vmatprep.mubr.msk.bf16.mxu0 %vm372_vm1, %v21766_v0  ;;  %v18198_v28 = vor.u32 %v17959_v22, %v17937_v15  ;;  %v15512_v14 = vpop.f32.mrf.mxu1  ;;  %v1640_v0 = vpop.f32.mrf.mxu0  ;;  %v18205_v8 = vld [vmem:[%s16415_s27 + $0x20] sm:$0xff]  }
 0x15c   : > { %v2737_v63 = vmul.f32 %v2659_v42, %v18115_v45  ;;  %15727 = vmatmul.mubr.msk.bf16.gmra.mxu1 %vm372_vm1, %v21767_v6  ;;  %v1737_v35 = vadd.f32 %v15478_v32, %v21768_v34  ;;  %v2662_v25 = vmul.f32 %v18101_v59, %v18153_v54  ;;  %v2738_v13 = vmul.f32 %v2660_v27, %v2372_v44  ;;  %v18211_v45 = vpop.permute.xlu1 %2597  ;;  %v21772_v59 = vld [vmem:[#allocation40_spill] sm:$0xff] }
 0x15d   : > { %21765 = vst [vmem:[#allocation26_spill] sm:$0xff] %v18187_v47  ;;  %v2771_v37 = vadd.f32 %v2770_v20, %v2736_v39  ;;  %v2694_v36 = vadd.f32 %v2693_v18, %v2659_v42  ;;  %v2663_v15 = vmul.f32 %v18118_v5, %v2375_v48  ;;  %v2661_v22 = vmul.f32 %v18072_v2, %v2373_v12  ;;  %v2269_v32 = vpop.f32.mrf.mxu1  ;;  %v15479_v6 = vpop.f32.mrf.mxu0  ;;  %v21771_v47 = vld [vmem:[#allocation38_spill] sm:$0xff] }
 0x15e   : > { %21769 = vst [vmem:[#allocation52_spill] sm:$0xff] %v18211_v45  ;;  %15730 = vmatprep.mubr.msk.bf16.mxu1 %vm372_vm1, %v17909_v23  ;;  %v18215_v18 = vpack.c.bf16 %v2373_v12, %v2372_v44  ;;  %v18217_v20 = vadd.f32 %v15512_v14, %v1733_v41  ;;  %v2376_v61 = vadd.f32 %v2269_v32, %v1731_v40  ;;  %21773 = vst [vmem:[#allocation5_spill] sm:$0xff] %v18221_v52  ;;  %v21775_v40 = vld [vmem:[#allocation42_spill] sm:$0xff] }
 0x15f   : > { %v2695_v42 = vadd.f32 %v2694_v36, %v2660_v27  ;;  %v2772_v39 = vadd.f32 %v2771_v37, %v2737_v63  ;;  %v2739_v34 = vmul.f32 %v2661_v22, %v2373_v12  ;;  %v1735_v5 = vadd.f32 %v1640_v0, %v21771_v47  ;;  %v15513_v23 = vpop.f32.mrf.mxu1  ;;  %v1643_v27 = vpop.f32.mrf.mxu0 }
 0x160   : > { %21770 = vst [vmem:[#allocation53_spill] sm:$0xff] %v18215_v18  ;;  %v1738_v2 = vadd.f32 %v15479_v6, %v21772_v59  ;;  %v21774_v44 = vshrl.u32 %v18093_v53, 16  ;;  %v2664_v37 = vmul.f32 %v18132_v7, %v2376_v61  ;;  %v18229_v12 = vadd.f32 %v15513_v23, %v1734_v3  ;;  %v18250_v6 = vpop.permute.xlu1 %2607  ;;  %v21779_v23 = vld [vmem:[#allocation8_spill] sm:$0xff] }
 0x161   : > { %v2773_v1 = vadd.f32 %v2772_v39, %v2738_v13  ;;  %v2696_v56 = vadd.f32 %v2695_v42, %v2661_v22  ;;  %v1736_v47 = vadd.f32 %v1643_v27, %v21775_v40  ;;  %v21776_v59 = vshll.u32 %v18093_v53, 16  ;;  %v18237_v13 = vld [vmem:[%s16415_s27 + $0x18] sm:$0xff]   ;;  %v2272_v42 = vpop.f32.mrf.mxu1  ;;  %v15482_v39 = vpop.f32.mrf.mxu0  ;;  %21778 = vst [vmem:[#allocation54_spill] sm:$0xff] %v18250_v6  ;;  %v16241_v7 = vld [vmem:[%s16415_s27 + $0x88] sm:$0xff]  }
 0x162   : > { %v18225_v63 = vrot.slane %v21774_v44, 1  ;;  %v2740_v14 = vmul.f32 %v2662_v25, %v18153_v54  ;;  %15697 = vmatmul.mubr.msk.bf16.gmra.mxu0 %vm372_vm1, %v17920_v11  ;;  %v18244_v3 = vsel %vm427_vm0, %v17943_v49, 0  ;;  %v2741_v32 = vmul.f32 %v2663_v15, %v2375_v48  ;;  %v21783_v44 = vld [vmem:[#allocation44_spill] sm:$0xff] }
 0x163   : > { %v18234_v36 = vrot.slane %v21776_v59, 2  ;;  %v2697_v0 = vadd.f32 %v2696_v56, %v2662_v25  ;;  %v2774_v22 = vadd.f32 %v2773_v1, %v2739_v34  ;;  %v18248_v53 = vpack.c.bf16 %v18229_v12, %v18217_v20  ;;  %15700 = vmatprep.mubr.msk.bf16.mxu0 %vm372_vm1, %v21779_v23  ;;  %v21780_v56 = vld [vmem:[#allocation20_spill] sm:$0xff]  ;;  %v15516_v27 = vpop.f32.mrf.mxu1  ;;  %v1656_v59 = vpop.f32.mrf.mxu0 }
 0x164   : > { %v18256_v1 = vor.u32 %v17994_v62, %v21780_v56  ;;  %v21781_v11 = vrot.slane %v18065_v33, 1  ;;  %v21782_v54 = vrot.slane %v21759_v51, 1  ;;  %v2377_v34 = vadd.f32 %v2272_v42, %v1732_v58  ;;  %15731 = vmatmul.mubr.msk.bf16.gmra.mxu1 %vm372_vm1, %v17984_v26  ;;  %v18272_v51 = vpop.permute.xlu0 %2612  ;;  %v21786_v56 = vld [vmem:[#allocation45_spill] sm:$0xff] }
 0x165   : > { %21777 = vst [vmem:[#allocation60_spill] sm:$0xff] %v18248_v53  ;;  %v2775_v48 = vadd.f32 %v2774_v22, %v2740_v14  ;;  %v2698_v25 = vadd.f32 %v2697_v0, %v2663_v15  ;;  %v1741_v40 = vadd.f32 %v15482_v39, %v21783_v44  ;;  %v2666_v62 = vmul.f32 %v18178_v19, %v18217_v20  ;;  %v2285_v22 = vpop.f32.mrf.mxu1  ;;  %v15483_v42 = vpop.f32.mrf.mxu0  ;;  %v16215_v44 = vld [vmem:[%s16415_s27 + $0x10] sm:$0xfc]  }
 0x166   : > { %v18263_v49 = vsel %vm1399_vm3, %v21782_v54, %v21781_v11  ;;  %v2742_v23 = vmul.f32 %v2664_v37, %v2376_v61  ;;  %v18270_v33 = vadd.f32 %v15516_v27, %v1737_v35  ;;  %21784 = vst [vmem:[#allocation27_spill] sm:$0xff] %v18272_v51  ;;  %15734 = vmatprep.mubr.msk.bf16.mxu1 %vm372_vm1, %v18047_v46  ;;  %v7302_v58 = vshrl.u32 %v18237_v13, 16  ;;  %v21787_v11 = vld [vmem:[#allocation47_spill] sm:$0xff] }
 0x167   : > { %v2699_v15 = vadd.f32 %v2698_v25, %v2664_v37  ;;  %v2776_v14 = vadd.f32 %v2775_v48, %v2741_v32  ;;  %v2665_v26 = vmul.f32 %v18166_v50, %v2377_v34  ;;  %v18278_v0 = vpack.c.bf16 %v2377_v34, %v2376_v61  ;;  %v15517_v61 = vpop.f32.mrf.mxu1  ;;  %v1659_v25 = vpop.f32.mrf.mxu0 }
 0x168   : > { %v2380_v39 = vadd.f32 %v2285_v22, %v1735_v5  ;;  %v1739_v35 = vadd.f32 %v1656_v59, %v21786_v56  ;;  %v1742_v54 = vadd.f32 %v15483_v42, %v21787_v11  ;;  %v18285_v46 = vsel %vm1911_vm4, %v18143_v9, %v18198_v28  ;;  %v18293_v59 = vpop.permute.xlu1 %2617 }
 0x169   : > { %21785 = vst [vmem:[#allocation56_spill] sm:$0xff] %v18278_v0  ;;  %v2777_v27 = vadd.f32 %v2776_v14, %v2742_v23  ;;  %v2667_v37 = vmul.f32 %v18211_v45, %v18229_v12  ;;  %v2700_v32 = vadd.f32 %v2699_v15, %v2665_v26  ;;  %v2743_v48 = vmul.f32 %v2665_v26, %v2377_v34  ;;  %v2288_v11 = vpop.f32.mrf.mxu1  ;;  %v21789_v15 = vld [vmem:[#allocation50_spill] sm:$0xff]  ;;  %v18300_v26 = vpop.f32.mrf.mxu0 }
 0x16a   : > { %v2668_v5 = vmul.f32 %v18221_v52, %v2380_v39  ;;  %v18291_v22 = vadd.f32 %v15517_v61, %v1738_v2  ;;  %21788 = vst [vmem:[#allocation29_spill] sm:$0xff] %v18293_v59  ;;  %v18295_v42 = vrot.slane %v7302_v58, 2  ;;  %v7305_v9 = vshll.u32 %v18237_v13, 16  ;;  %15701 = vmatmul.mubr.msk.bf16.gmra.mxu0 %vm372_vm1, %v18020_v4  ;;  %v18308_v58 = vpop.permute.xlu0 %2622 }
 0x16b   : > { %v2744_v23 = vmul.f32 %v2666_v62, %v18217_v20  ;;  %v2701_v14 = vadd.f32 %v2700_v32, %v2666_v62  ;;  %v2778_v56 = vadd.f32 %v2777_v27, %v2743_v48  ;;  %v1740_v34 = vadd.f32 %v1659_v25, %v21789_v15  ;;  %21791 = vst [vmem:[#allocation59_spill] sm:$0xff] %v18308_v58  ;;  %v15520_v32 = vpop.f32.mrf.mxu1 }
 0x16c   : > { %v18306_v2 = vpack.c.bf16 %v18291_v22, %v18270_v33  ;;  %v2381_v61 = vadd.f32 %v2288_v11, %v1736_v47  ;;  %15704 = vmatprep.mubr.msk.bf16.mxu0 %vm372_vm1, %v18079_v31  ;;  %v18315_v20 = vsel %vm1911_vm4, %v18198_v28, %v18256_v1  ;;  %v6296_v13 = vor.u32 %v18122_v24, %v18112_v60  ;;  %v18322_v47 = vpop.f32.mrf.mxu0  ;;  %v18338_v15 = vpop.permute.xlu1 %2627 }
 0x16d   : > { %v2745_v4 = vmul.f32 %v2667_v37, %v18229_v12  ;;  %v2779_v62 = vadd.f32 %v2778_v56, %v2744_v23  ;;  %v2702_v27 = vadd.f32 %v2701_v14, %v2667_v37  ;;  %15735 = vmatmul.mubr.msk.bf16.gmra.mxu1 %vm372_vm1, %v18054_v30  ;;  %v7294_v31 = vshrl.u32 %v16215_v44, 16  ;;  %v2301_v30 = vpop.f32.mrf.mxu1  ;;  %v18336_v56 = vld [vmem:[%s16415_s27 + $0x20] sm:$0xff]   ;;  %21793 = vst [vmem:[#allocation57_spill] sm:$0xff] %v18338_v15 }
 0x16e   : > { %21790 = vst [vmem:[#allocation31_spill] sm:$0xff] %v18306_v2  ;;  %v2670_v48 = vmul.f32 %v18272_v51, %v18270_v33  ;;  %v2746_v28 = vmul.f32 %v2668_v5, %v2380_v39  ;;  %v2669_v25 = vmul.f32 %v18250_v6, %v2381_v61  ;;  %15738 = vmatprep.mubr.msk.bf16.mxu1 %vm372_vm1, %v18139_v21  ;;  %v7297_v60 = vshll.u32 %v16215_v44, 16  ;;  %v18333_v14 = vpop.f32.mrf.mxu0 }
 0x16f   : > { %v2703_v24 = vadd.f32 %v2702_v27, %v2668_v5  ;;  %v2780_v12 = vadd.f32 %v2779_v62, %v2745_v4  ;;  %v18329_v37 = vpack.c.bf16 %v2381_v61, %v2380_v39  ;;  %v18331_v23 = vadd.f32 %v15520_v32, %v1741_v40  ;;  %v15521_v5 = vpop.f32.mrf.mxu1  ;;  %v18350_v62 = vpop.permute.xlu0 %2632 }
 0x170   : > { %v2747_v11 = vmul.f32 %v2669_v25, %v2381_v61  ;;  %v2384_v41 = vadd.f32 %v2301_v30, %v1739_v35  ;;  %v18342_v2 = vsel %vm1911_vm4, %v18256_v1, %v6296_v13  ;;  %v6305_v21 = vor.u32 %v18234_v36, %v18225_v63  ;;  %v18348_v4 = vpop.f32.mrf.mxu0  ;;  %21794 = vst [vmem:[#allocation58_spill] sm:$0xff] %v18350_v62 }
 0x171   : > { %21792 = vst [vmem:[#allocation32_spill] sm:$0xff] %v18329_v37  ;;  %v2781_v39 = vadd.f32 %v2780_v12, %v2746_v28  ;;  %v2671_v40 = vmul.f32 %v18293_v59, %v18291_v22  ;;  %v2704_v44 = vadd.f32 %v2703_v24, %v2669_v25  ;;  %v7307_v61 = vrot.slane %v7305_v9, 3  ;;  %v2304_v12 = vpop.f32.mrf.mxu1  ;;  %v18365_v9 = vld [vmem:[%s16415_s27 + $0x28] sm:$0xff]   ;;  %v18493_v37 = vld [vmem:[%s21358_s1 + $0x1c] sm:$0x3] }
 0x172   : > { %v2672_v35 = vmul.f32 %v18308_v58, %v2384_v41  ;;  %v18353_v27 = vadd.f32 %v15521_v5, %v1742_v54  ;;  %v18355_v1 = vrot.slane %v7294_v31, 2  ;;  %v18357_v32 = vrot.slane %v7297_v60, 3  ;;  %v18360_v25 = vpop.f32.mrf.mxu0  ;;  %15705 = vmatmul.mubr.msk.bf16.gmra.mxu0 %vm372_vm1, %v18086_v10 }
 0x173   : > { %v2748_v63 = vmul.f32 %v2670_v48, %v18270_v33  ;;  %v2705_v36 = vadd.f32 %v2704_v44, %v2670_v48  ;;  %v2782_v28 = vadd.f32 %v2781_v39, %v2747_v11  ;;  %v7311_v24 = vshrl.u32 %v18336_v56, 16  ;;  %15708 = vmatprep.mubr.msk.bf16.mxu0 %vm372_vm1, %v18173_v55  ;;  %v15564_v44 = vpop.f32.mrf.mxu1 }
 0x174   : > { %v18370_v54 = vpack.c.bf16 %v18353_v27, %v18331_v23  ;;  %v18375_v33 = vsel %vm1911_vm4, %v6296_v13, %v6305_v21  ;;  %v21796_v31 = vrot.slane %v18159_v38, 2  ;;  %v21797_v48 = vrot.slane %v18146_v16, 2  ;;  %v18392_v16 = vpop.f32.mrf.mxu0 }
 0x175   : > { %v21798_v60 = vrot.slane %v18205_v8, 2  ;;  %v2749_v55 = vmul.f32 %v2671_v40, %v18291_v22  ;;  %v2783_v39 = vadd.f32 %v2782_v28, %v2748_v63  ;;  %v2706_v13 = vadd.f32 %v2705_v36, %v2671_v40  ;;  %15739 = vmatmul.mubr.msk.bf16.gmra.mxu1 %vm372_vm1, %v18194_v17  ;;  %v3786_v28 = vpop.f32.mrf.mxu1 }
 0x176   : > { %21795 = vst [vmem:[#allocation63_spill] sm:$0xff] %v18370_v54  ;;  %v6783_v10 = vsel %vm4813_vm5, %v21797_v48, %v21796_v31  ;;  %v21799_v30 = vmov %v21796_v31  ;;  %v2385_v21 = vadd.f32 %v2304_v12, %v1740_v34  ;;  %v2674_v5 = vmul.f32 %v18350_v62, %v18331_v23  ;;  %v18396_v31 = vpop.permute.xlu1 %2637  ;;  %15742 = vmatprep.mubr.msk.bf16.mxu1 %vm372_vm1, %v18285_v46  ;;  %v16220_v34 = vld [vmem:[%s16415_s27 + $0x28] sm:$0xff]   ;;  %v18408_v12 = vpop.f32.mrf.mxu0 }
 0x177   : > { %v18387_v11 = vsel %vm4813_vm5, %v21799_v30, %v21798_v60  ;;  %v2750_v38 = vmul.f32 %v2672_v35, %v2384_v41  ;;  %21800 = vst [vmem:[#allocation35_spill] sm:$0xff] %v18396_v31  ;;  %v18399_v48 = vadd.f32 %v15564_v44, %v18300_v26  ;;  %v7314_v22 = vshll.u32 %v18336_v56, 16  ;;  %v16222_v44 = vld [vmem:[%s16415_s27 + $0x30] sm:$0xff]  }
 0x178   : > { %v2707_v40 = vadd.f32 %v2706_v13, %v2672_v35  ;;  %v2784_v17 = vadd.f32 %v2783_v39, %v2749_v55  ;;  %v2673_v63 = vmul.f32 %v18338_v15, %v2385_v21  ;;  %v18406_v36 = vpack.c.bf16 %v2385_v21, %v2384_v41  ;;  %v18420_v35 = vld [vmem:[%s16415_s27 + $0x30] sm:$0xff]   ;;  %v15565_v13 = vpop.f32.mrf.mxu1 }
 0x179   : > { %v18411_v60 = vadd.f32 %v3786_v28, %v18322_v47  ;;  %v7300_v26 = vor.u32 %v18357_v32, %v18355_v1  ;;  %v18416_v46 = vor.u32 %v7307_v61, %v18295_v42  ;;  %v6786_v56 = vrot.slane %v18365_v9, 2  ;;  %v18424_v47 = vpop.f32.mrf.mxu0 }
 0x17a   : > { %21801 = vst [vmem:[#allocation38_spill] sm:$0xff] %v18406_v36  ;;  %v2785_v30 = vadd.f32 %v2784_v17, %v2750_v38  ;;  %v2675_v41 = vmul.f32 %v18396_v31, %v18353_v27  ;;  %v2708_v55 = vadd.f32 %v2707_v40, %v2673_v63  ;;  %v2751_v39 = vmul.f32 %v2673_v63, %v2385_v21  ;;  %v3789_v28 = vpop.f32.mrf.mxu1  ;;  %v18436_v63 = vld [vmem:[%s16415_s27 + $0x38] sm:$0xff]  }
 0x17b   : > { %v18428_v1 = vadd.f32 %v15565_v13, %v18333_v14  ;;  %v7313_v42 = vrot.slane %v7311_v24, 2  ;;  %v7320_v61 = vshrl.u32 %v16220_v34, 16  ;;  %v7323_v32 = vshll.u32 %v16220_v34, 16  ;;  %v18431_v40 = vpop.f32.mrf.mxu0  ;;  %15709 = vmatmul.mubr.msk.bf16.gmra.mxu0 %vm372_vm1, %v18263_v49  ;;  %v16224_v49 = vld [vmem:[%s16415_s27 + $0x38] sm:$0xff]  }
 0x17c   : > { %v2752_v9 = vmul.f32 %v2674_v5, %v18331_v23  ;;  %v2709_v38 = vadd.f32 %v2708_v55, %v2674_v5  ;;  %v2786_v17 = vadd.f32 %v2785_v30, %v2751_v39  ;;  %v7316_v21 = vrot.slane %v7314_v22, 3  ;;  %15752 = vmatprep.mubr.msk.bf16.mxu0 %vm372_vm1, %v6783_v10  ;;  %v16226_v22 = vld [vmem:[%s16415_s27 + $0x40] sm:$0xff]   ;;  %v15568_v39 = vpop.f32.mrf.mxu1 }
 0x17d   : > { %v18439_v14 = vadd.f32 %v3789_v28, %v18348_v4  ;;  %v21802_v24 = vrot.slane %v18205_v8, 2  ;;  %v18447_v5 = vsel %vm427_vm0, %v18003_v29, 0  ;;  %v6788_v34 = vrot.slane %v18420_v35, 2  ;;  %15743 = vmatmul.mubr.msk.bf16.gmra.mxu1 %vm372_vm1, %v18315_v20  ;;  %v18457_v8 = vpop.f32.mrf.mxu0  ;;  %v16228_v29 = vld [vmem:[%s16415_s27 + $0x48] sm:$0xff]  }
 0x17e   : > { %v2753_v30 = vmul.f32 %v2675_v41, %v18353_v27  ;;  %v18453_v55 = vadd.f32 %v2709_v38, %v2675_v41  ;;  %v2787_v4 = vadd.f32 %v2786_v17, %v2752_v9  ;;  %v7329_v10 = vshrl.u32 %v16222_v44, 16  ;;  %15746 = vmatprep.mubr.msk.bf16.mxu1 %vm372_vm1, %v18342_v2  ;;  %v3802_v38 = vpop.f32.mrf.mxu1 }
 0x17f   : > { %v6787_v23 = vsel %vm4813_vm5, %v21802_v24, %v6786_v56  ;;  %v18461_v13 = vadd.f32 %v15568_v39, %v18360_v25  ;;  %v7322_v27 = vrot.slane %v7320_v61, 2  ;;  %v7325_v35 = vrot.slane %v7323_v32, 3  ;;  %v18467_v17 = vpop.f32.mrf.mxu0  ;;  %v16223_v25 = vld [vmem:[%s16415_s27 + $0x40] sm:$0xff]   ;;  %v18474_v39 = vld [vmem:[%s16415_s27 + $0x48] sm:$0xff]  }
 0x180   : > { %v7332_v41 = vshll.u32 %v16222_v44, 16  ;;  %v18465_v9 = vadd.f32 %v2787_v4, %v2753_v30  ;;  %v7309_v20 = vsel %vm7292_vm6, %v7300_v26, %v18416_v46  ;;  %v7317_v28 = vor.u32 %v7316_v21, %v7313_v42  ;;  %v15569_v30 = vpop.f32.mrf.mxu1  ;;  %v16230_v21 = vld [vmem:[%s16415_s27 + $0x50] sm:$0xff]  }
 0x181   : > { %v6790_v24 = vrot.slane %v18436_v63, 2  ;;  %v18477_v2 = vadd.f32 %v3802_v38, %v18392_v16  ;;  %v7338_v61 = vshrl.u32 %v16224_v49, 16  ;;  %v7341_v44 = vshll.u32 %v16224_v49, 16  ;;  %v18479_v4 = vpop.f32.mrf.mxu0 }
 0x182   : > { %v7347_v32 = vshrl.u32 %v16226_v22, 16  ;;  %v18482_v36 = vsel %vm4813_vm5, %v6786_v56, %v6788_v34  ;;  %v7350_v54 = vshll.u32 %v16226_v22, 16  ;;  %v7356_v26 = vshrl.u32 %v16228_v29, 16  ;;  %v3805_v56 = vpop.f32.mrf.mxu1 }
 0x183   : > { %v7359_v42 = vshll.u32 %v16228_v29, 16  ;;  %v18486_v63 = vadd.f32 %v15569_v30, %v18408_v12  ;;  %v18488_v16 = vor.u32 %v7325_v35, %v7322_v27  ;;  %v7331_v38 = vrot.slane %v7329_v10, 2  ;;  %v18495_v22 = vpop.f32.mrf.mxu0  ;;  %15753 = vmatmul.mubr.msk.bf16.vlgmr.msra.gmra.mxu0 %vm372_vm1, %v18387_v11  ;;  %v16232_v35 = vld [vmem:[%s16415_s27 + $0x58] sm:$0xff]  }
 0x184   : > { %v7334_v49 = vrot.slane %v7332_v41, 3  ;;  %v18501_v12 = vsel %vm7292_vm6, %v18416_v46, %v7317_v28  ;;  %v6791_v29 = vsel %vm4813_vm5, %v6788_v34, %v6790_v24  ;;  %v6792_v10 = vrot.slane %v16223_v25, 2  ;;  %v16234_v41 = vld [vmem:[%s16415_s27 + $0x60] sm:$0xff]   ;;  %15827 = vmatpush3.bf16.msra.mxu0 %v18244_v3  ;;  %15756 = vmatprep.mubr.msk.bf16.mxu0 %vm372_vm1, %v6787_v23  ;;  %v18513_v46 = vld [vmem:[%s16415_s27 + $0x50] sm:$0xff]   ;;  %v15572_v18 = vpop.f32.mrf.mxu1 }
 0x185   : > { %v6794_v27 = vrot.slane %v18474_v39, 2  ;;  %v18508_v30 = vadd.f32 %v3805_v56, %v18424_v47  ;;  %v7340_v0 = vrot.slane %v7338_v61, 2  ;;  %v7343_v11 = vrot.slane %v7341_v44, 3  ;;  %15747 = vmatmul.mubr.msk.bf16.gmra.mxu1 %vm372_vm1, %v18375_v33  ;;  %v18517_v34 = vpop.f32.mrf.mxu0  ;;  %15992 = vmatprep.subr.msk.bf16.mxu0 %vm427_vm0, %v18493_v37  ;;  %v16236_v44 = vld [vmem:[%s16415_s27 + $0x68] sm:$0xff]  }
 0x186   : > { %v7349_v53 = vrot.slane %v7347_v32, 2  ;;  %v7352_v25 = vrot.slane %v7350_v54, 3  ;;  %v7358_v39 = vrot.slane %v7356_v26, 2  ;;  %v7361_v47 = vrot.slane %v7359_v42, 3  ;;  %15790 = vmatprep.mubr.msk.bf16.mxu1 %vm372_vm1, %v7309_v20  ;;  %v3818_v32 = vpop.f32.mrf.mxu1 }
 0x187   : > { %v7365_v56 = vshrl.u32 %v16230_v21, 16  ;;  %v18522_v3 = vadd.f32 %v15572_v18, %v18431_v40  ;;  %v7327_v23 = vsel %vm7292_vm6, %v7317_v28, %v18488_v16  ;;  %v7335_v61 = vor.u32 %v7334_v49, %v7331_v38  ;;  %v18528_v54 = vpop.f32.mrf.mxu0 }
 0x188   : > { %v7368_v33 = vshll.u32 %v16230_v21, 16  ;;  %v7374_v26 = vshrl.u32 %v16232_v35, 16  ;;  %v7377_v42 = vshll.u32 %v16232_v35, 16  ;;  %v7383_v31 = vshrl.u32 %v16234_v41, 16  ;;  %v18541_v21 = vld [vmem:[%s16415_s27 + $0x58] sm:$0xff]   ;;  %v15573_v38 = vpop.f32.mrf.mxu1 }
 0x189   : > { %v7386_v15 = vshll.u32 %v16234_v41, 16  ;;  %v18531_v18 = vadd.f32 %v3818_v32, %v18457_v8  ;;  %v18534_v40 = vsel %vm4813_vm5, %v6790_v24, %v6792_v10  ;;  %v18537_v20 = vsel %vm4813_vm5, %v6792_v10, %v6794_v27  ;;  %v18543_v49 = vpop.f32.mrf.mxu0  ;;  %v18546_v32 = vld [vmem:[%s16415_s27 + $0x60] sm:$0xff]  }
 0x18a   : > { %v6796_v28 = vrot.slane %v18513_v46, 2  ;;  %v7344_v35 = vor.u32 %v7343_v11, %v7340_v0  ;;  %v7353_v62 = vor.u32 %v7352_v25, %v7349_v53  ;;  %v7362_v41 = vor.u32 %v7361_v47, %v7358_v39  ;;  %v3821_v59 = vpop.f32.mrf.mxu1  ;;  %v16233_v11 = vld [vmem:[%s16415_s27 + $0x68] sm:$0xff]   ;;  %v18557_v47 = vld [vmem:[%s16415_s27 + $0x70] sm:$0xff]  }
 0x18b   : > { %v7367_v8 = vrot.slane %v7365_v56, 2  ;;  %v18549_v24 = vadd.f32 %v15573_v38, %v18467_v17  ;;  %v7370_v10 = vrot.slane %v7368_v33, 3  ;;  %v7392_v58 = vshrl.u32 %v16236_v44, 16  ;;  %v18551_v6 = vpop.f32.mrf.mxu0  ;;  %15757 = vmatmul.mubr.msk.bf16.gmra.mxu0 %vm372_vm1, %v18482_v36 }
 0x18c   : > { %v7395_v46 = vshll.u32 %v16236_v44, 16  ;;  %v7376_v0 = vrot.slane %v7374_v26, 2  ;;  %v7379_v53 = vrot.slane %v7377_v42, 3  ;;  %v7385_v25 = vrot.slane %v7383_v31, 2  ;;  %15760 = vmatprep.mubr.msk.bf16.mxu0 %vm372_vm1, %v6791_v29  ;;  %v16238_v44 = vld [vmem:[%s16415_s27 + $0x70] sm:$0xff]   ;;  %v15576_v31 = vpop.f32.mrf.mxu1  ;;  %v16240_v26 = vld [vmem:[%s16415_s27 + $0x78] sm:$0xff]  }
 0x18d   : > { %21803 = vst [vmem:[#allocation40_spill] sm:$0xff] %v18549_v24  ;;  %v7388_v39 = vrot.slane %v7386_v15, 3  ;;  %v18560_v17 = vadd.f32 %v3821_v59, %v18479_v4  ;;  %v7336_v56 = vsel %vm7292_vm6, %v18488_v16, %v7335_v61  ;;  %v18566_v33 = vsel %vm4813_vm5, %v6794_v27, %v6796_v28  ;;  %v18573_v15 = vld [vmem:[%s21358_s1 + $0x1e] sm:$0x3]  ;;  %15791 = vmatmul.mubr.msk.bf16.vlgmr.msra.gmra.mxu1 %vm372_vm1, %v18501_v12  ;;  %v18577_v59 = vpop.f32.mrf.mxu0  ;;  %v16242_v42 = vld [vmem:[%s16415_s27 + $0x80] sm:$0xff]  }
 0x18e   : > { %v6798_v36 = vrot.slane %v18541_v21, 2  ;;  %v7345_v4 = vsel %vm7292_vm6, %v7335_v61, %v7344_v35  ;;  %v18581_v16 = vsel %vm7292_vm6, %v7344_v35, %v7353_v62  ;;  %v18584_v29 = vsel %vm7292_vm6, %v7353_v62, %v7362_v41  ;;  %15865 = vmatpush3.bf16.msra.mxu1 %v18447_v5  ;;  %15794 = vmatprep.mubr.msk.bf16.mxu1 %vm372_vm1, %v7327_v23  ;;  %v3834_v35 = vpop.f32.mrf.mxu1 }
 0x18f   : > { %21804 = vst [vmem:[#allocation42_spill] sm:$0xff] %v18560_v17  ;;  %v6800_v27 = vrot.slane %v18546_v32, 2  ;;  %v18590_v21 = vadd.f32 %v15576_v31, %v18495_v22  ;;  %v7371_v12 = vor.u32 %v7370_v10, %v7367_v8  ;;  %v7394_v61 = vrot.slane %v7392_v58, 2  ;;  %v18594_v51 = vpop.f32.mrf.mxu0  ;;  %15993 = vmatprep.subr.msk.bf16.mxu1 %vm427_vm0, %v18573_v15  ;;  %v18606_v58 = vld [vmem:[%s16415_s27 + $0x78] sm:$0xff]  }
 0x190   : > { %v7397_v38 = vrot.slane %v7395_v46, 3  ;;  %v7380_v62 = vor.u32 %v7379_v53, %v7376_v0  ;;  %v6802_v52 = vrot.slane %v16233_v11, 2  ;;  %v7389_v45 = vor.u32 %v7388_v39, %v7385_v25  ;;  %v15577_v10 = vpop.f32.mrf.mxu1  ;;  %v16245_v17 = vld [vmem:[%s16415_s27 + $0x98] sm:$0xff]  }
 0x191   : > { %21805 = vst [vmem:[#allocation8_spill] sm:$0xff] %v18590_v21  ;;  %v6804_v32 = vrot.slane %v18557_v47, 2  ;;  %v18600_v22 = vadd.f32 %v3834_v35, %v18517_v34  ;;  %v18603_v5 = vsel %vm4813_vm5, %v6796_v28, %v6798_v36  ;;  %v7401_v23 = vshrl.u32 %v16238_v44, 16  ;;  %v18608_v46 = vpop.f32.mrf.mxu0 }
 0x192   : > { %v7404_v8 = vshll.u32 %v16238_v44, 16  ;;  %v7410_v0 = vshrl.u32 %v16240_v26, 16  ;;  %v7413_v53 = vshll.u32 %v16240_v26, 16  ;;  %v7419_v11 = vshrl.u32 %v16242_v42, 16  ;;  %v16244_v44 = vld [vmem:[%s16415_s27 + $0x88] sm:$0xff]   ;;  %v3837_v31 = vpop.f32.mrf.mxu1 }
 0x193   : > { %21806 = vst [vmem:[#allocation20_spill] sm:$0xff] %v18600_v22  ;;  %v7422_v25 = vshll.u32 %v16242_v42, 16  ;;  %v18611_v39 = vadd.f32 %v15577_v10, %v18528_v54  ;;  %v18614_v34 = vsel %vm7292_vm6, %v7362_v41, %v7371_v12  ;;  %v18617_v28 = vsel %vm4813_vm5, %v6798_v36, %v6800_v27  ;;  %v18622_v35 = vpop.f32.mrf.mxu0  ;;  %15761 = vmatmul.mubr.msk.bf16.gmra.mxu0 %vm372_vm1, %v18534_v40  ;;  %v16246_v42 = vld [vmem:[%s16415_s27 + $0x90] sm:$0xff]   ;;  %v16239_v10 = vld [vmem:[%s16415_s27 + $0x80] sm:$0xff]  }
 0x194   : > { %v18619_v47 = vor.u32 %v7397_v38, %v7394_v61  ;;  %v18627_v26 = vsel %vm7292_vm6, %v7371_v12, %v7380_v62  ;;  %v18630_v54 = vsel %vm4813_vm5, %v6800_v27, %v6802_v52  ;;  %v18633_v41 = vsel %vm7292_vm6, %v7380_v62, %v7389_v45  ;;  %v16248_v61 = vld [vmem:[%s16415_s27 + $0x98] sm:$0xff]   ;;  %15764 = vmatprep.mubr.msk.bf16.mxu0 %vm372_vm1, %v18537_v20  ;;  %v15580_v50 = vpop.f32.mrf.mxu1 }
 0x195   : > { %21807 = vst [vmem:[#allocation44_spill] sm:$0xff] %v18611_v39  ;;  %v18636_v36 = vsel %vm4813_vm5, %v6802_v52, %v6804_v32  ;;  %v18641_v38 = vadd.f32 %v3837_v31, %v18543_v49  ;;  %v6806_v40 = vrot.slane %v18606_v58, 2  ;;  %v7403_v27 = vrot.slane %v7401_v23, 2  ;;  %15795 = vmatmul.mubr.msk.bf16.gmra.mxu1 %vm372_vm1, %v7336_v56  ;;  %v18648_v62 = vpop.f32.mrf.mxu0  ;;  %v18652_v49 = vld [vmem:[%s16415_s27 + $0x90] sm:$0xff]  }
 0x196   : > { %v7406_v12 = vrot.slane %v7404_v8, 3  ;;  %v7412_v52 = vrot.slane %v7410_v0, 2  ;;  %v7415_v19 = vrot.slane %v7413_v53, 3  ;;  %v7421_v39 = vrot.slane %v7419_v11, 2  ;;  %15798 = vmatprep.mubr.msk.bf16.mxu1 %vm372_vm1, %v7345_v4  ;;  %v3850_v8 = vpop.f32.mrf.mxu1 }
 0x197   : > { %21808 = vst [vmem:[#allocation45_spill] sm:$0xff] %v18641_v38  ;;  %v7424_v57 = vrot.slane %v7422_v25, 3  ;;  %v18655_v20 = vadd.f32 %v15580_v50, %v18551_v6  ;;  %v18660_v58 = vsel %vm7292_vm6, %v7389_v45, %v18619_v47  ;;  %v7428_v56 = vshrl.u32 %v16244_v44, 16  ;;  %v18662_v0 = vpop.f32.mrf.mxu0  ;;  %v16249_v4 = vld [vmem:[%s16415_s27 + $0xa0] ss:$0 sps:$4 sm:$0x77]  }
 0x198   : > { %v7431_v23 = vshll.u32 %v16244_v44, 16  ;;  %v7437_v53 = vshrl.u32 %v16246_v42, 16  ;;  %v7440_v11 = vshll.u32 %v16246_v42, 16  ;;  %v7446_v25 = vshrl.u32 %v16248_v61, 16 }
 0x199   : > { %21809 = vst [vmem:[#allocation47_spill] sm:$0xff] %v18655_v20  ;;  %v7449_v31 = vshll.u32 %v16248_v61, 16  ;;  %v18665_v38 = vadd.f32 %v3850_v8, %v18577_v59  ;;  %v18668_v50 = vsel %vm4813_vm5, %v6804_v32, %v6806_v40  ;;  %v7407_v6 = vor.u32 %v7406_v12, %v7403_v27  ;;  %v15581_v20 = vpop.f32.mrf.mxu1  ;;  %v18671_v44 = vpop.f32.mrf.mxu0  ;;  %v16247_v27 = vld [vmem:[%s16415_s27 + $0xa0] ss:$0 sps:$4 sm:$0x33]  }
 0x19a   : > { %v6808_v45 = vrot.slane %v16239_v10, 2  ;;  %v7416_v22 = vor.u32 %v7415_v19, %v7412_v52  ;;  %v6810_v43 = vrot.slane %v16241_v7, 2  ;;  %v7425_v21 = vor.u32 %v7424_v57, %v7421_v39 }
 0x19b   : > { %21810 = vst [vmem:[#allocation50_spill] sm:$0xff] %v18665_v38  ;;  %v6812_v42 = vrot.slane %v18652_v49, 2  ;;  %v2711_v61 = vrot.slane %v18453_v55, 4  ;;  %v18677_v59 = vadd.f32 %v15581_v20, %v18594_v51  ;;  %v7430_v32 = vrot.slane %v7428_v56, 2  ;;  %v3853_v12 = vpop.f32.mrf.mxu1  ;;  %v18680_v10 = vpop.f32.mrf.mxu0  ;;  %15765 = vmatmul.mubr.msk.bf16.gmra.mxu0 %vm372_vm1, %v18566_v33  ;;  %v16250_v33 = vld [vmem:[%s16415_s27 + $0x8] sm:$0xfe]  }
 0x19c   : > { %v7433_v8 = vrot.slane %v7431_v23, 3  ;;  %v7439_v7 = vrot.slane %v7437_v53, 2  ;;  %v7442_v57 = vrot.slane %v7440_v11, 3  ;;  %v7448_v19 = vrot.slane %v7446_v25, 2  ;;  %15768 = vmatprep.mubr.msk.bf16.mxu0 %vm372_vm1, %v18603_v5  ;;  %v16251_v53 = vld [vmem:[%s16415_s27 + $0x10] sm:$0xff]   ;;  %v16261_v38 = vld [vmem:[%s16415_s27 + $0x38] sm:$0xff]  }
 0x19d   : > { %21811 = vst [vmem:[#allocation65_spill] sm:$0xff] %v18677_v59  ;;  %v7451_v39 = vrot.slane %v7449_v31, 3  ;;  %v18685_v52 = vadd.f32 %v3853_v12, %v18608_v46  ;;  %v18691_v51 = vsel %vm7292_vm6, %v18619_v47, %v7407_v6  ;;  %v18694_v49 = vsel %vm4813_vm5, %v6806_v40, %v6808_v45  ;;  %v15584_v56 = vpop.f32.mrf.mxu1  ;;  %15799 = vmatmul.mubr.msk.bf16.gmra.mxu1 %vm372_vm1, %v18581_v16  ;;  %v18699_v23 = vpop.f32.mrf.mxu0  ;;  %v16252_v59 = vld [vmem:[%s16415_s27 + $0x18] sm:$0xff]  }
 0x19e   : > { %v7455_v20 = vshrl.u32 %v16249_v4, 16  ;;  %v18702_v46 = vsel %vm7292_vm6, %v7407_v6, %v7416_v22  ;;  %v18705_v5 = vsel %vm4813_vm5, %v6808_v45, %v6810_v43  ;;  %v18708_v47 = vsel %vm7292_vm6, %v7416_v22, %v7425_v21  ;;  %15802 = vmatprep.mubr.msk.bf16.mxu1 %vm372_vm1, %v18584_v29 }
 0x19f   : > { %21812 = vst [vmem:[#allocation66_spill] sm:$0xff] %v18685_v52  ;;  %v7458_v40 = vshll.u32 %v16249_v4, 16  ;;  %v2712_v11 = vadd.f32 %v2711_v61, %v18453_v55  ;;  %v18713_v25 = vadd.f32 %v15584_v56, %v18622_v35  ;;  %v7434_v16 = vor.u32 %v7433_v8, %v7430_v32  ;;  %v3866_v6 = vpop.f32.mrf.mxu1  ;;  %v18717_v12 = vpop.f32.mrf.mxu0 }
 0x1a0   : > { %v6814_v31 = vrot.slane %v16245_v17, 2  ;;  %v18720_v45 = vsel %vm4813_vm5, %v6810_v43, %v6812_v42  ;;  %v7443_v22 = vor.u32 %v7442_v57, %v7439_v7  ;;  %v6816_v52 = vrot.slane %v16247_v27, 2 }
 0x1a1   : > { %21813 = vst [vmem:[#allocation67_spill] sm:$0xff] %v18713_v25  ;;  %v7452_v4 = vor.u32 %v7451_v39, %v7448_v19  ;;  %v2789_v55 = vrot.slane %v18465_v9, 4  ;;  %v18725_v35 = vadd.f32 %v3866_v6, %v18648_v62  ;;  %v7457_v61 = vrot.slane %v7455_v20, 2  ;;  %v15585_v32 = vpop.f32.mrf.mxu1  ;;  %v18727_v17 = vpop.f32.mrf.mxu0  ;;  %v16255_v19 = vld [vmem:[%s16415_s27 + $0x20] sm:$0xff]  }
 0x1a2   : > { %v8311_v29 = vshrl.u32 %v16250_v33, 16  ;;  %v7460_v8 = vrot.slane %v7458_v40, 3  ;;  %v8314_v56 = vshll.u32 %v16250_v33, 16  ;;  %v8319_v43 = vshrl.u32 %v16251_v53, 16 }
 0x1a3   : > { %21814 = vst [vmem:[#allocation68_spill] sm:$0xff] %v18725_v35  ;;  %v8322_v25 = vshll.u32 %v16251_v53, 16  ;;  %v2713_v7 = vrot.slane %v2712_v11, 2  ;;  %v18730_v27 = vadd.f32 %v15585_v32, %v18662_v0  ;;  %v18733_v57 = vsel %vm7292_vm6, %v7425_v21, %v7434_v16  ;;  %v3869_v39 = vpop.f32.mrf.mxu1  ;;  %v18739_v20 = vpop.f32.mrf.mxu0  ;;  %15769 = vmatmul.mubr.msk.bf16.gmra.mxu0 %vm372_vm1, %v18617_v28  ;;  %v16257_v53 = vld [vmem:[%s16415_s27 + $0x28] sm:$0xff]  }
 0x1a4   : > { %v18736_v62 = vsel %vm4813_vm5, %v6812_v42, %v6814_v31  ;;  %v18744_v33 = vsel %vm7292_vm6, %v7434_v16, %v7443_v22  ;;  %v18747_v0 = vsel %vm4813_vm5, %v6814_v31, %v6816_v52  ;;  %v8328_v40 = vshrl.u32 %v16252_v59, 16  ;;  %15772 = vmatprep.mubr.msk.bf16.mxu0 %vm372_vm1, %v18630_v54  ;;  %v16259_v52 = vld [vmem:[%s16415_s27 + $0x30] sm:$0xff]  }
 0x1a5   : > { %21815 = vst [vmem:[#allocation69_spill] sm:$0xff] %v18730_v27  ;;  %v8331_v21 = vshll.u32 %v16252_v59, 16  ;;  %v18751_v42 = vadd.f32 %v2789_v55, %v18465_v9  ;;  %v18754_v6 = vadd.f32 %v3869_v39, %v18671_v44  ;;  %v18759_v28 = vsel %vm7292_vm6, %v7443_v22, %v7452_v4  ;;  %v15588_v31 = vpop.f32.mrf.mxu1  ;;  %15803 = vmatmul.mubr.msk.bf16.gmra.mxu1 %vm372_vm1, %v18614_v34  ;;  %v18764_v59 = vpop.f32.mrf.mxu0  ;;  %v16253_v39 = vld [vmem:[%s16415_s27 + $0x8] sm:$0xfc]   ;;  %v18775_v22 = vld [vmem:[%s16415_s27 + $0x10] sm:$0xff]  }
 0x1a6   : > { %v8313_v16 = vrot.slane %v8311_v29, 1  ;;  %v7461_v9 = vor.u32 %v7460_v8, %v7457_v61  ;;  %v8316_v55 = vrot.slane %v8314_v56, 2  ;;  %v8321_v32 = vrot.slane %v8319_v43, 1  ;;  %15806 = vmatprep.mubr.msk.bf16.mxu1 %vm372_vm1, %v18627_v26  ;;  %v16256_v26 = vld [vmem:[%s16415_s27 + $0x18] sm:$0xff]  }
 0x1a7   : > { %21816 = vst [vmem:[#allocation70_spill] sm:$0xff] %v18751_v42  ;;  %21817 = vst [vmem:[#allocation71_spill] sm:$0xff] %v18754_v6  ;;  %v8324_v44 = vrot.slane %v8322_v25, 2  ;;  %v18767_v6 = vadd.f32 %v2713_v7, %v2712_v11  ;;  %v18770_v54 = vadd.f32 %v15588_v31, %v18680_v10  ;;  %v8337_v29 = vshrl.u32 %v16255_v19, 16  ;;  %v3882_v27 = vpop.f32.mrf.mxu1  ;;  %v18777_v35 = vpop.f32.mrf.mxu0  ;;  %v16260_v42 = vld [vmem:[%s16415_s27 + $0x28] sm:$0xff]  }
 0x1a8   : > { %v8340_v34 = vshll.u32 %v16255_v19, 16  ;;  %v8330_v61 = vrot.slane %v8328_v40, 1  ;;  %v8333_v25 = vrot.slane %v8331_v21, 2  ;;  %v8346_v8 = vshrl.u32 %v16257_v53, 16 }
 0x1a9   : > { %21818 = vst [vmem:[#allocation72_spill] sm:$0xff] %v18767_v6  ;;  %21819 = vst [vmem:[#allocation73_spill] sm:$0xff] %v18770_v54  ;;  %v8349_v11 = vshll.u32 %v16257_v53, 16  ;;  %v18781_v10 = vadd.f32 %v3882_v27, %v18699_v23  ;;  %v8355_v43 = vshrl.u32 %v16259_v52, 16  ;;  %v8358_v7 = vshll.u32 %v16259_v52, 16  ;;  %v15589_v31 = vpop.f32.mrf.mxu1  ;;  %v18784_v19 = vpop.f32.mrf.mxu0  ;;  %v16258_v53 = vld [vmem:[%s16415_s27 + $0x20] sm:$0xff]  }
 0x1aa   : > { %v18787_v6 = vsel %vm7292_vm6, %v7452_v4, %v7461_v9  ;;  %v8317_v40 = vor.u32 %v8316_v55, %v8313_v16  ;;  %v8325_v54 = vor.u32 %v8324_v44, %v8321_v32  ;;  %v8882_v21 = vrot.slane %v16253_v39, 2  ;;  %v18805_v55 = vld [vmem:[%s16415_s27 + $0x30] sm:$0xff]  }
 0x1ab   : > { %21820 = vst [vmem:[#allocation74_spill] sm:$0xff] %v18781_v10  ;;  %v18792_v56 = vadd.f32 %v15589_v31, %v18717_v12  ;;  %v8883_v23 = vrot.slane %v18775_v22, 2  ;;  %v8339_v27 = vrot.slane %v8337_v29, 1  ;;  %v8342_v52 = vrot.slane %v8340_v34, 2  ;;  %v3885_v10 = vpop.f32.mrf.mxu1  ;;  %v18796_v24 = vpop.f32.mrf.mxu0  ;;  %15773 = vmatmul.mubr.msk.bf16.gmra.mxu0 %vm372_vm1, %v18636_v36  ;;  %v16263_v36 = vld [vmem:[%s16415_s27 + $0x40] sm:$0xff]   ;;  %v16265_v31 = vld [vmem:[%s16415_s27 + $0x48] sm:$0xff]  }
 0x1ac   : > { %v8334_v4 = vor.u32 %v8333_v25, %v8330_v61  ;;  %v18802_v16 = vsel %vm427_vm0, %v18493_v37, 0  ;;  %v8348_v9 = vrot.slane %v8346_v8, 1  ;;  %v8351_v12 = vrot.slane %v8349_v11, 2  ;;  %15776 = vmatprep.mubr.msk.bf16.mxu0 %vm372_vm1, %v18668_v50 }
 0x1ad   : > { %v18808_v32 = vadd.f32 %v3885_v10, %v18727_v17  ;;  %v8885_v44 = vrot.slane %v16256_v26, 2  ;;  %v8357_v39 = vrot.slane %v8355_v43, 1  ;;  %v8360_v22 = vrot.slane %v8358_v7, 2  ;;  %v15592_v29 = vpop.f32.mrf.mxu1  ;;  %15807 = vmatmul.mubr.msk.bf16.gmra.mxu1 %vm372_vm1, %v18633_v41  ;;  %v18815_v37 = vpop.f32.mrf.mxu0  ;;  %v18829_v10 = vld [vmem:[%s16415_s27 + $0x38] sm:$0xff]  }
 0x1ae   : > { %v18818_v34 = vsel %vm1911_vm4, %v8317_v40, %v8325_v54  ;;  %v8887_v17 = vrot.slane %v16258_v53, 2  ;;  %v8364_v61 = vshrl.u32 %v16261_v38, 16  ;;  %v8367_v25 = vshll.u32 %v16261_v38, 16  ;;  %15810 = vmatprep.mubr.msk.bf16.mxu1 %vm372_vm1, %v18660_v58 }
 0x1af   : > { %21821 = vst [vmem:[#allocation75_spill] sm:$0xff] %v18808_v32  ;;  %v18821_v50 = vadd.f32 %v15592_v29, %v18739_v20  ;;  %v18826_v8 = vsel %vm4813_vm5, %v8882_v21, %v8883_v23  ;;  %v8343_v11 = vor.u32 %v8342_v52, %v8339_v27  ;;  %v8889_v41 = vrot.slane %v16260_v42, 2  ;;  %v3898_v26 = vpop.f32.mrf.mxu1  ;;  %v18831_v43 = vpop.f32.mrf.mxu0 }
 0x1b0   : > { %v18834_v7 = vsel %vm1911_vm4, %v8325_v54, %v8334_v4  ;;  %v18838_v38 = vsel %vm427_vm0, %v18573_v15, 0  ;;  %v8352_v20 = vor.u32 %v8351_v12, %v8348_v9  ;;  %v8891_v58 = vrot.slane %v18805_v55, 2  ;;  %v16267_v55 = vld [vmem:[%s16415_s27 + $0x50] sm:$0xff]  }
 0x1b1   : > { %21822 = vst [vmem:[#allocation76_spill] sm:$0xff] %v18821_v50  ;;  %v18843_v42 = vadd.f32 %v3898_v26, %v18764_v59  ;;  %v18846_v40 = vsel %vm4813_vm5, %v8883_v23, %v8885_v44  ;;  %v8361_v21 = vor.u32 %v8360_v22, %v8357_v39  ;;  %v8373_v53 = vshrl.u32 %v16263_v36, 16  ;;  %v15593_v27 = vpop.f32.mrf.mxu1  ;;  %v18848_v54 = vpop.f32.mrf.mxu0  ;;  %v18865_v22 = vld [vmem:[%s16415_s27 + $0x40] sm:$0xff]  }
 0x1b2   : > { %v18851_v52 = vsel %vm4813_vm5, %v8885_v44, %v8887_v17  ;;  %v8366_v15 = vrot.slane %v8364_v61, 1  ;;  %v8369_v9 = vrot.slane %v8367_v25, 2  ;;  %v8376_v12 = vshll.u32 %v16263_v36, 16 }
 0x1b3   : > { %21823 = vst [vmem:[#allocation77_spill] sm:$0xff] %v18843_v42  ;;  %v18855_v29 = vadd.f32 %v15593_v27, %v18777_v35  ;;  %v18858_v59 = vsel %vm1911_vm4, %v8334_v4, %v8343_v11  ;;  %v18861_v23 = vsel %vm4813_vm5, %v8887_v17, %v8889_v41  ;;  %v8893_v39 = vrot.slane %v18829_v10, 2  ;;  %v3901_v44 = vpop.f32.mrf.mxu1  ;;  %v15602_v61 = vpop.f32.mrf.mxu0  ;;  %15777 = vmatmul.mubr.msk.bf16.gmra.mxu0 %vm372_vm1, %v18694_v49  ;;  %v16269_v17 = vld [vmem:[%s16415_s27 + $0x58] sm:$0xff]   ;;  %v16271_v27 = vld [vmem:[%s16415_s27 + $0x60] sm:$0xff]  }
 0x1b4   : > { %v18870_v36 = vsel %vm1911_vm4, %v8343_v11, %v8352_v20  ;;  %v18873_v35 = vsel %vm4813_vm5, %v8889_v41, %v8891_v58  ;;  %v8382_v4 = vshrl.u32 %v16265_v31, 16  ;;  %v8385_v25 = vshll.u32 %v16265_v31, 16  ;;  %15780 = vmatprep.mubr.msk.bf16.mxu0 %vm372_vm1, %v18705_v5 }
 0x1b5   : > { %21824 = vst [vmem:[#allocation78_spill] sm:$0xff] %v18855_v29  ;;  %v18877_v26 = vadd.f32 %v3901_v44, %v18784_v19  ;;  %v4611_v10 = vadd.f32 %v15602_v61, %v18399_v48  ;;  %v18883_v49 = vsel %vm1911_vm4, %v8352_v20, %v8361_v21  ;;  %v8375_v11 = vrot.slane %v8373_v53, 1  ;;  %v15596_v29 = vpop.f32.mrf.mxu1  ;;  %15811 = vmatmul.mubr.msk.bf16.gmra.mxu1 %vm372_vm1, %v18691_v51  ;;  %v4430_v41 = vpop.f32.mrf.mxu0  ;;  %v16268_v51 = vld [vmem:[%s16415_s27 + $0x48] sm:$0xff]  }
 0x1b6   : > { %v8370_v31 = vor.u32 %v8369_v9, %v8366_v15  ;;  %v8378_v19 = vrot.slane %v8376_v12, 2  ;;  %v8391_v44 = vshrl.u32 %v16267_v55, 16  ;;  %v18889_v48 = vadd.f32 %v15596_v29, %v18796_v24  ;;  %15814 = vmatprep.mubr.msk.bf16.mxu1 %vm372_vm1, %v18702_v46  ;;  %v18900_v24 = vld [vmem:[%s16415_s27 + $0x50] sm:$0xff]  }
 0x1b7   : > { %21825 = vst [vmem:[#allocation79_spill] sm:$0xff] %v18877_v26  ;;  %v8394_v26 = vshll.u32 %v16267_v55, 16  ;;  %v4609_v5 = vadd.f32 %v4430_v41, %v18411_v60  ;;  %v18895_v20 = vsel %vm4813_vm5, %v8891_v58, %v8893_v39  ;;  %v8895_v53 = vrot.slane %v18865_v22, 2  ;;  %v3914_v61 = vpop.f32.mrf.mxu1  ;;  %v15603_v15 = vpop.f32.mrf.mxu0 }
 0x1b8   : > { %21826 = vst [vmem:[#allocation80_spill] sm:$0xff] %v18889_v48  ;;  %v8384_v9 = vrot.slane %v8382_v4, 1  ;;  %v8387_v12 = vrot.slane %v8385_v25, 2  ;;  %v8400_v55 = vshrl.u32 %v16269_v17, 16  ;;  %v8403_v42 = vshll.u32 %v16269_v17, 16  ;;  %v16273_v17 = vld [vmem:[%s16415_s27 + $0x68] sm:$0xff]  }
 0x1b9   : > { %v18903_v60 = vadd.f32 %v3914_v61, %v18815_v37  ;;  %v4612_v46 = vadd.f32 %v15603_v15, %v18428_v1  ;;  %v8409_v58 = vshrl.u32 %v16271_v27, 16  ;;  %v8412_v29 = vshll.u32 %v16271_v27, 16  ;;  %v15597_v41 = vpop.f32.mrf.mxu1  ;;  %v4433_v22 = vpop.f32.mrf.mxu0  ;;  %v16272_v61 = vld [vmem:[%s16415_s27 + $0x58] sm:$0xff]  }
 0x1ba   : > { %v18907_v48 = vsel %vm1911_vm4, %v8361_v21, %v8370_v31  ;;  %v8379_v50 = vor.u32 %v8378_v19, %v8375_v11  ;;  %v8393_v4 = vrot.slane %v8391_v44, 1  ;;  %v8396_v25 = vrot.slane %v8394_v26, 2  ;;  %v18922_v44 = vld [vmem:[%s16415_s27 + $0x60] sm:$0xff]  }
 0x1bb   : > { %21827 = vst [vmem:[#allocation81_spill] sm:$0xff] %v18903_v60  ;;  %v18911_v32 = vadd.f32 %v15597_v41, %v18831_v43  ;;  %v4610_v37 = vadd.f32 %v4433_v22, %v18439_v14  ;;  %v18915_v1 = vsel %vm4813_vm5, %v8893_v39, %v8895_v53  ;;  %v8897_v27 = vrot.slane %v16268_v51, 2  ;;  %v3917_v15 = vpop.f32.mrf.mxu1  ;;  %v15606_v60 = vpop.f32.mrf.mxu0  ;;  %15781 = vmatmul.mubr.msk.bf16.gmra.mxu0 %vm372_vm1, %v18720_v45  ;;  %v16275_v43 = vld [vmem:[%s16415_s27 + $0x70] sm:$0xff]  }
 0x1bc   : > { %v8388_v21 = vor.u32 %v8387_v12, %v8384_v9  ;;  %v8402_v11 = vrot.slane %v8400_v55, 1  ;;  %v8405_v19 = vrot.slane %v8403_v42, 2  ;;  %v8899_v26 = vrot.slane %v18900_v24, 2  ;;  %15784 = vmatprep.mubr.msk.bf16.mxu0 %vm372_vm1, %v18736_v62 }
 0x1bd   : > { %21828 = vst [vmem:[#allocation82_spill] sm:$0xff] %v18911_v32  ;;  %v18926_v14 = vadd.f32 %v3917_v15, %v18848_v54  ;;  %v18929_v39 = vadd.f32 %v15606_v60, %v18461_v13  ;;  %v8411_v51 = vrot.slane %v8409_v58, 1  ;;  %v8414_v41 = vrot.slane %v8412_v29, 2  ;;  %v15640_v45 = vpop.f32.mrf.mxu1  ;;  %15815 = vmatmul.mubr.msk.bf16.gmra.mxu1 %vm372_vm1, %v18708_v47  ;;  %v4446_v42 = vpop.f32.mrf.mxu0 }
 0x1be   : > { %v18936_v9 = vsel %vm1911_vm4, %v8370_v31, %v8379_v50  ;;  %v8397_v12 = vor.u32 %v8396_v25, %v8393_v4  ;;  %v8418_v54 = vshrl.u32 %v16273_v17, 16  ;;  %v8421_v55 = vshll.u32 %v16273_v17, 16  ;;  %15818 = vmatprep.mubr.msk.bf16.mxu1 %vm372_vm1, %v18733_v57  ;;  %v18951_v4 = vld [vmem:[%s16415_s27 + $0x68] sm:$0xff]   ;;  %v16277_v17 = vld [vmem:[%s16415_s27 + $0x78] sm:$0xff]  }
 0x1bf   : > { %21829 = vst [vmem:[#allocation83_spill] sm:$0xff] %v18926_v14  ;;  %v18938_v24 = vadd.f32 %v15640_v45, %v4611_v10  ;;  %v4613_v13 = vadd.f32 %v4446_v42, %v18477_v2  ;;  %v18944_v62 = vsel %vm4813_vm5, %v8895_v53, %v8897_v27  ;;  %v8901_v47 = vrot.slane %v16272_v61, 2  ;;  %v4942_v60 = vpop.f32.mrf.mxu1  ;;  %v15607_v58 = vpop.f32.mrf.mxu0  ;;  %v21830_v45 = vld [vmem:[#allocation18_spill] sm:$0xff] }
 0x1c0   : > { %v18947_v31 = vsel %vm1911_vm4, %v8379_v50, %v8388_v21  ;;  %v8406_v29 = vor.u32 %v8405_v19, %v8402_v11  ;;  %v8903_v22 = vrot.slane %v18922_v44, 2  ;;  %v8427_v10 = vshrl.u32 %v16275_v43, 16 }
 0x1c1   : > { %v5121_v2 = vadd.f32 %v4942_v60, %v4609_v5  ;;  %v4616_v25 = vadd.f32 %v15607_v58, %v18486_v63  ;;  %v18955_v57 = vsel %vm4813_vm5, %v8897_v27, %v8899_v26  ;;  %v8415_v53 = vor.u32 %v8414_v41, %v8411_v51  ;;  %v15641_v61 = vpop.f32.mrf.mxu1  ;;  %v4449_v15 = vpop.f32.mrf.mxu0  ;;  %v18967_v27 = vld [vmem:[%s16415_s27 + $0x70] sm:$0xff]   ;;  %v21833_v60 = vld [vmem:[#allocation22_spill] sm:$0xff] }
 0x1c2   : > { %v18959_v50 = vsel %vm1911_vm4, %v8388_v21, %v8397_v12  ;;  %v8420_v11 = vrot.slane %v8418_v54, 1  ;;  %v8423_v19 = vrot.slane %v8421_v55, 2  ;;  %v8430_v44 = vshll.u32 %v16275_v43, 16 }
 0x1c3   : > { %v5229_v42 = vmul.f32 %v5121_v2, %v21830_v45  ;;  %v5124_v14 = vadd.f32 %v15641_v61, %v4612_v46  ;;  %v4614_v5 = vadd.f32 %v4449_v15, %v18508_v30  ;;  %v18964_v63 = vsel %vm4813_vm5, %v8899_v26, %v8901_v47  ;;  %v4945_v51 = vpop.f32.mrf.mxu1  ;;  %v15610_v41 = vpop.f32.mrf.mxu0  ;;  %15785 = vmatmul.mubr.msk.bf16.gmra.mxu0 %vm372_vm1, %v18747_v0 }
 0x1c4   : > { %v18972_v21 = vsel %vm1911_vm4, %v8397_v12, %v8406_v29  ;;  %v18975_v43 = vsel %vm4813_vm5, %v8901_v47, %v8903_v22  ;;  %v8429_v54 = vrot.slane %v8427_v10, 1  ;;  %v8905_v46 = vrot.slane %v18951_v4, 2  ;;  %15828 = vmatprep.mubr.msk.bf16.mxu0 %vm372_vm1, %v18818_v34  ;;  %v21834_v34 = vld [vmem:[#allocation24_spill] sm:$0xff] }
 0x1c5   : > { %21831 = vst [vmem:[#allocation84_spill] sm:$0xff] %v18975_v43  ;;  %v18979_v30 = vpack.c.bf16 %v5124_v14, %v18938_v24  ;;  %v5122_v26 = vadd.f32 %v4945_v51, %v4610_v37  ;;  %v18984_v55 = vsel %vm1911_vm4, %v8406_v29, %v8415_v53  ;;  %v8436_v0 = vshrl.u32 %v16277_v17, 16  ;;  %v15644_v58 = vpop.f32.mrf.mxu1  ;;  %15819 = vmatmul.mubr.msk.bf16.gmra.mxu1 %vm372_vm1, %v18744_v33  ;;  %v4462_v10 = vpop.f32.mrf.mxu0 }
 0x1c6   : > { %v5231_v12 = vmul.f32 %v18938_v24, %v21833_v60  ;;  %v4619_v47 = vadd.f32 %v15610_v41, %v18522_v3  ;;  %v18991_v4 = vor.u32 %v8423_v19, %v8420_v11  ;;  %v8432_v37 = vrot.slane %v8430_v44, 2  ;;  %15822 = vmatprep.mubr.msk.bf16.mxu1 %vm372_vm1, %v18759_v28  ;;  %v19005_v44 = vld [vmem:[%s16415_s27 + $0x80] sm:$0xff]   ;;  %v21837_v28 = vld [vmem:[#allocation40_spill] sm:$0xff] }
 0x1c7   : > { %21832 = vst [vmem:[#allocation85_spill] sm:$0xff] %v18979_v30  ;;  %v5307_v61 = vmul.f32 %v5229_v42, %v5121_v2  ;;  %v5230_v15 = vmul.f32 %v5122_v26, %v21834_v34  ;;  %v8439_v29 = vshll.u32 %v16277_v17, 16  ;;  %v21835_v30 = vld [vmem:[#allocation28_spill] sm:$0xff]  ;;  %v18998_v45 = vpack.c.bf16 %v5122_v26, %v5121_v2  ;;  %v4958_v3 = vpop.f32.mrf.mxu1  ;;  %v15611_v19 = vpop.f32.mrf.mxu0 }
 0x1c8   : > { %v5232_v60 = vmul.f32 %v5124_v14, %v21835_v30  ;;  %v19001_v33 = vadd.f32 %v15644_v58, %v18929_v39  ;;  %v4617_v11 = vadd.f32 %v4462_v10, %v18531_v18  ;;  %v5125_v32 = vadd.f32 %v4958_v3, %v4613_v13  ;;  %v21839_v3 = vld [vmem:[#allocation42_spill] sm:$0xff] }
 0x1c9   : > { %21836 = vst [vmem:[#allocation86_spill] sm:$0xff] %v18998_v45  ;;  %v5265_v41 = vadd.f32 %v5230_v15, %v5229_v42  ;;  %v5308_v34 = vmul.f32 %v5230_v15, %v5122_v26  ;;  %v4620_v17 = vadd.f32 %v15611_v19, %v21837_v28  ;;  %v5309_v51 = vmul.f32 %v5231_v12, %v18938_v24  ;;  %v15645_v43 = vpop.f32.mrf.mxu1  ;;  %v4465_v2 = vpop.f32.mrf.mxu0  ;;  %v21838_v42 = vld [vmem:[#allocation30_spill] sm:$0xff] }
 0x1ca   : > { %v19011_v39 = vsel %vm1911_vm4, %v8415_v53, %v18991_v4  ;;  %v19014_v58 = vsel %vm4813_vm5, %v8903_v22, %v8905_v46  ;;  %v8438_v18 = vrot.slane %v8436_v0, 1  ;;  %v5233_v26 = vmul.f32 %v5125_v32, %v21838_v42  ;;  %v19024_v22 = vld [vmem:[%s16415_s27 + $0x78] sm:$0xff]  }
 0x1cb   : > { %v5266_v10 = vadd.f32 %v5265_v41, %v5231_v12  ;;  %v5343_v45 = vadd.f32 %v5308_v34, %v5307_v61  ;;  %v5128_v13 = vadd.f32 %v15645_v43, %v4616_v25  ;;  %v4961_v15 = vpop.f32.mrf.mxu1  ;;  %v4618_v19 = vadd.f32 %v4465_v2, %v21839_v3  ;;  %v15614_v24 = vpop.f32.mrf.mxu0  ;;  %15829 = vmatmul.mubr.msk.bf16.vlgmr.msra.gmra.mxu0 %vm372_vm1, %v18834_v7  ;;  %v21844_v41 = vld [vmem:[#allocation33_spill] sm:$0xff] }
 0x1cc   : > { %v19020_v28 = vor.u32 %v8432_v37, %v8429_v54  ;;  %v8441_v53 = vrot.slane %v8439_v29, 2  ;;  %v8445_v30 = vshrl.u32 %v19005_v44, 16  ;;  %v5310_v0 = vmul.f32 %v5232_v60, %v5124_v14  ;;  %15903 = vmatpush3.bf16.msra.mxu0 %v18802_v16  ;;  %v21842_v37 = vld [vmem:[#allocation8_spill] sm:$0xff]  ;;  %15832 = vmatprep.mubr.msk.bf16.mxu0 %vm372_vm1, %v18858_v59 }
 0x1cd   : > { %v5344_v12 = vadd.f32 %v5343_v45, %v5309_v51  ;;  %v5267_v61 = vadd.f32 %v5266_v10, %v5232_v60  ;;  %v21840_v25 = vrot.slane %v18967_v27, 2  ;;  %v19033_v34 = vpack.c.bf16 %v5128_v13, %v19001_v33  ;;  %v15648_v54 = vpop.f32.mrf.mxu1  ;;  %15823 = vmatmul.mubr.msk.bf16.gmra.mxu1 %vm372_vm1, %v18787_v6  ;;  %v4478_v14 = vpop.f32.mrf.mxu0 }
 0x1ce   : > { %v5126_v7 = vadd.f32 %v4961_v15, %v4614_v5  ;;  %v4623_v29 = vadd.f32 %v15614_v24, %v21842_v37  ;;  %v8448_v16 = vshll.u32 %v19005_v44, 16  ;;  %v19041_v51 = vadd.f32 %v15648_v54, %v4619_v47  ;;  %15866 = vmatprep.mubr.msk.bf16.mxu1 %vm372_vm1, %v18826_v8  ;;  %v21843_v5 = vld [vmem:[#allocation36_spill] sm:$0xff]  ;;  %v21846_v24 = vld [vmem:[#allocation41_spill] sm:$0xff]  ;;  %v21848_v44 = vld [vmem:[#allocation43_spill] sm:$0xff] }
 0x1cf   : > { %v19030_v43 = vsel %vm4813_vm5, %v8905_v46, %v21840_v25  ;;  %21841 = vst [vmem:[#allocation40_spill] sm:$0xff] %v19033_v34  ;;  %v5268_v45 = vadd.f32 %v5267_v61, %v5233_v26  ;;  %v5311_v46 = vmul.f32 %v5233_v26, %v5125_v32  ;;  %v5345_v60 = vadd.f32 %v5344_v12, %v5310_v0  ;;  %v4974_v15 = vpop.f32.mrf.mxu1  ;;  %v15615_v59 = vpop.f32.mrf.mxu0  ;;  %v21847_v47 = vld [vmem:[#allocation20_spill] sm:$0xff] }
 0x1d0   : > { %v5235_v6 = vmul.f32 %v19001_v33, %v21843_v5  ;;  %v5234_v2 = vmul.f32 %v5126_v7, %v21844_v41  ;;  %v19048_v10 = vpack.c.bf16 %v5126_v7, %v5125_v32  ;;  %v5236_v26 = vmul.f32 %v5128_v13, %v21846_v24  ;;  %v19054_v61 = vld [vmem:[%s16415_s27 + $0x88] sm:$0xff]  }
 0x1d1   : > { %v5346_v3 = vadd.f32 %v5345_v60, %v5311_v46  ;;  %v5129_v0 = vadd.f32 %v4974_v15, %v4617_v11  ;;  %v4621_v12 = vadd.f32 %v4478_v14, %v21847_v47  ;;  %v15649_v54 = vpop.f32.mrf.mxu1  ;;  %v4481_v37 = vpop.f32.mrf.mxu0  ;;  %v19059_v32 = vsel %vm1911_vm4, %v18991_v4, %v19020_v28  ;;  %v21849_v34 = vld [vmem:[#allocation44_spill] sm:$0xff]  ;;  %v21850_v47 = vld [vmem:[#allocation45_spill] sm:$0xff] }
 0x1d2   : > { %21845 = vst [vmem:[#allocation30_spill] sm:$0xff] %v19048_v10  ;;  %v5269_v8 = vadd.f32 %v5268_v45, %v5234_v2  ;;  %v5312_v25 = vmul.f32 %v5234_v2, %v5126_v7  ;;  %v19061_v10 = vor.u32 %v8441_v53, %v8438_v18  ;;  %v5132_v60 = vadd.f32 %v15649_v54, %v4620_v17  ;;  %v21852_v53 = vld [vmem:[#allocation48_spill] sm:$0xff]  ;;  %v21855_v54 = vld [vmem:[#allocation46_spill] sm:$0xff] }
 0x1d3   : > { %v5237_v46 = vmul.f32 %v5129_v0, %v21848_v44  ;;  %v4624_v11 = vadd.f32 %v15615_v59, %v21849_v34  ;;  %v19065_v15 = vrot.slane %v8445_v30, 1  ;;  %v5313_v14 = vmul.f32 %v5235_v6, %v19001_v33  ;;  %v4977_v2 = vpop.f32.mrf.mxu1  ;;  %v15618_v41 = vpop.f32.mrf.mxu0  ;;  %15833 = vmatmul.mubr.msk.bf16.gmra.mxu0 %vm372_vm1, %v18870_v36  ;;  %v21853_v36 = vld [vmem:[#allocation47_spill] sm:$0xff] }
 0x1d4   : > { %v5270_v45 = vadd.f32 %v5269_v8, %v5235_v6  ;;  %v5347_v7 = vadd.f32 %v5346_v3, %v5312_v25  ;;  %v4622_v24 = vadd.f32 %v4481_v37, %v21850_v47  ;;  %v5314_v4 = vmul.f32 %v5236_v26, %v5128_v13  ;;  %15836 = vmatprep.mubr.msk.bf16.mxu0 %vm372_vm1, %v18883_v49  ;;  %v21854_v25 = vld [vmem:[#allocation3_spill] sm:$0xff] }
 0x1d5   : > { %v19072_v18 = vpack.c.bf16 %v5132_v60, %v19041_v51  ;;  %v5130_v17 = vadd.f32 %v4977_v2, %v4618_v19  ;;  %v8454_v30 = vshrl.u32 %v19054_v61, 16  ;;  %v5239_v34 = vmul.f32 %v19041_v51, %v21852_v53  ;;  %v15652_v59 = vpop.f32.mrf.mxu1  ;;  %15867 = vmatmul.mubr.msk.bf16.vlgmr.msra.gmra.mxu1 %vm372_vm1, %v18846_v40  ;;  %v4494_v3 = vpop.f32.mrf.mxu0  ;;  %v19094_v53 = vld [vmem:[%s16415_s27 + $0x80] sm:$0xff]  }
 0x1d6   : > { %v5348_v33 = vadd.f32 %v5347_v7, %v5313_v14  ;;  %v5271_v6 = vadd.f32 %v5270_v45, %v5236_v26  ;;  %v4627_v13 = vadd.f32 %v15618_v41, %v21853_v36  ;;  %v5315_v8 = vmul.f32 %v5237_v46, %v5129_v0  ;;  %15941 = vmatpush3.bf16.msra.mxu1 %v18838_v38  ;;  %v21857_v36 = vld [vmem:[#allocation50_spill] sm:$0xff]  ;;  %v19097_v38 = vld [vmem:[%s16415_s27 + $0x90] sm:$0xff]  }
 0x1d7   : > { %21851 = vst [vmem:[#allocation42_spill] sm:$0xff] %v19072_v18  ;;  %v5240_v19 = vmul.f32 %v5132_v60, %v21854_v25  ;;  %v5238_v49 = vmul.f32 %v5130_v17, %v21855_v54  ;;  %15870 = vmatprep.mubr.msk.bf16.mxu1 %vm372_vm1, %v18851_v52  ;;  %v8450_v26 = vrot.slane %v8448_v16, 2  ;;  %v19087_v45 = vpack.c.bf16 %v5130_v17, %v5129_v0  ;;  %v4990_v41 = vpop.f32.mrf.mxu1  ;;  %v15619_v7 = vpop.f32.mrf.mxu0  ;;  %v21858_v25 = vld [vmem:[#allocation65_spill] sm:$0xff] }
 0x1d8   : > { %v5272_v37 = vadd.f32 %v5271_v6, %v5237_v46  ;;  %v5349_v14 = vadd.f32 %v5348_v33, %v5314_v4  ;;  %v19089_v40 = vadd.f32 %v15652_v59, %v4623_v29  ;;  %v5133_v47 = vadd.f32 %v4990_v41, %v4621_v12 }
 0x1d9   : > { %21856 = vst [vmem:[#allocation8_spill] sm:$0xff] %v19087_v45  ;;  %v5316_v2 = vmul.f32 %v5238_v49, %v5130_v17  ;;  %v4625_v18 = vadd.f32 %v4494_v3, %v21857_v36  ;;  %v4628_v54 = vadd.f32 %v15619_v7, %v21858_v25  ;;  %v15653_v46 = vpop.f32.mrf.mxu1  ;;  %v4497_v4 = vpop.f32.mrf.mxu0  ;;  %v21859_v0 = vrot.slane %v19024_v22, 2  ;;  %v21861_v17 = vld [vmem:[#allocation4_spill] sm:$0xff]  ;;  %v21862_v3 = vld [vmem:[#allocation66_spill] sm:$0xff] }
 0x1da   : > { %v5350_v52 = vadd.f32 %v5349_v14, %v5315_v8  ;;  %v5273_v16 = vadd.f32 %v5272_v37, %v5238_v49  ;;  %v21860_v29 = vrot.slane %v18967_v27, 2  ;;  %v8457_v12 = vshll.u32 %v19054_v61, 16 }
 0x1db   : > { %v5241_v6 = vmul.f32 %v5133_v47, %v21861_v17  ;;  %v5136_v59 = vadd.f32 %v15653_v46, %v4624_v11  ;;  %v4626_v25 = vadd.f32 %v4497_v4, %v21862_v3  ;;  %v19112_v8 = vsel %vm1911_vm4, %v19020_v28, %v19061_v10  ;;  %v4993_v27 = vpop.f32.mrf.mxu1  ;;  %v15622_v41 = vpop.f32.mrf.mxu0  ;;  %15837 = vmatmul.mubr.msk.bf16.gmra.mxu0 %vm372_vm1, %v18907_v48  ;;  %v21864_v48 = vld [vmem:[#allocation67_spill] sm:$0xff]  ;;  %v21871_v28 = vld [vmem:[#allocation37_spill] sm:$0xff] }
 0x1dc   : > { %v19104_v33 = vsel %vm4813_vm5, %v21860_v29, %v21859_v0  ;;  %v5317_v49 = vmul.f32 %v5239_v34, %v19041_v51  ;;  %v5274_v37 = vadd.f32 %v5273_v16, %v5239_v34  ;;  %v5351_v14 = vadd.f32 %v5350_v52, %v5316_v2  ;;  %15840 = vmatprep.mubr.msk.bf16.mxu0 %vm372_vm1, %v18936_v9  ;;  %v21865_v16 = vld [vmem:[#allocation6_spill] sm:$0xff]  ;;  %v19144_v51 = vld [vmem:[%s16415_s27 + $0x88] sm:$0xff]  }
 0x1dd   : > { %v19117_v61 = vrot.slane %v8454_v30, 1  ;;  %v5318_v7 = vmul.f32 %v5240_v19, %v5132_v60  ;;  %v19120_v11 = vpack.c.bf16 %v5136_v59, %v19089_v40  ;;  %v5134_v36 = vadd.f32 %v4993_v27, %v4622_v24  ;;  %v15656_v52 = vpop.f32.mrf.mxu1  ;;  %15871 = vmatmul.mubr.msk.bf16.gmra.mxu1 %vm372_vm1, %v18861_v23  ;;  %v4510_v60 = vpop.f32.mrf.mxu0  ;;  %v21866_v23 = vld [vmem:[#allocation62_spill] sm:$0xff]  ;;  %v21868_v27 = vld [vmem:[#allocation68_spill] sm:$0xff] }
 0x1de   : > { %v5352_v34 = vadd.f32 %v5351_v14, %v5317_v49  ;;  %v5275_v2 = vadd.f32 %v5274_v37, %v5240_v19  ;;  %v4631_v30 = vadd.f32 %v15622_v41, %v21864_v48  ;;  %v5243_v46 = vmul.f32 %v19089_v40, %v21865_v16  ;;  %15874 = vmatprep.mubr.msk.bf16.mxu1 %vm372_vm1, %v18873_v35  ;;  %v21869_v48 = vld [vmem:[#allocation69_spill] sm:$0xff]  ;;  %v19147_v35 = vld [vmem:[%s16415_s27 + $0x98] ss:$0 sps:$4 sm:$0x33]  }
 0x1df   : > { %21863 = vst [vmem:[#allocation36_spill] sm:$0xff] %v19120_v11  ;;  %v5319_v9 = vmul.f32 %v5241_v6, %v5133_v47  ;;  %v19131_v4 = vadd.f32 %v15656_v52, %v4627_v13  ;;  %v19136_v24 = vor.u32 %v8450_v26, %v19065_v15  ;;  %v5242_v29 = vmul.f32 %v5134_v36, %v21866_v23  ;;  %v5006_v49 = vpop.f32.mrf.mxu1  ;;  %v15623_v37 = vpop.f32.mrf.mxu0  ;;  %v21870_v26 = vld [vmem:[#allocation7_spill] sm:$0xff] }
 0x1e0   : > { %v5276_v19 = vadd.f32 %v5275_v2, %v5241_v6  ;;  %v5353_v0 = vadd.f32 %v5352_v34, %v5318_v7  ;;  %v19139_v3 = vpack.c.bf16 %v5134_v36, %v5133_v47  ;;  %v5137_v14 = vadd.f32 %v5006_v49, %v4625_v18 }
 0x1e1   : > { %v4629_v41 = vadd.f32 %v4510_v60, %v21868_v27  ;;  %v4632_v13 = vadd.f32 %v15623_v37, %v21869_v48  ;;  %v8459_v52 = vrot.slane %v8457_v12, 2  ;;  %v5244_v6 = vmul.f32 %v5136_v59, %v21870_v26  ;;  %v15657_v2 = vpop.f32.mrf.mxu1  ;;  %v4513_v47 = vpop.f32.mrf.mxu0 }
 0x1e2   : > { %21867 = vst [vmem:[#allocation20_spill] sm:$0xff] %v19139_v3  ;;  %v5354_v15 = vadd.f32 %v5353_v0, %v5319_v9  ;;  %v5277_v7 = vadd.f32 %v5276_v19, %v5242_v29  ;;  %v5320_v34 = vmul.f32 %v5242_v29, %v5134_v36  ;;  %v5245_v3 = vmul.f32 %v5137_v14, %v21871_v28  ;;  %v21874_v36 = vld [vmem:[#allocation71_spill] sm:$0xff] }
 0x1e3   : > { %v5140_v11 = vadd.f32 %v15657_v2, %v4628_v54  ;;  %v21872_v18 = vrot.slane %v19094_v53, 2  ;;  %v21873_v60 = vrot.slane %v19024_v22, 2  ;;  %v8466_v49 = vshll.u32 %v19097_v38, 16  ;;  %v5009_v19 = vpop.f32.mrf.mxu1  ;;  %v15626_v27 = vpop.f32.mrf.mxu0  ;;  %15841 = vmatmul.mubr.msk.bf16.gmra.mxu0 %vm372_vm1, %v18947_v31  ;;  %v21876_v2 = vld [vmem:[#allocation73_spill] sm:$0xff] }
 0x1e4   : > { %v5321_v9 = vmul.f32 %v5243_v46, %v19089_v40  ;;  %v5278_v0 = vadd.f32 %v5277_v7, %v5243_v46  ;;  %v5355_v37 = vadd.f32 %v5354_v15, %v5320_v34  ;;  %v4630_v29 = vadd.f32 %v4513_v47, %v21874_v36  ;;  %15844 = vmatprep.mubr.msk.bf16.mxu0 %vm372_vm1, %v18959_v50  ;;  %v21879_v36 = vld [vmem:[#allocation10_spill] sm:$0xff] }
 0x1e5   : > { %v19156_v12 = vsel %vm4813_vm5, %v21873_v60, %v21872_v18  ;;  %v19164_v54 = vpack.c.bf16 %v5140_v11, %v19131_v4  ;;  %v5138_v22 = vadd.f32 %v5009_v19, %v4626_v25  ;;  %v8472_v40 = vshrl.u32 %v19147_v35, 16  ;;  %v15660_v34 = vpop.f32.mrf.mxu1  ;;  %15875 = vmatmul.mubr.msk.bf16.gmra.mxu1 %vm372_vm1, %v18895_v20  ;;  %v4526_v47 = vpop.f32.mrf.mxu0  ;;  %v21877_v18 = vld [vmem:[#allocation39_spill] sm:$0xff]  ;;  %v21878_v19 = vld [vmem:[#allocation12_spill] sm:$0xff] }
 0x1e6   : > { %v5322_v46 = vmul.f32 %v5244_v6, %v5136_v59  ;;  %v5356_v15 = vadd.f32 %v5355_v37, %v5321_v9  ;;  %v5279_v7 = vadd.f32 %v5278_v0, %v5244_v6  ;;  %v4635_v31 = vadd.f32 %v15626_v27, %v21876_v2  ;;  %15878 = vmatprep.mubr.msk.bf16.mxu1 %vm372_vm1, %v18915_v1 }
 0x1e7   : > { %21875 = vst [vmem:[#allocation43_spill] sm:$0xff] %v19164_v54  ;;  %v5247_v25 = vmul.f32 %v19131_v4, %v21877_v18  ;;  %v5323_v60 = vmul.f32 %v5245_v3, %v5137_v14  ;;  %v5248_v50 = vmul.f32 %v5140_v11, %v21878_v19  ;;  %v5246_v48 = vmul.f32 %v5138_v22, %v21879_v36  ;;  %v5022_v20 = vpop.f32.mrf.mxu1  ;;  %v15627_v37 = vpop.f32.mrf.mxu0  ;;  %v21881_v54 = vld [vmem:[#allocation74_spill] sm:$0xff] }
 0x1e8   : > { %v5280_v59 = vadd.f32 %v5279_v7, %v5245_v3  ;;  %v5357_v6 = vadd.f32 %v5356_v15, %v5322_v46  ;;  %v19179_v9 = vpack.c.bf16 %v5138_v22, %v5137_v14  ;;  %v19181_v0 = vadd.f32 %v15660_v34, %v4631_v30  ;;  %v21883_v14 = vld [vmem:[#allocation14_spill] sm:$0xff] }
 0x1e9   : > { %v5324_v27 = vmul.f32 %v5246_v48, %v5138_v22  ;;  %v5141_v2 = vadd.f32 %v5022_v20, %v4629_v41  ;;  %v4633_v45 = vadd.f32 %v4526_v47, %v21881_v54  ;;  %v4636_v18 = vadd.f32 %v15627_v37, %v18792_v56  ;;  %v15661_v36 = vpop.f32.mrf.mxu1  ;;  %v4529_v26 = vpop.f32.mrf.mxu0  ;;  %v21884_v22 = vld [vmem:[#allocation75_spill] sm:$0xff] }
 0x1ea   : > { %21880 = vst [vmem:[#allocation44_spill] sm:$0xff] %v19179_v9  ;;  %v5358_v19 = vadd.f32 %v5357_v6, %v5323_v60  ;;  %v5281_v28 = vadd.f32 %v5280_v59, %v5246_v48  ;;  %v19188_v1 = vsel %vm1911_vm4, %v19061_v10, %v19136_v24  ;;  %v21882_v30 = vshrl.u32 %v19097_v38, 16  ;;  %v21890_v20 = vld [vmem:[#allocation15_spill] sm:$0xff] }
 0x1eb   : > { %v5249_v46 = vmul.f32 %v5141_v2, %v21883_v14  ;;  %v5144_v41 = vadd.f32 %v15661_v36, %v4632_v13  ;;  %v4634_v54 = vadd.f32 %v4529_v26, %v21884_v22  ;;  %v19195_v56 = vor.u32 %v8459_v52, %v19117_v61  ;;  %v5025_v34 = vpop.f32.mrf.mxu1  ;;  %v15630_v47 = vpop.f32.mrf.mxu0  ;;  %15845 = vmatmul.mubr.msk.bf16.gmra.mxu0 %vm372_vm1, %v18972_v21  ;;  %v19215_v52 = vld [vmem:[%s16415_s27 + $0x90] sm:$0xff]   ;;  %v21889_v36 = vld [vmem:[#allocation16_spill] sm:$0xff] }
 0x1ec   : > { %v8465_v3 = vrot.slane %v21882_v30, 1  ;;  %v5325_v48 = vmul.f32 %v5247_v25, %v19131_v4  ;;  %v5282_v15 = vadd.f32 %v5281_v28, %v5247_v25  ;;  %v5359_v7 = vadd.f32 %v5358_v19, %v5324_v27  ;;  %15848 = vmatprep.mubr.msk.bf16.mxu0 %vm372_vm1, %v18984_v55  ;;  %v21888_v25 = vld [vmem:[#allocation76_spill] sm:$0xff] }
 0x1ed   : > { %v8468_v10 = vrot.slane %v8466_v49, 2  ;;  %v5326_v38 = vmul.f32 %v5248_v50, %v5140_v11  ;;  %v19201_v60 = vpack.c.bf16 %v5144_v41, %v19181_v0  ;;  %v21886_v61 = vrot.slane %v19144_v51, 2  ;;  %v15664_v49 = vpop.f32.mrf.mxu1  ;;  %15879 = vmatmul.mubr.msk.bf16.gmra.mxu1 %vm372_vm1, %v18944_v62  ;;  %v4542_v19 = vpop.f32.mrf.mxu0 }
 0x1ee   : > { %v21887_v13 = vrot.slane %v19094_v53, 2  ;;  %v19212_v4 = vrot.slane %v8472_v40, 1  ;;  %v5360_v21 = vadd.f32 %v5359_v7, %v5325_v48  ;;  %v5283_v26 = vadd.f32 %v5282_v15, %v5248_v50  ;;  %15882 = vmatprep.mubr.msk.bf16.mxu1 %vm372_vm1, %v18955_v57  ;;  %v21892_v48 = vld [vmem:[#allocation77_spill] sm:$0xff]  ;;  %v21893_v7 = vld [vmem:[#allocation78_spill] sm:$0xff] }
 0x1ef   : > { %21885 = vst [vmem:[#allocation45_spill] sm:$0xff] %v19201_v60  ;;  %v5142_v11 = vadd.f32 %v5025_v34, %v4630_v29  ;;  %v4639_v55 = vadd.f32 %v15630_v47, %v21888_v25  ;;  %v5251_v53 = vmul.f32 %v19181_v0, %v21889_v36  ;;  %v5327_v59 = vmul.f32 %v5249_v46, %v5141_v2  ;;  %v5038_v27 = vpop.f32.mrf.mxu1  ;;  %v15631_v30 = vpop.f32.mrf.mxu0  ;;  %v19234_v47 = vld [vmem:[%s16415_s27 + $0x10] sm:$0xfc]  }
 0x1f0   : > { %v19210_v28 = vsel %vm4813_vm5, %v21887_v13, %v21886_v61  ;;  %v19222_v6 = vadd.f32 %v15664_v49, %v4635_v31  ;;  %v8475_v40 = vshll.u32 %v19147_v35, 16  ;;  %v5284_v29 = vadd.f32 %v5283_v26, %v5249_v46  ;;  %v21894_v61 = vld [vmem:[#allocation55_spill] sm:$0xff] }
 0x1f1   : > { %v5361_v50 = vadd.f32 %v5360_v21, %v5326_v38  ;;  %v5250_v37 = vmul.f32 %v5142_v11, %v21890_v20  ;;  %v19228_v62 = vpack.c.bf16 %v5142_v11, %v5141_v2  ;;  %v5145_v22 = vadd.f32 %v5038_v27, %v4633_v45  ;;  %v15665_v13 = vpop.f32.mrf.mxu1  ;;  %v4545_v21 = vpop.f32.mrf.mxu0  ;;  %v21895_v2 = vld [vmem:[#allocation19_spill] sm:$0xff] }
 0x1f2   : > { %v4637_v15 = vadd.f32 %v4542_v19, %v21892_v48  ;;  %v4640_v34 = vadd.f32 %v15631_v30, %v21893_v7  ;;  %v5252_v35 = vmul.f32 %v5144_v41, %v21894_v61  ;;  %v5148_v49 = vadd.f32 %v15665_v13, %v4636_v18  ;;  %v21896_v30 = vld [vmem:[#allocation79_spill] sm:$0xff]  ;;  %v21900_v13 = vld [vmem:[#allocation21_spill] sm:$0xff] }
 0x1f3   : > { %21891 = vst [vmem:[#allocation47_spill] sm:$0xff] %v19228_v62  ;;  %v5362_v57 = vadd.f32 %v5361_v50, %v5327_v59  ;;  %v5285_v46 = vadd.f32 %v5284_v29, %v5250_v37  ;;  %v5328_v38 = vmul.f32 %v5250_v37, %v5142_v11  ;;  %v5253_v26 = vmul.f32 %v5145_v22, %v21895_v2  ;;  %v5041_v50 = vpop.f32.mrf.mxu1  ;;  %v15634_v11 = vpop.f32.mrf.mxu0 }
 0x1f4   : > { %v19241_v45 = vsel %vm1911_vm4, %v19136_v24, %v19195_v56  ;;  %v19243_v25 = vor.u32 %v8468_v10, %v8465_v3  ;;  %v5329_v19 = vmul.f32 %v5251_v53, %v19181_v0  ;;  %v4638_v29 = vadd.f32 %v4545_v21, %v21896_v30  ;;  %15849 = vmatmul.mubr.msk.bf16.gmra.mxu0 %vm372_vm1, %v19011_v39  ;;  %v21898_v39 = vld [vmem:[#allocation80_spill] sm:$0xff]  ;;  %v16289_v21 = vld [vmem:[%s16415_s27 + $0x18] sm:$0xff]  }
 0x1f5   : > { %v5286_v27 = vadd.f32 %v5285_v46, %v5251_v53  ;;  %v5363_v59 = vadd.f32 %v5362_v57, %v5328_v38  ;;  %v19250_v18 = vpack.c.bf16 %v5148_v49, %v19222_v6  ;;  %v5146_v37 = vadd.f32 %v5041_v50, %v4634_v54  ;;  %15852 = vmatprep.mubr.msk.bf16.mxu0 %vm372_vm1, %v19059_v32  ;;  %v15668_v48 = vpop.f32.mrf.mxu1  ;;  %v4558_v57 = vpop.f32.mrf.mxu0  ;;  %v21899_v46 = vld [vmem:[#allocation23_spill] sm:$0xff] }
 0x1f6   : > { %v19254_v24 = vrot.slane %v8475_v40, 2  ;;  %v9394_v0 = vshrl.u32 %v19234_v47, 16  ;;  %v5330_v3 = vmul.f32 %v5252_v35, %v5144_v41  ;;  %15883 = vmatmul.mubr.msk.bf16.gmra.mxu1 %vm372_vm1, %v18964_v63  ;;  %v4643_v7 = vadd.f32 %v15634_v11, %v21898_v39  ;;  %v21901_v40 = vld [vmem:[#allocation84_spill] sm:$0xff]  ;;  %v21903_v39 = vld [vmem:[#allocation81_spill] sm:$0xff] }
 0x1f7   : > { %21897 = vst [vmem:[#allocation50_spill] sm:$0xff] %v19250_v18  ;;  %v5364_v10 = vadd.f32 %v5363_v59, %v5329_v19  ;;  %v5287_v53 = vadd.f32 %v5286_v27, %v5252_v35  ;;  %v5255_v54 = vmul.f32 %v19222_v6, %v21899_v46  ;;  %v5331_v38 = vmul.f32 %v5253_v26, %v5145_v22  ;;  %v5054_v59 = vpop.f32.mrf.mxu1  ;;  %v15635_v50 = vpop.f32.mrf.mxu0  ;;  %v21904_v18 = vld [vmem:[#allocation82_spill] sm:$0xff] }
 0x1f8   : > { %v5254_v32 = vmul.f32 %v5146_v37, %v21900_v13  ;;  %15886 = vmatprep.mubr.msk.bf16.mxu1 %vm372_vm1, %v21901_v40  ;;  %v9397_v41 = vshll.u32 %v19234_v47, 16  ;;  %v19267_v27 = vpack.c.bf16 %v5146_v37, %v5145_v22  ;;  %v19269_v63 = vadd.f32 %v15668_v48, %v4639_v55  ;;  %v21905_v40 = vld [vmem:[#allocation52_spill] sm:$0xff]  ;;  %v21906_v22 = vld [vmem:[#allocation5_spill] sm:$0xff]  ;;  %v19280_v48 = vld [vmem:[%s16415_s27 + $0x20] sm:$0xff]  }
 0x1f9   : > { %v5288_v35 = vadd.f32 %v5287_v53, %v5253_v26  ;;  %v5365_v19 = vadd.f32 %v5364_v10, %v5330_v3  ;;  %v5149_v11 = vadd.f32 %v5054_v59, %v4637_v15  ;;  %v4641_v31 = vadd.f32 %v4558_v57, %v21903_v39  ;;  %v15669_v47 = vpop.f32.mrf.mxu1  ;;  %v4561_v26 = vpop.f32.mrf.mxu0  ;;  %v21907_v53 = vld [vmem:[#allocation83_spill] sm:$0xff] }
 0x1fa   : > { %21902 = vst [vmem:[#allocation65_spill] sm:$0xff] %v19267_v27  ;;  %v5332_v30 = vmul.f32 %v5254_v32, %v5146_v37  ;;  %v4644_v62 = vadd.f32 %v15635_v50, %v21904_v18  ;;  %v5256_v9 = vmul.f32 %v5148_v49, %v21905_v40  ;;  %v8470_v55 = vsel %vm1911_vm4, %v19195_v56, %v19243_v25 }
 0x1fb   : > { %v5366_v60 = vadd.f32 %v5365_v19, %v5331_v38  ;;  %v5289_v13 = vadd.f32 %v5288_v35, %v5254_v32  ;;  %v5257_v3 = vmul.f32 %v5149_v11, %v21906_v22  ;;  %v5152_v10 = vadd.f32 %v15669_v47, %v4640_v34  ;;  %v5057_v19 = vpop.f32.mrf.mxu1  ;;  %v19283_v32 = vpop.f32.mrf.mxu0 }
 0x1fc   : > { %v4642_v37 = vadd.f32 %v4561_v26, %v21907_v53  ;;  %v9402_v15 = vshrl.u32 %v16289_v21, 16  ;;  %v5333_v18 = vmul.f32 %v5255_v54, %v19222_v6  ;;  %15853 = vmatmul.mubr.msk.bf16.gmra.mxu0 %vm372_vm1, %v19112_v8  ;;  %v8478_v56 = vor.u32 %v19254_v24, %v19212_v4  ;;  %v21909_v4 = vld [vmem:[#allocation27_spill] sm:$0xff] }
 0x1fd   : > { %v5290_v57 = vadd.f32 %v5289_v13, %v5255_v54  ;;  %v5367_v38 = vadd.f32 %v5366_v60, %v5332_v30  ;;  %v19290_v34 = vpack.c.bf16 %v5152_v10, %v19269_v63  ;;  %15856 = vmatprep.mubr.msk.bf16.mxu0 %vm372_vm1, %v19188_v1  ;;  %v19294_v35 = vrot.slane %v9394_v0, 2  ;;  %v15672_v30 = vpop.f32.mrf.mxu1  ;;  %v5826_v8 = vpop.f32.mrf.mxu0 }
 0x1fe   : > { %v19296_v6 = vrot.slane %v9397_v41, 3  ;;  %v9405_v60 = vshll.u32 %v16289_v21, 16  ;;  %v5334_v54 = vmul.f32 %v5256_v9, %v5148_v49  ;;  %v5150_v50 = vadd.f32 %v5057_v19, %v4638_v29  ;;  %15887 = vmatmul.mubr.msk.bf16.gmra.mxu1 %vm372_vm1, %v19014_v58  ;;  %v21910_v29 = vld [vmem:[#allocation54_spill] sm:$0xff]  ;;  %v21912_v19 = vld [vmem:[#allocation29_spill] sm:$0xff] }
 0x1ff   : > { %21908 = vst [vmem:[#allocation4_spill] sm:$0xff] %v19290_v34  ;;  %v5368_v13 = vadd.f32 %v5367_v38, %v5333_v18  ;;  %v5291_v59 = vadd.f32 %v5290_v57, %v5256_v9  ;;  %v5259_v24 = vmul.f32 %v19269_v63, %v21909_v4  ;;  %v5335_v39 = vmul.f32 %v5257_v3, %v5149_v11  ;;  %v5070_v58 = vpop.f32.mrf.mxu1  ;;  %v15679_v47 = vpop.f32.mrf.mxu0 }
 0x200   : > { %v19302_v1 = vadd.f32 %v15672_v30, %v4643_v7  ;;  %15890 = vmatprep.mubr.msk.bf16.mxu1 %vm372_vm1, %v19030_v43  ;;  %v9411_v49 = vshrl.u32 %v19280_v48, 16  ;;  %v5258_v21 = vmul.f32 %v5150_v50, %v21910_v29  ;;  %v19308_v41 = vpack.c.bf16 %v5150_v50, %v5149_v11  ;;  %v16293_v7 = vld [vmem:[%s16415_s27 + $0x28] sm:$0xff]  }
 0x201   : > { %v5292_v0 = vadd.f32 %v5291_v59, %v5257_v3  ;;  %v5369_v9 = vadd.f32 %v5368_v13, %v5334_v54  ;;  %v5153_v26 = vadd.f32 %v5070_v58, %v4641_v31  ;;  %v9404_v53 = vrot.slane %v9402_v15, 2  ;;  %v15673_v27 = vpop.f32.mrf.mxu1  ;;  %v5829_v3 = vpop.f32.mrf.mxu0  ;;  %v21913_v54 = vld [vmem:[#allocation59_spill] sm:$0xff]  ;;  %v19340_v58 = vld [vmem:[%s16415_s27 + $0x98] ss:$0 sps:$4 sm:$0x33]  }
 0x202   : > { %21911 = vst [vmem:[#allocation66_spill] sm:$0xff] %v19308_v41  ;;  %v9407_v18 = vrot.slane %v9405_v60, 3  ;;  %v9414_v57 = vshll.u32 %v19280_v48, 16  ;;  %v5260_v30 = vmul.f32 %v5152_v10, %v21912_v19  ;;  %v5336_v34 = vmul.f32 %v5258_v21, %v5150_v50 }
 0x203   : > { %v5370_v38 = vadd.f32 %v5369_v9, %v5335_v39  ;;  %v5293_v43 = vadd.f32 %v5292_v0, %v5258_v21  ;;  %v5261_v13 = vmul.f32 %v5153_v26, %v21913_v54  ;;  %v19314_v59 = vadd.f32 %v15673_v27, %v4644_v62  ;;  %v5073_v39 = vpop.f32.mrf.mxu1  ;;  %v19321_v9 = vpop.f32.mrf.mxu0 }
 0x204   : > { %v8479_v11 = vsel %vm1911_vm4, %v19243_v25, %v8478_v56  ;;  %v9400_v31 = vor.u32 %v19296_v6, %v19294_v35  ;;  %v5337_v15 = vmul.f32 %v5259_v24, %v19269_v63  ;;  %15857 = vmatmul.mubr.msk.bf16.gmra.mxu0 %vm372_vm1, %v19241_v45  ;;  %v9413_v50 = vrot.slane %v9411_v49, 2  ;;  %v21915_v49 = vld [vmem:[#allocation58_spill] sm:$0xff] }
 0x205   : > { %v5294_v48 = vadd.f32 %v5293_v43, %v5259_v24  ;;  %v5371_v60 = vadd.f32 %v5370_v38, %v5336_v34  ;;  %v19327_v62 = vpack.c.bf16 %v19314_v59, %v19302_v1  ;;  %v5154_v25 = vadd.f32 %v5073_v39, %v4642_v37  ;;  %15860 = vmatprep.mubr.msk.bf16.mxu0 %vm372_vm1, %v8470_v55  ;;  %v15716_v6 = vpop.f32.mrf.mxu1  ;;  %v5842_v45 = vpop.f32.mrf.mxu0  ;;  %v21916_v37 = vld [vmem:[#allocation57_spill] sm:$0xff] }
 0x206   : > { %v19330_v27 = vor.u32 %v9407_v18, %v9404_v53  ;;  %v9420_v63 = vshrl.u32 %v16293_v7, 16  ;;  %v5338_v56 = vmul.f32 %v5260_v30, %v5152_v10  ;;  %15891 = vmatmul.mubr.msk.bf16.gmra.mxu1 %vm372_vm1, %v19104_v33  ;;  %v9423_v24 = vshll.u32 %v16293_v7, 16  ;;  %v16295_v53 = vld [vmem:[%s16415_s27 + $0x30] sm:$0xff]  }
 0x207   : > { %21914 = vst [vmem:[#allocation67_spill] sm:$0xff] %v19327_v62  ;;  %v5372_v34 = vadd.f32 %v5371_v60, %v5337_v15  ;;  %v5295_v35 = vadd.f32 %v5294_v48, %v5260_v30  ;;  %v5263_v0 = vmul.f32 %v19302_v1, %v21915_v49  ;;  %v5339_v21 = vmul.f32 %v5261_v13, %v5153_v26  ;;  %v6398_v7 = vpop.f32.mrf.mxu1  ;;  %v15683_v43 = vpop.f32.mrf.mxu0 }
 0x208   : > { %v5262_v55 = vmul.f32 %v5154_v25, %v21916_v37  ;;  %15894 = vmatprep.mubr.msk.bf16.mxu1 %vm372_vm1, %v19156_v12  ;;  %v9416_v10 = vrot.slane %v9414_v57, 3  ;;  %v19343_v30 = vpack.c.bf16 %v5154_v25, %v5153_v26  ;;  %v19346_v33 = vadd.f32 %v15716_v6, %v19283_v32  ;;  %v16297_v57 = vld [vmem:[%s16415_s27 + $0x38] sm:$0xff]  }
 0x209   : > { %v5296_v18 = vadd.f32 %v5295_v35, %v5261_v13  ;;  %v5373_v38 = vadd.f32 %v5372_v34, %v5338_v56  ;;  %v19348_v48 = vadd.f32 %v6398_v7, %v5826_v8  ;;  %v9409_v12 = vsel %vm7292_vm6, %v9400_v31, %v19330_v27  ;;  %v21918_v13 = vld [vmem:[#allocation35_spill] sm:$0xff]  ;;  %v15717_v34 = vpop.f32.mrf.mxu1  ;;  %v5845_v32 = vpop.f32.mrf.mxu0  ;;  %v19365_v7 = vld [vmem:[%s16415_s27 + $0x18] sm:$0xff]  }
 0x20a   : > { %21917 = vst [vmem:[#allocation6_spill] sm:$0xff] %v19343_v30  ;;  %v5340_v15 = vmul.f32 %v5262_v55, %v5154_v25  ;;  %v9422_v60 = vrot.slane %v9420_v63, 2  ;;  %v5264_v26 = vmul.f32 %v19314_v59, %v21918_v13  ;;  %v9425_v35 = vrot.slane %v9423_v24, 3  ;;  %v16291_v63 = vld [vmem:[%s16415_s27 + $0x10] sm:$0xf8]  }
 0x20b   : > { %v5374_v39 = vadd.f32 %v5373_v38, %v5339_v21  ;;  %v5297_v56 = vadd.f32 %v5296_v18, %v5262_v55  ;;  %v19355_v6 = vadd.f32 %v15717_v34, %v15679_v47  ;;  %v21919_v30 = vrot.slane %v19215_v52, 2  ;;  %v6401_v62 = vpop.f32.mrf.mxu1  ;;  %v19368_v24 = vpop.f32.mrf.mxu0 }
 0x20c   : > { %v21920_v8 = vrot.slane %v19144_v51, 2  ;;  %v8917_v31 = vrot.slane %v19340_v58, 2  ;;  %v9429_v21 = vshrl.u32 %v16295_v53, 16  ;;  %v5341_v38 = vmul.f32 %v5263_v0, %v19302_v1  ;;  %15861 = vmatmul.mubr.msk.bf16.gmra.mxu0 %vm372_vm1, %v8479_v11 }
 0x20d   : > { %v5298_v55 = vadd.f32 %v5297_v56, %v5263_v0  ;;  %v5375_v18 = vadd.f32 %v5374_v39, %v5340_v15  ;;  %v9432_v47 = vshll.u32 %v16295_v53, 16  ;;  %v19371_v34 = vadd.f32 %v6401_v62, %v5829_v3  ;;  %15904 = vmatprep.mubr.msk.bf16.mxu0 %vm372_vm1, %v9409_v12  ;;  %v15720_v1 = vpop.f32.mrf.mxu1  ;;  %v5858_v0 = vpop.f32.mrf.mxu0 }
 0x20e   : > { %v8916_v25 = vsel %vm4813_vm5, %v21920_v8, %v21919_v30  ;;  %v9417_v51 = vor.u32 %v9416_v10, %v9413_v50  ;;  %v9438_v58 = vshrl.u32 %v16297_v57, 16  ;;  %v9441_v30 = vshll.u32 %v16297_v57, 16  ;;  %15895 = vmatmul.mubr.msk.bf16.gmra.mxu1 %vm372_vm1, %v19210_v28 }
 0x20f   : > { %v5342_v8 = vmul.f32 %v5264_v26, %v19314_v59  ;;  %v5299_v41 = vadd.f32 %v5298_v55, %v5264_v26  ;;  %v5376_v13 = vadd.f32 %v5375_v18, %v5341_v38  ;;  %v9426_v15 = vor.u32 %v9425_v35, %v9422_v60  ;;  %15898 = vmatprep.mubr.msk.bf16.mxu1 %vm372_vm1, %v8916_v25  ;;  %v6414_v10 = vpop.f32.mrf.mxu1  ;;  %v15687_v53 = vpop.f32.mrf.mxu0  ;;  %v16299_v26 = vld [vmem:[%s16415_s27 + $0x40] sm:$0xff]   ;;  %v16301_v38 = vld [vmem:[%s16415_s27 + $0x48] sm:$0xff]   ;;  %v21922_v18 = vld [vmem:[#allocation70_spill] sm:$0xff] }
 0x210   : > { %v19378_v11 = vadd.f32 %v15720_v1, %v19321_v9  ;;  %v10038_v3 = vrot.slane %v16291_v63, 3  ;;  %v21470_v50 = vrot.slane %v19365_v7, 3  ;;  %v9431_v12 = vrot.slane %v9429_v21, 2  ;;  %v21921_v55 = vld [vmem:[#allocation72_spill] sm:$0xff] }
 0x211   : > { %v5300_v62 = vrot.slane %v5299_v41, 4  ;;  %v5377_v59 = vadd.f32 %v5376_v13, %v5342_v8  ;;  %v9434_v57 = vrot.slane %v9432_v47, 3  ;;  %v19382_v28 = vadd.f32 %v6414_v10, %v5842_v45  ;;  %v15721_v25 = vpop.f32.mrf.mxu1  ;;  %v5861_v63 = vpop.f32.mrf.mxu0 }
 0x212   : > { %v9418_v9 = vsel %vm7292_vm6, %v19330_v27, %v9417_v51  ;;  %v9440_v60 = vrot.slane %v9438_v58, 2  ;;  %v9443_v39 = vrot.slane %v9441_v30, 3  ;;  %v9427_v13 = vsel %vm7292_vm6, %v9417_v51, %v9426_v15 }
 0x213   : > { %v5301_v56 = vadd.f32 %v5300_v62, %v5299_v41  ;;  %v5378_v35 = vrot.slane %v5377_v59, 4  ;;  %v2715_v21 = vrot.slane %v21921_v55, 1  ;;  %v21923_v45 = vrot.slane %v21922_v18, 2  ;;  %v16294_v41 = vld [vmem:[%s16415_s27 + $0x20] sm:$0xff]   ;;  %v6417_v62 = vpop.f32.mrf.mxu1  ;;  %v19399_v10 = vpop.f32.mrf.mxu0 }
 0x214   : > { %v19393_v8 = vadd.f32 %v15721_v25, %v15683_v43  ;;  %v21924_v27 = vrot.slane %v19215_v52, 2  ;;  %15905 = vmatmul.mubr.msk.bf16.vlgmr.msra.gmra.mxu0 %vm372_vm1, %v9418_v9  ;;  %v10040_v51 = vsel %vm10037_vm7, %v10038_v3, %v21470_v50  ;;  %v9435_v37 = vor.u32 %v9434_v57, %v9431_v12  ;;  %v16305_v50 = vld [vmem:[%s16415_s27 + $0x58] sm:$0xff]  }
 0x215   : > { %v2792_v47 = vadd.f32 %v21923_v45, %v21922_v18  ;;  %v5302_v30 = vrot.slane %v5301_v56, 2  ;;  %v5379_v1 = vadd.f32 %v5378_v35, %v5377_v59  ;;  %v19406_v18 = vld [vmem:[%s16415_s27 + $0x28] sm:$0xff]   ;;  %v19408_v43 = vadd.f32 %v6417_v62, %v5845_v32  ;;  %15908 = vmatprep.mubr.msk.bf16.mxu0 %vm372_vm1, %v9427_v13  ;;  %v15724_v45 = vpop.f32.mrf.mxu1  ;;  %v5874_v9 = vpop.f32.mrf.mxu0 }
 0x216   : > { %v8918_v58 = vsel %vm4813_vm5, %v21924_v27, %v8917_v31  ;;  %v19411_v52 = vor.u32 %v9443_v39, %v9440_v60  ;;  %v9447_v31 = vshrl.u32 %v16299_v26, 16  ;;  %v9450_v59 = vshll.u32 %v16299_v26, 16 }
 0x217   : > { %v5303_v35 = vadd.f32 %v5302_v30, %v5301_v56  ;;  %v5380_v25 = vrot.slane %v5379_v1, 2  ;;  %15899 = vmatmul.mubr.msk.bf16.gmra.mxu1 %vm372_vm1, %v8918_v58  ;;  %v9456_v27 = vshrl.u32 %v16301_v38, 16  ;;  %v9459_v49 = vshll.u32 %v16301_v38, 16  ;;  %v6430_v26 = vpop.f32.mrf.mxu1  ;;  %v15691_v56 = vpop.f32.mrf.mxu0  ;;  %v16303_v30 = vld [vmem:[%s16415_s27 + $0x50] sm:$0xff]  }
 0x218   : > { %v2716_v3 = vadd.f32 %v2715_v21, %v21921_v55  ;;  %v2793_v12 = vrot.slane %v2792_v47, 1  ;;  %v19416_v32 = vadd.f32 %v15724_v45, %v19368_v24  ;;  %15942 = vmatprep.mubr.msk.bf16.mxu1 %vm372_vm1, %v10040_v51  ;;  %v10041_v57 = vrot.slane %v16294_v41, 3 }
 0x219   : > { %v5304_v60 = vrot.slane %v5303_v35, 1  ;;  %v5381_v39 = vadd.f32 %v5380_v25, %v5379_v1  ;;  %v9436_v13 = vsel %vm7292_vm6, %v9426_v15, %v9435_v37  ;;  %v10043_v38 = vrot.slane %v19406_v18, 3  ;;  %v15725_v1 = vpop.f32.mrf.mxu1  ;;  %v5877_v51 = vpop.f32.mrf.mxu0 }
 0x21a   : > { %v19421_v58 = vadd.f32 %v6430_v26, %v5858_v0  ;;  %v9445_v55 = vsel %vm7292_vm6, %v9435_v37, %v19411_v52  ;;  %v9449_v24 = vrot.slane %v9447_v31, 2  ;;  %v9452_v21 = vrot.slane %v9450_v59, 3  ;;  %v16298_v26 = vld [vmem:[%s16415_s27 + $0x30] sm:$0xff]  }
 0x21b   : > { %v5305_v62 = vadd.f32 %v5304_v60, %v5303_v35  ;;  %v5382_v41 = vrot.slane %v5381_v39, 1  ;;  %v9458_v25 = vrot.slane %v9456_v27, 2  ;;  %v9461_v45 = vrot.slane %v9459_v49, 3  ;;  %v6433_v59 = vpop.f32.mrf.mxu1  ;;  %v15694_v35 = vpop.f32.mrf.mxu0  ;;  %v19438_v27 = vld [vmem:[%s16415_s27 + $0x38] sm:$0xff]  }
 0x21c   : > { %v19427_v15 = vadd.f32 %v15725_v1, %v15687_v53  ;;  %v21925_v18 = vrot.slane %v19365_v7, 3  ;;  %v2794_v54 = vadd.f32 %v2793_v12, %v2792_v47  ;;  %15909 = vmatmul.mubr.msk.bf16.gmra.mxu0 %vm372_vm1, %v9436_v13  ;;  %v10044_v60 = vsel %vm10037_vm7, %v10041_v57, %v10043_v38 }
 0x21d   : > { %v19433_v37 = vadd.f32 %v5305_v62, %v2716_v3  ;;  %v5383_v31 = vadd.f32 %v5382_v41, %v5381_v39  ;;  %v19440_v49 = vadd.f32 %v6433_v59, %v5861_v63  ;;  %15912 = vmatprep.mubr.msk.bf16.mxu0 %vm372_vm1, %v9445_v55  ;;  %v9453_v7 = vor.u32 %v9452_v21, %v9449_v24  ;;  %v15728_v47 = vpop.f32.mrf.mxu1  ;;  %v5890_v3 = vpop.f32.mrf.mxu0  ;;  %v16307_v41 = vld [vmem:[%s16415_s27 + $0x60] sm:$0xff]  }
 0x21e   : > { %v10042_v0 = vsel %vm10037_vm7, %v21925_v18, %v10041_v57  ;;  %v9465_v53 = vshrl.u32 %v16303_v30, 16  ;;  %v9468_v1 = vshll.u32 %v16303_v30, 16  ;;  %v9462_v12 = vor.u32 %v9461_v45, %v9458_v25 }
 0x21f   : > { %21926 = vst [vmem:[#allocation62_spill] sm:$0xff] %v19433_v37  ;;  %v19443_v18 = vadd.f32 %v5383_v31, %v2794_v54  ;;  %15943 = vmatmul.mubr.msk.bf16.vlgmr.msra.gmra.mxu1 %vm372_vm1, %v10042_v0  ;;  %v9474_v39 = vshrl.u32 %v16305_v50, 16  ;;  %v9477_v13 = vshll.u32 %v16305_v50, 16  ;;  %v19447_v57 = vadd.f32 %v15728_v47, %v19399_v10  ;;  %v6446_v55 = vpop.f32.mrf.mxu1  ;;  %v15695_v24 = vpop.f32.mrf.mxu0  ;;  %v16309_v31 = vld [vmem:[%s16415_s27 + $0x68] sm:$0xff]  }
 0x220   : > { %15946 = vmatprep.mubr.msk.bf16.mxu1 %vm372_vm1, %v10044_v60  ;;  %v10045_v63 = vrot.slane %v16298_v26, 3  ;;  %v10047_v54 = vrot.slane %v19438_v27, 3  ;;  %v19451_v21 = vadd.f32 %v6446_v55, %v5874_v9  ;;  %v9454_v30 = vsel %vm7292_vm6, %v19411_v52, %v9453_v7  ;;  %v16302_v9 = vld [vmem:[%s16415_s27 + $0x40] sm:$0xff]  }
 0x221   : > { %21927 = vst [vmem:[#allocation68_spill] sm:$0xff] %v19443_v18  ;;  %v9467_v62 = vrot.slane %v9465_v53, 2  ;;  %v9470_v50 = vrot.slane %v9468_v1, 3  ;;  %v15729_v10 = vpop.f32.mrf.mxu1  ;;  %v5893_v25 = vpop.f32.mrf.mxu0  ;;  %v9463_v45 = vsel %vm7292_vm6, %v9453_v7, %v9462_v12  ;;  %v9476_v0 = vrot.slane %v9474_v39, 2  ;;  %v19465_v53 = vld [vmem:[%s16415_s27 + $0x48] sm:$0xff]  }
 0x222   : > { %v9479_v26 = vrot.slane %v9477_v13, 3  ;;  %v19458_v59 = vadd.f32 %v15729_v10, %v15691_v56  ;;  %v10046_v60 = vsel %vm10037_vm7, %v10043_v38, %v10045_v63  ;;  %v10048_v52 = vsel %vm10037_vm7, %v10045_v63, %v10047_v54 }
 0x223   : > { %v6449_v27 = vpop.f32.mrf.mxu1  ;;  %v15698_v47 = vpop.f32.mrf.mxu0  ;;  %v9471_v7 = vor.u32 %v9470_v50, %v9467_v62  ;;  %v9483_v39 = vshrl.u32 %v16307_v41, 16  ;;  %v9486_v13 = vshll.u32 %v16307_v41, 16  ;;  %v9492_v10 = vshrl.u32 %v16309_v31, 16 }
 0x224   : > { %15913 = vmatmul.mubr.msk.bf16.gmra.mxu0 %vm372_vm1, %v9454_v30  ;;  %v19467_v1 = vadd.f32 %v6449_v27, %v5877_v51  ;;  %v9480_v55 = vor.u32 %v9479_v26, %v9476_v0  ;;  %v9495_v18 = vshll.u32 %v16309_v31, 16  ;;  %v10049_v51 = vrot.slane %v16302_v9, 3  ;;  %v16311_v26 = vld [vmem:[%s16415_s27 + $0x70] sm:$0xff]   ;;  %v16313_v9 = vld [vmem:[%s16415_s27 + $0x78] sm:$0xff]  }
 0x225   : > { %15916 = vmatprep.mubr.msk.bf16.mxu0 %vm372_vm1, %v9463_v45  ;;  %v15732_v56 = vpop.f32.mrf.mxu1  ;;  %v5906_v38 = vpop.f32.mrf.mxu0  ;;  %v10051_v62 = vrot.slane %v19465_v53, 3  ;;  %v9472_v41 = vsel %vm7292_vm6, %v9462_v12, %v9471_v7  ;;  %v9488_v0 = vrot.slane %v9486_v13, 3  ;;  %v16306_v53 = vld [vmem:[%s16415_s27 + $0x50] sm:$0xff]   ;;  %v9510_v29 = vshrl.u32 %v16313_v9, 16 }
 0x226   : > { %v19471_v30 = vadd.f32 %v15732_v56, %v15694_v35  ;;  %v9481_v27 = vsel %vm7292_vm6, %v9471_v7, %v9480_v55  ;;  %v9494_v56 = vrot.slane %v9492_v10, 2  ;;  %v10050_v19 = vsel %vm10037_vm7, %v10047_v54, %v10049_v51 }
 0x227   : > { %15947 = vmatmul.mubr.msk.bf16.gmra.mxu1 %vm372_vm1, %v10046_v60  ;;  %v6462_v63 = vpop.f32.mrf.mxu1  ;;  %v15699_v45 = vpop.f32.mrf.mxu0  ;;  %v9485_v60 = vrot.slane %v9483_v39, 2  ;;  %v10052_v12 = vsel %vm10037_vm7, %v10049_v51, %v10051_v62  ;;  %v19488_v39 = vld [vmem:[%s16415_s27 + $0x58] sm:$0xff]   ;;  %v9504_v10 = vshll.u32 %v16311_v26, 16  ;;  %v9513_v4 = vshll.u32 %v16313_v9, 16 }
 0x228   : > { %15950 = vmatprep.mubr.msk.bf16.mxu1 %vm372_vm1, %v10048_v52  ;;  %v19475_v50 = vadd.f32 %v6462_v63, %v5890_v3  ;;  %v9497_v52 = vrot.slane %v9495_v18, 3  ;;  %v9501_v18 = vshrl.u32 %v16311_v26, 16 }
 0x229   : > { %v15733_v31 = vpop.f32.mrf.mxu1  ;;  %v5909_v35 = vpop.f32.mrf.mxu0  ;;  %v9489_v7 = vor.u32 %v9488_v0, %v9485_v60  ;;  %v10055_v60 = vrot.slane %v19488_v39, 3  ;;  %v16310_v39 = vld [vmem:[%s16415_s27 + $0x60] sm:$0xff]  }
 0x22a   : > { %v19481_v37 = vadd.f32 %v15733_v31, %v15695_v24  ;;  %v9498_v31 = vor.u32 %v9497_v52, %v9494_v56  ;;  %v9506_v56 = vrot.slane %v9504_v10, 3  ;;  %v16315_v52 = vld [vmem:[%s16415_s27 + $0x80] sm:$0xff]  }
 0x22b   : > { %v6465_v3 = vpop.f32.mrf.mxu1  ;;  %v15702_v63 = vpop.f32.mrf.mxu0  ;;  %v9490_v26 = vsel %vm7292_vm6, %v9480_v55, %v9489_v7 }
 0x22c   : > { %15917 = vmatmul.mubr.msk.bf16.gmra.mxu0 %vm372_vm1, %v9472_v41  ;;  %v19490_v13 = vadd.f32 %v6465_v3, %v5893_v25  ;;  %v10053_v25 = vrot.slane %v16306_v53, 3  ;;  %v9499_v3 = vsel %vm7292_vm6, %v9489_v7, %v9498_v31  ;;  %v16317_v53 = vld [vmem:[%s16415_s27 + $0x88] sm:$0xff]  }
 0x22d   : > { %15920 = vmatprep.mubr.msk.bf16.mxu0 %vm372_vm1, %v9481_v27  ;;  %v15736_v24 = vpop.f32.mrf.mxu1  ;;  %v5922_v54 = vpop.f32.mrf.mxu0  ;;  %v9528_v46 = vshrl.u32 %v16317_v53, 16  ;;  %v9531_v2 = vshll.u32 %v16317_v53, 16 }
 0x22e   : > { %v19494_v41 = vadd.f32 %v15736_v24, %v15698_v47  ;;  %v9512_v24 = vrot.slane %v9510_v29, 2  ;;  %v10054_v40 = vsel %vm10037_vm7, %v10051_v62, %v10053_v25  ;;  %v10056_v55 = vsel %vm10037_vm7, %v10053_v25, %v10055_v60 }
 0x22f   : > { %15951 = vmatmul.mubr.msk.bf16.gmra.mxu1 %vm372_vm1, %v10050_v19  ;;  %v6478_v51 = vpop.f32.mrf.mxu1  ;;  %v15703_v27 = vpop.f32.mrf.mxu0  ;;  %v9503_v19 = vrot.slane %v9501_v18, 2  ;;  %v19511_v18 = vld [vmem:[%s16415_s27 + $0x68] sm:$0xff]   ;;  %v9519_v29 = vshrl.u32 %v16315_v52, 16 }
 0x230   : > { %15954 = vmatprep.mubr.msk.bf16.mxu1 %vm372_vm1, %v10052_v12  ;;  %v19498_v0 = vadd.f32 %v6478_v51, %v5906_v38  ;;  %v9515_v12 = vrot.slane %v9513_v4, 3 }
 0x231   : > { %v15737_v9 = vpop.f32.mrf.mxu1  ;;  %v5925_v47 = vpop.f32.mrf.mxu0  ;;  %v9507_v4 = vor.u32 %v9506_v56, %v9503_v19  ;;  %v10059_v19 = vrot.slane %v19511_v18, 3  ;;  %v16319_v56 = vld [vmem:[%s16415_s27 + $0x90] sm:$0xff]  }
 0x232   : > { %v19504_v22 = vadd.f32 %v15737_v9, %v15699_v45  ;;  %v9522_v45 = vshll.u32 %v16315_v52, 16  ;;  %v9516_v9 = vor.u32 %v9515_v12, %v9512_v24  ;;  %v9521_v24 = vrot.slane %v9519_v29, 2  ;;  %v16314_v18 = vld [vmem:[%s16415_s27 + $0x70] sm:$0xff]   ;;  %v19534_v29 = vld [vmem:[%s16415_s27 + $0x78] sm:$0xff]  }
 0x233   : > { %v6481_v38 = vpop.f32.mrf.mxu1  ;;  %v15706_v51 = vpop.f32.mrf.mxu0 }
 0x234   : > { %15921 = vmatmul.mubr.msk.bf16.gmra.mxu0 %vm372_vm1, %v9490_v26  ;;  %v19513_v10 = vadd.f32 %v6481_v38, %v5909_v35  ;;  %v10057_v35 = vrot.slane %v16310_v39, 3  ;;  %v9524_v12 = vrot.slane %v9522_v45, 3  ;;  %v9517_v38 = vsel %vm7292_vm6, %v9507_v4, %v9516_v9  ;;  %v16321_v39 = vld [vmem:[%s16415_s27 + $0x98] sm:$0xff]  }
 0x235   : > { %15924 = vmatprep.mubr.msk.bf16.mxu0 %vm372_vm1, %v9499_v3  ;;  %v15740_v7 = vpop.f32.mrf.mxu1  ;;  %v5938_v62 = vpop.f32.mrf.mxu0  ;;  %v9537_v45 = vshrl.u32 %v16319_v56, 16 }
 0x236   : > { %v19517_v26 = vadd.f32 %v15740_v7, %v15702_v63  ;;  %v9530_v7 = vrot.slane %v9528_v46, 2  ;;  %v10058_v20 = vsel %vm10037_vm7, %v10055_v60, %v10057_v35 }
 0x237   : > { %15955 = vmatmul.mubr.msk.bf16.gmra.mxu1 %vm372_vm1, %v10054_v40  ;;  %v6494_v25 = vpop.f32.mrf.mxu1  ;;  %v15707_v3 = vpop.f32.mrf.mxu0  ;;  %v9508_v40 = vsel %vm7292_vm6, %v9498_v31, %v9507_v4  ;;  %v10060_v31 = vsel %vm10037_vm7, %v10057_v35, %v10059_v19  ;;  %v9546_v4 = vshrl.u32 %v16321_v39, 16  ;;  %v10061_v35 = vrot.slane %v16314_v18, 3 }
 0x238   : > { %15958 = vmatprep.mubr.msk.bf16.mxu1 %vm372_vm1, %v10056_v55  ;;  %v19522_v52 = vadd.f32 %v6494_v25, %v5922_v54  ;;  %v9533_v55 = vrot.slane %v9531_v2, 3  ;;  %v9540_v25 = vshll.u32 %v16319_v56, 16  ;;  %v9525_v2 = vor.u32 %v9524_v12, %v9521_v24 }
 0x239   : > { %v15741_v53 = vpop.f32.mrf.mxu1  ;;  %v5941_v63 = vpop.f32.mrf.mxu0 }
 0x23a   : > { %v19527_v61 = vadd.f32 %v15741_v53, %v15703_v27  ;;  %v9534_v60 = vor.u32 %v9533_v55, %v9530_v7  ;;  %v9549_v53 = vshll.u32 %v16321_v39, 16  ;;  %v9542_v24 = vrot.slane %v9540_v25, 3  ;;  %v16323_v7 = vld [vmem:[%s16415_s27 + $0xa0] ss:$0 sps:$4 sm:$0x77]  }
 0x23b   : > { %v6497_v36 = vpop.f32.mrf.mxu1  ;;  %v15710_v54 = vpop.f32.mrf.mxu0 }
 0x23c   : > { %15925 = vmatmul.mubr.msk.bf16.gmra.mxu0 %vm372_vm1, %v9508_v40  ;;  %v19536_v14 = vadd.f32 %v6497_v36, %v5925_v47  ;;  %v10063_v47 = vrot.slane %v19534_v29, 3 }
 0x23d   : > { %15928 = vmatprep.mubr.msk.bf16.mxu0 %vm372_vm1, %v9517_v38  ;;  %v15744_v46 = vpop.f32.mrf.mxu1  ;;  %v5954_v27 = vpop.f32.mrf.mxu0  ;;  %v9539_v38 = vrot.slane %v9537_v45, 2 }
 0x23e   : > { %21928 = vst [vmem:[#allocation69_spill] sm:$0xff] %v19536_v14  ;;  %v19540_v40 = vadd.f32 %v15744_v46, %v15706_v51  ;;  %v9535_v51 = vsel %vm7292_vm6, %v9525_v2, %v9534_v60  ;;  %v9548_v46 = vrot.slane %v9546_v4, 2  ;;  %v16318_v14 = vld [vmem:[%s16415_s27 + $0x80] sm:$0xff]  }
 0x23f   : > { %15959 = vmatmul.mubr.msk.bf16.gmra.mxu1 %vm372_vm1, %v10058_v20  ;;  %v6510_v56 = vpop.f32.mrf.mxu1  ;;  %v15711_v36 = vpop.f32.mrf.mxu0  ;;  %v9526_v20 = vsel %vm7292_vm6, %v9516_v9, %v9525_v2  ;;  %v9543_v25 = vor.u32 %v9542_v24, %v9539_v38  ;;  %v16320_v9 = vld [vmem:[%s16415_s27 + $0x88] sm:$0xff]   ;;  %v9555_v2 = vshrl.u32 %v16323_v7, 16 }
 0x240   : > { %21929 = vst [vmem:[#allocation71_spill] sm:$0xff] %v19540_v40  ;;  %15962 = vmatprep.mubr.msk.bf16.mxu1 %vm372_vm1, %v10060_v31  ;;  %v19544_v12 = vadd.f32 %v6510_v56, %v5938_v62  ;;  %v9551_v31 = vrot.slane %v9549_v53, 3  ;;  %v10062_v40 = vsel %vm10037_vm7, %v10059_v19, %v10061_v35  ;;  %v10064_v62 = vsel %vm10037_vm7, %v10061_v35, %v10063_v47 }
 0x241   : > { %v15745_v55 = vpop.f32.mrf.mxu1  ;;  %v5957_v39 = vpop.f32.mrf.mxu0  ;;  %v10067_v24 = vrot.slane %v16320_v9, 3 }
 0x242   : > { %21930 = vst [vmem:[#allocation73_spill] sm:$0xff] %v19544_v12  ;;  %v19549_v18 = vadd.f32 %v15745_v55, %v15707_v3  ;;  %v9558_v3 = vshll.u32 %v16323_v7, 16  ;;  %v9552_v53 = vor.u32 %v9551_v31, %v9548_v46 }
 0x243   : > { %v6513_v29 = vpop.f32.mrf.mxu1  ;;  %v15754_v45 = vpop.f32.mrf.mxu0 }
 0x244   : > { %15929 = vmatmul.mubr.msk.bf16.gmra.mxu0 %vm372_vm1, %v9526_v20  ;;  %v19556_v56 = vadd.f32 %v6513_v29, %v5941_v63  ;;  %v7090_v12 = vadd.f32 %v15754_v45, %v19346_v33  ;;  %v10065_v63 = vrot.slane %v16318_v14, 3  ;;  %v9544_v33 = vsel %vm7292_vm6, %v9534_v60, %v9543_v25 }
 0x245   : > { %15932 = vmatprep.mubr.msk.bf16.mxu0 %vm372_vm1, %v9535_v51  ;;  %v15748_v4 = vpop.f32.mrf.mxu1  ;;  %v6909_v19 = vpop.f32.mrf.mxu0  ;;  %v9557_v51 = vrot.slane %v9555_v2, 2  ;;  %v9560_v46 = vrot.slane %v9558_v3, 3 }
 0x246   : > { %v19561_v55 = vadd.f32 %v15748_v4, %v15710_v54  ;;  %v7088_v20 = vadd.f32 %v6909_v19, %v19348_v48  ;;  %v9553_v48 = vsel %vm7292_vm6, %v9543_v25, %v9552_v53  ;;  %v10066_v45 = vsel %vm10037_vm7, %v10063_v47, %v10065_v63 }
 0x247   : > { %15963 = vmatmul.mubr.msk.bf16.gmra.mxu1 %vm372_vm1, %v10062_v40  ;;  %v6526_v35 = vpop.f32.mrf.mxu1  ;;  %v15755_v38 = vpop.f32.mrf.mxu0 }
 0x248   : > { %15966 = vmatprep.mubr.msk.bf16.mxu1 %vm372_vm1, %v10064_v62  ;;  %v19566_v7 = vadd.f32 %v6526_v35, %v5954_v27  ;;  %v7091_v40 = vadd.f32 %v15755_v38, %v19355_v6  ;;  %v16322_v62 = vld [vmem:[%s16415_s27 + $0x90] sm:$0xff]   ;;  %v10068_v27 = vsel %vm10037_vm7, %v10065_v63, %v10067_v24  ;;  %v16324_v6 = vld [vmem:[%s16415_s27 + $0x98] sm:$0xff]  }
 0x249   : > { %v15749_v54 = vpop.f32.mrf.mxu1  ;;  %v6912_v31 = vpop.f32.mrf.mxu0  ;;  %v10069_v19 = vrot.slane %v16322_v62, 3 }
 0x24a   : > { %v19570_v29 = vadd.f32 %v15749_v54, %v15711_v36  ;;  %v7089_v14 = vadd.f32 %v6912_v31, %v19371_v34  ;;  %v9561_v36 = vor.u32 %v9560_v46, %v9557_v51  ;;  %v16325_v54 = vld [vmem:[%s16415_s27 + $0xa0] ss:$0 sps:$4 sm:$0x77]   ;;  %v21931_v31 = vld [vmem:[#allocation18_spill] sm:$0xff]  ;;  %s15995_s27 = smul.u32 576, %s22365_s12 }
 0x24b   : > { %v6529_v60 = vpop.f32.mrf.mxu1  ;;  %v15758_v9 = vpop.f32.mrf.mxu0 }
 0x24c   : > { %15933 = vmatmul.mubr.msk.bf16.gmra.mxu0 %vm372_vm1, %v9544_v33  ;;  %v19578_v2 = vadd.f32 %v6529_v60, %v5957_v39  ;;  %v7094_v3 = vadd.f32 %v15758_v9, %v19378_v11  ;;  %v10071_v39 = vrot.slane %v16324_v6, 3  ;;  %v9562_v33 = vsel %vm7292_vm6, %v9552_v53, %v9561_v36  ;;  %v21933_v53 = vld [vmem:[#allocation22_spill] sm:$0xff]  ;;  %s20592_s10 = scalar_lea.vmem %s21360_s3, %s15995_s27 }
 0x24d   : > { %15936 = vmatprep.mubr.msk.bf16.mxu0 %vm372_vm1, %v9553_v48  ;;  %v15792_v25 = vpop.f32.mrf.mxu1  ;;  %v6925_v34 = vpop.f32.mrf.mxu0 }
 0x24e   : > { %v7735_v47 = vadd.f32 %v15792_v25, %v7090_v12  ;;  %v7092_v4 = vadd.f32 %v6925_v34, %v19382_v28  ;;  %v10070_v28 = vsel %vm10037_vm7, %v10067_v24, %v10069_v19  ;;  %v21934_v24 = vld [vmem:[#allocation24_spill] sm:$0xff] }
 0x24f   : > { %15967 = vmatmul.mubr.msk.bf16.gmra.mxu1 %vm372_vm1, %v10066_v45  ;;  %v7554_v63 = vpop.f32.mrf.mxu1  ;;  %v15759_v35 = vpop.f32.mrf.mxu0 }
 0x250   : > { %15970 = vmatprep.mubr.msk.bf16.mxu1 %vm372_vm1, %v10068_v27  ;;  %v7733_v38 = vadd.f32 %v7554_v63, %v7088_v20  ;;  %v7095_v11 = vadd.f32 %v15759_v35, %v19393_v8  ;;  %v10072_v20 = vsel %vm10037_vm7, %v10069_v19, %v10071_v39  ;;  %v7843_v27 = vmul.f32 %v7735_v47, %v21933_v53  ;;  %v21935_v63 = vld [vmem:[#allocation28_spill] sm:$0xff] }
 0x251   : > { %v15793_v51 = vpop.f32.mrf.mxu1  ;;  %v6928_v46 = vpop.f32.mrf.mxu0 }
 0x252   : > { %v7841_v48 = vmul.f32 %v7733_v38, %v21931_v31  ;;  %v7736_v45 = vadd.f32 %v15793_v51, %v7091_v40  ;;  %v7093_v12 = vadd.f32 %v6928_v46, %v19408_v43  ;;  %v10073_v43 = vrot.slane %v16325_v54, 3 }
 0x253   : > { %v7557_v60 = vpop.f32.mrf.mxu1  ;;  %v15762_v62 = vpop.f32.mrf.mxu0  ;;  %v7921_v54 = vmul.f32 %v7843_v27, %v7735_v47 }
 0x254   : > { %15937 = vmatmul.mubr.msk.bf16.gmra.mxu0 %vm372_vm1, %v9562_v33  ;;  %v19593_v9 = vpack.c.bf16 %v7736_v45, %v7735_v47  ;;  %v7734_v8 = vadd.f32 %v7557_v60, %v7089_v14  ;;  %v7098_v40 = vadd.f32 %v15762_v62, %v19416_v32  ;;  %v7919_v25 = vmul.f32 %v7841_v48, %v7733_v38 }
 0x255   : > { %v15796_v6 = vpop.f32.mrf.mxu1  ;;  %v6941_v36 = vpop.f32.mrf.mxu0  ;;  %v7844_v35 = vmul.f32 %v7736_v45, %v21935_v63 }
 0x256   : > { %21932 = vst [vmem:[#allocation74_spill] sm:$0xff] %v19593_v9  ;;  %v7842_v34 = vmul.f32 %v7734_v8, %v21934_v24  ;;  %v19601_v19 = vpack.c.bf16 %v7734_v8, %v7733_v38  ;;  %v7739_v33 = vadd.f32 %v15796_v6, %v7094_v3  ;;  %v7096_v51 = vadd.f32 %v6941_v36, %v19421_v58 }
 0x257   : > { %15971 = vmatmul.mubr.msk.bf16.gmra.mxu1 %vm372_vm1, %v10070_v28  ;;  %v7570_v14 = vpop.f32.mrf.mxu1  ;;  %v15763_v46 = vpop.f32.mrf.mxu0  ;;  %v10074_v24 = vsel %vm10037_vm7, %v10071_v39, %v10073_v43  ;;  %v7922_v36 = vmul.f32 %v7844_v35, %v7736_v45 }
 0x258   : > { %15974 = vmatprep.mubr.msk.bf16.mxu1 %vm372_vm1, %v10072_v20  ;;  %21936 = vst [vmem:[#allocation75_spill] sm:$0xff] %v19601_v19  ;;  %v7877_v60 = vadd.f32 %v7842_v34, %v7841_v48  ;;  %v7920_v28 = vmul.f32 %v7842_v34, %v7734_v8  ;;  %v7737_v9 = vadd.f32 %v7570_v14, %v7092_v4 }
 0x259   : > { %v7099_v32 = vadd.f32 %v15763_v46, %v19427_v15  ;;  %v15797_v62 = vpop.f32.mrf.mxu1  ;;  %v6944_v53 = vpop.f32.mrf.mxu0  ;;  %v7847_v14 = vmul.f32 %v7739_v33, %v21843_v5 }
 0x25a   : > { %v7878_v20 = vadd.f32 %v7877_v60, %v7843_v27  ;;  %v7955_v31 = vadd.f32 %v7920_v28, %v7919_v25  ;;  %v7845_v38 = vmul.f32 %v7737_v9, %v21838_v42  ;;  %v7740_v19 = vadd.f32 %v15797_v62, %v7095_v11 }
 0x25b   : > { %v7573_v3 = vpop.f32.mrf.mxu1  ;;  %v7097_v6 = vadd.f32 %v6944_v53, %v19440_v49  ;;  %v15766_v58 = vpop.f32.mrf.mxu0  ;;  %v21938_v49 = vld [vmem:[#allocation33_spill] sm:$0xff] }
 0x25c   : > { %v7956_v48 = vadd.f32 %v7955_v31, %v7921_v54  ;;  %v7879_v8 = vadd.f32 %v7878_v20, %v7844_v35  ;;  %v19608_v4 = vpack.c.bf16 %v7740_v19, %v7739_v33  ;;  %v7738_v15 = vadd.f32 %v7573_v3, %v7093_v12 }
 0x25d   : > { %v15800_v47 = vpop.f32.mrf.mxu1  ;;  %v7102_v39 = vadd.f32 %v15766_v58, %v19447_v57  ;;  %v6957_v27 = vpop.f32.mrf.mxu0  ;;  %v7923_v25 = vmul.f32 %v7845_v38, %v7737_v9  ;;  %v7925_v58 = vmul.f32 %v7847_v14, %v7739_v33  ;;  %v21943_v33 = vld [vmem:[#allocation3_spill] sm:$0xff] }
 0x25e   : > { %21937 = vst [vmem:[#allocation76_spill] sm:$0xff] %v19608_v4  ;;  %v7880_v43 = vadd.f32 %v7879_v8, %v7845_v38  ;;  %v7957_v34 = vadd.f32 %v7956_v48, %v7922_v36  ;;  %v7743_v11 = vadd.f32 %v15800_v47, %v7098_v40  ;;  %v7846_v53 = vmul.f32 %v7738_v15, %v21938_v49  ;;  %v21979_v4 = vld [vmem:[#allocation57_spill] sm:$0xff] }
 0x25f   : > { %15975 = vmatmul.mubr.msk.bf16.gmra.mxu1 %vm372_vm1, %v10074_v24  ;;  %v19614_v45 = vpack.c.bf16 %v7738_v15, %v7737_v9  ;;  %v7586_v31 = vpop.f32.mrf.mxu1  ;;  %v15767_v35 = vpop.f32.mrf.mxu0  ;;  %v7100_v60 = vadd.f32 %v6957_v27, %v19451_v21  ;;  %v21940_v24 = vld [vmem:[#allocation41_spill] sm:$0xff] }
 0x260   : > { %v7958_v46 = vadd.f32 %v7957_v34, %v7923_v25  ;;  %v7741_v12 = vadd.f32 %v7586_v31, %v7096_v51  ;;  %v7848_v28 = vmul.f32 %v7740_v19, %v21940_v24  ;;  %v7881_v57 = vadd.f32 %v7880_v43, %v7846_v53 }
 0x261   : > { %21939 = vst [vmem:[#allocation77_spill] sm:$0xff] %v19614_v45  ;;  %v7924_v54 = vmul.f32 %v7846_v53, %v7738_v15  ;;  %v15801_v62 = vpop.f32.mrf.mxu1  ;;  %v6960_v20 = vpop.f32.mrf.mxu0  ;;  %v7103_v3 = vadd.f32 %v15767_v35, %v19458_v59  ;;  %v21944_v35 = vld [vmem:[#allocation46_spill] sm:$0xff] }
 0x262   : > { %v7849_v40 = vmul.f32 %v7741_v12, %v21848_v44  ;;  %v7744_v38 = vadd.f32 %v15801_v62, %v7099_v32  ;;  %v7882_v9 = vadd.f32 %v7881_v57, %v7847_v14  ;;  %v7101_v8 = vadd.f32 %v6960_v20, %v19467_v1  ;;  %v21942_v32 = vld [vmem:[#allocation48_spill] sm:$0xff] }
 0x263   : > { %v7959_v36 = vadd.f32 %v7958_v46, %v7924_v54  ;;  %v7589_v48 = vpop.f32.mrf.mxu1  ;;  %v15770_v51 = vpop.f32.mrf.mxu0  ;;  %v7926_v27 = vmul.f32 %v7848_v28, %v7740_v19  ;;  %v7851_v31 = vmul.f32 %v7743_v11, %v21942_v32 }
 0x264   : > { %v19621_v47 = vpack.c.bf16 %v7744_v38, %v7743_v11  ;;  %v7742_v21 = vadd.f32 %v7589_v48, %v7097_v6  ;;  %v7883_v15 = vadd.f32 %v7882_v9, %v7848_v28  ;;  %v7106_v34 = vadd.f32 %v15770_v51, %v19471_v30 }
 0x265   : > { %v7960_v43 = vadd.f32 %v7959_v36, %v7925_v58  ;;  %v15804_v25 = vpop.f32.mrf.mxu1  ;;  %v6973_v53 = vpop.f32.mrf.mxu0  ;;  %v7927_v59 = vmul.f32 %v7849_v40, %v7741_v12  ;;  %v7852_v14 = vmul.f32 %v7744_v38, %v21943_v33 }
 0x266   : > { %21941 = vst [vmem:[#allocation78_spill] sm:$0xff] %v19621_v47  ;;  %v7850_v46 = vmul.f32 %v7742_v21, %v21944_v35  ;;  %v7884_v57 = vadd.f32 %v7883_v15, %v7849_v40  ;;  %v19627_v54 = vpack.c.bf16 %v7742_v21, %v7741_v12  ;;  %v7747_v62 = vadd.f32 %v15804_v25, %v7102_v39 }
 0x267   : > { %v7961_v1 = vadd.f32 %v7960_v43, %v7926_v27  ;;  %v7602_v6 = vpop.f32.mrf.mxu1  ;;  %v15771_v19 = vpop.f32.mrf.mxu0  ;;  %v7104_v58 = vadd.f32 %v6973_v53, %v19475_v50  ;;  %v7929_v12 = vmul.f32 %v7851_v31, %v7743_v11 }
 0x268   : > { %21945 = vst [vmem:[#allocation79_spill] sm:$0xff] %v19627_v54  ;;  %v7928_v20 = vmul.f32 %v7850_v46, %v7742_v21  ;;  %v7745_v28 = vadd.f32 %v7602_v6, %v7100_v60  ;;  %v7107_v30 = vadd.f32 %v15771_v19, %v19481_v37  ;;  %v7885_v36 = vadd.f32 %v7884_v57, %v7850_v46 }
 0x269   : > { %v7962_v9 = vadd.f32 %v7961_v1, %v7927_v59  ;;  %v15805_v48 = vpop.f32.mrf.mxu1  ;;  %v6976_v51 = vpop.f32.mrf.mxu0  ;;  %v7930_v21 = vmul.f32 %v7852_v14, %v7744_v38  ;;  %v7855_v57 = vmul.f32 %v7747_v62, %v21865_v16 }
 0x26a   : > { %v7853_v47 = vmul.f32 %v7745_v28, %v21861_v17  ;;  %v7748_v45 = vadd.f32 %v15805_v48, %v7103_v3  ;;  %v7105_v40 = vadd.f32 %v6976_v51, %v19490_v13  ;;  %v7886_v27 = vadd.f32 %v7885_v36, %v7851_v31 }
 0x26b   : > { %v7963_v39 = vadd.f32 %v7962_v9, %v7928_v20  ;;  %v7605_v43 = vpop.f32.mrf.mxu1  ;;  %v15774_v15 = vpop.f32.mrf.mxu0 }
 0x26c   : > { %v19633_v60 = vpack.c.bf16 %v7748_v45, %v7747_v62  ;;  %v7887_v25 = vadd.f32 %v7886_v27, %v7852_v14  ;;  %v7746_v37 = vadd.f32 %v7605_v43, %v7101_v8  ;;  %v7110_v59 = vadd.f32 %v15774_v15, %v19494_v41  ;;  %v21948_v41 = vld [vmem:[#allocation7_spill] sm:$0xff] }
 0x26d   : > { %v7964_v50 = vadd.f32 %v7963_v39, %v7929_v12  ;;  %v15808_v53 = vpop.f32.mrf.mxu1  ;;  %v6989_v46 = vpop.f32.mrf.mxu0  ;;  %v7931_v3 = vmul.f32 %v7853_v47, %v7745_v28  ;;  %v7856_v36 = vmul.f32 %v7748_v45, %v21948_v41  ;;  %v7933_v43 = vmul.f32 %v7855_v57, %v7747_v62  ;;  %v21952_v62 = vld [vmem:[#allocation12_spill] sm:$0xff] }
 0x26e   : > { %21946 = vst [vmem:[#allocation80_spill] sm:$0xff] %v19633_v60  ;;  %v7751_v1 = vadd.f32 %v15808_v53, %v7106_v34  ;;  %v7888_v13 = vadd.f32 %v7887_v25, %v7853_v47  ;;  %v7854_v31 = vmul.f32 %v7746_v37, %v21866_v23  ;;  %v19638_v6 = vpack.c.bf16 %v7746_v37, %v7745_v28  ;;  %v21949_v47 = vld [vmem:[#allocation37_spill] sm:$0xff] }
 0x26f   : > { %v7965_v11 = vadd.f32 %v7964_v50, %v7930_v21  ;;  %v7618_v38 = vpop.f32.mrf.mxu1  ;;  %v15775_v19 = vpop.f32.mrf.mxu0  ;;  %v7108_v14 = vadd.f32 %v6989_v46, %v19498_v0  ;;  %v7934_v25 = vmul.f32 %v7856_v36, %v7748_v45  ;;  %v21970_v60 = vld [vmem:[#allocation5_spill] sm:$0xff] }
 0x270   : > { %21947 = vst [vmem:[#allocation84_spill] sm:$0xff] %v19638_v6  ;;  %v7749_v20 = vadd.f32 %v7618_v38, %v7104_v58  ;;  %v7111_v8 = vadd.f32 %v15775_v19, %v19504_v22  ;;  %v7889_v48 = vadd.f32 %v7888_v13, %v7854_v31  ;;  %v7932_v51 = vmul.f32 %v7854_v31, %v7746_v37  ;;  %v21953_v38 = vld [vmem:[#allocation10_spill] sm:$0xff] }
 0x271   : > { %v7966_v9 = vadd.f32 %v7965_v11, %v7931_v3  ;;  %v15809_v12 = vpop.f32.mrf.mxu1  ;;  %v6992_v34 = vpop.f32.mrf.mxu0  ;;  %v21951_v11 = vld [vmem:[#allocation39_spill] sm:$0xff] }
 0x272   : > { %v7857_v27 = vmul.f32 %v7749_v20, %v21949_v47  ;;  %v7752_v39 = vadd.f32 %v15809_v12, %v7107_v30  ;;  %v7890_v28 = vadd.f32 %v7889_v48, %v7855_v57  ;;  %v7109_v58 = vadd.f32 %v6992_v34, %v19513_v10 }
 0x273   : > { %v7967_v15 = vadd.f32 %v7966_v9, %v7932_v51  ;;  %v7621_v21 = vpop.f32.mrf.mxu1  ;;  %v15778_v50 = vpop.f32.mrf.mxu0  ;;  %v7859_v31 = vmul.f32 %v7751_v1, %v21951_v11 }
 0x274   : > { %v19645_v0 = vpack.c.bf16 %v7752_v39, %v7751_v1  ;;  %v7750_v22 = vadd.f32 %v7621_v21, %v7105_v40  ;;  %v7891_v46 = vadd.f32 %v7890_v28, %v7856_v36  ;;  %v7114_v37 = vadd.f32 %v15778_v50, %v19517_v26  ;;  %v21955_v50 = vld [vmem:[#allocation14_spill] sm:$0xff] }
 0x275   : > { %v7968_v53 = vadd.f32 %v7967_v15, %v7933_v43  ;;  %v15812_v3 = vpop.f32.mrf.mxu1  ;;  %v7005_v13 = vpop.f32.mrf.mxu0  ;;  %v7935_v30 = vmul.f32 %v7857_v27, %v7749_v20  ;;  %v7860_v57 = vmul.f32 %v7752_v39, %v21952_v62 }
 0x276   : > { %21950 = vst [vmem:[#allocation81_spill] sm:$0xff] %v19645_v0  ;;  %v7858_v19 = vmul.f32 %v7750_v22, %v21953_v38  ;;  %v7892_v9 = vadd.f32 %v7891_v46, %v7857_v27  ;;  %v19651_v48 = vpack.c.bf16 %v7750_v22, %v7749_v20  ;;  %v7755_v51 = vadd.f32 %v15812_v3, %v7110_v59  ;;  %v21956_v27 = vld [vmem:[#allocation69_spill] sm:$0xff] }
 0x277   : > { %v7969_v10 = vadd.f32 %v7968_v53, %v7934_v25  ;;  %v7634_v40 = vpop.f32.mrf.mxu1  ;;  %v15779_v45 = vpop.f32.mrf.mxu0  ;;  %v7112_v34 = vadd.f32 %v7005_v13, %v19522_v52  ;;  %v7937_v20 = vmul.f32 %v7859_v31, %v7751_v1 }
 0x278   : > { %21954 = vst [vmem:[#allocation82_spill] sm:$0xff] %v19651_v48  ;;  %v7936_v12 = vmul.f32 %v7858_v19, %v7750_v22  ;;  %v7753_v36 = vadd.f32 %v7634_v40, %v7108_v14  ;;  %v7115_v26 = vadd.f32 %v15779_v45, %v19527_v61  ;;  %v7893_v28 = vadd.f32 %v7892_v9, %v7858_v19  ;;  %v21958_v19 = vld [vmem:[#allocation71_spill] sm:$0xff]  ;;  %v21959_v40 = vld [vmem:[#allocation16_spill] sm:$0xff] }
 0x279   : > { %v7970_v43 = vadd.f32 %v7969_v10, %v7935_v30  ;;  %v15813_v15 = vpop.f32.mrf.mxu1  ;;  %v7008_v21 = vpop.f32.mrf.mxu0  ;;  %v7938_v22 = vmul.f32 %v7860_v57, %v7752_v39  ;;  %v7863_v45 = vmul.f32 %v7755_v51, %v21959_v40 }
 0x27a   : > { %v7861_v0 = vmul.f32 %v7753_v36, %v21955_v50  ;;  %v7756_v6 = vadd.f32 %v15813_v15, %v7111_v8  ;;  %v7113_v25 = vadd.f32 %v7008_v21, %v21956_v27  ;;  %v7894_v53 = vadd.f32 %v7893_v28, %v7859_v31  ;;  %v21960_v31 = vld [vmem:[#allocation15_spill] sm:$0xff] }
 0x27b   : > { %v7971_v59 = vadd.f32 %v7970_v43, %v7936_v12  ;;  %v7637_v46 = vpop.f32.mrf.mxu1  ;;  %v15782_v3 = vpop.f32.mrf.mxu0 }
 0x27c   : > { %v19657_v14 = vpack.c.bf16 %v7756_v6, %v7755_v51  ;;  %v7895_v13 = vadd.f32 %v7894_v53, %v7860_v57  ;;  %v7754_v61 = vadd.f32 %v7637_v46, %v7109_v58  ;;  %v7118_v9 = vadd.f32 %v15782_v3, %v21958_v19 }
 0x27d   : > { %v7972_v52 = vadd.f32 %v7971_v59, %v7937_v20  ;;  %v15816_v30 = vpop.f32.mrf.mxu1  ;;  %v7021_v10 = vpop.f32.mrf.mxu0  ;;  %v7939_v8 = vmul.f32 %v7861_v0, %v7753_v36  ;;  %v21962_v20 = vld [vmem:[#allocation73_spill] sm:$0xff]  ;;  %v21963_v59 = vld [vmem:[#allocation55_spill] sm:$0xff] }
 0x27e   : > { %21957 = vst [vmem:[#allocation83_spill] sm:$0xff] %v19657_v14  ;;  %v7759_v15 = vadd.f32 %v15816_v30, %v7114_v37  ;;  %v7896_v21 = vadd.f32 %v7895_v13, %v7861_v0  ;;  %v7862_v12 = vmul.f32 %v7754_v61, %v21960_v31  ;;  %v19662_v43 = vpack.c.bf16 %v7754_v61, %v7753_v36  ;;  %v21964_v0 = vld [vmem:[#allocation19_spill] sm:$0xff] }
 0x27f   : > { %v7973_v1 = vadd.f32 %v7972_v52, %v7938_v22  ;;  %v7650_v39 = vpop.f32.mrf.mxu1  ;;  %v15783_v28 = vpop.f32.mrf.mxu0  ;;  %v7116_v57 = vadd.f32 %v7021_v10, %v21962_v20  ;;  %v7864_v46 = vmul.f32 %v7756_v6, %v21963_v59  ;;  %v7941_v13 = vmul.f32 %v7863_v45, %v7755_v51  ;;  %v21966_v20 = vld [vmem:[#allocation23_spill] sm:$0xff]  ;;  %v21967_v51 = vld [vmem:[#allocation21_spill] sm:$0xff] }
 0x280   : > { %21961 = vst [vmem:[#allocation72_spill] sm:$0xff] %v19662_v43  ;;  %v7757_v27 = vadd.f32 %v7650_v39, %v7112_v34  ;;  %v7119_v58 = vadd.f32 %v15783_v28, %v19549_v18  ;;  %v7897_v3 = vadd.f32 %v7896_v21, %v7862_v12  ;;  %v7940_v19 = vmul.f32 %v7862_v12, %v7754_v61 }
 0x281   : > { %v7974_v53 = vadd.f32 %v7973_v1, %v7939_v8  ;;  %v15817_v14 = vpop.f32.mrf.mxu1  ;;  %v7024_v37 = vpop.f32.mrf.mxu0  ;;  %v7942_v8 = vmul.f32 %v7864_v46, %v7756_v6  ;;  %v7867_v48 = vmul.f32 %v7759_v15, %v21966_v20 }
 0x282   : > { %v7865_v22 = vmul.f32 %v7757_v27, %v21964_v0  ;;  %v7760_v52 = vadd.f32 %v15817_v14, %v7115_v26  ;;  %v7898_v36 = vadd.f32 %v7897_v3, %v7863_v45  ;;  %v7117_v34 = vadd.f32 %v7024_v37, %v19556_v56 }
 0x283   : > { %v7975_v30 = vadd.f32 %v7974_v53, %v7940_v19  ;;  %v7653_v43 = vpop.f32.mrf.mxu1  ;;  %v15786_v39 = vpop.f32.mrf.mxu0 }
 0x284   : > { %v19669_v10 = vpack.c.bf16 %v7760_v52, %v7759_v15  ;;  %v7758_v18 = vadd.f32 %v7653_v43, %v7113_v25  ;;  %v7899_v28 = vadd.f32 %v7898_v36, %v7864_v46  ;;  %v7122_v61 = vadd.f32 %v15786_v39, %v19561_v55 }
 0x285   : > { %v7976_v1 = vadd.f32 %v7975_v30, %v7941_v13  ;;  %v15820_v21 = vpop.f32.mrf.mxu1  ;;  %v7037_v12 = vpop.f32.mrf.mxu0  ;;  %v7943_v26 = vmul.f32 %v7865_v22, %v7757_v27  ;;  %v21969_v13 = vld [vmem:[#allocation52_spill] sm:$0xff] }
 0x286   : > { %21965 = vst [vmem:[#allocation70_spill] sm:$0xff] %v19669_v10  ;;  %v7866_v14 = vmul.f32 %v7758_v18, %v21967_v51  ;;  %v7900_v45 = vadd.f32 %v7899_v28, %v7865_v22  ;;  %v19674_v3 = vpack.c.bf16 %v7758_v18, %v7757_v27  ;;  %v7763_v56 = vadd.f32 %v15820_v21, %v7118_v9 }
 0x287   : > { %v7977_v53 = vadd.f32 %v7976_v1, %v7942_v8  ;;  %v7666_v19 = vpop.f32.mrf.mxu1  ;;  %v15787_v37 = vpop.f32.mrf.mxu0  ;;  %v7120_v43 = vadd.f32 %v7037_v12, %v19566_v7  ;;  %v7868_v36 = vmul.f32 %v7760_v52, %v21969_v13  ;;  %v7945_v9 = vmul.f32 %v7867_v48, %v7759_v15 }
 0x288   : > { %21968 = vst [vmem:[#allocation28_spill] sm:$0xff] %v19674_v3  ;;  %v7944_v25 = vmul.f32 %v7866_v14, %v7758_v18  ;;  %v7761_v6 = vadd.f32 %v7666_v19, %v7116_v57  ;;  %v7123_v46 = vadd.f32 %v15787_v37, %v19570_v29  ;;  %v7901_v30 = vadd.f32 %v7900_v45, %v7866_v14  ;;  %v21972_v45 = vld [vmem:[#allocation27_spill] sm:$0xff] }
 0x289   : > { %v7978_v55 = vadd.f32 %v7977_v53, %v7943_v26  ;;  %v15821_v39 = vpop.f32.mrf.mxu1  ;;  %v7040_v10 = vpop.f32.mrf.mxu0  ;;  %v7946_v7 = vmul.f32 %v7868_v36, %v7760_v52  ;;  %v7871_v19 = vmul.f32 %v7763_v56, %v21972_v45  ;;  %v21975_v52 = vld [vmem:[#allocation29_spill] sm:$0xff] }
 0x28a   : > { %v7869_v22 = vmul.f32 %v7761_v6, %v21970_v60  ;;  %v7764_v8 = vadd.f32 %v15821_v39, %v7119_v58  ;;  %v7121_v27 = vadd.f32 %v7040_v10, %v19578_v2  ;;  %v7902_v1 = vadd.f32 %v7901_v30, %v7867_v48  ;;  %v21973_v2 = vld [vmem:[#allocation54_spill] sm:$0xff] }
 0x28b   : > { %v7979_v28 = vadd.f32 %v7978_v55, %v7944_v25  ;;  %v7669_v18 = vpop.f32.mrf.mxu1  ;;  %v15830_v57 = vpop.f32.mrf.mxu0 }
 0x28c   : > { %v19681_v21 = vpack.c.bf16 %v7764_v8, %v7763_v56  ;;  %v7903_v12 = vadd.f32 %v7902_v1, %v7868_v36  ;;  %v7762_v26 = vadd.f32 %v7669_v18, %v7117_v34  ;;  %v7947_v37 = vmul.f32 %v7869_v22, %v7761_v6  ;;  %v21976_v18 = vld [vmem:[#allocation59_spill] sm:$0xff] }
 0x28d   : > { %v7980_v29 = vadd.f32 %v7979_v28, %v7945_v9  ;;  %v15824_v53 = vpop.f32.mrf.mxu1  ;;  %v8571_v14 = vpop.f32.mrf.mxu0  ;;  %v7872_v9 = vmul.f32 %v7764_v8, %v21975_v52 }
 0x28e   : > { %21971 = vst [vmem:[#allocation33_spill] sm:$0xff] %v19681_v21  ;;  %v7767_v3 = vadd.f32 %v15824_v53, %v7122_v61  ;;  %v7904_v58 = vadd.f32 %v7903_v12, %v7869_v22  ;;  %v7870_v15 = vmul.f32 %v7762_v26, %v21973_v2  ;;  %v19685_v48 = vpack.c.bf16 %v7762_v26, %v7761_v6 }
 0x28f   : > { %v7981_v39 = vadd.f32 %v7980_v29, %v7946_v7  ;;  %v7682_v10 = vpop.f32.mrf.mxu1  ;;  %v15831_v25 = vpop.f32.mrf.mxu0  ;;  %v7949_v61 = vmul.f32 %v7871_v19, %v7763_v56 }
 0x290   : > { %21974 = vst [vmem:[#allocation41_spill] sm:$0xff] %v19685_v48  ;;  %v7765_v55 = vadd.f32 %v7682_v10, %v7120_v43  ;;  %v7905_v36 = vadd.f32 %v7904_v58, %v7870_v15  ;;  %v7948_v34 = vmul.f32 %v7870_v15, %v7762_v26  ;;  %v7950_v48 = vmul.f32 %v7872_v9, %v7764_v8  ;;  %v21978_v58 = vld [vmem:[#allocation58_spill] sm:$0xff] }
 0x291   : > { %v7982_v30 = vadd.f32 %v7981_v39, %v7947_v37  ;;  %v15825_v1 = vpop.f32.mrf.mxu1  ;;  %v8574_v28 = vpop.f32.mrf.mxu0  ;;  %v7875_v26 = vmul.f32 %v7767_v3, %v21978_v58 }
 0x292   : > { %v7873_v21 = vmul.f32 %v7765_v55, %v21976_v18  ;;  %v7768_v54 = vadd.f32 %v15825_v1, %v7123_v46  ;;  %v7906_v22 = vadd.f32 %v7905_v36, %v7871_v19 }
 0x293   : > { %v7983_v7 = vadd.f32 %v7982_v30, %v7948_v34  ;;  %v7685_v29 = vpop.f32.mrf.mxu1  ;;  %v15834_v12 = vpop.f32.mrf.mxu0 }
 0x294   : > { %v19689_v6 = vpack.c.bf16 %v7768_v54, %v7767_v3  ;;  %v7766_v53 = vadd.f32 %v7685_v29, %v7121_v27  ;;  %v7907_v37 = vadd.f32 %v7906_v22, %v7872_v9  ;;  %v7951_v15 = vmul.f32 %v7873_v21, %v7765_v55  ;;  %v21981_v9 = vld [vmem:[#allocation35_spill] sm:$0xff] }
 0x295   : > { %v7984_v43 = vadd.f32 %v7983_v7, %v7949_v61  ;;  %v15868_v39 = vpop.f32.mrf.mxu1  ;;  %v8587_v10 = vpop.f32.mrf.mxu0  ;;  %v7876_v1 = vmul.f32 %v7768_v54, %v21981_v9 }
 0x296   : > { %21977 = vst [vmem:[#allocation48_spill] sm:$0xff] %v19689_v6  ;;  %v7874_v52 = vmul.f32 %v7766_v53, %v21979_v4  ;;  %v7908_v18 = vadd.f32 %v7907_v37, %v7873_v21  ;;  %v19693_v56 = vpack.c.bf16 %v7766_v53, %v7765_v55  ;;  %v19695_v19 = vadd.f32 %v15868_v39, %v15830_v57 }
 0x297   : > { %v7985_v46 = vadd.f32 %v7984_v43, %v7950_v48  ;;  %v9010_v30 = vpop.f32.mrf.mxu1  ;;  %v15835_v36 = vpop.f32.mrf.mxu0  ;;  %v7953_v6 = vmul.f32 %v7875_v26, %v7767_v3  ;;  %v7954_v37 = vmul.f32 %v7876_v1, %v7768_v54 }
 0x298   : > { %21980 = vst [vmem:[#allocation3_spill] sm:$0xff] %v19693_v56  ;;  %v7952_v34 = vmul.f32 %v7874_v52, %v7766_v53  ;;  %v19697_v27 = vadd.f32 %v9010_v30, %v8571_v14  ;;  %v7909_v61 = vadd.f32 %v7908_v18, %v7874_v52 }
 0x299   : > { %v7986_v8 = vadd.f32 %v7985_v46, %v7951_v15  ;;  %v15869_v22 = vpop.f32.mrf.mxu1  ;;  %v8590_v7 = vpop.f32.mrf.mxu0 }
 0x29a   : > { %v19700_v29 = vadd.f32 %v15869_v22, %v15831_v25  ;;  %v7910_v21 = vadd.f32 %v7909_v61, %v7875_v26 }
 0x29b   : > { %v7987_v48 = vadd.f32 %v7986_v8, %v7952_v34  ;;  %v9013_v55 = vpop.f32.mrf.mxu1  ;;  %v15838_v43 = vpop.f32.mrf.mxu0 }
 0x29c   : > { %v19702_v57 = vadd.f32 %v9013_v55, %v8574_v28  ;;  %v7911_v39 = vadd.f32 %v7910_v21, %v7876_v1 }
 0x29d   : > { %v7988_v53 = vadd.f32 %v7987_v48, %v7953_v6  ;;  %v15872_v14 = vpop.f32.mrf.mxu1  ;;  %v8603_v30 = vpop.f32.mrf.mxu0 }
 0x29e   : > { %v19704_v15 = vadd.f32 %v15872_v14, %v15834_v12  ;;  %v7912_v46 = vrot.slane %v7911_v39, 4 }
 0x29f   : > { %v7989_v52 = vadd.f32 %v7988_v53, %v7954_v37  ;;  %v9026_v18 = vpop.f32.mrf.mxu1  ;;  %v15839_v56 = vpop.f32.mrf.mxu0 }
 0x2a0   : > { %v19706_v25 = vadd.f32 %v9026_v18, %v8587_v10  ;;  %v7913_v3 = vadd.f32 %v7912_v46, %v7911_v39 }
 0x2a1   : > { %v7990_v26 = vrot.slane %v7989_v52, 4  ;;  %v15873_v34 = vpop.f32.mrf.mxu1  ;;  %v8606_v8 = vpop.f32.mrf.mxu0 }
 0x2a2   : > { %v19708_v61 = vadd.f32 %v15873_v34, %v15835_v36  ;;  %v7914_v28 = vrot.slane %v7913_v3, 2 }
 0x2a3   : > { %v7991_v54 = vadd.f32 %v7990_v26, %v7989_v52  ;;  %v9029_v1 = vpop.f32.mrf.mxu1  ;;  %v15842_v6 = vpop.f32.mrf.mxu0 }
 0x2a4   : > { %v19710_v22 = vadd.f32 %v9029_v1, %v8590_v7  ;;  %v7915_v12 = vadd.f32 %v7914_v28, %v7913_v3  ;;  %v21982_v7 = vld [vmem:[#allocation62_spill] sm:$0xff] }
 0x2a5   : > { %v7992_v21 = vrot.slane %v7991_v54, 2  ;;  %v15876_v48 = vpop.f32.mrf.mxu1  ;;  %v8619_v55 = vpop.f32.mrf.mxu0 }
 0x2a6   : > { %v19712_v37 = vadd.f32 %v15876_v48, %v15838_v43  ;;  %v7916_v10 = vrot.slane %v7915_v12, 1  ;;  %v21984_v48 = vld [vmem:[#allocation68_spill] sm:$0xff] }
 0x2a7   : > { %v7993_v53 = vadd.f32 %v7992_v21, %v7991_v54  ;;  %v9042_v39 = vpop.f32.mrf.mxu1  ;;  %v15843_v14 = vpop.f32.mrf.mxu0 }
 0x2a8   : > { %v19714_v46 = vadd.f32 %v9042_v39, %v8603_v30  ;;  %v7917_v36 = vadd.f32 %v7916_v10, %v7915_v12 }
 0x2a9   : > { %v7994_v18 = vrot.slane %v7993_v53, 1  ;;  %v15877_v34 = vpop.f32.mrf.mxu1  ;;  %v8622_v52 = vpop.f32.mrf.mxu0 }
 0x2aa   : > { %v19716_v26 = vadd.f32 %v15877_v34, %v15839_v56  ;;  %v19719_v1 = vadd.f32 %v7917_v36, %v21982_v7 }
 0x2ab   : > { %v7995_v3 = vadd.f32 %v7994_v18, %v7993_v53  ;;  %v9045_v28 = vpop.f32.mrf.mxu1  ;;  %v15846_v9 = vpop.f32.mrf.mxu0 }
 0x2ac   : > { %21983 = vst [vmem:[#allocation46_spill] sm:$0xff] %v19719_v1  ;;  %v19721_v43 = vadd.f32 %v9045_v28, %v8606_v8 }
 0x2ad   : > { %v19724_v54 = vadd.f32 %v7995_v3, %v21984_v48  ;;  %v15880_v21 = vpop.f32.mrf.mxu1  ;;  %v8635_v30 = vpop.f32.mrf.mxu0 }
 0x2ae   : > { %v19726_v39 = vadd.f32 %v15880_v21, %v15842_v6 }
 0x2af   : > { %21985 = vst [vmem:[#allocation7_spill] sm:$0xff] %v19724_v54  ;;  %v9058_v12 = vpop.f32.mrf.mxu1  ;;  %v15847_v10 = vpop.f32.mrf.mxu0 }
 0x2b0   : > { %v19728_v4 = vadd.f32 %v9058_v12, %v8619_v55 }
 0x2b1   : > { %v15881_v56 = vpop.f32.mrf.mxu1  ;;  %v8638_v34 = vpop.f32.mrf.mxu0 }
 0x2b2   : > { %v19730_v36 = vadd.f32 %v15881_v56, %v15843_v14 }
 0x2b3   : > { %v9061_v53 = vpop.f32.mrf.mxu1 }
 0x2b4   : > { %v15850_v18 = vpop.f32.mrf.mxu0  ;;  %v19732_v7 = vadd.f32 %v9061_v53, %v8622_v52 }
 0x2b6   : > { %v15884_v8 = vpop.f32.mrf.mxu1  ;;  %v8651_v28 = vpop.f32.mrf.mxu0 }
 0x2b7   : > { %v19734_v3 = vadd.f32 %v15884_v8, %v15846_v9 }
 0x2b8   : > { %v9074_v48 = vpop.f32.mrf.mxu1  ;;  %v15851_v54 = vpop.f32.mrf.mxu0 }
 0x2b9   : > { %v19736_v6 = vadd.f32 %v9074_v48, %v8635_v30 }
 0x2ba   : > { %v15885_v21 = vpop.f32.mrf.mxu1  ;;  %v8654_v1 = vpop.f32.mrf.mxu0 }
 0x2bb   : > { %v19738_v55 = vadd.f32 %v15885_v21, %v15847_v10 }
 0x2bc   : > { %v9077_v12 = vpop.f32.mrf.mxu1  ;;  %v15854_v58 = vpop.f32.mrf.mxu0 }
 0x2bd   : > { %v19740_v14 = vadd.f32 %v9077_v12, %v8638_v34 }
 0x2be   : > { %v15888_v56 = vpop.f32.mrf.mxu1  ;;  %v8667_v2 = vpop.f32.mrf.mxu0 }
 0x2bf   : > { %v19742_v52 = vadd.f32 %v15888_v56, %v15850_v18 }
 0x2c0   : > { %v9090_v53 = vpop.f32.mrf.mxu1  ;;  %v15855_v45 = vpop.f32.mrf.mxu0 }
 0x2c1   : > { %v19744_v9 = vadd.f32 %v9090_v53, %v8651_v28 }
 0x2c2   : > { %v15889_v8 = vpop.f32.mrf.mxu1  ;;  %v8670_v60 = vpop.f32.mrf.mxu0 }
 0x2c3   : > { %v19746_v30 = vadd.f32 %v15889_v8, %v15851_v54 }
 0x2c4   : > { %v9093_v48 = vpop.f32.mrf.mxu1  ;;  %v15858_v13 = vpop.f32.mrf.mxu0 }
 0x2c5   : > { %21986 = vst [vmem:[#allocation37_spill] sm:$0xff] %v19746_v30  ;;  %v19748_v10 = vadd.f32 %v9093_v48, %v8654_v1 }
 0x2c6   : > { %v15892_v21 = vpop.f32.mrf.mxu1  ;;  %v8683_v51 = vpop.f32.mrf.mxu0 }
 0x2c7   : > { %21987 = vst [vmem:[#allocation39_spill] sm:$0xff] %v19748_v10  ;;  %v19750_v34 = vadd.f32 %v15892_v21, %v15854_v58 }
 0x2c8   : > { %v9106_v12 = vpop.f32.mrf.mxu1  ;;  %v15859_v20 = vpop.f32.mrf.mxu0 }
 0x2c9   : > { %21988 = vst [vmem:[#allocation10_spill] sm:$0xff] %v19750_v34  ;;  %v19752_v18 = vadd.f32 %v9106_v12, %v8667_v2 }
 0x2ca   : > { %v15893_v56 = vpop.f32.mrf.mxu1  ;;  %v8686_v0 = vpop.f32.mrf.mxu0 }
 0x2cb   : > { %21989 = vst [vmem:[#allocation69_spill] sm:$0xff] %v19752_v18  ;;  %v19754_v28 = vadd.f32 %v15893_v56, %v15855_v45 }
 0x2cc   : > { %v9109_v53 = vpop.f32.mrf.mxu1  ;;  %v15862_v59 = vpop.f32.mrf.mxu0 }
 0x2cd   : > { %21990 = vst [vmem:[#allocation71_spill] sm:$0xff] %v19754_v28  ;;  %v19756_v54 = vadd.f32 %v9109_v53, %v8670_v60 }
 0x2ce   : > { %v15896_v8 = vpop.f32.mrf.mxu1  ;;  %v8699_v31 = vpop.f32.mrf.mxu0 }
 0x2cf   : > { %21991 = vst [vmem:[#allocation73_spill] sm:$0xff] %v19756_v54  ;;  %v19758_v1 = vadd.f32 %v15896_v8, %v15858_v13 }
 0x2d0   : > { %v9122_v48 = vpop.f32.mrf.mxu1  ;;  %v15863_v40 = vpop.f32.mrf.mxu0 }
 0x2d1   : > { %21992 = vst [vmem:[#allocation62_spill] sm:$0xff] %v19758_v1  ;;  %v19760_v58 = vadd.f32 %v9122_v48, %v8683_v51 }
 0x2d2   : > { %v15897_v21 = vpop.f32.mrf.mxu1  ;;  %v8702_v34 = vpop.f32.mrf.mxu0 }
 0x2d3   : > { %21993 = vst [vmem:[#allocation68_spill] sm:$0xff] %v19760_v58  ;;  %v19762_v2 = vadd.f32 %v15897_v21, %v15859_v20 }
 0x2d4   : > { %v9125_v12 = vpop.f32.mrf.mxu1  ;;  %v15906_v18 = vpop.f32.mrf.mxu0 }
 0x2d5   : > { %21994 = vst [vmem:[#allocation87_spill] sm:$0xff] %v19762_v2  ;;  %v19764_v45 = vadd.f32 %v9125_v12, %v8686_v0  ;;  %v9835_v12 = vadd.f32 %v15906_v18, %v19695_v19 }
 0x2d6   : > { %v9654_v28 = vpop.f32.mrf.mxu0 }
 0x2d7   : > { %21995 = vst [vmem:[#allocation88_spill] sm:$0xff] %v19764_v45  ;;  %v15900_v56 = vpop.f32.mrf.mxu1 }
 0x2d8   : > { %v19766_v60 = vadd.f32 %v15900_v56, %v15862_v59  ;;  %v15907_v54 = vpop.f32.mrf.mxu0 }
 0x2d9   : > { %v9138_v53 = vpop.f32.mrf.mxu1 }
 0x2da   : > { %21996 = vst [vmem:[#allocation89_spill] sm:$0xff] %v19766_v60  ;;  %v19768_v13 = vadd.f32 %v9138_v53, %v8699_v31  ;;  %v9657_v1 = vpop.f32.mrf.mxu0 }
 0x2db   : > { %v15901_v8 = vpop.f32.mrf.mxu1 }
 0x2dc   : > { %21997 = vst [vmem:[#allocation90_spill] sm:$0xff] %v19768_v13  ;;  %v19770_v51 = vadd.f32 %v15901_v8, %v15863_v40  ;;  %v19772_v58 = vpop.f32.mrf.mxu0  ;;  %v9833_v8 = vadd.f32 %v9654_v28, %v19697_v27  ;;  %v9836_v13 = vadd.f32 %v15907_v54, %v19700_v29  ;;  %v22014_v29 = vld [vmem:[#allocation22_spill] sm:$0xff]  ;;  %v22016_v27 = vld [vmem:[#allocation24_spill] sm:$0xff] }
 0x2dd   : > { %v9141_v48 = vpop.f32.mrf.mxu1 }
 0x2de   : > { %21998 = vst [vmem:[#allocation91_spill] sm:$0xff] %v19770_v51  ;;  %v19774_v20 = vadd.f32 %v9141_v48, %v8702_v34  ;;  %v9670_v60 = vpop.f32.mrf.mxu0 }
 0x2df   : > { %v15944_v56 = vpop.f32.mrf.mxu1 }
 0x2e0   : > { %21999 = vst [vmem:[#allocation92_spill] sm:$0xff] %v19774_v20  ;;  %v15911_v59 = vpop.f32.mrf.mxu0  ;;  %v10347_v34 = vadd.f32 %v15944_v56, %v9835_v12  ;;  %v9834_v20 = vadd.f32 %v9657_v1, %v19702_v57  ;;  %v9837_v12 = vadd.f32 %v9670_v60, %v19706_v25 }
 0x2e1   : > { %v10166_v21 = vpop.f32.mrf.mxu1  ;;  %v9840_v57 = vadd.f32 %v15911_v59, %v19708_v61 }
 0x2e2   : > { %v10345_v45 = vadd.f32 %v10166_v21, %v9833_v8  ;;  %v9673_v0 = vpop.f32.mrf.mxu0  ;;  %v22010_v8 = vld [vmem:[#allocation18_spill] sm:$0xff]  ;;  %v10455_v50 = vmul.f32 %v10347_v34, %v22014_v29 }
 0x2e3   : > { %v15945_v53 = vpop.f32.mrf.mxu1 }
 0x2e4   : > { %v10348_v48 = vadd.f32 %v15945_v53, %v9836_v13  ;;  %v10453_v28 = vmul.f32 %v10345_v45, %v22010_v8  ;;  %v15914_v2 = vpop.f32.mrf.mxu0  ;;  %v22019_v8 = vld [vmem:[#allocation31_spill] sm:$0xff]  ;;  %v10533_v60 = vmul.f32 %v10455_v50, %v10347_v34 }
 0x2e5   : > { %v10169_v40 = vpop.f32.mrf.mxu1 }
 0x2e6   : > { %v19802_v19 = vpack.c.bf16 %v10348_v48, %v10347_v34  ;;  %v10346_v18 = vadd.f32 %v10169_v40, %v9834_v20  ;;  %v9686_v31 = vpop.f32.mrf.mxu0  ;;  %v10531_v40 = vmul.f32 %v10453_v28, %v10345_v45  ;;  %v10456_v29 = vmul.f32 %v10348_v48, %v21935_v63 }
 0x2e7   : > { %v15948_v21 = vpop.f32.mrf.mxu1 }
 0x2e8   : > { %22012 = vst [vmem:[#allocation18_spill] sm:$0xff] %v19802_v19  ;;  %v10454_v54 = vmul.f32 %v10346_v18, %v22016_v27  ;;  %v19814_v13 = vpack.c.bf16 %v10346_v18, %v10345_v45  ;;  %v15915_v56 = vpop.f32.mrf.mxu0  ;;  %v9839_v27 = vadd.f32 %v19772_v58, %v19704_v15  ;;  %v10534_v10 = vmul.f32 %v10456_v29, %v10348_v48  ;;  %v22021_v19 = vld [vmem:[#allocation63_spill] sm:$0xff] }
 0x2e9   : > { %v10182_v53 = vpop.f32.mrf.mxu1 }
 0x2ea   : > { %22018 = vst [vmem:[#allocation22_spill] sm:$0xff] %v19814_v13  ;;  %v10489_v1 = vadd.f32 %v10454_v54, %v10453_v28  ;;  %v10532_v62 = vmul.f32 %v10454_v54, %v10346_v18  ;;  %v10349_v51 = vadd.f32 %v10182_v53, %v9837_v12  ;;  %v9689_v30 = vpop.f32.mrf.mxu0  ;;  %v22020_v28 = vld [vmem:[#allocation32_spill] sm:$0xff]  ;;  %v9838_v54 = vadd.f32 %v9673_v0, %v19710_v22 }
 0x2eb   : > { %v15949_v20 = vpop.f32.mrf.mxu1  ;;  %v10351_v12 = vadd.f32 %v15948_v21, %v9839_v27  ;;  %v9841_v0 = vadd.f32 %v9686_v31, %v19714_v46  ;;  %v22023_v21 = vld [vmem:[#allocation38_spill] sm:$0xff] }
 0x2ec   : > { %v10490_v61 = vadd.f32 %v10489_v1, %v10455_v50  ;;  %v10567_v45 = vadd.f32 %v10532_v62, %v10531_v40  ;;  %v10457_v59 = vmul.f32 %v10349_v51, %v21838_v42  ;;  %v10352_v13 = vadd.f32 %v15949_v20, %v9840_v57  ;;  %v15918_v25 = vpop.f32.mrf.mxu0  ;;  %v22025_v50 = vld [vmem:[#allocation85_spill] sm:$0xff] }
 0x2ed   : > { %v10185_v53 = vpop.f32.mrf.mxu1  ;;  %v10459_v48 = vmul.f32 %v10351_v12, %v21843_v5  ;;  %v9843_v62 = vadd.f32 %v15914_v2, %v19712_v37 }
 0x2ee   : > { %v10568_v15 = vadd.f32 %v10567_v45, %v10533_v60  ;;  %v10491_v58 = vadd.f32 %v10490_v61, %v10456_v29  ;;  %v19828_v42 = vpack.c.bf16 %v10352_v13, %v10351_v12  ;;  %v10350_v57 = vadd.f32 %v10185_v53, %v9838_v54  ;;  %v9702_v20 = vpop.f32.mrf.mxu0 }
 0x2ef   : > { %v15952_v1 = vpop.f32.mrf.mxu1  ;;  %v10535_v63 = vmul.f32 %v10457_v59, %v10349_v51  ;;  %v9844_v53 = vadd.f32 %v15915_v56, %v19716_v26  ;;  %v10460_v46 = vmul.f32 %v10352_v13, %v21940_v24  ;;  %v10537_v18 = vmul.f32 %v10459_v48, %v10351_v12  ;;  %v22026_v24 = vld [vmem:[#allocation86_spill] sm:$0xff] }
 0x2f0   : > { %22022 = vst [vmem:[#allocation24_spill] sm:$0xff] %v19828_v42  ;;  %v10492_v40 = vadd.f32 %v10491_v58, %v10457_v59  ;;  %v10569_v22 = vadd.f32 %v10568_v15, %v10534_v10  ;;  %v10458_v29 = vmul.f32 %v10350_v57, %v21938_v49  ;;  %v19834_v60 = vpack.c.bf16 %v10350_v57, %v10349_v51  ;;  %v15919_v45 = vpop.f32.mrf.mxu0 }
 0x2f1   : > { %v10198_v61 = vpop.f32.mrf.mxu1  ;;  %v9842_v51 = vadd.f32 %v9689_v30, %v19721_v43  ;;  %v10355_v27 = vadd.f32 %v15952_v1, %v9843_v62  ;;  %v22028_v1 = vld [vmem:[#allocation40_spill] sm:$0xff] }
 0x2f2   : > { %22024 = vst [vmem:[#allocation31_spill] sm:$0xff] %v19834_v60  ;;  %v10570_v54 = vadd.f32 %v10569_v22, %v10535_v63  ;;  %v10353_v58 = vadd.f32 %v10198_v61, %v9841_v0  ;;  %v10493_v31 = vadd.f32 %v10492_v40, %v10458_v29  ;;  %v10536_v59 = vmul.f32 %v10458_v29, %v10350_v57  ;;  %v9705_v5 = vpop.f32.mrf.mxu0  ;;  %v22144_v60 = vld [vmem:[#allocation26_spill] sm:$0xff] }
 0x2f3   : > { %v15953_v15 = vpop.f32.mrf.mxu1  ;;  %v10538_v61 = vmul.f32 %v10460_v46, %v10352_v13  ;;  %v9847_v13 = vadd.f32 %v15918_v25, %v19726_v39 }
 0x2f4   : > { %v10356_v34 = vadd.f32 %v15953_v15, %v9844_v53  ;;  %v10494_v37 = vadd.f32 %v10493_v31, %v10459_v48  ;;  %v10571_v2 = vadd.f32 %v10570_v54, %v10536_v59  ;;  %v10461_v26 = vmul.f32 %v10353_v58, %v21848_v44  ;;  %v15922_v63 = vpop.f32.mrf.mxu0 }
 0x2f5   : > { %v10201_v56 = vpop.f32.mrf.mxu1  ;;  %v10463_v44 = vmul.f32 %v10355_v27, %v21942_v32  ;;  %v9845_v54 = vadd.f32 %v9702_v20, %v19728_v4 }
 0x2f6   : > { %v19845_v57 = vpack.c.bf16 %v10356_v34, %v10355_v27  ;;  %v10354_v0 = vadd.f32 %v10201_v56, %v9842_v51  ;;  %v10572_v43 = vadd.f32 %v10571_v2, %v10537_v18  ;;  %v10495_v30 = vadd.f32 %v10494_v37, %v10460_v46  ;;  %v9718_v12 = vpop.f32.mrf.mxu0 }
 0x2f7   : > { %v15956_v62 = vpop.f32.mrf.mxu1  ;;  %v10539_v59 = vmul.f32 %v10461_v26, %v10353_v58  ;;  %v9848_v18 = vadd.f32 %v15919_v45, %v19730_v36  ;;  %v10464_v4 = vmul.f32 %v10356_v34, %v21943_v33  ;;  %v10541_v49 = vmul.f32 %v10463_v44, %v10355_v27 }
 0x2f8   : > { %22027 = vst [vmem:[#allocation32_spill] sm:$0xff] %v19845_v57  ;;  %v10462_v53 = vmul.f32 %v10354_v0, %v21944_v35  ;;  %v10496_v31 = vadd.f32 %v10495_v30, %v10461_v26  ;;  %v10573_v15 = vadd.f32 %v10572_v43, %v10538_v61  ;;  %v19852_v22 = vpack.c.bf16 %v10354_v0, %v10353_v58  ;;  %v15923_v56 = vpop.f32.mrf.mxu0  ;;  %v22030_v26 = vld [vmem:[#allocation30_spill] sm:$0xff] }
 0x2f9   : > { %v10214_v51 = vpop.f32.mrf.mxu1  ;;  %v10359_v58 = vadd.f32 %v15956_v62, %v9847_v13  ;;  %v9846_v36 = vadd.f32 %v9705_v5, %v19732_v7 }
 0x2fa   : > { %22029 = vst [vmem:[#allocation63_spill] sm:$0xff] %v19852_v22  ;;  %v10540_v46 = vmul.f32 %v10462_v53, %v10354_v0  ;;  %v10357_v37 = vadd.f32 %v10214_v51, %v9845_v54  ;;  %v10574_v32 = vadd.f32 %v10573_v15, %v10539_v59  ;;  %v10497_v20 = vadd.f32 %v10496_v31, %v10462_v53  ;;  %v9721_v30 = vpop.f32.mrf.mxu0  ;;  %v22031_v59 = vld [vmem:[#allocation42_spill] sm:$0xff]  ;;  %v22141_v22 = vld [vmem:[#allocation53_spill] sm:$0xff] }
 0x2fb   : > { %v15957_v35 = vpop.f32.mrf.mxu1  ;;  %v10542_v15 = vmul.f32 %v10464_v4, %v10356_v34  ;;  %v10467_v7 = vmul.f32 %v10359_v58, %v21865_v16 }
 0x2fc   : > { %v10465_v43 = vmul.f32 %v10357_v37, %v21861_v17  ;;  %v10360_v48 = vadd.f32 %v15957_v35, %v9848_v18  ;;  %v10498_v39 = vadd.f32 %v10497_v20, %v10463_v44  ;;  %v10575_v25 = vadd.f32 %v10574_v32, %v10540_v46  ;;  %v15926_v0 = vpop.f32.mrf.mxu0  ;;  %v22033_v44 = vld [vmem:[#allocation8_spill] sm:$0xff] }
 0x2fd   : > { %v10217_v45 = vpop.f32.mrf.mxu1  ;;  %v9849_v46 = vadd.f32 %v9718_v12, %v19736_v6  ;;  %v10545_v18 = vmul.f32 %v10467_v7, %v10359_v58 }
 0x2fe   : > { %v19864_v31 = vpack.c.bf16 %v10360_v48, %v10359_v58  ;;  %v10576_v62 = vadd.f32 %v10575_v25, %v10541_v49  ;;  %v10499_v51 = vadd.f32 %v10498_v39, %v10464_v4  ;;  %v10358_v17 = vadd.f32 %v10217_v45, %v9846_v36  ;;  %v9734_v27 = vpop.f32.mrf.mxu0 }
 0x2ff   : > { %v15960_v13 = vpop.f32.mrf.mxu1  ;;  %v10543_v5 = vmul.f32 %v10465_v43, %v10357_v37  ;;  %v9851_v4 = vadd.f32 %v15922_v63, %v19734_v3  ;;  %v9852_v39 = vadd.f32 %v15923_v56, %v19738_v55  ;;  %v10468_v16 = vmul.f32 %v10360_v48, %v21948_v41  ;;  %v22036_v41 = vld [vmem:[#allocation20_spill] sm:$0xff] }
 0x300   : > { %22032 = vst [vmem:[#allocation38_spill] sm:$0xff] %v19864_v31  ;;  %v10500_v32 = vadd.f32 %v10499_v51, %v10465_v43  ;;  %v10577_v20 = vadd.f32 %v10576_v62, %v10542_v15  ;;  %v10466_v35 = vmul.f32 %v10358_v17, %v21866_v23  ;;  %v19870_v53 = vpack.c.bf16 %v10358_v17, %v10357_v37  ;;  %v15927_v34 = vpop.f32.mrf.mxu0  ;;  %v22035_v15 = vld [vmem:[#allocation36_spill] sm:$0xff]  ;;  %v22135_v31 = vld [vmem:[#allocation51_spill] sm:$0xff] }
 0x301   : > { %v10230_v33 = vpop.f32.mrf.mxu1  ;;  %v9850_v37 = vadd.f32 %v9721_v30, %v19740_v14  ;;  %v10363_v62 = vadd.f32 %v15960_v13, %v9851_v4 }
 0x302   : > { %22034 = vst [vmem:[#allocation85_spill] sm:$0xff] %v19870_v53  ;;  %v10361_v25 = vadd.f32 %v10230_v33, %v9849_v46  ;;  %v10578_v36 = vadd.f32 %v10577_v20, %v10543_v5  ;;  %v10501_v45 = vadd.f32 %v10500_v32, %v10466_v35  ;;  %v10544_v6 = vmul.f32 %v10466_v35, %v10358_v17  ;;  %v9737_v43 = vpop.f32.mrf.mxu0  ;;  %v22041_v20 = vld [vmem:[#allocation12_spill] sm:$0xff] }
 0x303   : > { %v15961_v12 = vpop.f32.mrf.mxu1  ;;  %v10546_v32 = vmul.f32 %v10468_v16, %v10360_v48  ;;  %v9853_v35 = vadd.f32 %v9734_v27, %v19744_v9  ;;  %v9855_v48 = vadd.f32 %v15926_v0, %v19742_v52 }
 0x304   : > { %v10364_v51 = vadd.f32 %v15961_v12, %v9852_v39  ;;  %v10502_v49 = vadd.f32 %v10501_v45, %v10467_v7  ;;  %v10579_v2 = vadd.f32 %v10578_v36, %v10544_v6  ;;  %v10469_v3 = vmul.f32 %v10361_v25, %v21949_v47  ;;  %v15930_v63 = vpop.f32.mrf.mxu0  ;;  %v22038_v7 = vld [vmem:[#allocation43_spill] sm:$0xff] }
 0x305   : > { %v10233_v55 = vpop.f32.mrf.mxu1  ;;  %v10471_v47 = vmul.f32 %v10363_v62, %v21951_v11 }
 0x306   : > { %v19881_v17 = vpack.c.bf16 %v10364_v51, %v10363_v62  ;;  %v10362_v5 = vadd.f32 %v10233_v55, %v9850_v37  ;;  %v10580_v14 = vadd.f32 %v10579_v2, %v10545_v18  ;;  %v10503_v30 = vadd.f32 %v10502_v49, %v10468_v16  ;;  %v9750_v58 = vpop.f32.mrf.mxu0  ;;  %v22040_v2 = vld [vmem:[#allocation37_spill] sm:$0xff] }
 0x307   : > { %v15964_v13 = vpop.f32.mrf.mxu1  ;;  %v10547_v36 = vmul.f32 %v10469_v3, %v10361_v25  ;;  %v9856_v18 = vadd.f32 %v15927_v34, %v22040_v2  ;;  %v10472_v9 = vmul.f32 %v10364_v51, %v22041_v20  ;;  %v10549_v46 = vmul.f32 %v10471_v47, %v10363_v62  ;;  %v22044_v34 = vld [vmem:[#allocation39_spill] sm:$0xff] }
 0x308   : > { %22037 = vst [vmem:[#allocation86_spill] sm:$0xff] %v19881_v17  ;;  %v10470_v4 = vmul.f32 %v10362_v5, %v21953_v38  ;;  %v10504_v39 = vadd.f32 %v10503_v30, %v10469_v3  ;;  %v10581_v45 = vadd.f32 %v10580_v14, %v10546_v32  ;;  %v19888_v6 = vpack.c.bf16 %v10362_v5, %v10361_v25  ;;  %v15931_v37 = vpop.f32.mrf.mxu0  ;;  %v22042_v3 = vld [vmem:[#allocation44_spill] sm:$0xff]  ;;  %v22043_v14 = vld [vmem:[#allocation14_spill] sm:$0xff]  ;;  %v22050_v20 = vld [vmem:[#allocation15_spill] sm:$0xff] }
 0x309   : > { %v10246_v12 = vpop.f32.mrf.mxu1  ;;  %v10367_v25 = vadd.f32 %v15964_v13, %v9855_v48  ;;  %v10550_v2 = vmul.f32 %v10472_v9, %v10364_v51 }
 0x30a   : > { %22039 = vst [vmem:[#allocation40_spill] sm:$0xff] %v19888_v6  ;;  %v10548_v49 = vmul.f32 %v10470_v4, %v10362_v5  ;;  %v10365_v16 = vadd.f32 %v10246_v12, %v9853_v35  ;;  %v10582_v11 = vadd.f32 %v10581_v45, %v10547_v36  ;;  %v10505_v27 = vadd.f32 %v10504_v39, %v10470_v4  ;;  %v9753_v30 = vpop.f32.mrf.mxu0 }
 0x30b   : > { %v15965_v38 = vpop.f32.mrf.mxu1  ;;  %v9854_v5 = vadd.f32 %v9737_v43, %v22044_v34 }
 0x30c   : > { %v10473_v56 = vmul.f32 %v10365_v16, %v22043_v14  ;;  %v10368_v23 = vadd.f32 %v15965_v38, %v9856_v18  ;;  %v10506_v52 = vadd.f32 %v10505_v27, %v10471_v47  ;;  %v10583_v0 = vadd.f32 %v10582_v11, %v10548_v49  ;;  %v15934_v12 = vpop.f32.mrf.mxu0  ;;  %v22047_v47 = vld [vmem:[#allocation47_spill] sm:$0xff]  ;;  %v22048_v11 = vld [vmem:[#allocation16_spill] sm:$0xff]  ;;  %v22049_v38 = vld [vmem:[#allocation69_spill] sm:$0xff] }
 0x30d   : > { %v10249_v35 = vpop.f32.mrf.mxu1  ;;  %v10475_v43 = vmul.f32 %v10367_v25, %v22048_v11  ;;  %v9857_v34 = vadd.f32 %v9750_v58, %v22049_v38  ;;  %v22054_v11 = vld [vmem:[#allocation55_spill] sm:$0xff] }
 0x30e   : > { %v19900_v39 = vpack.c.bf16 %v10368_v23, %v10367_v25  ;;  %v10584_v13 = vadd.f32 %v10583_v0, %v10549_v46  ;;  %v10507_v48 = vadd.f32 %v10506_v52, %v10472_v9  ;;  %v10366_v14 = vadd.f32 %v10249_v35, %v9854_v5  ;;  %v9766_v62 = vpop.f32.mrf.mxu0  ;;  %v22052_v9 = vld [vmem:[#allocation10_spill] sm:$0xff]  ;;  %v22053_v0 = vld [vmem:[#allocation71_spill] sm:$0xff] }
 0x30f   : > { %v15968_v18 = vpop.f32.mrf.mxu1  ;;  %v10551_v27 = vmul.f32 %v10473_v56, %v10365_v16  ;;  %v9859_v52 = vadd.f32 %v15930_v63, %v22052_v9  ;;  %v9860_v5 = vadd.f32 %v15931_v37, %v22053_v0  ;;  %v10476_v54 = vmul.f32 %v10368_v23, %v22054_v11  ;;  %v22057_v63 = vld [vmem:[#allocation19_spill] sm:$0xff] }
 0x310   : > { %22046 = vst [vmem:[#allocation30_spill] sm:$0xff] %v19900_v39  ;;  %v10508_v55 = vadd.f32 %v10507_v48, %v10473_v56  ;;  %v10585_v36 = vadd.f32 %v10584_v13, %v10550_v2  ;;  %v10474_v32 = vmul.f32 %v10366_v14, %v22050_v20  ;;  %v19906_v4 = vpack.c.bf16 %v10366_v14, %v10365_v16  ;;  %v15935_v51 = vpop.f32.mrf.mxu0  ;;  %v22056_v16 = vld [vmem:[#allocation73_spill] sm:$0xff] }
 0x311   : > { %v10262_v33 = vpop.f32.mrf.mxu1  ;;  %v9858_v48 = vadd.f32 %v9753_v30, %v22056_v16  ;;  %v10371_v38 = vadd.f32 %v15968_v18, %v9859_v52  ;;  %v10553_v40 = vmul.f32 %v10475_v43, %v10367_v25  ;;  %v10554_v0 = vmul.f32 %v10476_v54, %v10368_v23 }
 0x312   : > { %22051 = vst [vmem:[#allocation42_spill] sm:$0xff] %v19906_v4  ;;  %v10369_v35 = vadd.f32 %v10262_v33, %v9857_v34  ;;  %v10586_v49 = vadd.f32 %v10585_v36, %v10551_v27  ;;  %v10509_v61 = vadd.f32 %v10508_v55, %v10474_v32  ;;  %v10552_v58 = vmul.f32 %v10474_v32, %v10366_v14  ;;  %v9769_v2 = vpop.f32.mrf.mxu0  ;;  %v22065_v34 = vld [vmem:[#allocation62_spill] sm:$0xff]  ;;  %v22067_v55 = vld [vmem:[#allocation52_spill] sm:$0xff]  ;;  %v22132_v4 = vld [vmem:[#allocation25_spill] sm:$0xff] }
 0x313   : > { %v15969_v56 = vpop.f32.mrf.mxu1  ;;  %v9863_v23 = vadd.f32 %v15934_v12, %v22065_v34  ;;  %v22070_v34 = vld [vmem:[#allocation88_spill] sm:$0xff] }
 0x314   : > { %v10372_v29 = vadd.f32 %v15969_v56, %v9860_v5  ;;  %v10510_v46 = vadd.f32 %v10509_v61, %v10475_v43  ;;  %v10587_v10 = vadd.f32 %v10586_v49, %v10552_v58  ;;  %v10477_v9 = vmul.f32 %v10369_v35, %v22057_v63  ;;  %v15938_v33 = vpop.f32.mrf.mxu0  ;;  %v22061_v49 = vld [vmem:[#allocation23_spill] sm:$0xff]  ;;  %v22062_v5 = vld [vmem:[#allocation68_spill] sm:$0xff]  ;;  %v22063_v58 = vld [vmem:[#allocation21_spill] sm:$0xff] }
 0x315   : > { %v10265_v37 = vpop.f32.mrf.mxu1  ;;  %v10479_v43 = vmul.f32 %v10371_v38, %v22061_v49  ;;  %v9861_v11 = vadd.f32 %v9766_v62, %v22062_v5  ;;  %v22076_v61 = vld [vmem:[#allocation54_spill] sm:$0xff] }
 0x316   : > { %v19917_v32 = vpack.c.bf16 %v10372_v29, %v10371_v38  ;;  %v10370_v14 = vadd.f32 %v10265_v37, %v9858_v48  ;;  %v10588_v30 = vadd.f32 %v10587_v10, %v10553_v40  ;;  %v10511_v18 = vadd.f32 %v10510_v46, %v10476_v54  ;;  %v9782_v37 = vpop.f32.mrf.mxu0  ;;  %v22066_v10 = vld [vmem:[#allocation87_spill] sm:$0xff] }
 0x317   : > { %v15972_v52 = vpop.f32.mrf.mxu1  ;;  %v10555_v63 = vmul.f32 %v10477_v9, %v10369_v35  ;;  %v9864_v40 = vadd.f32 %v15935_v51, %v22066_v10  ;;  %v10480_v62 = vmul.f32 %v10372_v29, %v22067_v55  ;;  %v10557_v27 = vmul.f32 %v10479_v43, %v10371_v38  ;;  %v22083_v38 = vld [vmem:[#allocation59_spill] sm:$0xff] }
 0x318   : > { %22059 = vst [vmem:[#allocation8_spill] sm:$0xff] %v19917_v32  ;;  %v10478_v56 = vmul.f32 %v10370_v14, %v22063_v58  ;;  %v10512_v16 = vadd.f32 %v10511_v18, %v10477_v9  ;;  %v10589_v36 = vadd.f32 %v10588_v30, %v10554_v0  ;;  %v19924_v20 = vpack.c.bf16 %v10370_v14, %v10369_v35  ;;  %v22069_v35 = vld [vmem:[#allocation5_spill] sm:$0xff] }
 0x319   : > { %v10278_v48 = vpop.f32.mrf.mxu1  ;;  %v10375_v0 = vadd.f32 %v15972_v52, %v9863_v23  ;;  %v9862_v51 = vadd.f32 %v9769_v2, %v22070_v34  ;;  %v22129_v32 = vld [vmem:[#allocation17_spill] sm:$0xff] }
 0x31a   : > { %22064 = vst [vmem:[#allocation36_spill] sm:$0xff] %v19924_v20  ;;  %v10556_v54 = vmul.f32 %v10478_v56, %v10370_v14  ;;  %v10373_v46 = vadd.f32 %v10278_v48, %v9861_v11  ;;  %v10590_v49 = vadd.f32 %v10589_v36, %v10555_v63  ;;  %v10513_v5 = vadd.f32 %v10512_v16, %v10478_v56  ;;  %v15939_v14 = vpop.f32.mrf.mxu0 }
 0x31b   : > { %v15973_v58 = vpop.f32.mrf.mxu1  ;;  %v10558_v16 = vmul.f32 %v10480_v62, %v10372_v29  ;;  %v22130_v20 = vunpack.c.l.bf16 %v22129_v32 }
 0x31c   : > { %v10481_v30 = vmul.f32 %v10373_v46, %v22069_v35  ;;  %v10376_v13 = vadd.f32 %v15973_v58, %v9864_v40  ;;  %v10514_v45 = vadd.f32 %v10513_v5, %v10479_v43  ;;  %v10591_v12 = vadd.f32 %v10590_v49, %v10556_v54  ;;  %v22074_v54 = vld [vmem:[#allocation27_spill] sm:$0xff]  ;;  %v22075_v5 = vld [vmem:[#allocation90_spill] sm:$0xff]  ;;  %v9785_v55 = vpop.f32.mrf.mxu0 }
 0x31d   : > { %v10281_v11 = vpop.f32.mrf.mxu1  ;;  %v10483_v49 = vmul.f32 %v10375_v0, %v22074_v54  ;;  %v9865_v58 = vadd.f32 %v9782_v37, %v22075_v5  ;;  %v22080_v54 = vld [vmem:[#allocation29_spill] sm:$0xff] }
 0x31e   : > { %v19936_v56 = vpack.c.bf16 %v10376_v13, %v10375_v0  ;;  %v10592_v52 = vadd.f32 %v10591_v12, %v10557_v27  ;;  %v10515_v23 = vadd.f32 %v10514_v45, %v10480_v62  ;;  %v10374_v10 = vadd.f32 %v10281_v11, %v9862_v51  ;;  %v22078_v45 = vld [vmem:[#allocation89_spill] sm:$0xff]  ;;  %v22079_v62 = vld [vmem:[#allocation91_spill] sm:$0xff] }
 0x31f   : > { %v15976_v40 = vpop.f32.mrf.mxu1  ;;  %v10559_v2 = vmul.f32 %v10481_v30, %v10373_v46  ;;  %v9867_v27 = vadd.f32 %v15938_v33, %v22078_v45  ;;  %v9868_v12 = vadd.f32 %v15939_v14, %v22079_v62  ;;  %v10484_v43 = vmul.f32 %v10376_v13, %v22080_v54  ;;  %v22084_v14 = vld [vmem:[#allocation75_spill] sm:$0xff] }
 0x320   : > { %22072 = vst [vmem:[#allocation20_spill] sm:$0xff] %v19936_v56  ;;  %v10516_v35 = vadd.f32 %v10515_v23, %v10481_v30  ;;  %v10593_v34 = vadd.f32 %v10592_v52, %v10558_v16  ;;  %v10482_v63 = vmul.f32 %v10374_v10, %v22076_v61  ;;  %v19942_v48 = vpack.c.bf16 %v10374_v10, %v10373_v46  ;;  %v22081_v16 = vld [vmem:[#allocation74_spill] sm:$0xff]  ;;  %v22082_v61 = vld [vmem:[#allocation92_spill] sm:$0xff]  ;;  %v22123_v56 = vld [vmem:[#allocation13_spill] sm:$0xff] }
 0x321   : > { %v10294_v9 = vpop.f32.mrf.mxu1  ;;  %v9866_v46 = vadd.f32 %v9785_v55, %v22082_v61  ;;  %v10379_v23 = vadd.f32 %v15976_v40, %v9867_v27  ;;  %v10561_v25 = vmul.f32 %v10483_v49, %v10375_v0  ;;  %v22157_v52 = vunpack.c.l.bf16 %v22023_v21 }
 0x322   : > { %22077 = vst [vmem:[#allocation43_spill] sm:$0xff] %v19942_v48  ;;  %v10377_v51 = vadd.f32 %v10294_v9, %v9865_v58  ;;  %v10594_v11 = vadd.f32 %v10593_v34, %v10559_v2  ;;  %v10517_v36 = vadd.f32 %v10516_v35, %v10482_v63  ;;  %v10560_v37 = vmul.f32 %v10482_v63, %v10374_v10 }
 0x323   : > { %v15977_v30 = vpop.f32.mrf.mxu1  ;;  %v10562_v35 = vmul.f32 %v10484_v43, %v10376_v13  ;;  %v22169_v13 = vunpack.c.l.bf16 %v22033_v44  ;;  %v22171_v27 = vunpack.c.l.bf16 %v22031_v59  ;;  %v22174_v40 = vunpack.c.l.bf16 %v22036_v41 }
 0x324   : > { %v10380_v5 = vadd.f32 %v15977_v30, %v9868_v12  ;;  %v10518_v18 = vadd.f32 %v10517_v36, %v10483_v49  ;;  %v10595_v29 = vadd.f32 %v10594_v11, %v10560_v37  ;;  %v10485_v33 = vmul.f32 %v10377_v51, %v22083_v38  ;;  %v22087_v36 = vld [vmem:[#allocation58_spill] sm:$0xff]  ;;  %v22088_v38 = vld [vmem:[#allocation57_spill] sm:$0xff] }
 0x325   : > { %v10297_v45 = vpop.f32.mrf.mxu1  ;;  %v10487_v49 = vmul.f32 %v10379_v23, %v22087_v36  ;;  %v22177_v30 = vunpack.c.l.bf16 %v22035_v15 }
 0x326   : > { %v19953_v58 = vpack.c.bf16 %v10380_v5, %v10379_v23  ;;  %v10378_v63 = vadd.f32 %v10297_v45, %v9866_v46  ;;  %v10596_v34 = vadd.f32 %v10595_v29, %v10561_v25  ;;  %v10519_v55 = vadd.f32 %v10518_v18, %v10484_v43  ;;  %v22092_v45 = vld [vmem:[#allocation35_spill] sm:$0xff] }
 0x327   : > { %v10563_v11 = vmul.f32 %v10485_v33, %v10377_v51  ;;  %v10488_v0 = vmul.f32 %v10380_v5, %v22092_v45  ;;  %v10565_v46 = vmul.f32 %v10487_v49, %v10379_v23  ;;  %v22150_v45 = vld [vmem:[#allocation60_spill] sm:$0xff]  ;;  %v22159_v23 = vunpack.c.l.bf16 %v22021_v19 }
 0x328   : > { %22085 = vst [vmem:[#allocation37_spill] sm:$0xff] %v19953_v58  ;;  %v10486_v62 = vmul.f32 %v10378_v63, %v22088_v38  ;;  %v10520_v12 = vadd.f32 %v10519_v55, %v10485_v33  ;;  %v10597_v54 = vadd.f32 %v10596_v34, %v10562_v35  ;;  %v19960_v37 = vpack.c.bf16 %v10378_v63, %v10377_v51  ;;  %v22120_v58 = vld [vmem:[#allocation9_spill] sm:$0xff] }
 0x329   : > { %v10566_v33 = vmul.f32 %v10488_v0, %v10380_v5  ;;  %v22151_v2 = vunpack.c.l.bf16 %v22150_v45  ;;  %v22161_v43 = vunpack.c.l.bf16 %v22026_v24  ;;  %v22165_v35 = vunpack.c.l.bf16 %v22030_v26 }
 0x32a   : > { %22089 = vst [vmem:[#allocation12_spill] sm:$0xff] %v19960_v37  ;;  %v10564_v18 = vmul.f32 %v10486_v62, %v10378_v63  ;;  %v10598_v29 = vadd.f32 %v10597_v54, %v10563_v11  ;;  %v10521_v36 = vadd.f32 %v10520_v12, %v10486_v62  ;;  %v22108_v11 = vld [vmem:[#allocation46_spill] sm:$0xff]  ;;  %v22155_v12 = vunpack.c.l.bf16 %v22019_v8 }
 0x32b   : > { %v22163_v62 = vunpack.c.l.bf16 %v22025_v50  ;;  %v22167_v55 = vunpack.c.l.bf16 %v22028_v1 }
 0x32c   : > { %v10522_v9 = vadd.f32 %v10521_v36, %v10487_v49  ;;  %v10599_v25 = vadd.f32 %v10598_v29, %v10564_v18 }
 0x32e   : > { %v10523_v38 = vadd.f32 %v10522_v9, %v10488_v0  ;;  %v10600_v51 = vadd.f32 %v10599_v25, %v10565_v46  ;;  %v22153_v25 = vunpack.c.l.bf16 %v22020_v28 }
 0x330   : > { %v10524_v54 = vrot.slane %v10523_v38, 4  ;;  %v10601_v63 = vadd.f32 %v10600_v51, %v10566_v33 }
 0x332   : > { %v10525_v49 = vadd.f32 %v10524_v54, %v10523_v38  ;;  %v10602_v18 = vrot.slane %v10601_v63, 4 }
 0x334   : > { %v10526_v29 = vrot.slane %v10525_v49, 2  ;;  %v10603_v46 = vadd.f32 %v10602_v18, %v10601_v63 }
 0x336   : > { %v10527_v33 = vadd.f32 %v10526_v29, %v10525_v49  ;;  %v10604_v51 = vrot.slane %v10603_v46, 2 }
 0x338   : > { %v10528_v61 = vrot.slane %v10527_v33, 1  ;;  %v10605_v54 = vadd.f32 %v10604_v51, %v10603_v46  ;;  %v22109_v51 = vld [vmem:[#allocation7_spill] sm:$0xff] }
 0x33a   : > { %v10529_v63 = vadd.f32 %v10528_v61, %v10527_v33  ;;  %v10606_v18 = vrot.slane %v10605_v54, 1  ;;  %v22111_v33 = vld [vmem:[#allocation64_spill] sm:$0xff] }
 0x33b   : > { %v22112_v38 = vunpack.c.l.bf16 %v22111_v33 }
 0x33c   : > { %v10530_v29 = vadd.f32 %v10529_v63, %v22108_v11  ;;  %v10607_v17 = vadd.f32 %v10606_v18, %v10605_v54  ;;  %v22117_v54 = vld [vmem:[#allocation34_spill] sm:$0xff] }
 0x33d   : > { %v22118_v61 = vunpack.c.l.bf16 %v22117_v54 }
 0x33e   : > { %v10608_v5 = vadd.f32 %v10607_v17, %v22109_v51  ;;  %v20027_v36 = vmul.f32 0.0009765625, %v10530_v29  ;;  %v22113_v17 = vunpack.c.h.bf16 %v22111_v33  ;;  %v22114_v51 = vld [vmem:[#allocation61_spill] sm:$0xff]  ;;  %v22119_v33 = vunpack.c.h.bf16 %v22117_v54 }
 0x33f   : > { %v22115_v11 = vunpack.c.l.bf16 %v22114_v51  ;;  %v22125_v54 = vunpack.c.h.bf16 %v22123_v56 }
 0x340   : > { %22110 = vst [vmem:[#allocation44_spill] sm:$0xff] %v20027_v36  ;;  %v10791_v18 = vmul.f32 0.0009765625, %v10608_v5  ;;  %v10792_v34 = vmul.f32 %v20027_v36, %v20027_v36  ;;  %v20038_v46 = vsub.f32 %v22112_v38, %v20027_v36  ;;  %v20043_v29 = vsub.f32 %v22113_v17, %v20027_v36 }
 0x341   : > { %v20048_v49 = vsub.f32 %v22115_v11, %v20027_v36  ;;  %v22116_v5 = vunpack.c.h.bf16 %v22114_v51  ;;  %v20058_v38 = vsub.f32 %v22118_v61, %v20027_v36  ;;  %v20063_v17 = vsub.f32 %v22119_v33, %v20027_v36 }
 0x342   : > { %v10793_v0 = vsub.f32 %v10791_v18, %v10792_v34  ;;  %v22121_v11 = vunpack.c.l.bf16 %v22120_v58  ;;  %v22122_v51 = vunpack.c.h.bf16 %v22120_v58  ;;  %v22124_v61 = vunpack.c.l.bf16 %v22123_v56  ;;  %v22126_v34 = vld [vmem:[#allocation11_spill] sm:$0xff] }
 0x343   : > { %v20053_v63 = vsub.f32 %v22116_v5, %v20027_v36  ;;  %v20083_v33 = vsub.f32 %v22125_v54, %v20027_v36  ;;  %v22127_v18 = vunpack.c.l.bf16 %v22126_v34  ;;  %v22128_v58 = vunpack.c.h.bf16 %v22126_v34 }
 0x344   : > { %v20068_v37 = vsub.f32 %v22121_v11, %v20027_v36  ;;  %v20073_v5 = vsub.f32 %v22122_v51, %v20027_v36  ;;  %v20078_v48 = vsub.f32 %v22124_v61, %v20027_v36  ;;  %v20098_v61 = vsub.f32 %v22130_v20, %v20027_v36 }
 0x345   : > { %v20088_v11 = vsub.f32 %v22127_v18, %v20027_v36  ;;  %v20093_v51 = vsub.f32 %v22128_v58, %v20027_v36  ;;  %v10794_v39 = vadd.f32 1e-05, %v10793_v0  ;;  %v22131_v56 = vunpack.c.h.bf16 %v22129_v32 }
 0x346   : > { %v22133_v18 = vunpack.c.l.bf16 %v22132_v4  ;;  %v22134_v34 = vunpack.c.h.bf16 %v22132_v4  ;;  %v22136_v20 = vunpack.c.l.bf16 %v22135_v31  ;;  %v22137_v32 = vunpack.c.h.bf16 %v22135_v31 }
 0x347   : > { %v20103_v54 = vsub.f32 %v22131_v56, %v20027_v36  ;;  %v22138_v56 = vld [vmem:[#allocation49_spill] sm:$0xff]  ;;  %16326 = vrsqrt.f32 %v10794_v39  ;;  %v22143_v31 = vunpack.c.h.bf16 %v22141_v22  ;;  %v22147_v39 = vld [vmem:[#allocation56_spill] sm:$0xff] }
 0x348   : > { %v20108_v6 = vsub.f32 %v22133_v18, %v20027_v36  ;;  %v20113_v58 = vsub.f32 %v22134_v34, %v20027_v36  ;;  %v20118_v53 = vsub.f32 %v22136_v20, %v20027_v36  ;;  %v20123_v0 = vsub.f32 %v22137_v32, %v20027_v36 }
 0x349   : > { %v22139_v57 = vunpack.c.l.bf16 %v22138_v56  ;;  %v22140_v4 = vunpack.c.h.bf16 %v22138_v56  ;;  %v22142_v20 = vunpack.c.l.bf16 %v22141_v22  ;;  %v20143_v32 = vsub.f32 %v22143_v31, %v20027_v36 }
 0x34a   : > { %v22146_v56 = vunpack.c.h.bf16 %v22144_v60  ;;  %v22148_v9 = vunpack.c.l.bf16 %v22147_v39  ;;  %v22149_v22 = vunpack.c.h.bf16 %v22147_v39  ;;  %v22154_v39 = vunpack.c.h.bf16 %v22020_v28 }
 0x34b   : > { %v20128_v18 = vsub.f32 %v22139_v57, %v20027_v36  ;;  %v20133_v34 = vsub.f32 %v22140_v4, %v20027_v36  ;;  %v20138_v42 = vsub.f32 %v22142_v20, %v20027_v36  ;;  %v22145_v57 = vunpack.c.l.bf16 %v22144_v60 }
 0x34c   : > { %v20153_v4 = vsub.f32 %v22146_v56, %v20027_v36  ;;  %v20158_v20 = vsub.f32 %v22148_v9, %v20027_v36  ;;  %v20163_v31 = vsub.f32 %v22149_v22, %v20027_v36  ;;  %v22152_v60 = vunpack.c.h.bf16 %v22150_v45 }
 0x34d   : > { %v20148_v10 = vsub.f32 %v22145_v57, %v20027_v36  ;;  %v20168_v57 = vsub.f32 %v22151_v2, %v20027_v36  ;;  %v20178_v9 = vsub.f32 %v22153_v25, %v20027_v36  ;;  %v20183_v22 = vsub.f32 %v22154_v39, %v20027_v36 }
 0x34e   : > { %v20173_v56 = vsub.f32 %v22152_v60, %v20027_v36  ;;  %v20188_v2 = vsub.f32 %v22155_v12, %v20027_v36  ;;  %v22156_v45 = vunpack.c.h.bf16 %v22019_v8  ;;  %v20198_v25 = vsub.f32 %v22157_v52, %v20027_v36 }
 0x34f   : > { %v22158_v28 = vunpack.c.h.bf16 %v22023_v21  ;;  %v20208_v12 = vsub.f32 %v22159_v23, %v20027_v36  ;;  %v22160_v8 = vunpack.c.h.bf16 %v22021_v19  ;;  %v20218_v52 = vsub.f32 %v22161_v43, %v20027_v36 }
 0x350   : > { %v20193_v60 = vsub.f32 %v22156_v45, %v20027_v36  ;;  %v22162_v21 = vunpack.c.h.bf16 %v22026_v24  ;;  %v20228_v23 = vsub.f32 %v22163_v62, %v20027_v36  ;;  %v22164_v19 = vunpack.c.h.bf16 %v22025_v50 }
 0x351   : > { %v20203_v39 = vsub.f32 %v22158_v28, %v20027_v36  ;;  %v20213_v45 = vsub.f32 %v22160_v8, %v20027_v36  ;;  %v20238_v43 = vsub.f32 %v22165_v35, %v20027_v36  ;;  %v22166_v24 = vunpack.c.h.bf16 %v22030_v26 }
 0x352   : > { %v20223_v28 = vsub.f32 %v22162_v21, %v20027_v36  ;;  %v20233_v8 = vsub.f32 %v22164_v19, %v20027_v36  ;;  %v20248_v62 = vsub.f32 %v22167_v55, %v20027_v36  ;;  %v22168_v50 = vunpack.c.h.bf16 %v22028_v1 }
 0x353   : > { %v20243_v21 = vsub.f32 %v22166_v24, %v20027_v36  ;;  %v20258_v35 = vsub.f32 %v22169_v13, %v20027_v36  ;;  %v22170_v26 = vunpack.c.h.bf16 %v22033_v44  ;;  %v20268_v55 = vsub.f32 %v22171_v27, %v20027_v36 }
 0x354   : > { %v20253_v19 = vsub.f32 %v22168_v50, %v20027_v36  ;;  %v22172_v1 = vunpack.c.h.bf16 %v22031_v59  ;;  %v20278_v13 = vsub.f32 %v22174_v40, %v20027_v36  ;;  %v22175_v44 = vunpack.c.h.bf16 %v22036_v41 }
 0x355   : > { %v20263_v24 = vsub.f32 %v22170_v26, %v20027_v36  ;;  %v20288_v27 = vsub.f32 %v22177_v30, %v20027_v36  ;;  %v22178_v59 = vunpack.c.h.bf16 %v22035_v15  ;;  %v22182_v41 = vunpack.c.h.bf16 %v22042_v3 }
 0x356   : > { %v20273_v50 = vsub.f32 %v22172_v1, %v20027_v36  ;;  %v20283_v26 = vsub.f32 %v22175_v44, %v20027_v36  ;;  %v22186_v15 = vunpack.c.h.bf16 %v22038_v7 }
 0x357   : > { %v20293_v1 = vsub.f32 %v22178_v59, %v20027_v36  ;;  %v20303_v44 = vsub.f32 %v22182_v41, %v20027_v36 }
 0x358   : > { %22173 = vst [vmem:[#allocation14_spill] sm:$0xff] %v20273_v50  ;;  %22176 = vst [vmem:[#allocation39_spill] sm:$0xff] %v20283_v26  ;;  %v22180_v50 = vunpack.c.l.bf16 %v22042_v3  ;;  %v22184_v26 = vunpack.c.l.bf16 %v22038_v7  ;;  %v20313_v59 = vsub.f32 %v22186_v15, %v20027_v36  ;;  %v22190_v3 = vunpack.c.h.bf16 %v22047_v47 }
 0x359   : > { %22179 = vst [vmem:[#allocation47_spill] sm:$0xff] %v20293_v1  ;;  %22183 = vst [vmem:[#allocation69_spill] sm:$0xff] %v20303_v44  ;;  %v22188_v1 = vunpack.c.l.bf16 %v22047_v47  ;;  %v22192_v44 = vld [vmem:[#allocation45_spill] sm:$0xff] }
 0x35a   : > { %v20298_v40 = vsub.f32 %v22180_v50, %v20027_v36  ;;  %v20308_v30 = vsub.f32 %v22184_v26, %v20027_v36  ;;  %22187 = vst [vmem:[#allocation10_spill] sm:$0xff] %v20313_v59  ;;  %v20323_v41 = vsub.f32 %v22190_v3, %v20027_v36  ;;  %v22195_v7 = vunpack.c.h.bf16 %v22192_v44  ;;  %v22197_v59 = vld [vmem:[#allocation65_spill] sm:$0xff] }
 0x35b   : > { %v20318_v50 = vsub.f32 %v22188_v1, %v20027_v36  ;;  %v22200_v47 = vunpack.c.h.bf16 %v22197_v59 }
 0x35c   : > { %22181 = vst [vmem:[#allocation16_spill] sm:$0xff] %v20298_v40  ;;  %22185 = vst [vmem:[#allocation15_spill] sm:$0xff] %v20308_v30  ;;  %v22193_v40 = vunpack.c.l.bf16 %v22192_v44  ;;  %v20333_v15 = vsub.f32 %v22195_v7, %v20027_v36  ;;  %v22198_v30 = vunpack.c.l.bf16 %v22197_v59 }
 0x35d   : > { %22189 = vst [vmem:[#allocation71_spill] sm:$0xff] %v20318_v50  ;;  %22191 = vst [vmem:[#allocation55_spill] sm:$0xff] %v20323_v41  ;;  %v20343_v3 = vsub.f32 %v22200_v47, %v20027_v36  ;;  %v22202_v41 = vld [vmem:[#allocation50_spill] sm:$0xff] }
 0x35e   : > { %v20328_v26 = vsub.f32 %v22193_v40, %v20027_v36  ;;  %22196 = vst [vmem:[#allocation19_spill] sm:$0xff] %v20333_v15  ;;  %v20338_v1 = vsub.f32 %v22198_v30, %v20027_v36  ;;  %v22203_v50 = vunpack.c.l.bf16 %v22202_v41  ;;  %v22205_v44 = vunpack.c.h.bf16 %v22202_v41  ;;  %v22207_v15 = vld [vmem:[#allocation66_spill] sm:$0xff] }
 0x35f   : > { %22201 = vst [vmem:[#allocation68_spill] sm:$0xff] %v20343_v3  ;;  %v22210_v59 = vunpack.c.h.bf16 %v22207_v15  ;;  %v22212_v3 = vld [vmem:[#allocation4_spill] sm:$0xff] }
 0x360   : > { %22194 = vst [vmem:[#allocation73_spill] sm:$0xff] %v20328_v26  ;;  %22199 = vst [vmem:[#allocation23_spill] sm:$0xff] %v20338_v1  ;;  %v20348_v40 = vsub.f32 %v22203_v50, %v20027_v36  ;;  %v20353_v7 = vsub.f32 %v22205_v44, %v20027_v36  ;;  %v22208_v26 = vunpack.c.l.bf16 %v22207_v15  ;;  %v22213_v1 = vunpack.c.l.bf16 %v22212_v3 }
 0x361   : > { %v20363_v47 = vsub.f32 %v22210_v59, %v20027_v36  ;;  %v22215_v41 = vunpack.c.h.bf16 %v22212_v3 }
 0x362   : > { %22204 = vst [vmem:[#allocation21_spill] sm:$0xff] %v20348_v40  ;;  %22206 = vst [vmem:[#allocation62_spill] sm:$0xff] %v20353_v7  ;;  %v20358_v30 = vsub.f32 %v22208_v26, %v20027_v36  ;;  %v20368_v50 = vsub.f32 %v22213_v1, %v20027_v36  ;;  %v22216_v7 = vld [vmem:[#allocation6_spill] sm:$0xff] }
 0x363   : > { %22211 = vst [vmem:[#allocation52_spill] sm:$0xff] %v20363_v47  ;;  %v20373_v44 = vsub.f32 %v22215_v41, %v20027_v36  ;;  %v22217_v40 = vunpack.c.l.bf16 %v22216_v7  ;;  %v22219_v15 = vunpack.c.h.bf16 %v22216_v7  ;;  %v22220_v47 = vld [vmem:[#allocation67_spill] sm:$0xff]  ;;  %v22227_v7 = vunpack.c.h.bf16 %v22084_v14 }
 0x364   : > { %22209 = vst [vmem:[#allocation87_spill] sm:$0xff] %v20358_v30  ;;  %22214 = vst [vmem:[#allocation5_spill] sm:$0xff] %v20368_v50  ;;  %v22221_v30 = vunpack.c.l.bf16 %v22220_v47  ;;  %v20390_v50 = vpop.eup %16326  ;;  %v22223_v3 = vunpack.c.h.bf16 %v22220_v47 }
 0x365   : > { %v20378_v26 = vsub.f32 %v22217_v40, %v20027_v36  ;;  %v20383_v59 = vsub.f32 %v22219_v15, %v20027_v36  ;;  %v22225_v40 = vunpack.c.l.bf16 %v22084_v14  ;;  %v20405_v15 = vsub.f32 %v22227_v7, %v20027_v36 }
 0x366   : > { %v20388_v1 = vsub.f32 %v22221_v30, %v20027_v36  ;;  %v20395_v41 = vsub.f32 %v22223_v3, %v20027_v36  ;;  %v22229_v30 = vunpack.c.l.bf16 %v22081_v16  ;;  %v20414_v47 = vmul.f32 %v20390_v50, %v20038_v46 }
 0x367   : > { %22218 = vst [vmem:[#allocation88_spill] sm:$0xff] %v20378_v26  ;;  %v20400_v26 = vsub.f32 %v22225_v40, %v20027_v36  ;;  %22228 = vst [vmem:[#allocation89_spill] sm:$0xff] %v20405_v15  ;;  %v20418_v3 = vmul.f32 %v20390_v50, %v20043_v29  ;;  %v20422_v40 = vmul.f32 %v20390_v50, %v20048_v49 }
 0x368   : > { %22222 = vst [vmem:[#allocation27_spill] sm:$0xff] %v20388_v1  ;;  %22224 = vst [vmem:[#allocation90_spill] sm:$0xff] %v20395_v41  ;;  %v20410_v1 = vsub.f32 %v22229_v30, %v20027_v36  ;;  %v20426_v14 = vmul.f32 %v20390_v50, %v20053_v63  ;;  %v20430_v7 = vmul.f32 %v20390_v50, %v20058_v38  ;;  %v10940_v30 = vmax.f32 %v20414_v47, 0.0 }
 0x369   : > { %22226 = vst [vmem:[#allocation54_spill] sm:$0xff] %v20400_v26  ;;  %v20434_v46 = vmul.f32 %v20390_v50, %v20063_v17  ;;  %v20438_v29 = vmul.f32 %v20390_v50, %v20068_v37  ;;  %v20442_v49 = vmul.f32 %v20390_v50, %v20073_v5  ;;  %v20446_v63 = vmul.f32 %v20390_v50, %v20078_v48 }
 0x36a   : > { %22230 = vst [vmem:[#allocation91_spill] sm:$0xff] %v20410_v1  ;;  %v20450_v38 = vmul.f32 %v20390_v50, %v20083_v33  ;;  %v20454_v17 = vmul.f32 %v20390_v50, %v20088_v11  ;;  %v20458_v37 = vmul.f32 %v20390_v50, %v20093_v51  ;;  %v20462_v5 = vmul.f32 %v20390_v50, %v20098_v61 }
 0x36b   : > { %v20466_v48 = vmul.f32 %v20390_v50, %v20103_v54  ;;  %v20470_v33 = vmul.f32 %v20390_v50, %v20108_v6  ;;  %v20474_v11 = vmul.f32 %v20390_v50, %v20113_v58  ;;  %v20478_v51 = vmul.f32 %v20390_v50, %v20118_v53 }
 0x36c   : > { %v20482_v61 = vmul.f32 %v20390_v50, %v20123_v0  ;;  %v20486_v54 = vmul.f32 %v20390_v50, %v20128_v18  ;;  %v20490_v6 = vmul.f32 %v20390_v50, %v20133_v34  ;;  %v20494_v58 = vmul.f32 %v20390_v50, %v20138_v42 }
 0x36d   : > { %v20498_v53 = vmul.f32 %v20390_v50, %v20143_v32  ;;  %v20502_v0 = vmul.f32 %v20390_v50, %v20148_v10  ;;  %v20506_v18 = vmul.f32 %v20390_v50, %v20153_v4  ;;  %v20510_v34 = vmul.f32 %v20390_v50, %v20158_v20 }
 0x36e   : > { %v20514_v42 = vmul.f32 %v20390_v50, %v20163_v31  ;;  %v20518_v32 = vmul.f32 %v20390_v50, %v20168_v57  ;;  %v20522_v10 = vmul.f32 %v20390_v50, %v20173_v56  ;;  %v20526_v4 = vmul.f32 %v20390_v50, %v20178_v9 }
 0x36f   : > { %v20530_v20 = vmul.f32 %v20390_v50, %v20183_v22  ;;  %v20534_v31 = vmul.f32 %v20390_v50, %v20188_v2  ;;  %v20538_v57 = vmul.f32 %v20390_v50, %v20193_v60  ;;  %v20542_v56 = vmul.f32 %v20390_v50, %v20198_v25 }
 0x370   : > { %v20546_v9 = vmul.f32 %v20390_v50, %v20203_v39  ;;  %v20550_v22 = vmul.f32 %v20390_v50, %v20208_v12  ;;  %v20554_v2 = vmul.f32 %v20390_v50, %v20213_v45  ;;  %v10941_v60 = vmax.f32 %v20418_v3, 0.0 }
 0x371   : > { %v10942_v25 = vmax.f32 %v20422_v40, 0.0  ;;  %v10943_v1 = vmax.f32 %v20426_v14, 0.0  ;;  %v10944_v39 = vmax.f32 %v20430_v7, 0.0  ;;  %v10945_v15 = vmax.f32 %v20434_v46, 0.0 }
 0x372   : > { %v10946_v12 = vmax.f32 %v20438_v29, 0.0  ;;  %v10947_v26 = vmax.f32 %v20442_v49, 0.0  ;;  %v10948_v45 = vmax.f32 %v20446_v63, 0.0  ;;  %v10949_v16 = vmax.f32 %v20450_v38, 0.0 }
 0x373   : > { %v10950_v47 = vmax.f32 %v20454_v17, 0.0  ;;  %v10951_v3 = vmax.f32 %v20458_v37, 0.0  ;;  %v10952_v40 = vmax.f32 %v20462_v5, 0.0  ;;  %v10953_v14 = vmax.f32 %v20466_v48, 0.0 }
 0x374   : > { %v10954_v7 = vmax.f32 %v20470_v33, 0.0  ;;  %v10955_v46 = vmax.f32 %v20474_v11, 0.0  ;;  %v10956_v29 = vmax.f32 %v20478_v51, 0.0  ;;  %v10957_v49 = vmax.f32 %v20482_v61, 0.0 }
 0x375   : > { %v10958_v63 = vmax.f32 %v20486_v54, 0.0  ;;  %v10959_v38 = vmax.f32 %v20490_v6, 0.0  ;;  %v10960_v17 = vmax.f32 %v20494_v58, 0.0  ;;  %v10961_v37 = vmax.f32 %v20498_v53, 0.0 }
 0x376   : > { %v10962_v5 = vmax.f32 %v20502_v0, 0.0  ;;  %v10963_v48 = vmax.f32 %v20506_v18, 0.0  ;;  %v10964_v33 = vmax.f32 %v20510_v34, 0.0  ;;  %v10965_v11 = vmax.f32 %v20514_v42, 0.0 }
 0x377   : > { %v10966_v51 = vmax.f32 %v20518_v32, 0.0  ;;  %v10967_v61 = vmax.f32 %v20522_v10, 0.0  ;;  %v10968_v54 = vmax.f32 %v20526_v4, 0.0  ;;  %v10969_v6 = vmax.f32 %v20530_v20, 0.0 }
 0x378   : > { %v10970_v58 = vmax.f32 %v20534_v31, 0.0  ;;  %v10971_v53 = vmax.f32 %v20538_v57, 0.0  ;;  %v10972_v0 = vmax.f32 %v20542_v56, 0.0  ;;  %v10973_v18 = vmax.f32 %v20546_v9, 0.0 }
 0x379   : > { %v10974_v34 = vmax.f32 %v20550_v22, 0.0  ;;  %v10975_v42 = vmax.f32 %v20554_v2, 0.0  ;;  %v14280_v32 = vpack.c.bf16 %v10941_v60, %v10940_v30  ;;  %v14285_v10 = vpack.c.bf16 %v10943_v1, %v10942_v25 }
 0x37a   : > { %v14290_v4 = vpack.c.bf16 %v10945_v15, %v10944_v39  ;;  %v14295_v20 = vpack.c.bf16 %v10947_v26, %v10946_v12  ;;  %v14300_v31 = vpack.c.bf16 %v10949_v16, %v10948_v45  ;;  %v14305_v57 = vpack.c.bf16 %v10951_v3, %v10950_v47  ;;  %v22231_v45 = vld [vmem:[#allocation14_spill] sm:$0xff]  ;;  %v22232_v47 = vld [vmem:[#allocation39_spill] sm:$0xff] }
 0x37b   : > { %v14310_v36 = vpack.c.bf16 %v10953_v14, %v10952_v40  ;;  %v14315_v41 = vpack.c.bf16 %v10955_v46, %v10954_v7  ;;  %14281 = vst [vmem:[%s20592_s10] sm:$0xff] %v14280_v32   ;;  %14941 = vst [vmem:[%s20592_s10 + $0x8] sm:$0xff] %v14285_v10   ;;  %v14320_v56 = vpack.c.bf16 %v10957_v49, %v10956_v29  ;;  %v22233_v3 = vld [vmem:[#allocation47_spill] sm:$0xff]  ;;  %v22234_v40 = vld [vmem:[#allocation16_spill] sm:$0xff] }
 0x37c   : > { %14942 = vst [vmem:[%s20592_s10 + $0x10] sm:$0xff] %v14290_v4   ;;  %14943 = vst [vmem:[%s20592_s10 + $0x18] sm:$0xff] %v14295_v20   ;;  %v14325_v9 = vpack.c.bf16 %v10959_v38, %v10958_v63  ;;  %v14330_v1 = vpack.c.bf16 %v10961_v37, %v10960_v17  ;;  %v14335_v22 = vpack.c.bf16 %v10963_v48, %v10962_v5  ;;  %v22235_v7 = vld [vmem:[#allocation69_spill] sm:$0xff]  ;;  %v22236_v46 = vld [vmem:[#allocation15_spill] sm:$0xff] }
 0x37d   : > { %14944 = vst [vmem:[%s20592_s10 + $0x20] sm:$0xff] %v14300_v31   ;;  %14945 = vst [vmem:[%s20592_s10 + $0x28] sm:$0xff] %v14305_v57   ;;  %v14340_v16 = vpack.c.bf16 %v10965_v11, %v10964_v33  ;;  %v14345_v26 = vpack.c.bf16 %v10967_v61, %v10966_v51  ;;  %v14350_v15 = vpack.c.bf16 %v10969_v6, %v10968_v54  ;;  %v22237_v49 = vld [vmem:[#allocation10_spill] sm:$0xff]  ;;  %v22238_v63 = vld [vmem:[#allocation71_spill] sm:$0xff] }
 0x37e   : > { %14946 = vst [vmem:[%s20592_s10 + $0x30] sm:$0xff] %v14310_v36   ;;  %14947 = vst [vmem:[%s20592_s10 + $0x38] sm:$0xff] %v14315_v41   ;;  %v14355_v2 = vpack.c.bf16 %v10971_v53, %v10970_v58  ;;  %v14360_v30 = vpack.c.bf16 %v10973_v18, %v10972_v0  ;;  %v14365_v60 = vpack.c.bf16 %v10975_v42, %v10974_v34  ;;  %v22239_v17 = vld [vmem:[#allocation55_spill] sm:$0xff]  ;;  %v22240_v5 = vld [vmem:[#allocation73_spill] sm:$0xff] }
 0x37f   : > { %14948 = vst [vmem:[%s20592_s10 + $0x40] sm:$0xff] %v14320_v56   ;;  %14949 = vst [vmem:[%s20592_s10 + $0x48] sm:$0xff] %v14325_v9   ;;  %v20612_v25 = vmul.f32 %v20390_v50, %v20218_v52  ;;  %v20616_v36 = vmul.f32 %v20390_v50, %v20223_v28  ;;  %v20624_v41 = vmul.f32 %v20390_v50, %v20228_v23  ;;  %v22241_v33 = vld [vmem:[#allocation19_spill] sm:$0xff]  ;;  %v22243_v54 = vld [vmem:[#allocation68_spill] sm:$0xff] }
 0x380   : > { %14950 = vst [vmem:[%s20592_s10 + $0x50] sm:$0xff] %v14330_v1   ;;  %14951 = vst [vmem:[%s20592_s10 + $0x58] sm:$0xff] %v14335_v22   ;;  %v20628_v39 = vmul.f32 %v20390_v50, %v20233_v8  ;;  %v20632_v52 = vmul.f32 %v20390_v50, %v20238_v43  ;;  %v20636_v28 = vmul.f32 %v20390_v50, %v20243_v21  ;;  %v22242_v51 = vld [vmem:[#allocation23_spill] sm:$0xff]  ;;  %v22244_v58 = vld [vmem:[#allocation21_spill] sm:$0xff] }
 0x381   : > { %14952 = vst [vmem:[%s20592_s10 + $0x60] sm:$0xff] %v14340_v16   ;;  %14953 = vst [vmem:[%s20592_s10 + $0x68] sm:$0xff] %v14345_v26   ;;  %v20642_v12 = vmul.f32 %v20390_v50, %v20248_v62  ;;  %v20646_v23 = vmul.f32 %v20390_v50, %v20253_v19  ;;  %v20650_v8 = vmul.f32 %v20390_v50, %v20258_v35  ;;  %v22245_v0 = vld [vmem:[#allocation62_spill] sm:$0xff]  ;;  %v22246_v34 = vld [vmem:[#allocation87_spill] sm:$0xff] }
 0x382   : > { %14954 = vst [vmem:[%s20592_s10 + $0x70] sm:$0xff] %v14350_v15   ;;  %14955 = vst [vmem:[%s20592_s10 + $0x78] sm:$0xff] %v14355_v2   ;;  %v20654_v43 = vmul.f32 %v20390_v50, %v20263_v24  ;;  %v20658_v21 = vmul.f32 %v20390_v50, %v20268_v55  ;;  %v20662_v62 = vmul.f32 %v20390_v50, %v22231_v45  ;;  %v22247_v32 = vld [vmem:[#allocation52_spill] sm:$0xff]  ;;  %v22248_v4 = vld [vmem:[#allocation5_spill] sm:$0xff]  ;;  %v11300_v15 = vmax.f32 %v20612_v25, 0.0 }
 0x383   : > { %14956 = vst [vmem:[%s20592_s10 + $0x80] sm:$0xff] %v14360_v30   ;;  %14957 = vst [vmem:[%s20592_s10 + $0x88] sm:$0xff] %v14365_v60   ;;  %v20666_v19 = vmul.f32 %v20390_v50, %v20278_v13  ;;  %v20670_v35 = vmul.f32 %v20390_v50, %v22232_v47  ;;  %v20674_v24 = vmul.f32 %v20390_v50, %v20288_v27  ;;  %v22249_v57 = vld [vmem:[#allocation88_spill] sm:$0xff]  ;;  %v22250_v1 = vld [vmem:[#allocation27_spill] sm:$0xff]  ;;  %v11302_v2 = vmax.f32 %v20624_v41, 0.0 }
 0x384   : > { %v20678_v55 = vmul.f32 %v20390_v50, %v22233_v3  ;;  %v20682_v14 = vmul.f32 %v20390_v50, %v22234_v40  ;;  %v20686_v13 = vmul.f32 %v20390_v50, %v22235_v7  ;;  %v20690_v29 = vmul.f32 %v20390_v50, %v22236_v46  ;;  %v22251_v16 = vld [vmem:[#allocation90_spill] sm:$0xff] }
 0x385   : > { %v20694_v27 = vmul.f32 %v20390_v50, %v22237_v49  ;;  %v20698_v38 = vmul.f32 %v20390_v50, %v22238_v63  ;;  %v20702_v37 = vmul.f32 %v20390_v50, %v22239_v17  ;;  %v20706_v48 = vmul.f32 %v20390_v50, %v22240_v5 }
 0x386   : > { %v20710_v11 = vmul.f32 %v20390_v50, %v22241_v33  ;;  %v20714_v61 = vmul.f32 %v20390_v50, %v22242_v51  ;;  %v20718_v6 = vmul.f32 %v20390_v50, %v22243_v54  ;;  %v20722_v53 = vmul.f32 %v20390_v50, %v22244_v58 }
 0x387   : > { %v20726_v18 = vmul.f32 %v20390_v50, %v22245_v0  ;;  %v20730_v42 = vmul.f32 %v20390_v50, %v22246_v34  ;;  %v20734_v10 = vmul.f32 %v20390_v50, %v22247_v32  ;;  %v20738_v20 = vmul.f32 %v20390_v50, %v22248_v4 }
 0x388   : > { %v20742_v31 = vmul.f32 %v20390_v50, %v20373_v44  ;;  %v20746_v56 = vmul.f32 %v20390_v50, %v22249_v57  ;;  %v20750_v9 = vmul.f32 %v20390_v50, %v20383_v59  ;;  %v20754_v22 = vmul.f32 %v20390_v50, %v22250_v1 }
 0x389   : > { %v20758_v26 = vmul.f32 %v20390_v50, %v22251_v16  ;;  %v11301_v44 = vmax.f32 %v20616_v36, 0.0  ;;  %v11303_v30 = vmax.f32 %v20628_v39, 0.0  ;;  %v11304_v60 = vmax.f32 %v20632_v52, 0.0 }
 0x38a   : > { %v11305_v59 = vmax.f32 %v20636_v28, 0.0  ;;  %v11306_v45 = vmax.f32 %v20642_v12, 0.0  ;;  %v11307_v47 = vmax.f32 %v20646_v23, 0.0  ;;  %v11308_v3 = vmax.f32 %v20650_v8, 0.0 }
 0x38b   : > { %v11309_v40 = vmax.f32 %v20654_v43, 0.0  ;;  %v11310_v25 = vmax.f32 %v20658_v21, 0.0  ;;  %v11311_v36 = vmax.f32 %v20662_v62, 0.0  ;;  %v11312_v41 = vmax.f32 %v20666_v19, 0.0 }
 0x38c   : > { %v11313_v39 = vmax.f32 %v20670_v35, 0.0  ;;  %v11314_v52 = vmax.f32 %v20674_v24, 0.0  ;;  %v11315_v28 = vmax.f32 %v20678_v55, 0.0  ;;  %v11316_v12 = vmax.f32 %v20682_v14, 0.0 }
 0x38d   : > { %v11317_v23 = vmax.f32 %v20686_v13, 0.0  ;;  %v11318_v8 = vmax.f32 %v20690_v29, 0.0  ;;  %v11319_v43 = vmax.f32 %v20694_v27, 0.0  ;;  %v11320_v21 = vmax.f32 %v20698_v38, 0.0 }
 0x38e   : > { %v11321_v62 = vmax.f32 %v20702_v37, 0.0  ;;  %v11322_v19 = vmax.f32 %v20706_v48, 0.0  ;;  %v11323_v35 = vmax.f32 %v20710_v11, 0.0  ;;  %v11324_v24 = vmax.f32 %v20714_v61, 0.0 }
 0x38f   : > { %v11325_v55 = vmax.f32 %v20718_v6, 0.0  ;;  %v11326_v14 = vmax.f32 %v20722_v53, 0.0  ;;  %v11327_v7 = vmax.f32 %v20726_v18, 0.0  ;;  %v11328_v13 = vmax.f32 %v20730_v42, 0.0 }
 0x390   : > { %v11329_v46 = vmax.f32 %v20734_v10, 0.0  ;;  %v11330_v29 = vmax.f32 %v20738_v20, 0.0  ;;  %v11331_v49 = vmax.f32 %v20742_v31, 0.0  ;;  %v11332_v27 = vmax.f32 %v20746_v56, 0.0  ;;  %v22252_v20 = vld [vmem:[#allocation44_spill] sm:$0xff]  ;;  %v22253_v31 = vld [vmem:[#allocation74_spill] sm:$0xff] }
 0x391   : > { %v11333_v63 = vmax.f32 %v20750_v9, 0.0  ;;  %v11334_v38 = vmax.f32 %v20754_v22, 0.0  ;;  %v11335_v17 = vmax.f32 %v20758_v26, 0.0  ;;  %v14442_v37 = vpack.c.bf16 %v11301_v44, %v11300_v15  ;;  %v22255_v9 = vld [vmem:[#allocation77_spill] sm:$0xff]  ;;  %v22258_v15 = vld [vmem:[#allocation76_spill] sm:$0xff] }
 0x392   : > { %v14447_v5 = vpack.c.bf16 %v11303_v30, %v11302_v2  ;;  %v14452_v48 = vpack.c.bf16 %v11305_v59, %v11304_v60  ;;  %v14457_v33 = vpack.c.bf16 %v11307_v47, %v11306_v45  ;;  %v14462_v11 = vpack.c.bf16 %v11309_v40, %v11308_v3  ;;  %v22261_v59 = vld [vmem:[#allocation79_spill] sm:$0xff] }
 0x393   : > { %v14467_v51 = vpack.c.bf16 %v11311_v36, %v11310_v25  ;;  %14976 = vst [vmem:[%s20592_s10 + $0x90] sm:$0xff] %v14442_v37   ;;  %v14472_v61 = vpack.c.bf16 %v11313_v39, %v11312_v41  ;;  %v14477_v54 = vpack.c.bf16 %v11315_v28, %v11314_v52  ;;  %v14482_v6 = vpack.c.bf16 %v11317_v23, %v11316_v12  ;;  %v22264_v25 = vld [vmem:[#allocation78_spill] sm:$0xff]  ;;  %v22267_v28 = vld [vmem:[#allocation84_spill] sm:$0xff] }
 0x394   : > { %14977 = vst [vmem:[%s20592_s10 + $0x98] sm:$0xff] %v14447_v5   ;;  %v14487_v58 = vpack.c.bf16 %v11319_v43, %v11318_v8  ;;  %14978 = vst [vmem:[%s20592_s10 + $0xa0] sm:$0xff] %v14452_v48   ;;  %v14492_v53 = vpack.c.bf16 %v11321_v62, %v11320_v21  ;;  %v14497_v0 = vpack.c.bf16 %v11323_v35, %v11322_v19  ;;  %v22254_v57 = vunpack.c.h.bf16 %v22253_v31  ;;  %v22270_v21 = vld [vmem:[#allocation80_spill] sm:$0xff] }
 0x395   : > { %14979 = vst [vmem:[%s20592_s10 + $0xa8] sm:$0xff] %v14457_v33   ;;  %14980 = vst [vmem:[%s20592_s10 + $0xb0] sm:$0xff] %v14462_v11   ;;  %v14502_v18 = vpack.c.bf16 %v11325_v55, %v11324_v24  ;;  %v14507_v34 = vpack.c.bf16 %v11327_v7, %v11326_v14  ;;  %v14512_v42 = vpack.c.bf16 %v11329_v46, %v11328_v13  ;;  %v22256_v1 = vunpack.c.l.bf16 %v22255_v9  ;;  %v22273_v55 = vld [vmem:[#allocation82_spill] sm:$0xff]  ;;  %v22282_v11 = vld [vmem:[#allocation83_spill] sm:$0xff] }
 0x396   : > { %14981 = vst [vmem:[%s20592_s10 + $0xb8] sm:$0xff] %v14467_v51   ;;  %14982 = vst [vmem:[%s20592_s10 + $0xc0] sm:$0xff] %v14472_v61   ;;  %v14517_v32 = vpack.c.bf16 %v11331_v49, %v11330_v29  ;;  %v14522_v10 = vpack.c.bf16 %v11333_v63, %v11332_v27  ;;  %v14527_v4 = vpack.c.bf16 %v11335_v17, %v11334_v38  ;;  %v22257_v16 = vunpack.c.h.bf16 %v22255_v9  ;;  %v22276_v29 = vld [vmem:[#allocation81_spill] sm:$0xff]  ;;  %v22279_v17 = vld [vmem:[#allocation72_spill] sm:$0xff] }
 0x397   : > { %14983 = vst [vmem:[%s20592_s10 + $0xc8] sm:$0xff] %v14477_v54   ;;  %14984 = vst [vmem:[%s20592_s10 + $0xd0] sm:$0xff] %v14482_v6   ;;  %v11591_v56 = vsub.f32 %v22254_v57, %v22252_v20  ;;  %v11592_v22 = vsub.f32 %v22256_v1, %v22252_v20  ;;  %v22259_v44 = vunpack.c.l.bf16 %v22258_v15  ;;  %v22260_v30 = vunpack.c.h.bf16 %v22258_v15  ;;  %v22291_v57 = vld [vmem:[#allocation41_spill] sm:$0xff] }
 0x398   : > { %14985 = vst [vmem:[%s20592_s10 + $0xd8] sm:$0xff] %v14487_v58   ;;  %14986 = vst [vmem:[%s20592_s10 + $0xe0] sm:$0xff] %v14492_v53   ;;  %v11593_v26 = vsub.f32 %v22257_v16, %v22252_v20  ;;  %v22262_v45 = vunpack.c.l.bf16 %v22261_v59  ;;  %v22263_v3 = vunpack.c.h.bf16 %v22261_v59  ;;  %v22265_v36 = vunpack.c.l.bf16 %v22264_v25  ;;  %v22285_v58 = vld [vmem:[#allocation28_spill] sm:$0xff] }
 0x399   : > { %14987 = vst [vmem:[%s20592_s10 + $0xe8] sm:$0xff] %v14497_v0   ;;  %14988 = vst [vmem:[%s20592_s10 + $0xf0] sm:$0xff] %v14502_v18   ;;  %v11594_v2 = vsub.f32 %v22259_v44, %v22252_v20  ;;  %v11595_v60 = vsub.f32 %v22260_v30, %v22252_v20  ;;  %v22266_v39 = vunpack.c.h.bf16 %v22264_v25  ;;  %v22268_v12 = vunpack.c.l.bf16 %v22267_v28  ;;  %v22294_v44 = vld [vmem:[#allocation33_spill] sm:$0xff]  ;;  %v22297_v25 = vld [vmem:[#allocation3_spill] sm:$0xff] }
 0x39a   : > { %14989 = vst [vmem:[%s20592_s10 + $0xf8] sm:$0xff] %v14507_v34   ;;  %14990 = vst [vmem:[%s20592_s10 + $0x100] sm:$0xff] %v14512_v42   ;;  %v11596_v47 = vsub.f32 %v22262_v45, %v22252_v20  ;;  %v11597_v40 = vsub.f32 %v22263_v3, %v22252_v20  ;;  %v11598_v41 = vsub.f32 %v22265_v36, %v22252_v20  ;;  %v22269_v8 = vunpack.c.h.bf16 %v22267_v28  ;;  %v22288_v42 = vld [vmem:[#allocation70_spill] sm:$0xff] }
 0x39b   : > { %14991 = vst [vmem:[%s20592_s10 + $0x108] sm:$0xff] %v14517_v32   ;;  %14992 = vst [vmem:[%s20592_s10 + $0x110] sm:$0xff] %v14522_v10   ;;  %v11599_v52 = vsub.f32 %v22266_v39, %v22252_v20  ;;  %v11600_v23 = vsub.f32 %v22268_v12, %v22252_v20  ;;  %v22271_v62 = vunpack.c.l.bf16 %v22270_v21  ;;  %v22272_v35 = vunpack.c.h.bf16 %v22270_v21 }
 0x39c   : > { %14993 = vst [vmem:[%s20592_s10 + $0x118] sm:$0xff] %v14527_v4   ;;  %v11601_v43 = vsub.f32 %v22269_v8, %v22252_v20  ;;  %v22274_v14 = vunpack.c.l.bf16 %v22273_v55  ;;  %v22275_v13 = vunpack.c.h.bf16 %v22273_v55  ;;  %v22277_v49 = vunpack.c.l.bf16 %v22276_v29  ;;  %v22300_v8 = vld [vmem:[#allocation48_spill] sm:$0xff] }
 0x39d   : > { %v11602_v19 = vsub.f32 %v22271_v62, %v22252_v20  ;;  %v11603_v24 = vsub.f32 %v22272_v35, %v22252_v20  ;;  %v22278_v63 = vunpack.c.h.bf16 %v22276_v29  ;;  %v22280_v37 = vunpack.c.l.bf16 %v22279_v17  ;;  %v22304_v29 = vld [vmem:[#allocation89_spill] sm:$0xff] }
 0x39e   : > { %v11604_v7 = vsub.f32 %v22274_v14, %v22252_v20  ;;  %v11605_v46 = vsub.f32 %v22275_v13, %v22252_v20  ;;  %v11606_v27 = vsub.f32 %v22277_v49, %v22252_v20  ;;  %v22281_v48 = vunpack.c.h.bf16 %v22279_v17  ;;  %v22303_v14 = vld [vmem:[#allocation54_spill] sm:$0xff] }
 0x39f   : > { %v11607_v38 = vsub.f32 %v22278_v63, %v22252_v20  ;;  %v11608_v5 = vsub.f32 %v22280_v37, %v22252_v20  ;;  %v22283_v51 = vunpack.c.l.bf16 %v22282_v11  ;;  %v22284_v54 = vunpack.c.h.bf16 %v22282_v11  ;;  %v22305_v63 = vld [vmem:[#allocation91_spill] sm:$0xff] }
 0x3a0   : > { %v11609_v33 = vsub.f32 %v22281_v48, %v22252_v20  ;;  %v22286_v53 = vunpack.c.l.bf16 %v22285_v58  ;;  %v22287_v18 = vunpack.c.h.bf16 %v22285_v58  ;;  %v22289_v32 = vunpack.c.l.bf16 %v22288_v42 }
 0x3a1   : > { %v11610_v61 = vsub.f32 %v22283_v51, %v22252_v20  ;;  %v11611_v6 = vsub.f32 %v22284_v54, %v22252_v20  ;;  %v22290_v4 = vunpack.c.h.bf16 %v22288_v42  ;;  %v22292_v9 = vunpack.c.l.bf16 %v22291_v57 }
 0x3a2   : > { %v11612_v0 = vsub.f32 %v22286_v53, %v22252_v20  ;;  %v11613_v34 = vsub.f32 %v22287_v18, %v22252_v20  ;;  %v11614_v10 = vsub.f32 %v22289_v32, %v22252_v20  ;;  %v22293_v16 = vunpack.c.h.bf16 %v22291_v57 }
 0x3a3   : > { %v11615_v31 = vsub.f32 %v22290_v4, %v22252_v20  ;;  %v11616_v1 = vsub.f32 %v22292_v9, %v22252_v20  ;;  %v22295_v30 = vunpack.c.l.bf16 %v22294_v44  ;;  %v22296_v45 = vunpack.c.h.bf16 %v22294_v44 }
 0x3a4   : > { %v11617_v15 = vsub.f32 %v22293_v16, %v22252_v20  ;;  %v22298_v36 = vunpack.c.l.bf16 %v22297_v25  ;;  %v22299_v28 = vunpack.c.h.bf16 %v22297_v25  ;;  %v22301_v21 = vunpack.c.l.bf16 %v22300_v8 }
 0x3a5   : > { %v11618_v59 = vsub.f32 %v22295_v30, %v22252_v20  ;;  %v11619_v3 = vsub.f32 %v22296_v45, %v22252_v20  ;;  %v22302_v35 = vunpack.c.h.bf16 %v22300_v8  ;;  %v20915_v13 = vmul.f32 %v20390_v50, %v22303_v14 }
 0x3a6   : > { %v11620_v39 = vsub.f32 %v22298_v36, %v22252_v20  ;;  %v11621_v12 = vsub.f32 %v22299_v28, %v22252_v20  ;;  %v11622_v62 = vsub.f32 %v22301_v21, %v22252_v20  ;;  %v20919_v49 = vmul.f32 %v20390_v50, %v22304_v29 }
 0x3a7   : > { %v11623_v55 = vsub.f32 %v22302_v35, %v22252_v20  ;;  %v20923_v17 = vmul.f32 %v20390_v50, %v22305_v63  ;;  %v20926_v37 = vmul.f32 %v20390_v50, %v11591_v56  ;;  %v20929_v48 = vmul.f32 %v20390_v50, %v11592_v22 }
 0x3a8   : > { %v20932_v11 = vmul.f32 %v20390_v50, %v11593_v26  ;;  %v20935_v51 = vmul.f32 %v20390_v50, %v11594_v2  ;;  %v20938_v54 = vmul.f32 %v20390_v50, %v11595_v60  ;;  %v20941_v58 = vmul.f32 %v20390_v50, %v11596_v47 }
 0x3a9   : > { %v20944_v53 = vmul.f32 %v20390_v50, %v11597_v40  ;;  %v20947_v56 = vmul.f32 %v20390_v50, %v11598_v41  ;;  %v20950_v22 = vmul.f32 %v20390_v50, %v11599_v52  ;;  %v20953_v26 = vmul.f32 %v20390_v50, %v11600_v23 }
 0x3aa   : > { %v20956_v2 = vmul.f32 %v20390_v50, %v11601_v43  ;;  %v20959_v60 = vmul.f32 %v20390_v50, %v11602_v19  ;;  %v20962_v47 = vmul.f32 %v20390_v50, %v11603_v24  ;;  %v20965_v40 = vmul.f32 %v20390_v50, %v11604_v7 }
 0x3ab   : > { %v20968_v41 = vmul.f32 %v20390_v50, %v11605_v46  ;;  %v20971_v52 = vmul.f32 %v20390_v50, %v11606_v27  ;;  %v20974_v23 = vmul.f32 %v20390_v50, %v11607_v38  ;;  %v20977_v43 = vmul.f32 %v20390_v50, %v11608_v5 }
 0x3ac   : > { %v20980_v19 = vmul.f32 %v20390_v50, %v11609_v33  ;;  %v20983_v24 = vmul.f32 %v20390_v50, %v11610_v61  ;;  %v20986_v7 = vmul.f32 %v20390_v50, %v11611_v6  ;;  %v20989_v46 = vmul.f32 %v20390_v50, %v11612_v0 }
 0x3ad   : > { %v20992_v27 = vmul.f32 %v20390_v50, %v11613_v34  ;;  %v20995_v38 = vmul.f32 %v20390_v50, %v11614_v10  ;;  %v20998_v5 = vmul.f32 %v20390_v50, %v11615_v31  ;;  %v21001_v33 = vmul.f32 %v20390_v50, %v11616_v1 }
 0x3ae   : > { %v21004_v61 = vmul.f32 %v20390_v50, %v11617_v15  ;;  %v21007_v6 = vmul.f32 %v20390_v50, %v11618_v59  ;;  %v21010_v0 = vmul.f32 %v20390_v50, %v11619_v3  ;;  %v21013_v18 = vmul.f32 %v20390_v50, %v11620_v39 }
 0x3af   : > { %v21016_v34 = vmul.f32 %v20390_v50, %v11621_v12  ;;  %v21019_v42 = vmul.f32 %v20390_v50, %v11622_v62  ;;  %v21022_v32 = vmul.f32 %v20390_v50, %v11623_v55  ;;  %v11660_v10 = vmax.f32 %v20915_v13, 0.0 }
 0x3b0   : > { %v11661_v4 = vmax.f32 %v20919_v49, 0.0  ;;  %v11662_v31 = vmax.f32 %v20923_v17, 0.0  ;;  %v11663_v57 = vmax.f32 %v20926_v37, 0.0  ;;  %v11664_v9 = vmax.f32 %v20929_v48, 0.0 }
 0x3b1   : > { %v11665_v1 = vmax.f32 %v20932_v11, 0.0  ;;  %v11666_v16 = vmax.f32 %v20935_v51, 0.0  ;;  %v11667_v15 = vmax.f32 %v20938_v54, 0.0  ;;  %v11668_v44 = vmax.f32 %v20941_v58, 0.0 }
 0x3b2   : > { %v11669_v30 = vmax.f32 %v20944_v53, 0.0  ;;  %v11670_v59 = vmax.f32 %v20947_v56, 0.0  ;;  %v11671_v45 = vmax.f32 %v20950_v22, 0.0  ;;  %v11672_v3 = vmax.f32 %v20953_v26, 0.0 }
 0x3b3   : > { %v11673_v25 = vmax.f32 %v20956_v2, 0.0  ;;  %v11674_v36 = vmax.f32 %v20959_v60, 0.0  ;;  %v11675_v39 = vmax.f32 %v20962_v47, 0.0  ;;  %v11676_v28 = vmax.f32 %v20965_v40, 0.0 }
 0x3b4   : > { %v11677_v12 = vmax.f32 %v20968_v41, 0.0  ;;  %v11678_v8 = vmax.f32 %v20971_v52, 0.0  ;;  %v11679_v21 = vmax.f32 %v20974_v23, 0.0  ;;  %v11680_v62 = vmax.f32 %v20977_v43, 0.0 }
 0x3b5   : > { %v11681_v35 = vmax.f32 %v20980_v19, 0.0  ;;  %v11682_v55 = vmax.f32 %v20983_v24, 0.0  ;;  %v11683_v14 = vmax.f32 %v20986_v7, 0.0  ;;  %v11684_v13 = vmax.f32 %v20989_v46, 0.0 }
 0x3b6   : > { %v11685_v29 = vmax.f32 %v20992_v27, 0.0  ;;  %v11686_v49 = vmax.f32 %v20995_v38, 0.0  ;;  %v11687_v63 = vmax.f32 %v20998_v5, 0.0  ;;  %v11688_v17 = vmax.f32 %v21001_v33, 0.0  ;;  %v22306_v33 = vld [vmem:[#allocation22_spill] sm:$0xff] }
 0x3b7   : > { %v11689_v37 = vmax.f32 %v21004_v61, 0.0  ;;  %v11690_v48 = vmax.f32 %v21007_v6, 0.0  ;;  %v11691_v11 = vmax.f32 %v21010_v0, 0.0  ;;  %v11692_v51 = vmax.f32 %v21013_v18, 0.0 }
 0x3b8   : > { %v11693_v54 = vmax.f32 %v21016_v34, 0.0  ;;  %v11694_v58 = vmax.f32 %v21019_v42, 0.0  ;;  %v11695_v53 = vmax.f32 %v21022_v32, 0.0  ;;  %v14604_v56 = vpack.c.bf16 %v11661_v4, %v11660_v10  ;;  %v22309_v34 = vld [vmem:[#allocation18_spill] sm:$0xff] }
 0x3b9   : > { %v14609_v22 = vpack.c.bf16 %v11663_v57, %v11662_v31  ;;  %v14614_v26 = vpack.c.bf16 %v11665_v1, %v11664_v9  ;;  %v14619_v2 = vpack.c.bf16 %v11667_v15, %v11666_v16  ;;  %v14624_v60 = vpack.c.bf16 %v11669_v30, %v11668_v44  ;;  %v22312_v31 = vld [vmem:[#allocation31_spill] sm:$0xff]  ;;  %v22315_v15 = vld [vmem:[#allocation24_spill] sm:$0xff] }
 0x3ba   : > { %v14629_v47 = vpack.c.bf16 %v11671_v45, %v11670_v59  ;;  %v14634_v40 = vpack.c.bf16 %v11673_v25, %v11672_v3  ;;  %15012 = vst [vmem:[%s20592_s10 + $0x120] sm:$0xff] %v14604_v56   ;;  %v14639_v41 = vpack.c.bf16 %v11675_v39, %v11674_v36  ;;  %v14644_v52 = vpack.c.bf16 %v11677_v12, %v11676_v28  ;;  %v22318_v3 = vld [vmem:[#allocation63_spill] sm:$0xff]  ;;  %v22321_v12 = vld [vmem:[#allocation32_spill] sm:$0xff] }
 0x3bb   : > { %15013 = vst [vmem:[%s20592_s10 + $0x128] sm:$0xff] %v14609_v22   ;;  %15014 = vst [vmem:[%s20592_s10 + $0x130] sm:$0xff] %v14614_v26   ;;  %v14649_v23 = vpack.c.bf16 %v11679_v21, %v11678_v8  ;;  %v14654_v43 = vpack.c.bf16 %v11681_v35, %v11680_v62  ;;  %v14659_v19 = vpack.c.bf16 %v11683_v14, %v11682_v55  ;;  %v22307_v61 = vunpack.c.l.bf16 %v22306_v33  ;;  %v22324_v55 = vld [vmem:[#allocation85_spill] sm:$0xff]  ;;  %v22333_v22 = vld [vmem:[#allocation86_spill] sm:$0xff] }
 0x3bc   : > { %15015 = vst [vmem:[%s20592_s10 + $0x138] sm:$0xff] %v14619_v2   ;;  %15016 = vst [vmem:[%s20592_s10 + $0x140] sm:$0xff] %v14624_v60   ;;  %v14664_v24 = vpack.c.bf16 %v11685_v29, %v11684_v13  ;;  %v14669_v7 = vpack.c.bf16 %v11687_v63, %v11686_v49  ;;  %v14674_v46 = vpack.c.bf16 %v11689_v37, %v11688_v17  ;;  %v22308_v0 = vunpack.c.h.bf16 %v22306_v33  ;;  %v22327_v63 = vld [vmem:[#allocation38_spill] sm:$0xff] }
 0x3bd   : > { %15017 = vst [vmem:[%s20592_s10 + $0x148] sm:$0xff] %v14629_v47   ;;  %15018 = vst [vmem:[%s20592_s10 + $0x150] sm:$0xff] %v14634_v40   ;;  %v14679_v27 = vpack.c.bf16 %v11691_v11, %v11690_v48  ;;  %v14684_v38 = vpack.c.bf16 %v11693_v54, %v11692_v51  ;;  %v14689_v5 = vpack.c.bf16 %v11695_v53, %v11694_v58  ;;  %v22310_v42 = vunpack.c.l.bf16 %v22309_v34  ;;  %v22330_v51 = vld [vmem:[#allocation40_spill] sm:$0xff]  ;;  %v22336_v40 = vld [vmem:[#allocation42_spill] sm:$0xff] }
 0x3be   : > { %15019 = vst [vmem:[%s20592_s10 + $0x158] sm:$0xff] %v14639_v41   ;;  %15020 = vst [vmem:[%s20592_s10 + $0x160] sm:$0xff] %v14644_v52   ;;  %v11948_v6 = vsub.f32 %v22307_v61, %v22252_v20  ;;  %v11949_v18 = vsub.f32 %v22308_v0, %v22252_v20  ;;  %v22311_v10 = vunpack.c.h.bf16 %v22309_v34  ;;  %v22313_v57 = vunpack.c.l.bf16 %v22312_v31  ;;  %v22345_v34 = vld [vmem:[#allocation8_spill] sm:$0xff] }
 0x3bf   : > { %15021 = vst [vmem:[%s20592_s10 + $0x168] sm:$0xff] %v14649_v23   ;;  %15022 = vst [vmem:[%s20592_s10 + $0x170] sm:$0xff] %v14654_v43   ;;  %v11950_v32 = vsub.f32 %v22310_v42, %v22252_v20  ;;  %v22314_v1 = vunpack.c.h.bf16 %v22312_v31  ;;  %v22316_v44 = vunpack.c.l.bf16 %v22315_v15  ;;  %v22317_v59 = vunpack.c.h.bf16 %v22315_v15 }
 0x3c0   : > { %15023 = vst [vmem:[%s20592_s10 + $0x178] sm:$0xff] %v14659_v19   ;;  %15024 = vst [vmem:[%s20592_s10 + $0x180] sm:$0xff] %v14664_v24   ;;  %v11951_v4 = vsub.f32 %v22311_v10, %v22252_v20  ;;  %v11952_v9 = vsub.f32 %v22313_v57, %v22252_v20  ;;  %v22319_v25 = vunpack.c.l.bf16 %v22318_v3  ;;  %v22320_v39 = vunpack.c.h.bf16 %v22318_v3  ;;  %v22339_v19 = vld [vmem:[#allocation30_spill] sm:$0xff] }
 0x3c1   : > { %15025 = vst [vmem:[%s20592_s10 + $0x188] sm:$0xff] %v14669_v7   ;;  %15026 = vst [vmem:[%s20592_s10 + $0x190] sm:$0xff] %v14674_v46   ;;  %v11953_v16 = vsub.f32 %v22314_v1, %v22252_v20  ;;  %v11954_v30 = vsub.f32 %v22316_v44, %v22252_v20  ;;  %v11955_v45 = vsub.f32 %v22317_v59, %v22252_v20  ;;  %v22322_v8 = vunpack.c.l.bf16 %v22321_v12  ;;  %v22348_v1 = vld [vmem:[#allocation43_spill] sm:$0xff] }
 0x3c2   : > { %15027 = vst [vmem:[%s20592_s10 + $0x198] sm:$0xff] %v14679_v27   ;;  %15028 = vst [vmem:[%s20592_s10 + $0x1a0] sm:$0xff] %v14684_v38   ;;  %v11956_v36 = vsub.f32 %v22319_v25, %v22252_v20  ;;  %v11957_v28 = vsub.f32 %v22320_v39, %v22252_v20  ;;  %v22323_v62 = vunpack.c.h.bf16 %v22321_v12  ;;  %v22325_v14 = vunpack.c.l.bf16 %v22324_v55  ;;  %v22342_v38 = vld [vmem:[#allocation36_spill] sm:$0xff] }
 0x3c3   : > { %15029 = vst [vmem:[%s20592_s10 + $0x1a8] sm:$0xff] %v14689_v5   ;;  %v11958_v21 = vsub.f32 %v22322_v8, %v22252_v20  ;;  %v22326_v29 = vunpack.c.h.bf16 %v22324_v55  ;;  %v22328_v17 = vunpack.c.l.bf16 %v22327_v63  ;;  %v22329_v48 = vunpack.c.h.bf16 %v22327_v63  ;;  %v22351_v25 = vld [vmem:[#allocation20_spill] sm:$0xff] }
 0x3c4   : > { %v11959_v35 = vsub.f32 %v22323_v62, %v22252_v20  ;;  %v11960_v13 = vsub.f32 %v22325_v14, %v22252_v20  ;;  %v22331_v54 = vunpack.c.l.bf16 %v22330_v51  ;;  %v22332_v53 = vunpack.c.h.bf16 %v22330_v51  ;;  %v22354_v55 = vld [vmem:[#allocation12_spill] sm:$0xff] }
 0x3c5   : > { %v11961_v49 = vsub.f32 %v22326_v29, %v22252_v20  ;;  %v11962_v37 = vsub.f32 %v22328_v17, %v22252_v20  ;;  %v11963_v11 = vsub.f32 %v22329_v48, %v22252_v20  ;;  %v22334_v26 = vunpack.c.l.bf16 %v22333_v22  ;;  %v22357_v48 = vld [vmem:[#allocation37_spill] sm:$0xff] }
 0x3c6   : > { %v11964_v58 = vsub.f32 %v22331_v54, %v22252_v20  ;;  %v11965_v56 = vsub.f32 %v22332_v53, %v22252_v20  ;;  %v22335_v60 = vunpack.c.h.bf16 %v22333_v22  ;;  %v22337_v41 = vunpack.c.l.bf16 %v22336_v40 }
 0x3c7   : > { %v11966_v2 = vsub.f32 %v22334_v26, %v22252_v20  ;;  %v22338_v23 = vunpack.c.h.bf16 %v22336_v40  ;;  %v22340_v24 = vunpack.c.l.bf16 %v22339_v19  ;;  %v22341_v46 = vunpack.c.h.bf16 %v22339_v19 }
 0x3c8   : > { %v11967_v47 = vsub.f32 %v22335_v60, %v22252_v20  ;;  %v11968_v52 = vsub.f32 %v22337_v41, %v22252_v20  ;;  %v22343_v5 = vunpack.c.l.bf16 %v22342_v38  ;;  %v22344_v61 = vunpack.c.h.bf16 %v22342_v38 }
 0x3c9   : > { %v11969_v43 = vsub.f32 %v22338_v23, %v22252_v20  ;;  %v11970_v7 = vsub.f32 %v22340_v24, %v22252_v20  ;;  %v11971_v27 = vsub.f32 %v22341_v46, %v22252_v20  ;;  %v22346_v42 = vunpack.c.l.bf16 %v22345_v34 }
 0x3ca   : > { %v11972_v33 = vsub.f32 %v22343_v5, %v22252_v20  ;;  %v11973_v0 = vsub.f32 %v22344_v61, %v22252_v20  ;;  %v22347_v31 = vunpack.c.h.bf16 %v22345_v34  ;;  %v22349_v15 = vunpack.c.l.bf16 %v22348_v1 }
 0x3cb   : > { %v11974_v10 = vsub.f32 %v22346_v42, %v22252_v20  ;;  %v22350_v59 = vunpack.c.h.bf16 %v22348_v1  ;;  %v22352_v39 = vunpack.c.l.bf16 %v22351_v25  ;;  %v22353_v8 = vunpack.c.h.bf16 %v22351_v25 }
 0x3cc   : > { %v11975_v57 = vsub.f32 %v22347_v31, %v22252_v20  ;;  %v11976_v44 = vsub.f32 %v22349_v15, %v22252_v20  ;;  %v22355_v14 = vunpack.c.l.bf16 %v22354_v55  ;;  %v22356_v63 = vunpack.c.h.bf16 %v22354_v55 }
 0x3cd   : > { %v11977_v3 = vsub.f32 %v22350_v59, %v22252_v20  ;;  %v11978_v12 = vsub.f32 %v22352_v39, %v22252_v20  ;;  %v11979_v62 = vsub.f32 %v22353_v8, %v22252_v20  ;;  %v22358_v51 = vunpack.c.l.bf16 %v22357_v48 }
 0x3ce   : > { %v11980_v29 = vsub.f32 %v22355_v14, %v22252_v20  ;;  %v11981_v17 = vsub.f32 %v22356_v63, %v22252_v20  ;;  %v22359_v53 = vunpack.c.h.bf16 %v22357_v48  ;;  %v21187_v26 = vmul.f32 %v20390_v50, %v11948_v6 }
 0x3cf   : > { %v11982_v54 = vsub.f32 %v22358_v51, %v22252_v20  ;;  %v21190_v60 = vmul.f32 %v20390_v50, %v11949_v18  ;;  %v21193_v40 = vmul.f32 %v20390_v50, %v11950_v32  ;;  %v21196_v41 = vmul.f32 %v20390_v50, %v11951_v4 }
 0x3d0   : > { %v11983_v22 = vsub.f32 %v22359_v53, %v22252_v20  ;;  %v21199_v23 = vmul.f32 %v20390_v50, %v11952_v9  ;;  %v21202_v19 = vmul.f32 %v20390_v50, %v11953_v16  ;;  %v21205_v20 = vmul.f32 %v20390_v50, %v11954_v30 }
 0x3d1   : > { %v21208_v6 = vmul.f32 %v20390_v50, %v11955_v45  ;;  %v21211_v18 = vmul.f32 %v20390_v50, %v11956_v36  ;;  %v21214_v32 = vmul.f32 %v20390_v50, %v11957_v28  ;;  %v21217_v4 = vmul.f32 %v20390_v50, %v11958_v21 }
 0x3d2   : > { %v21220_v9 = vmul.f32 %v20390_v50, %v11959_v35  ;;  %v21223_v16 = vmul.f32 %v20390_v50, %v11960_v13  ;;  %v21226_v30 = vmul.f32 %v20390_v50, %v11961_v49  ;;  %v21229_v45 = vmul.f32 %v20390_v50, %v11962_v37 }
 0x3d3   : > { %v21232_v36 = vmul.f32 %v20390_v50, %v11963_v11  ;;  %v21235_v28 = vmul.f32 %v20390_v50, %v11964_v58  ;;  %v21238_v21 = vmul.f32 %v20390_v50, %v11965_v56  ;;  %v21241_v35 = vmul.f32 %v20390_v50, %v11966_v2 }
 0x3d4   : > { %v21244_v13 = vmul.f32 %v20390_v50, %v11967_v47  ;;  %v21247_v49 = vmul.f32 %v20390_v50, %v11968_v52  ;;  %v21250_v37 = vmul.f32 %v20390_v50, %v11969_v43  ;;  %v21253_v11 = vmul.f32 %v20390_v50, %v11970_v7 }
 0x3d5   : > { %v21256_v58 = vmul.f32 %v20390_v50, %v11971_v27  ;;  %v21259_v56 = vmul.f32 %v20390_v50, %v11972_v33  ;;  %v21262_v2 = vmul.f32 %v20390_v50, %v11973_v0  ;;  %v21265_v47 = vmul.f32 %v20390_v50, %v11974_v10 }
 0x3d6   : > { %v21268_v52 = vmul.f32 %v20390_v50, %v11975_v57  ;;  %v21271_v43 = vmul.f32 %v20390_v50, %v11976_v44  ;;  %v21274_v24 = vmul.f32 %v20390_v50, %v11977_v3  ;;  %v21277_v7 = vmul.f32 %v20390_v50, %v11978_v12 }
 0x3d7   : > { %v21280_v46 = vmul.f32 %v20390_v50, %v11979_v62  ;;  %v21283_v27 = vmul.f32 %v20390_v50, %v11980_v29  ;;  %v21286_v38 = vmul.f32 %v20390_v50, %v11981_v17  ;;  %v21289_v5 = vmul.f32 %v20390_v50, %v11982_v54 }
 0x3d8   : > { %v21292_v33 = vmul.f32 %v20390_v50, %v11983_v22  ;;  %v12020_v61 = vmax.f32 %v21187_v26, 0.0  ;;  %v12021_v0 = vmax.f32 %v21190_v60, 0.0  ;;  %v12022_v34 = vmax.f32 %v21193_v40, 0.0 }
 0x3d9   : > { %v12023_v42 = vmax.f32 %v21196_v41, 0.0  ;;  %v12024_v10 = vmax.f32 %v21199_v23, 0.0  ;;  %v12025_v31 = vmax.f32 %v21202_v19, 0.0  ;;  %v12026_v57 = vmax.f32 %v21205_v20, 0.0 }
 0x3da   : > { %v12027_v1 = vmax.f32 %v21208_v6, 0.0  ;;  %v12028_v15 = vmax.f32 %v21211_v18, 0.0  ;;  %v12029_v50 = vmax.f32 %v21214_v32, 0.0  ;;  %v12030_v44 = vmax.f32 %v21217_v4, 0.0 }
 0x3db   : > { %v12031_v59 = vmax.f32 %v21220_v9, 0.0  ;;  %v12032_v3 = vmax.f32 %v21223_v16, 0.0  ;;  %v12033_v25 = vmax.f32 %v21226_v30, 0.0  ;;  %v12034_v39 = vmax.f32 %v21229_v45, 0.0 }
 0x3dc   : > { %v12035_v12 = vmax.f32 %v21232_v36, 0.0  ;;  %v12036_v8 = vmax.f32 %v21235_v28, 0.0  ;;  %v12037_v62 = vmax.f32 %v21238_v21, 0.0  ;;  %v12038_v55 = vmax.f32 %v21241_v35, 0.0 }
 0x3dd   : > { %v12039_v14 = vmax.f32 %v21244_v13, 0.0  ;;  %v12040_v29 = vmax.f32 %v21247_v49, 0.0  ;;  %v12041_v63 = vmax.f32 %v21250_v37, 0.0  ;;  %v12042_v17 = vmax.f32 %v21253_v11, 0.0 }
 0x3de   : > { %v12043_v48 = vmax.f32 %v21256_v58, 0.0  ;;  %v12044_v51 = vmax.f32 %v21259_v56, 0.0  ;;  %v12045_v54 = vmax.f32 %v21262_v2, 0.0  ;;  %v12046_v53 = vmax.f32 %v21265_v47, 0.0 }
 0x3df   : > { %v12047_v22 = vmax.f32 %v21268_v52, 0.0  ;;  %v12048_v26 = vmax.f32 %v21271_v43, 0.0  ;;  %v12049_v60 = vmax.f32 %v21274_v24, 0.0  ;;  %v12050_v40 = vmax.f32 %v21277_v7, 0.0 }
 0x3e0   : > { %v12051_v41 = vmax.f32 %v21280_v46, 0.0  ;;  %v12052_v23 = vmax.f32 %v21283_v27, 0.0  ;;  %v12053_v19 = vmax.f32 %v21286_v38, 0.0  ;;  %v12054_v20 = vmax.f32 %v21289_v5, 0.0 }
 0x3e1   : > { %v12055_v6 = vmax.f32 %v21292_v33, 0.0  ;;  %v14766_v18 = vpack.c.bf16 %v12021_v0, %v12020_v61  ;;  %v14771_v32 = vpack.c.bf16 %v12023_v42, %v12022_v34  ;;  %v14776_v4 = vpack.c.bf16 %v12025_v31, %v12024_v10 }
 0x3e2   : > { %v14781_v9 = vpack.c.bf16 %v12027_v1, %v12026_v57  ;;  %v14786_v16 = vpack.c.bf16 %v12029_v50, %v12028_v15  ;;  %v14791_v30 = vpack.c.bf16 %v12031_v59, %v12030_v44  ;;  %v14796_v45 = vpack.c.bf16 %v12033_v25, %v12032_v3 }
 0x3e3   : > { %15048 = vst [vmem:[%s20592_s10 + $0x1b0] sm:$0xff] %v14766_v18   ;;  %v14801_v36 = vpack.c.bf16 %v12035_v12, %v12034_v39  ;;  %v14806_v28 = vpack.c.bf16 %v12037_v62, %v12036_v8  ;;  %15049 = vst [vmem:[%s20592_s10 + $0x1b8] sm:$0xff] %v14771_v32   ;;  %v14811_v21 = vpack.c.bf16 %v12039_v14, %v12038_v55 }
 0x3e4   : > { %15050 = vst [vmem:[%s20592_s10 + $0x1c0] sm:$0xff] %v14776_v4   ;;  %15051 = vst [vmem:[%s20592_s10 + $0x1c8] sm:$0xff] %v14781_v9   ;;  %v14816_v35 = vpack.c.bf16 %v12041_v63, %v12040_v29  ;;  %v14821_v13 = vpack.c.bf16 %v12043_v48, %v12042_v17  ;;  %v14826_v49 = vpack.c.bf16 %v12045_v54, %v12044_v51 }
 0x3e5   : > { %15052 = vst [vmem:[%s20592_s10 + $0x1d0] sm:$0xff] %v14786_v16   ;;  %15053 = vst [vmem:[%s20592_s10 + $0x1d8] sm:$0xff] %v14791_v30   ;;  %v14831_v37 = vpack.c.bf16 %v12047_v22, %v12046_v53  ;;  %v14836_v11 = vpack.c.bf16 %v12049_v60, %v12048_v26  ;;  %v14841_v58 = vpack.c.bf16 %v12051_v41, %v12050_v40 }
 0x3e6   : > { %15054 = vst [vmem:[%s20592_s10 + $0x1e0] sm:$0xff] %v14796_v45   ;;  %15055 = vst [vmem:[%s20592_s10 + $0x1e8] sm:$0xff] %v14801_v36   ;;  %v14846_v56 = vpack.c.bf16 %v12053_v19, %v12052_v23  ;;  %v14851_v2 = vpack.c.bf16 %v12055_v6, %v12054_v20 }
 0x3e7   : > { %15056 = vst [vmem:[%s20592_s10 + $0x1f0] sm:$0xff] %v14806_v28   ;;  %15057 = vst [vmem:[%s20592_s10 + $0x1f8] sm:$0xff] %v14811_v21  }
 0x3e8   : > { %15058 = vst [vmem:[%s20592_s10 + $0x200] sm:$0xff] %v14816_v35   ;;  %15059 = vst [vmem:[%s20592_s10 + $0x208] sm:$0xff] %v14821_v13  }
 0x3e9   : > { %15060 = vst [vmem:[%s20592_s10 + $0x210] sm:$0xff] %v14826_v49   ;;  %15061 = vst [vmem:[%s20592_s10 + $0x218] sm:$0xff] %v14831_v37  }
 0x3ea   : > { %15062 = vst [vmem:[%s20592_s10 + $0x220] sm:$0xff] %v14836_v11   ;;  %15063 = vst [vmem:[%s20592_s10 + $0x228] sm:$0xff] %v14841_v58  }
 0x3eb   : > { %15064 = vst [vmem:[%s20592_s10 + $0x230] sm:$0xff] %v14846_v56   ;;  %15065 = vst [vmem:[%s20592_s10 + $0x238] sm:$0xff] %v14851_v2  }
 0x3ec PF: > { %s13_s14 = sadd.s32 1, %s16350_s14   ;;  %s22360_s12 = smov %s16346_s13 }
 0x3ed   : > { %p10_p5 = scmp.ge.s32.totalorder %s13_s14, 4   ;;  %s22361_s13 = smov %s22363_s15 }
 0x3ef   :  { %12 = sbr.rel (!%p10_p5) target bundleno = 2 (0x2), region = 83 }

</bundles_post_ra>
